<compile_context>
chip_gen: v5e
topology: v5e:2x2
jax: 0.10.0
libtpu: 0.0.40
codegen_flags: <defaults>
</compile_context>

<pallas_src>
import jax
import jax.numpy as jnp
from jax.experimental import pallas as pl
from jax.experimental.pallas import tpu as pltpu


# ----------------------------------------------------------------------------
# Fused kernel: BN -> Chebyshev GCN -> conv1+relu -> maxpool -> conv2+relu -> FC
# ----------------------------------------------------------------------------
def _gcbnet_kernel(x_ref, bn_ref, Lbd_ref, wg_ref, w1_ref, w2_ref, bias_ref,
                   m_ref, wt1_ref, wt23_ref, cs_ref, seg_ref, o_ref, c1_s):
    R, F = x_ref.shape                 # R = Bt * N rows in this batch tile
    C = wg_ref.shape[1]                # graph-conv width (64)
    K = wg_ref.shape[0] // F           # Chebyshev order
    KK = m_ref.shape[1]                # conv taps (7)
    PAD = KK // 2
    C1 = w1_ref.shape[1]               # conv1 channels (32)
    C2 = w2_ref.shape[1]               # conv2 channels (16)
    NC = cs_ref.shape[1]               # classes (3)
    R2 = m_ref.shape[0] - R            # Bt * (N // 2) pooled rows
    f32 = jnp.float32

    # ---- BatchNorm1d (eval), folded to scale/shift ----
    bn = bn_ref[...]
    xb = x_ref[...] * bn[0:1, :] + bn[1:2, :]                        # (R, F)

    # ---- Chebyshev power series: one block-diagonal matmul per order ----
    Lbd = Lbd_ref[...]
    cols = [xb]
    prev = xb
    for _ in range(1, K):
        prev = jnp.dot(Lbd, prev, preferred_element_type=f32)        # (R, F)
        cols.append(prev)
    Z = jnp.concatenate(cols, axis=1) if K > 1 else xb               # (R, K*F)
    gcnn = jnp.maximum(
        jnp.dot(Z, wg_ref[...], preferred_element_type=f32), 0.0)    # (R, C)

    masks = m_ref[...]
    bias = bias_ref[...]
    b1 = bias[:, 0:C1]
    b2 = bias[:, C1:C1 + C2]
    bfc = bias[:, C1 + C2:C1 + C2 + NC]

    # ---- Conv1d(k=KK, pad=PAD)+ReLU: taps via XLU rolls + trace-time masks ----
    def conv_relu(xin, mask, w_ref, brow):
        rows = xin.shape[0]
        taps = []
        for k in range(KK):
            d = k - PAD
            if d == 0:
                taps.append(xin)
            else:
                tap = pltpu.roll(xin, (-d) % rows, 0)                # row r -> xin[r+d]
                taps.append(tap * mask[:, k:k + 1])                  # zero outside example
        im = jnp.concatenate(taps, axis=1)                           # (rows, KK*cin)
        y = jnp.dot(im, w_ref[...], preferred_element_type=f32) + brow
        return jnp.maximum(y, 0.0)

    c1 = conv_relu(gcnn, masks[0:R, :], w1_ref, b1)                  # (R, C1)

    # ---- MaxPool1d(2, 2) over time within each example ----
    # (ref-level stride-2 reads are the proven lowering; scratch is 32 KB)
    c1_s[...] = c1
    mp = jnp.maximum(c1_s[pl.ds(0, R2, stride=2), :],
                     c1_s[pl.ds(1, R2, stride=2), :])                # (R2, C1)

    c2 = conv_relu(mp, masks[R:R + R2, :], w2_ref, b2)               # (R2, C2)

    # ---- Fused fully-connected head --------------------------------------
    # rows1[r, o]  = sum_c gcnn[r, c]     * Wfc1[c, t(r), o]  (tiled weights wt1)
    # rows23[r, o] = sum_j [mp|c2][r, j]  * Wfc23[j, t(r), o] (tiled weights wt23)
    # out[b, o]    = sum_{rows r of example b} rows(r, o) + b_fc[o]
    p1 = jnp.concatenate([gcnn] * NC, axis=1) * wt1_ref[...]         # (R, NC*C)
    x23 = jnp.concatenate([mp, c2], axis=1)                          # (R2, C1+C2)
    p23 = jnp.concatenate([x23] * NC, axis=1) * wt23_ref[...]        # (R2, NC*(C1+C2))
    cs = cs_ref[...]
    rows1 = jnp.dot(p1, cs[0:NC * C, :], preferred_element_type=f32)   # (R, NC)
    rows23 = jnp.dot(p23, cs[NC * C:, :], preferred_element_type=f32)  # (R2, NC)
    rows_all = jnp.concatenate([rows1, rows23], axis=0)                # (R+R2, NC)
    out = jnp.dot(seg_ref[...], rows_all, preferred_element_type=f32) + bfc
    o_ref[...] = out.astype(o_ref.dtype)


def _pick_bt(B, N, per_example_bytes):
    """Batch-fold factor (examples per grid step), generation / VMEM aware."""
    try:
        kind = jax.devices()[0].device_kind.lower()
    except Exception:
        kind = ""
    dual_tc = ("v7" in kind) or ("7x" in kind)       # v7x: 2 TensorCores, 64 MiB VMEM
    budget = (16 if dual_tc else 24) * 1024 * 1024   # conservative scoped-VMEM budget

    def fits(bt):
        r = bt * N
        # per-example live slabs + double-buffered block-diagonal adjacency
        return bt * per_example_bytes + 8 * r * r <= budget and r <= 2048

    divs = [bt for bt in range(1, B + 1)
            if B % bt == 0 and (bt == B or bt % 8 == 0)]  # keep blocks 8-row aligned
    cands = [bt for bt in divs if fits(bt)]
    if not cands:
        return min(divs)                                  # smallest-footprint fallback
    if dual_tc:
        par = [bt for bt in cands if (B // bt) % 2 == 0]  # feed both TensorCores
        if par:
            return max(par)
    return max(cands)                                     # single core: fewest steps


# ----------------------------------------------------------------------------
# Forward wrapper: parameter preprocessing (trace-time) + one pallas_call
# ----------------------------------------------------------------------------
def gcbnet_forward(x, p):
    B, N, F = x.shape
    K, _, C = p['gc_w'].shape
    C1, _, KK = p['w1'].shape
    C2 = p['w2'].shape[0]
    NC = p['w_fc'].shape[1]
    N2 = N // 2
    PAD = KK // 2
    assert N % 2 == 0, "time/electrode dim must be even for MaxPool1d(2,2)"
    f32 = jnp.float32

    # normalize_A: relu(A) then D^-1/2 A D^-1/2  (parameter preprocessing)
    Ar = jnp.maximum(p['A'], 0.0)
    dinv = 1.0 / jnp.sqrt(jnp.sum(Ar, axis=1) + 1e-10)
    L = dinv[:, None] * Ar * dinv[None, :]

    # BatchNorm1d (eval) folded to scale/shift, packed into one (2, F) operand
    inv_std = jax.lax.rsqrt(p['bn_var'] + 1e-5)
    scale = p['bn_gamma'] * inv_std
    shift = p['bn_beta'] - p['bn_mean'] * scale
    bn = jnp.stack([scale, shift], axis=0)

    # Chebyshev weights stacked for the single (.., K*F)@(K*F, C) matmul
    wg = p['gc_w'].reshape(K * F, C)
    # Conv weights repacked for im2col: row index = tap*Cin + cin
    w1_im = jnp.transpose(p['w1'], (2, 1, 0)).reshape(KK * C, C1)
    w2_im = jnp.transpose(p['w2'], (2, 1, 0)).reshape(KK * C1, C2)
    # conv1 / conv2 / fc biases packed into one lane row
    biases = jnp.concatenate([p['b1'], p['b2'], p['b_fc']]).reshape(1, C1 + C2 + NC)

    # batch folding (examples per grid step)
    per_ex = 4 * (N * (F + C + KK * C + 2 * C1 + 2 * NC * C + KK + 4)
                  + N2 * (C1 + C2 + KK * C1 + 2 * NC * (C1 + C2) + KK + 4))
    Bt = _pick_bt(B, N, per_ex)
    R, R2 = Bt * N, Bt * N2
    steps = B // Bt

    # block-diagonal adjacency: one matmul per Chebyshev order inside the kernel
    Lbd = jnp.kron(jnp.eye(Bt, dtype=f32), L.astype(f32))             # (R, R)

    # per-row / per-tap conv boundary masks (trace-time constants)
    dk = jnp.arange(KK) - PAD
    t1 = jnp.arange(R) % N
    t2 = jnp.arange(R2) % N2
    m1 = (t1[:, None] + dk[None, :] >= 0) & (t1[:, None] + dk[None, :] < N)
    m2 = (t2[:, None] + dk[None, :] >= 0) & (t2[:, None] + dk[None, :] < N2)
    masks = jnp.concatenate([m1, m2], axis=0).astype(f32)             # (R+R2, KK)

    # FC weights re-tiled to the kernel's row layout: column = class*Cin + cin
    # (absorbs PyTorch's flatten order AND the per-row time selection).
    wfc = p['w_fc']
    wt1 = jnp.tile(jnp.transpose(wfc[:N * C].reshape(N, C, NC), (0, 2, 1))
                   .reshape(N, NC * C), (Bt, 1))                      # (R, NC*C)
    o2 = N * C
    wf2 = wfc[o2:o2 + C1 * N2].reshape(C1, N2, NC)
    wf3 = wfc[o2 + C1 * N2:].reshape(C2, N2, NC)
    w23 = jnp.concatenate([wf2, wf3], axis=0)                         # (C1+C2, N2, NC)
    wt23 = jnp.tile(jnp.transpose(w23, (1, 2, 0)).reshape(N2, NC * (C1 + C2)),
                    (Bt, 1))                                          # (R2, NC*(C1+C2))

    # class block-sum and per-example segment-sum matrices (trace-time 0/1 consts)
    def block_sum(width):
        j = jnp.arange(NC * width)[:, None]
        o = jnp.arange(NC)[None, :]
        return ((j >= o * width) & (j < (o + 1) * width)).astype(f32)
    cs = jnp.concatenate([block_sum(C), block_sum(C1 + C2)], axis=0)  # (NC*(C+C1+C2), NC)

    r_all = jnp.arange(R + R2)
    owner = jnp.where(r_all < R, r_all // N, (r_all - R) // N2)
    seg = (owner[None, :] == jnp.arange(Bt)[:, None]).astype(f32)     # (Bt, R+R2)

    x2 = x.reshape(B * N, F)                     # row r = b*N + n (free reshape)

    const = lambda i: (0, 0)
    return pl.pallas_call(
        _gcbnet_kernel,
        out_shape=jax.ShapeDtypeStruct((B, NC), f32),
        grid=(steps,),
        in_specs=[
            pl.BlockSpec((R, F), lambda i: (i, 0)),            # x slab (Bt examples)
            pl.BlockSpec((2, F), const),                       # bn scale / shift
            pl.BlockSpec((R, R), const),                       # block-diag adjacency
            pl.BlockSpec((K * F, C), const),                   # stacked graph-conv W
            pl.BlockSpec((KK * C, C1), const),                 # conv1 im2col W
            pl.BlockSpec((KK * C1, C2), const),                # conv2 im2col W
            pl.BlockSpec((1, C1 + C2 + NC), const),            # packed biases
            pl.BlockSpec((R + R2, KK), const),                 # conv boundary masks
            pl.BlockSpec((R, NC * C), const),                  # tiled FC W (gcnn)
            pl.BlockSpec((R2, NC * (C1 + C2)), const),         # tiled FC W (mp|conv2)
            pl.BlockSpec((NC * (C + C1 + C2), NC), const),     # class block-sum
            pl.BlockSpec((Bt, R + R2), const),                 # segment-sum
        ],
        out_specs=pl.BlockSpec((Bt, NC), lambda i: (i, 0)),
        scratch_shapes=[pltpu.VMEM((R, C1), f32)],             # conv1 out for maxpool
        compiler_params=pltpu.CompilerParams(
            dimension_semantics=("parallel",),
            vmem_limit_bytes=32 * 1024 * 1024),
    )(x2, bn, Lbd, wg, w1_im, w2_im, biases, masks, wt1, wt23, cs, seg)


# ----------------------------------------------------------------------------
# Pure-JAX reference (for numerical verification of the fused kernel)
# ----------------------------------------------------------------------------
def gcbnet_reference(x, p):
    B, N, F = x.shape
    K, _, C = p['gc_w'].shape
    xb = (x - p['bn_mean']) * jax.lax.rsqrt(p['bn_var'] + 1e-5) * p['bn_gamma'] + p['bn_beta']
    Ar = jnp.maximum(p['A'], 0.0)
    d = jnp.sum(Ar, axis=1)
    dinv = 1.0 / jnp.sqrt(d + 1e-10)
    L = dinv[:, None] * Ar * dinv[None, :]
    supports = [jnp.eye(N, dtype=jnp.float32), L]
    for _ in range(2, K):
        supports.append(supports[-1] @ L)
    res = sum(jnp.einsum('nm,bmf,fc->bnc', supports[k], xb, p['gc_w'][k]) for k in range(K))
    gcnn = jnp.maximum(res, 0.0)
    xin = jnp.transpose(gcnn, (0, 2, 1))                     # (B, C, N)

    def conv1d(xc, w, b):
        T = xc.shape[-1]
        kk = w.shape[-1]
        pad = kk // 2
        xp = jnp.pad(xc, ((0, 0), (0, 0), (pad, pad)))
        return sum(jnp.einsum('bct,oc->bot', xp[:, :, k:k + T], w[:, :, k])
                   for k in range(kk)) + b[None, :, None]

    y1 = jnp.maximum(conv1d(xin, p['w1'], p['b1']), 0.0)
    mp = jnp.maximum(y1[:, :, 0::2], y1[:, :, 1::2])
    y2 = jnp.maximum(conv1d(mp, p['w2'], p['b2']), 0.0)
    flat = jnp.concatenate([gcnn.reshape(B, -1), mp.reshape(B, -1), y2.reshape(B, -1)], axis=1)
    return flat @ p['w_fc'] + p['b_fc'][None, :]


if __name__ == "__main__":
    # xdim = (batch, electrodes, features) = (B, N, F); k_adj = K; num_out = 64
    B, N, F = 16, 16, 8
    K, C = 2, 64

    key = jax.random.PRNGKey(0)
    ks = jax.random.split(key, 8)
    x = jax.random.normal(ks[0], (B, N, F), jnp.float32)

    params = dict(
        A=jax.random.normal(ks[1], (N, N), jnp.float32) * (1.0 / jnp.sqrt(N)),
        gc_w=jax.random.normal(ks[2], (K, F, C), jnp.float32) * (1.0 / jnp.sqrt(F)),
        bn_gamma=jnp.ones((F,), jnp.float32),
        bn_beta=jnp.zeros((F,), jnp.float32),
        bn_mean=jnp.zeros((F,), jnp.float32),
        bn_var=jnp.ones((F,), jnp.float32),
        w1=jax.random.normal(ks[3], (32, C, 7), jnp.float32) * (1.0 / jnp.sqrt(7 * C)),
        b1=jax.random.normal(ks[4], (32,), jnp.float32) * 0.1,
        w2=jax.random.normal(ks[5], (16, 32, 7), jnp.float32) * (1.0 / jnp.sqrt(7 * 32)),
        b2=jax.random.normal(ks[6], (16,), jnp.float32) * 0.1,
        w_fc=jax.random.normal(ks[7], (88 * N, 3), jnp.float32) * (1.0 / jnp.sqrt(88 * N)),
        b_fc=jnp.zeros((3,), jnp.float32),
    )

    out = jax.block_until_ready(jax.jit(gcbnet_forward)(x, params))
    ref = jax.block_until_ready(gcbnet_reference(x, params))

    assert out.shape == (B, 3), out.shape
    err = float(jnp.max(jnp.abs(out - ref)))
    if not err < 1e-3:
        raise AssertionError(f"Pallas output mismatch vs reference: max|diff| = {err}")
    print("KERNEL_OK")
</pallas_src>

<mosaic_0001>
module attributes {stable_mosaic.version = 11 : i64} {
  func.func @_gcbnet_kernel(%arg0: i32, %arg1: memref<256x8xf32, #tpu.memory_space<vmem>>, %arg2: memref<2x8xf32, #tpu.memory_space<vmem>>, %arg3: memref<256x256xf32, #tpu.memory_space<vmem>>, %arg4: memref<16x64xf32, #tpu.memory_space<vmem>>, %arg5: memref<448x32xf32, #tpu.memory_space<vmem>>, %arg6: memref<224x16xf32, #tpu.memory_space<vmem>>, %arg7: memref<1x51xf32, #tpu.memory_space<vmem>>, %arg8: memref<384x7xf32, #tpu.memory_space<vmem>>, %arg9: memref<256x192xf32, #tpu.memory_space<vmem>>, %arg10: memref<128x144xf32, #tpu.memory_space<vmem>>, %arg11: memref<336x3xf32, #tpu.memory_space<vmem>>, %arg12: memref<16x384xf32, #tpu.memory_space<vmem>>, %arg13: memref<16x3xf32, #tpu.memory_space<vmem>>, %arg14: memref<256x32xf32, #tpu.memory_space<vmem>>) attributes {dimension_semantics = [#tpu.dimension_semantics<parallel>], iteration_bounds = array<i64: 1>, scalar_prefetch = 0 : i64, scratch_operands = 1 : i64, tpu.core_type = #tpu.core_type<tc>, window_params = [{transform_indices = @transform_0, window_bounds = array<i64: 256, 8>}, {pipeline_mode = #tpu.pipeline_mode<synchronous>, transform_indices = @transform_1, window_bounds = array<i64: 2, 8>}, {pipeline_mode = #tpu.pipeline_mode<synchronous>, transform_indices = @transform_2, window_bounds = array<i64: 256, 256>}, {pipeline_mode = #tpu.pipeline_mode<synchronous>, transform_indices = @transform_3, window_bounds = array<i64: 16, 64>}, {pipeline_mode = #tpu.pipeline_mode<synchronous>, transform_indices = @transform_4, window_bounds = array<i64: 448, 32>}, {pipeline_mode = #tpu.pipeline_mode<synchronous>, transform_indices = @transform_5, window_bounds = array<i64: 224, 16>}, {pipeline_mode = #tpu.pipeline_mode<synchronous>, transform_indices = @transform_6, window_bounds = array<i64: 1, 51>}, {pipeline_mode = #tpu.pipeline_mode<synchronous>, transform_indices = @transform_7, window_bounds = array<i64: 384, 7>}, {pipeline_mode = #tpu.pipeline_mode<synchronous>, transform_indices = @transform_8, window_bounds = array<i64: 256, 192>}, {pipeline_mode = #tpu.pipeline_mode<synchronous>, transform_indices = @transform_9, window_bounds = array<i64: 128, 144>}, {pipeline_mode = #tpu.pipeline_mode<synchronous>, transform_indices = @transform_10, window_bounds = array<i64: 336, 3>}, {pipeline_mode = #tpu.pipeline_mode<synchronous>, transform_indices = @transform_11, window_bounds = array<i64: 16, 384>}, {transform_indices = @transform_12, window_bounds = array<i64: 16, 3>}]} {
    %c0 = arith.constant 0 : index
    %c0_0 = arith.constant 0 : index
    %0 = vector.load %arg2[%c0, %c0_0] : memref<2x8xf32, #tpu.memory_space<vmem>>, vector<2x8xf32>
    %c0_1 = arith.constant 0 : index
    %c0_2 = arith.constant 0 : index
    %1 = vector.load %arg1[%c0_1, %c0_2] : memref<256x8xf32, #tpu.memory_space<vmem>>, vector<256x8xf32>
    %2 = vector.extract_strided_slice %0 {offsets = [0, 0], sizes = [1, 8], strides = [1, 1]} : vector<2x8xf32> to vector<1x8xf32>
    %3 = vector.broadcast %2 : vector<1x8xf32> to vector<256x8xf32>
    %4 = arith.mulf %1, %3 : vector<256x8xf32>
    %5 = vector.extract_strided_slice %0 {offsets = [1, 0], sizes = [1, 8], strides = [1, 1]} : vector<2x8xf32> to vector<1x8xf32>
    %6 = vector.broadcast %5 : vector<1x8xf32> to vector<256x8xf32>
    %7 = arith.addf %4, %6 : vector<256x8xf32>
    %c0_3 = arith.constant 0 : index
    %c0_4 = arith.constant 0 : index
    %8 = vector.load %arg3[%c0_3, %c0_4] : memref<256x256xf32, #tpu.memory_space<vmem>>, vector<256x256xf32>
    %cst = arith.constant dense<0.000000e+00> : vector<256x8xf32>
    %9 = tpu.matmul %8, %7, %cst {dimension_numbers = #tpu.dot_dimension_numbers<[1], [0], [0], [1], [0, 0, 1, 1], [], []>} : vector<256x256xf32>, vector<256x8xf32>, vector<256x8xf32> -> vector<256x8xf32>
    %10 = tpu.concatenate %7, %9 in 1 : vector<256x8xf32>, vector<256x8xf32> -> vector<256x16xf32>
    %c0_5 = arith.constant 0 : index
    %c0_6 = arith.constant 0 : index
    %11 = vector.load %arg4[%c0_5, %c0_6] : memref<16x64xf32, #tpu.memory_space<vmem>>, vector<16x64xf32>
    %cst_7 = arith.constant dense<0.000000e+00> : vector<256x64xf32>
    %12 = tpu.matmul %10, %11, %cst_7 {dimension_numbers = #tpu.dot_dimension_numbers<[1], [0], [0], [1], [0, 0, 1, 1], [], []>} : vector<256x16xf32>, vector<16x64xf32>, vector<256x64xf32> -> vector<256x64xf32>
    %cst_8 = arith.constant 0.000000e+00 : f32
    %13 = vector.broadcast %cst_8 : f32 to vector<256x64xf32>
    %14 = arith.maximumf %12, %13 : vector<256x64xf32>
    %c0_9 = arith.constant 0 : index
    %c0_10 = arith.constant 0 : index
    %15 = vector.load %arg8[%c0_9, %c0_10] : memref<384x7xf32, #tpu.memory_space<vmem>>, vector<384x7xf32>
    %c0_11 = arith.constant 0 : index
    %c0_12 = arith.constant 0 : index
    %16 = vector.load %arg7[%c0_11, %c0_12] : memref<1x51xf32, #tpu.memory_space<vmem>>, vector<1x51xf32>
    %17 = vector.extract_strided_slice %16 {offsets = [0, 0], sizes = [1, 32], strides = [1, 1]} : vector<1x51xf32> to vector<1x32xf32>
    %18 = vector.extract_strided_slice %16 {offsets = [0, 32], sizes = [1, 16], strides = [1, 1]} : vector<1x51xf32> to vector<1x16xf32>
    %19 = vector.extract_strided_slice %16 {offsets = [0, 48], sizes = [1, 3], strides = [1, 1]} : vector<1x51xf32> to vector<1x3xf32>
    %20 = vector.extract_strided_slice %15 {offsets = [0, 0], sizes = [256, 7], strides = [1, 1]} : vector<384x7xf32> to vector<256x7xf32>
    %c3_i32 = arith.constant 3 : i32
    %21 = tpu.dynamic_rotate %14 by %c3_i32 dim 0 : vector<256x64xf32>, i32 -> vector<256x64xf32>
    %22 = vector.extract_strided_slice %20 {offsets = [0, 0], sizes = [256, 1], strides = [1, 1]} : vector<256x7xf32> to vector<256x1xf32>
    %23 = vector.broadcast %22 : vector<256x1xf32> to vector<256x64xf32>
    %24 = arith.mulf %21, %23 : vector<256x64xf32>
    %c2_i32 = arith.constant 2 : i32
    %25 = tpu.dynamic_rotate %14 by %c2_i32 dim 0 : vector<256x64xf32>, i32 -> vector<256x64xf32>
    %26 = vector.extract_strided_slice %20 {offsets = [0, 1], sizes = [256, 1], strides = [1, 1]} : vector<256x7xf32> to vector<256x1xf32>
    %27 = vector.broadcast %26 : vector<256x1xf32> to vector<256x64xf32>
    %28 = arith.mulf %25, %27 : vector<256x64xf32>
    %c1_i32 = arith.constant 1 : i32
    %29 = tpu.dynamic_rotate %14 by %c1_i32 dim 0 : vector<256x64xf32>, i32 -> vector<256x64xf32>
    %30 = vector.extract_strided_slice %20 {offsets = [0, 2], sizes = [256, 1], strides = [1, 1]} : vector<256x7xf32> to vector<256x1xf32>
    %31 = vector.broadcast %30 : vector<256x1xf32> to vector<256x64xf32>
    %32 = arith.mulf %29, %31 : vector<256x64xf32>
    %c255_i32 = arith.constant 255 : i32
    %33 = tpu.dynamic_rotate %14 by %c255_i32 dim 0 : vector<256x64xf32>, i32 -> vector<256x64xf32>
    %34 = vector.extract_strided_slice %20 {offsets = [0, 4], sizes = [256, 1], strides = [1, 1]} : vector<256x7xf32> to vector<256x1xf32>
    %35 = vector.broadcast %34 : vector<256x1xf32> to vector<256x64xf32>
    %36 = arith.mulf %33, %35 : vector<256x64xf32>
    %c254_i32 = arith.constant 254 : i32
    %37 = tpu.dynamic_rotate %14 by %c254_i32 dim 0 : vector<256x64xf32>, i32 -> vector<256x64xf32>
    %38 = vector.extract_strided_slice %20 {offsets = [0, 5], sizes = [256, 1], strides = [1, 1]} : vector<256x7xf32> to vector<256x1xf32>
    %39 = vector.broadcast %38 : vector<256x1xf32> to vector<256x64xf32>
    %40 = arith.mulf %37, %39 : vector<256x64xf32>
    %c253_i32 = arith.constant 253 : i32
    %41 = tpu.dynamic_rotate %14 by %c253_i32 dim 0 : vector<256x64xf32>, i32 -> vector<256x64xf32>
    %42 = vector.extract_strided_slice %20 {offsets = [0, 6], sizes = [256, 1], strides = [1, 1]} : vector<256x7xf32> to vector<256x1xf32>
    %43 = vector.broadcast %42 : vector<256x1xf32> to vector<256x64xf32>
    %44 = arith.mulf %41, %43 : vector<256x64xf32>
    %45 = tpu.concatenate %24, %28, %32, %14, %36, %40, %44 in 1 : vector<256x64xf32>, vector<256x64xf32>, vector<256x64xf32>, vector<256x64xf32>, vector<256x64xf32>, vector<256x64xf32>, vector<256x64xf32> -> vector<256x448xf32>
    %c0_13 = arith.constant 0 : index
    %c0_14 = arith.constant 0 : index
    %46 = vector.load %arg5[%c0_13, %c0_14] : memref<448x32xf32, #tpu.memory_space<vmem>>, vector<448x32xf32>
    %cst_15 = arith.constant dense<0.000000e+00> : vector<256x32xf32>
    %47 = tpu.matmul %45, %46, %cst_15 {dimension_numbers = #tpu.dot_dimension_numbers<[1], [0], [0], [1], [0, 0, 1, 1], [], []>} : vector<256x448xf32>, vector<448x32xf32>, vector<256x32xf32> -> vector<256x32xf32>
    %48 = vector.broadcast %17 : vector<1x32xf32> to vector<256x32xf32>
    %49 = arith.addf %47, %48 : vector<256x32xf32>
    %cst_16 = arith.constant 0.000000e+00 : f32
    %50 = vector.broadcast %cst_16 : f32 to vector<256x32xf32>
    %51 = arith.maximumf %49, %50 : vector<256x32xf32>
    %c0_17 = arith.constant 0 : index
    %c0_18 = arith.constant 0 : index
    %52 = vector.load %arg14[%c0_17, %c0_18] : memref<256x32xf32, #tpu.memory_space<vmem>>, vector<256x32xf32>
    tpu.vector_store %arg14[%c0_17, %c0_18], %51 {strides = array<i32>} : memref<256x32xf32, #tpu.memory_space<vmem>>, vector<256x32xf32>,
    %c0_19 = arith.constant 0 : index
    %c0_20 = arith.constant 0 : index
    %53 = tpu.strided_load %arg14[%c0_19, %c0_20] {strides = array<i32: 2, 1>} : memref<256x32xf32, #tpu.memory_space<vmem>>, vector<128x32xf32>
    %c1 = arith.constant 1 : index
    %c0_21 = arith.constant 0 : index
    %54 = tpu.strided_load %arg14[%c1, %c0_21] {strides = array<i32: 2, 1>} : memref<256x32xf32, #tpu.memory_space<vmem>>, vector<128x32xf32>
    %55 = arith.maximumf %53, %54 : vector<128x32xf32>
    %56 = vector.extract_strided_slice %15 {offsets = [256, 0], sizes = [128, 7], strides = [1, 1]} : vector<384x7xf32> to vector<128x7xf32>
    %c3_i32_22 = arith.constant 3 : i32
    %57 = tpu.dynamic_rotate %55 by %c3_i32_22 dim 0 : vector<128x32xf32>, i32 -> vector<128x32xf32>
    %58 = vector.extract_strided_slice %56 {offsets = [0, 0], sizes = [128, 1], strides = [1, 1]} : vector<128x7xf32> to vector<128x1xf32>
    %59 = vector.broadcast %58 : vector<128x1xf32> to vector<128x32xf32>
    %60 = arith.mulf %57, %59 : vector<128x32xf32>
    %c2_i32_23 = arith.constant 2 : i32
    %61 = tpu.dynamic_rotate %55 by %c2_i32_23 dim 0 : vector<128x32xf32>, i32 -> vector<128x32xf32>
    %62 = vector.extract_strided_slice %56 {offsets = [0, 1], sizes = [128, 1], strides = [1, 1]} : vector<128x7xf32> to vector<128x1xf32>
    %63 = vector.broadcast %62 : vector<128x1xf32> to vector<128x32xf32>
    %64 = arith.mulf %61, %63 : vector<128x32xf32>
    %c1_i32_24 = arith.constant 1 : i32
    %65 = tpu.dynamic_rotate %55 by %c1_i32_24 dim 0 : vector<128x32xf32>, i32 -> vector<128x32xf32>
    %66 = vector.extract_strided_slice %56 {offsets = [0, 2], sizes = [128, 1], strides = [1, 1]} : vector<128x7xf32> to vector<128x1xf32>
    %67 = vector.broadcast %66 : vector<128x1xf32> to vector<128x32xf32>
    %68 = arith.mulf %65, %67 : vector<128x32xf32>
    %c127_i32 = arith.constant 127 : i32
    %69 = tpu.dynamic_rotate %55 by %c127_i32 dim 0 : vector<128x32xf32>, i32 -> vector<128x32xf32>
    %70 = vector.extract_strided_slice %56 {offsets = [0, 4], sizes = [128, 1], strides = [1, 1]} : vector<128x7xf32> to vector<128x1xf32>
    %71 = vector.broadcast %70 : vector<128x1xf32> to vector<128x32xf32>
    %72 = arith.mulf %69, %71 : vector<128x32xf32>
    %c126_i32 = arith.constant 126 : i32
    %73 = tpu.dynamic_rotate %55 by %c126_i32 dim 0 : vector<128x32xf32>, i32 -> vector<128x32xf32>
    %74 = vector.extract_strided_slice %56 {offsets = [0, 5], sizes = [128, 1], strides = [1, 1]} : vector<128x7xf32> to vector<128x1xf32>
    %75 = vector.broadcast %74 : vector<128x1xf32> to vector<128x32xf32>
    %76 = arith.mulf %73, %75 : vector<128x32xf32>
    %c125_i32 = arith.constant 125 : i32
    %77 = tpu.dynamic_rotate %55 by %c125_i32 dim 0 : vector<128x32xf32>, i32 -> vector<128x32xf32>
    %78 = vector.extract_strided_slice %56 {offsets = [0, 6], sizes = [128, 1], strides = [1, 1]} : vector<128x7xf32> to vector<128x1xf32>
    %79 = vector.broadcast %78 : vector<128x1xf32> to vector<128x32xf32>
    %80 = arith.mulf %77, %79 : vector<128x32xf32>
    %81 = tpu.concatenate %60, %64, %68, %55, %72, %76, %80 in 1 : vector<128x32xf32>, vector<128x32xf32>, vector<128x32xf32>, vector<128x32xf32>, vector<128x32xf32>, vector<128x32xf32>, vector<128x32xf32> -> vector<128x224xf32>
    %c0_25 = arith.constant 0 : index
    %c0_26 = arith.constant 0 : index
    %82 = vector.load %arg6[%c0_25, %c0_26] : memref<224x16xf32, #tpu.memory_space<vmem>>, vector<224x16xf32>
    %cst_27 = arith.constant dense<0.000000e+00> : vector<128x16xf32>
    %83 = tpu.matmul %81, %82, %cst_27 {dimension_numbers = #tpu.dot_dimension_numbers<[1], [0], [0], [1], [0, 0, 1, 1], [], []>} : vector<128x224xf32>, vector<224x16xf32>, vector<128x16xf32> -> vector<128x16xf32>
    %84 = vector.broadcast %18 : vector<1x16xf32> to vector<128x16xf32>
    %85 = arith.addf %83, %84 : vector<128x16xf32>
    %cst_28 = arith.constant 0.000000e+00 : f32
    %86 = vector.broadcast %cst_28 : f32 to vector<128x16xf32>
    %87 = arith.maximumf %85, %86 : vector<128x16xf32>
    %88 = tpu.concatenate %14, %14, %14 in 1 : vector<256x64xf32>, vector<256x64xf32>, vector<256x64xf32> -> vector<256x192xf32>
    %c0_29 = arith.constant 0 : index
    %c0_30 = arith.constant 0 : index
    %89 = vector.load %arg9[%c0_29, %c0_30] : memref<256x192xf32, #tpu.memory_space<vmem>>, vector<256x192xf32>
    %90 = arith.mulf %88, %89 : vector<256x192xf32>
    %91 = tpu.concatenate %55, %87 in 1 : vector<128x32xf32>, vector<128x16xf32> -> vector<128x48xf32>
    %92 = tpu.concatenate %91, %91, %91 in 1 : vector<128x48xf32>, vector<128x48xf32>, vector<128x48xf32> -> vector<128x144xf32>
    %c0_31 = arith.constant 0 : index
    %c0_32 = arith.constant 0 : index
    %93 = vector.load %arg10[%c0_31, %c0_32] : memref<128x144xf32, #tpu.memory_space<vmem>>, vector<128x144xf32>
    %94 = arith.mulf %92, %93 : vector<128x144xf32>
    %c0_33 = arith.constant 0 : index
    %c0_34 = arith.constant 0 : index
    %95 = vector.load %arg11[%c0_33, %c0_34] : memref<336x3xf32, #tpu.memory_space<vmem>>, vector<336x3xf32>
    %96 = vector.extract_strided_slice %95 {offsets = [0, 0], sizes = [192, 3], strides = [1, 1]} : vector<336x3xf32> to vector<192x3xf32>
    %cst_35 = arith.constant dense<0.000000e+00> : vector<256x3xf32>
    %97 = tpu.matmul %90, %96, %cst_35 {dimension_numbers = #tpu.dot_dimension_numbers<[1], [0], [0], [1], [0, 0, 1, 1], [], []>} : vector<256x192xf32>, vector<192x3xf32>, vector<256x3xf32> -> vector<256x3xf32>
    %98 = vector.extract_strided_slice %95 {offsets = [192, 0], sizes = [144, 3], strides = [1, 1]} : vector<336x3xf32> to vector<144x3xf32>
    %cst_36 = arith.constant dense<0.000000e+00> : vector<128x3xf32>
    %99 = tpu.matmul %94, %98, %cst_36 {dimension_numbers = #tpu.dot_dimension_numbers<[1], [0], [0], [1], [0, 0, 1, 1], [], []>} : vector<128x144xf32>, vector<144x3xf32>, vector<128x3xf32> -> vector<128x3xf32>
    %100 = tpu.concatenate %97, %99 in 0 : vector<256x3xf32>, vector<128x3xf32> -> vector<384x3xf32>
    %c0_37 = arith.constant 0 : index
    %c0_38 = arith.constant 0 : index
    %101 = vector.load %arg12[%c0_37, %c0_38] : memref<16x384xf32, #tpu.memory_space<vmem>>, vector<16x384xf32>
    %cst_39 = arith.constant dense<0.000000e+00> : vector<16x3xf32>
    %102 = tpu.matmul %101, %100, %cst_39 {dimension_numbers = #tpu.dot_dimension_numbers<[1], [0], [0], [1], [0, 0, 1, 1], [], []>} : vector<16x384xf32>, vector<384x3xf32>, vector<16x3xf32> -> vector<16x3xf32>
    %103 = vector.broadcast %19 : vector<1x3xf32> to vector<16x3xf32>
    %104 = arith.addf %102, %103 : vector<16x3xf32>
    %c0_40 = arith.constant 0 : index
    %c0_41 = arith.constant 0 : index
    %105 = vector.load %arg13[%c0_40, %c0_41] : memref<16x3xf32, #tpu.memory_space<vmem>>, vector<16x3xf32>
    tpu.vector_store %arg13[%c0_40, %c0_41], %104 {strides = array<i32>} : memref<16x3xf32, #tpu.memory_space<vmem>>, vector<16x3xf32>,
    return
  }
  func.func @transform_0(%arg0: i32) -> (i32, i32) {
    %c0_i32 = arith.constant 0 : i32
    %c0_i32_0 = arith.constant 0 : i32
    return %arg0, %c0_i32 : i32, i32
  }
  func.func @transform_1(%arg0: i32) -> (i32, i32) {
    %c0_i32 = arith.constant 0 : i32
    %c0_i32_0 = arith.constant 0 : i32
    %c0_i32_1 = arith.constant 0 : i32
    return %c0_i32, %c0_i32_0 : i32, i32
  }
  func.func @transform_2(%arg0: i32) -> (i32, i32) {
    %c0_i32 = arith.constant 0 : i32
    %c0_i32_0 = arith.constant 0 : i32
    %c0_i32_1 = arith.constant 0 : i32
    return %c0_i32, %c0_i32_0 : i32, i32
  }
  func.func @transform_3(%arg0: i32) -> (i32, i32) {
    %c0_i32 = arith.constant 0 : i32
    %c0_i32_0 = arith.constant 0 : i32
    %c0_i32_1 = arith.constant 0 : i32
    return %c0_i32, %c0_i32_0 : i32, i32
  }
  func.func @transform_4(%arg0: i32) -> (i32, i32) {
    %c0_i32 = arith.constant 0 : i32
    %c0_i32_0 = arith.constant 0 : i32
    %c0_i32_1 = arith.constant 0 : i32
    return %c0_i32, %c0_i32_0 : i32, i32
  }
  func.func @transform_5(%arg0: i32) -> (i32, i32) {
    %c0_i32 = arith.constant 0 : i32
    %c0_i32_0 = arith.constant 0 : i32
    %c0_i32_1 = arith.constant 0 : i32
    return %c0_i32, %c0_i32_0 : i32, i32
  }
  func.func @transform_6(%arg0: i32) -> (i32, i32) {
    %c0_i32 = arith.constant 0 : i32
    %c0_i32_0 = arith.constant 0 : i32
    %c0_i32_1 = arith.constant 0 : i32
    return %c0_i32, %c0_i32_0 : i32, i32
  }
  func.func @transform_7(%arg0: i32) -> (i32, i32) {
    %c0_i32 = arith.constant 0 : i32
    %c0_i32_0 = arith.constant 0 : i32
    %c0_i32_1 = arith.constant 0 : i32
    return %c0_i32, %c0_i32_0 : i32, i32
  }
  func.func @transform_8(%arg0: i32) -> (i32, i32) {
    %c0_i32 = arith.constant 0 : i32
    %c0_i32_0 = arith.constant 0 : i32
    %c0_i32_1 = arith.constant 0 : i32
    return %c0_i32, %c0_i32_0 : i32, i32
  }
  func.func @transform_9(%arg0: i32) -> (i32, i32) {
    %c0_i32 = arith.constant 0 : i32
    %c0_i32_0 = arith.constant 0 : i32
    %c0_i32_1 = arith.constant 0 : i32
    return %c0_i32, %c0_i32_0 : i32, i32
  }
  func.func @transform_10(%arg0: i32) -> (i32, i32) {
    %c0_i32 = arith.constant 0 : i32
    %c0_i32_0 = arith.constant 0 : i32
    %c0_i32_1 = arith.constant 0 : i32
    return %c0_i32, %c0_i32_0 : i32, i32
  }
  func.func @transform_11(%arg0: i32) -> (i32, i32) {
    %c0_i32 = arith.constant 0 : i32
    %c0_i32_0 = arith.constant 0 : i32
    %c0_i32_1 = arith.constant 0 : i32
    return %c0_i32, %c0_i32_0 : i32, i32
  }
  func.func @transform_12(%arg0: i32) -> (i32, i32) {
    %c0_i32 = arith.constant 0 : i32
    %c0_i32_0 = arith.constant 0 : i32
    return %arg0, %c0_i32 : i32, i32
  }
}

</mosaic_0001>

<bundles_post_ra>
// kernel: gcbnet_forward.1
= control target key start
LH: loop header
LB: loop body
LE: loop exit
PB: predicated region body
PF: predicated region fallthrough
CT: control target
= control target key end

     0   :  { %v12168_v0 = vmov 0   ;;  %v12170_v10 = vmov 1   ;;  %s6440_s23 = smov 8   ;;  %vm558_vm0 = vcmask 64512   ;;  %vm593_vm1 = vcmask 130048   ;;  %s6445_s25 = smov 96   ;;  %s12155_s7 = inlined_call_operand.vmem [shape: f32[384,7], index: 7, kind: input, shape index: {}]   ;;  %s12156_s0 = inlined_call_operand.vmem [shape: f32[256,8], index: 0, kind: input, shape index: {}]   ;;  %s12157_s1 = inlined_call_operand.vmem [shape: f32[2,8], index: 1, kind: input, shape index: {}]   ;;  %s12158_s2 = inlined_call_operand.vmem [shape: f32[256,256], index: 2, kind: input, shape index: {}]   ;;  %s12159_s3 = inlined_call_operand.vmem [shape: f32[16,64], index: 3, kind: input, shape index: {}]   ;;  %s12160_s4 = inlined_call_operand.vmem [shape: f32[448,32], index: 4, kind: input, shape index: {}]   ;;  %s12161_s6 = inlined_call_operand.vmem [shape: f32[1,51], index: 6, kind: input, shape index: {}]   ;;  %s12162_s10 = inlined_call_operand.vmem [shape: f32[336,3], index: 10, kind: input, shape index: {}]   ;;  %s12163_s8 = inlined_call_operand.vmem [shape: f32[256,192], index: 8, kind: input, shape index: {}]   ;;  %s12164_s5 = inlined_call_operand.vmem [shape: f32[224,16], index: 5, kind: input, shape index: {}]   ;;  %s12165_s9 = inlined_call_operand.vmem [shape: f32[128,144], index: 9, kind: input, shape index: {}]   ;;  %s12166_s11 = inlined_call_operand.vmem [shape: f32[16,384], index: 11, kind: input, shape index: {}]   ;;  %s12167_s12 = inlined_call_operand.vmem [shape: f32[16,3], index: 12, kind: output, shape index: {}]  }
   0x1   :  { %6049 = vset.pattern.permute.xlu1 %v12168_v0  ;;  %6048 = vset.pattern.permute.xlu2 %v12168_v0  ;;  %v6519_v1 = vld [vmem:[%s12155_s7 + $0x10] sm:$0xff]  ;;  %v6524_v2 = vld [vmem:[%s12155_s7] sm:$0xff]  ;;  %v57_v4 = vld [vmem:[%s12156_s0 + $0x78] sm:$0xff]  ;;  %vm2652_vm5 = vcmask 523264   ;;  %vm3388_vm9 = vcmask 261120   ;;  %s6446_s24 = smov 32  }
   0x2   :  { %v41_v3 = vld [vmem:[%s12157_s1] sm:$0x3]  ;;  %963 = vperm.xlu1 %6049, %v6519_v1   ;;  %953 = vperm.xlu2 %6048, %v6524_v2   ;;  %v73_v7 = vld [vmem:[%s12156_s0 + $0xf8] sm:$0xff]  ;;  %v56_v8 = vld [vmem:[%s12156_s0 + $0x70] sm:$0xff]  ;;  %vm4540_vm10 = vcmask 785408   ;;  %vm5166_vm11 = vcmask 392192  }
   0x3   :  { %v6534_v5 = vperm.slane %v41_v3, 0  ;;  %v6536_v6 = vperm.slane %v41_v3, 1  ;;  %v72_v9 = vld [vmem:[%s12156_s0 + $0xf0] sm:$0xff]  ;;  %6051 = vset.pattern.permute.xlu0 %v12170_v10  ;;  %v55_v15 = vld [vmem:[%s12156_s0 + $0x68] sm:$0xff]  ;;  %v54_v17 = vld [vmem:[%s12156_s0 + $0x60] sm:$0xff]  ;;  %vm5883_vm12 = vcmask 23552  }
   0x4   :  { %v71_v16 = vld [vmem:[%s12156_s0 + $0xe8] sm:$0xff]  ;;  %v70_v20 = vld [vmem:[%s12156_s0 + $0xe0] sm:$0xff]  ;;  %v53_v23 = vld [vmem:[%s12156_s0 + $0x58] sm:$0xff] }
   0x5   :  { %v90_v11 = vmul.f32 %v6534_v5, %v57_v4  ;;  %v106_v12 = vmul.f32 %v6534_v5, %v73_v7  ;;  %v89_v13 = vmul.f32 %v6534_v5, %v56_v8  ;;  %v105_v14 = vmul.f32 %v6534_v5, %v72_v9  ;;  %v69_v24 = vld [vmem:[%s12156_s0 + $0xd8] sm:$0xff]  ;;  %v6581_v25 = vld [vmem:[%s12155_s7 + $0x20] sm:$0xff]  ;;  %v52_v31 = vld [vmem:[%s12156_s0 + $0x50] sm:$0xff] }
   0x6   :  { %v88_v18 = vmul.f32 %v6534_v5, %v55_v15  ;;  %v104_v19 = vmul.f32 %v6534_v5, %v71_v16  ;;  %v6586_v26 = vld [vmem:[%s12155_s7 + $0x18] sm:$0xff]  ;;  %v87_v29 = vmul.f32 %v6534_v5, %v54_v17  ;;  %v103_v30 = vmul.f32 %v6534_v5, %v70_v20  ;;  %v68_v32 = vld [vmem:[%s12156_s0 + $0xd0] sm:$0xff]  ;;  %v51_v37 = vld [vmem:[%s12156_s0 + $0x48] sm:$0xff] }
   0x7   :  { %v6567_v21 = vadd.f32 %v6536_v6, %v90_v11  ;;  %v6570_v22 = vadd.f32 %v6536_v6, %v106_v12  ;;  %v6589_v27 = vadd.f32 %v6536_v6, %v89_v13  ;;  %v6592_v28 = vadd.f32 %v6536_v6, %v105_v14  ;;  %v67_v39 = vld [vmem:[%s12156_s0 + $0xc8] sm:$0xff]  ;;  %v50_v45 = vld [vmem:[%s12156_s0 + $0x40] sm:$0xff]  ;;  %v49_v51 = vld [vmem:[%s12156_s0 + $0x38] sm:$0xff] }
   0x8   :  { %v6605_v33 = vadd.f32 %v6536_v6, %v88_v18  ;;  %v6608_v34 = vadd.f32 %v6536_v6, %v104_v19  ;;  %v86_v35 = vmul.f32 %v6534_v5, %v53_v23  ;;  %v102_v36 = vmul.f32 %v6534_v5, %v69_v24  ;;  %v6634_v43 = vld [vmem:[%s12155_s7 + $0x8] sm:$0xff]  ;;  %v66_v46 = vld [vmem:[%s12156_s0 + $0xc0] sm:$0xff]  ;;  %v65_v52 = vld [vmem:[%s12156_s0 + $0xb8] sm:$0xff] }
   0x9   :  { %12398 = vst [vmem:[#allocation3_spill] sm:$0xff] %v6570_v22  ;;  %204 = vmatpush.msra.mxu0 %v6567_v21  ;;  %317 = vmatpush.msra.mxu1 %v6570_v22  ;;  %v85_v38 = vmul.f32 %v6534_v5, %v52_v31  ;;  %v6625_v40 = vadd.f32 %v6536_v6, %v87_v29  ;;  %v6668_v53 = vld [vmem:[%s12155_s7 + $0x38] sm:$0xff]  ;;  %v6673_v54 = vld [vmem:[%s12155_s7 + $0x28] sm:$0xff]  ;;  %v48_v58 = vld [vmem:[%s12156_s0 + $0x30] sm:$0xff] }
   0xa   :  { %12399 = vst [vmem:[#allocation4_spill] sm:$0xff] %v6592_v28  ;;  %6018 = vmatpush.msra.mxu3 %v6567_v21  ;;  %973 = vperm.xlu1 %6049, %v6581_v25   ;;  %v6628_v41 = vadd.f32 %v6536_v6, %v103_v30  ;;  %v101_v42 = vmul.f32 %v6534_v5, %v68_v32  ;;  %v64_v60 = vld [vmem:[%s12156_s0 + $0xb0] sm:$0xff]  ;;  %v47_v3 = vld [vmem:[%s12156_s0 + $0x28] sm:$0xff]  ;;  %v46_v14 = vld [vmem:[%s12156_s0 + $0x20] sm:$0xff] }
   0xb   :  { %12400 = vst [vmem:[#allocation5_spill] sm:$0xff] %v6608_v34  ;;  %968 = vperm.xlu2 %6048, %v6586_v26   ;;  %205 = vmatpush.msra.mxu0 %v6589_v27  ;;  %v84_v44 = vmul.f32 %v6534_v5, %v51_v37  ;;  %v6647_v47 = vadd.f32 %v6536_v6, %v86_v35  ;;  %v6703_v4 = vld [vmem:[%s12155_s7 + $0x30] sm:$0xff]  ;;  %v63_v8 = vld [vmem:[%s12156_s0 + $0xa8] sm:$0xff]  ;;  %v62_v15 = vld [vmem:[%s12156_s0 + $0xa0] sm:$0xff] }
   0xc   :  { %318 = vmatpush.msra.mxu1 %v6592_v28  ;;  %12401 = vst [vmem:[#allocation6_spill] sm:$0xff] %v6628_v41  ;;  %1213 = vperm.xlu0 %6051, %v6634_v43   ;;  %v6650_v48 = vadd.f32 %v6536_v6, %v102_v36  ;;  %v100_v49 = vmul.f32 %v6534_v5, %v67_v39  ;;  %v45_v19 = vld [vmem:[%s12156_s0 + $0x18] sm:$0xff]  ;;  %v6752_v24 = vld [vmem:[%s12155_s7 + $0x50] sm:$0xff]  ;;  %v6757_v29 = vld [vmem:[%s12155_s7 + $0x40] sm:$0xff] }
   0xd   :  { %206 = vmatpush.msra.mxu0 %v6605_v33  ;;  %v6654_v50 = vadd.f32 %v6536_v6, %v85_v38  ;;  %6019 = vmatpush.msra.mxu3 %v6589_v27  ;;  %v6676_v55 = vadd.f32 %v6536_v6, %v101_v42  ;;  %v83_v56 = vmul.f32 %v6534_v5, %v50_v45  ;;  %v61_v23 = vld [vmem:[%s12156_s0 + $0x98] sm:$0xff]  ;;  %v44_v35 = vld [vmem:[%s12156_s0 + $0x10] sm:$0xff]  ;;  %v7014_v22 = vld [vmem:[%s12155_s7 + $0xe8] sm:$0xff] }
   0xe   :  { %319 = vmatpush.msra.mxu1 %v6608_v34  ;;  %12402 = vst [vmem:[#allocation7_spill] sm:$0xff] %v6650_v48  ;;  %v99_v57 = vmul.f32 %v6534_v5, %v66_v46  ;;  %v6684_v59 = vadd.f32 %v6536_v6, %v84_v44  ;;  %v6693_v61 = vadd.f32 %v6536_v6, %v100_v49  ;;  %v60_v37 = vld [vmem:[%s12156_s0 + $0x90] sm:$0xff]  ;;  %v6784_v44 = vld [vmem:[%s12155_s7 + $0x48] sm:$0xff]  ;;  %v6995_v0 = vld [vmem:[%s12155_s7 + $0xd8] sm:$0xff] }
   0xf   :  { %207 = vmatpush.msra.mxu0 %v6625_v40  ;;  %12403 = vst [vmem:[#allocation8_spill] sm:$0xff] %v6676_v55  ;;  %6020 = vmatpush.msra.mxu3 %v6605_v33  ;;  %v82_v62 = vmul.f32 %v6534_v5, %v49_v51  ;;  %v98_v63 = vmul.f32 %v6534_v5, %v65_v52  ;;  %v43_v46 = vld [vmem:[%s12156_s0 + $0x8] sm:$0xff]  ;;  %v150_v10 = vld [vmem:[%s12158_s2 + $0x50] sm:$0xff]  ;;  %v152_v34 = vld [vmem:[%s12158_s2 + $0x60] sm:$0xff] }
  0x10   :  { %320 = vmatpush.msra.mxu1 %v6628_v41  ;;  %12404 = vst [vmem:[#allocation9_spill] sm:$0xff] %v6693_v61  ;;  %v81_v7 = vmul.f32 %v6534_v5, %v48_v58  ;;  %v6714_v9 = vadd.f32 %v6536_v6, %v83_v56  ;;  %v6717_v11 = vadd.f32 %v6536_v6, %v99_v57  ;;  %v59_v49 = vld [vmem:[%s12156_s0 + $0x88] sm:$0xff]  ;;  %v42_v58 = vld [vmem:[%s12156_s0] sm:$0xff]  ;;  %v7019_v28 = vld [vmem:[%s12155_s7 + $0xf0] sm:$0xff] }
  0x11   :  { %208 = vmatpush.msra.mxu0 %v6647_v47  ;;  %v97_v12 = vmul.f32 %v6534_v5, %v64_v60  ;;  %v80_v13 = vmul.f32 %v6534_v5, %v47_v3  ;;  %v6731_v16 = vadd.f32 %v6536_v6, %v82_v62  ;;  %v6734_v17 = vadd.f32 %v6536_v6, %v98_v63  ;;  %v58_v60 = vld [vmem:[%s12156_s0 + $0x80] sm:$0xff] }
  0x12   :  { %321 = vmatpush.msra.mxu1 %v6650_v48  ;;  %988 = vperm.xlu1 %6049, %v6668_v53   ;;  %12405 = vst [vmem:[#allocation10_spill] sm:$0xff] %v6717_v11  ;;  %v96_v18 = vmul.f32 %v6534_v5, %v63_v8  ;;  %v6741_v20 = vadd.f32 %v6536_v6, %v81_v7  ;;  %v6831_v8 = vld [vmem:[%s12155_s7 + $0x68] sm:$0xff]  ;;  %v154_v48 = vld [vmem:[%s12158_s2 + $0x70] sm:$0xff] }
  0x13   :  { %978 = vperm.xlu2 %6048, %v6673_v54   ;;  %209 = vmatpush.msra.mxu0 %v6654_v50  ;;  %12406 = vst [vmem:[#allocation11_spill] sm:$0xff] %v6734_v17  ;;  %v6760_v30 = vadd.f32 %v6536_v6, %v97_v12  ;;  %v79_v31 = vmul.f32 %v6534_v5, %v46_v14  ;;  %v6836_v12 = vld [vmem:[%s12155_s7 + $0x58] sm:$0xff] }
  0x14   :  { %322 = vmatpush.msra.mxu1 %v6676_v55  ;;  %1233 = vperm.xlu0 %6051, %v6703_v4   ;;  %v95_v32 = vmul.f32 %v6534_v5, %v62_v15  ;;  %v78_v36 = vmul.f32 %v6534_v5, %v45_v19  ;;  %v6775_v38 = vadd.f32 %v6536_v6, %v80_v13  ;;  %v155_v55 = vld [vmem:[%s12158_s2 + $0x78] sm:$0xff] }
  0x15   :  { %210 = vmatpush.msra.mxu0 %v6684_v59  ;;  %6021 = vmatpush.msra.mxu3 %v6625_v40  ;;  %12407 = vst [vmem:[#allocation12_spill] sm:$0xff] %v6760_v30  ;;  %v6778_v39 = vadd.f32 %v6536_v6, %v96_v18  ;;  %v94_v42 = vmul.f32 %v6534_v5, %v61_v23  ;;  %v6855_v23 = vld [vmem:[%s12155_s7 + $0x60] sm:$0xff] }
  0x16   :  { %323 = vmatpush.msra.mxu1 %v6693_v61  ;;  %v77_v45 = vmul.f32 %v6534_v5, %v44_v35  ;;  %v6798_v51 = vadd.f32 %v6536_v6, %v79_v31  ;;  %v6801_v52 = vadd.f32 %v6536_v6, %v95_v32  ;;  %v93_v56 = vmul.f32 %v6534_v5, %v60_v37  ;;  %v140_v32 = vld [vmem:[%s12158_s2] sm:$0xff]  ;;  %v141_v35 = vld [vmem:[%s12158_s2 + $0x8] sm:$0xff]  ;;  %v6893_v37 = vld [vmem:[%s12155_s7 + $0x78] sm:$0xff] }
  0x17   :  { %211 = vmatpush.msra.mxu0 %v6714_v9  ;;  %6022 = vmatpush.msra.mxu3 %v6647_v47  ;;  %v6805_v57 = vadd.f32 %v6536_v6, %v78_v36  ;;  %v6818_v62 = vadd.f32 %v6536_v6, %v94_v42  ;;  %v76_v63 = vmul.f32 %v6534_v5, %v43_v46  ;;  %v6888_v36 = vld [vmem:[%s12155_s7 + $0x70] sm:$0xff]  ;;  %v6910_v46 = vld [vmem:[%s12155_s7 + $0x98] sm:$0xff]  ;;  %v12180_v61 = vmov 2  }
  0x18   :  { %324 = vmatpush.msra.mxu1 %v6717_v11  ;;  %v92_v3 = vmul.f32 %v6534_v5, %v59_v49  ;;  %v6823_v7 = vadd.f32 %v6536_v6, %v77_v45  ;;  %v6839_v13 = vadd.f32 %v6536_v6, %v93_v56  ;;  %v75_v14 = vmul.f32 %v6534_v5, %v42_v58  ;;  %v142_v42 = vld [vmem:[%s12158_s2 + $0x10] sm:$0xff]  ;;  %v143_v45 = vld [vmem:[%s12158_s2 + $0x18] sm:$0xff]  ;;  %v6915_v49 = vld [vmem:[%s12155_s7 + $0x88] sm:$0xff] }
  0x19   :  { %212 = vmatpush.msra.mxu0 %v6731_v16  ;;  %6023 = vmatpush.msra.mxu3 %v6654_v50  ;;  %v91_v15 = vmul.f32 %v6534_v5, %v58_v60  ;;  %v6847_v18 = vadd.f32 %v6536_v6, %v76_v63  ;;  %v6921_v56 = vld [vmem:[%s12155_s7 + $0x90] sm:$0xff]  ;;  %v144_v58 = vld [vmem:[%s12158_s2 + $0x20] sm:$0xff]  ;;  %v145_v60 = vld [vmem:[%s12158_s2 + $0x28] sm:$0xff] }
  0x1a   :  { %325 = vmatpush.msra.mxu1 %v6734_v17  ;;  %1003 = vperm.xlu1 %6049, %v6752_v24   ;;  %v6850_v19 = vadd.f32 %v6536_v6, %v92_v3  ;;  %v6862_v5 = vadd.f32 %v6536_v6, %v75_v14  ;;  %v6937_v63 = vld [vmem:[%s12155_s7 + $0xb0] sm:$0xff]  ;;  %v6942_v3 = vld [vmem:[%s12155_s7 + $0xa0] sm:$0xff]  ;;  %v6947_v14 = vld [vmem:[%s12155_s7 + $0xa8] sm:$0xff] }
  0x1b   :  { %993 = vperm.xlu2 %6048, %v6757_v29   ;;  %213 = vmatpush.msra.mxu0 %v6741_v20  ;;  %v6865_v31 = vadd.f32 %v6536_v6, %v91_v15  ;;  %v6883_v6 = vld [vmem:[%s12155_s7 + $0x80] sm:$0xff]  ;;  %v146_v15 = vld [vmem:[%s12158_s2 + $0x30] sm:$0xff]  ;;  %v173_v11 = vld [vmem:[%s12158_s2 + $0x108] sm:$0xff] }
  0x1c   :  { %326 = vmatpush.msra.mxu1 %v6760_v30  ;;  %1245 = vperm.xlu0 %6051, %v6784_v44   ;;  %v174_v30 = vld [vmem:[%s12158_s2 + $0x110] sm:$0xff] }
  0x1d   :  { %214 = vmatpush.msra.mxu0 %v6775_v38  ;;  %6024 = vmatpush.msra.mxu3 %v6684_v59 }
  0x1e   :  { %327 = vmatpush.msra.mxu1 %v6778_v39 }
  0x1f   :  { %215 = vmatpush.msra.mxu0 %v6798_v51  ;;  %6025 = vmatpush.msra.mxu3 %v6714_v9 }
  0x20   :  { %328 = vmatpush.msra.mxu1 %v6801_v52 }
  0x21   :  { %216 = vmatpush.msra.mxu0 %v6805_v57  ;;  %6026 = vmatpush.msra.mxu3 %v6731_v16 }
  0x22   :  { %329 = vmatpush.msra.mxu1 %v6818_v62  ;;  %1018 = vperm.xlu1 %6049, %v6831_v8  }
  0x23   :  { %1008 = vperm.xlu2 %6048, %v6836_v12   ;;  %217 = vmatpush.msra.mxu0 %v6823_v7 }
  0x24   :  { %330 = vmatpush.msra.mxu1 %v6839_v13  ;;  %1257 = vperm.xlu0 %6051, %v6855_v23  }
  0x25   :  { %218 = vmatpush.msra.mxu0 %v6847_v18  ;;  %6027 = vmatpush.msra.mxu3 %v6741_v20 }
  0x26   :  { %331 = vmatpush.msra.mxu1 %v6850_v19 }
  0x27   :  { %219 = vmatpush.msra.mxu0 %v6862_v5  ;;  %6028 = vmatpush.msra.mxu3 %v6775_v38 }
  0x28   :  { %332 = vmatpush.msra.mxu1 %v6865_v31  ;;  %220 = vmatmul.f32.vlgmr.msra.gmra.mxu0 %v140_v32  ;;  %v147_v32 = vld [vmem:[%s12158_s2 + $0x38] sm:$0xff] }
  0x29   :  { %333 = vmatmul.f32.vlgmr.msra.gmra.mxu1 %v141_v35  ;;  %6029 = vmatpush.msra.mxu3 %v6798_v51  ;;  %v6961_v35 = vld [vmem:[%s12155_s7 + $0xc8] sm:$0xff] }
  0x2a   :  { %1033 = vperm.xlu1 %6049, %v6883_v6  }
  0x2b   :  { %1023 = vperm.xlu2 %6048, %v6888_v36   ;;  %6030 = vmatpush.msra.mxu3 %v6805_v57 }
  0x2c   :  { %1269 = vperm.xlu0 %6051, %v6893_v37  }
  0x2d   :  { %6031 = vmatpush.msra.mxu3 %v6823_v7 }
  0x2f   :  { %6032 = vmatpush.msra.mxu3 %v6847_v18 }
  0x30   :  { %223 = vmatmul.f32.gmra.mxu0 %v142_v42  ;;  %v6966_v42 = vld [vmem:[%s12155_s7 + $0xb8] sm:$0xff] }
  0x31   :  { %336 = vmatmul.f32.gmra.mxu1 %v143_v45  ;;  %6033 = vmatpush.msra.mxu3 %v6862_v5  ;;  %v6971_v45 = vld [vmem:[%s12155_s7 + $0xc0] sm:$0xff] }
  0x32   :  { %1048 = vperm.xlu1 %6049, %v6910_v46  }
  0x33   :  { %1038 = vperm.xlu2 %6048, %v6915_v49  }
  0x34   :  { %1281 = vperm.xlu0 %6051, %v6921_v56  }
  0x38   :  { %226 = vmatmul.f32.gmra.mxu0 %v144_v58  ;;  %v148_v58 = vld [vmem:[%s12158_s2 + $0x40] sm:$0xff] }
  0x39   :  { %339 = vmatmul.f32.gmra.mxu1 %v145_v60  ;;  %v149_v60 = vld [vmem:[%s12158_s2 + $0x48] sm:$0xff] }
  0x3a   :  { %1063 = vperm.xlu1 %6049, %v6937_v63  }
  0x3b   :  { %1053 = vperm.xlu2 %6048, %v6942_v3  }
  0x3c   :  { %1293 = vperm.xlu0 %6051, %v6947_v14  }
  0x40   :  { %229 = vmatmul.f32.gmra.mxu0 %v146_v15  ;;  %v6985_v15 = vld [vmem:[%s12155_s7 + $0xe0] sm:$0xff] }
  0x41   :  { %342 = vmatmul.f32.gmra.mxu1 %v147_v32  ;;  %v6990_v32 = vld [vmem:[%s12155_s7 + $0xd0] sm:$0xff] }
  0x42   :  { %1078 = vperm.xlu1 %6049, %v6961_v35  }
  0x43   :  { %1068 = vperm.xlu2 %6048, %v6966_v42  }
  0x44   :  { %1305 = vperm.xlu0 %6051, %v6971_v45  }
  0x48   :  { %232 = vmatmul.f32.gmra.mxu0 %v148_v58  ;;  %v151_v58 = vld [vmem:[%s12158_s2 + $0x58] sm:$0xff] }
  0x49   :  { %345 = vmatmul.f32.gmra.mxu1 %v149_v60  ;;  %v7009_v60 = vld [vmem:[%s12155_s7 + $0xf8] sm:$0xff] }
  0x4a   :  { %1093 = vperm.xlu1 %6049, %v6985_v15  }
  0x4b   :  { %1083 = vperm.xlu2 %6048, %v6990_v32  }
  0x4c   :  { %1317 = vperm.xlu0 %6051, %v6995_v0  }
  0x50   :  { %235 = vmatmul.f32.gmra.mxu0 %v150_v10  ;;  %v153_v10 = vld [vmem:[%s12158_s2 + $0x68] sm:$0xff] }
  0x51   :  { %348 = vmatmul.f32.gmra.mxu1 %v151_v58  ;;  %v12408_v58 = vmov 1  }
  0x52   :  { %1108 = vperm.xlu1 %6049, %v7009_v60  }
  0x53   :  { %1098 = vperm.xlu2 %6048, %v7014_v22  }
  0x54   :  { %1329 = vperm.xlu0 %6051, %v7019_v28  }
  0x58   :  { %238 = vmatmul.f32.gmra.mxu0 %v152_v34 }
  0x59   :  { %351 = vmatmul.f32.gmra.mxu1 %v153_v10  ;;  %v156_v10 = vld [vmem:[%s12158_s2 + $0x80] sm:$0xff] }
  0x5a   :  { %6052 = vset.pattern.permute.xlu1 %v12408_v58 }
  0x5b   :  { %6050 = vset.pattern.permute.xlu2 %v12408_v58  ;;  %1217 = vperm.xlu1 %6052, %v6519_v1   ;;  %v157_v58 = vld [vmem:[%s12158_s2 + $0x88] sm:$0xff] }
  0x5c   :  { %1209 = vperm.xlu2 %6050, %v6524_v2   ;;  %v7034_v41 = vpop.permute.xlu2 %953  ;;  %6054 = vset.pattern.permute.xlu0 %v12180_v61  ;;  %v165_v61 = vld [vmem:[%s12158_s2 + $0xc8] sm:$0xff] }
  0x5d   :  { %12409 = vst [vmem:[#allocation13_spill] sm:$0xff] %v7034_v41  ;;  %v161_v41 = vld [vmem:[%s12158_s2 + $0xa8] sm:$0xff]  ;;  %1438 = vperm.xlu0 %6054, %v6634_v43  }
  0x60   :  { %241 = vmatmul.f32.gmra.mxu0 %v154_v48 }
  0x61   :  { %354 = vmatmul.f32.gmra.mxu1 %v155_v55  ;;  %v158_v55 = vld [vmem:[%s12158_s2 + $0x90] sm:$0xff] }
  0x63   :  { %1225 = vperm.xlu1 %6052, %v6581_v25  }
  0x64   :  { %1221 = vperm.xlu2 %6050, %v6586_v26  }
  0x65   :  { %v7044_v34 = vpop.permute.xlu2 %968 }
  0x66   :  { %12410 = vst [vmem:[#allocation14_spill] sm:$0xff] %v7044_v34  ;;  %v159_v34 = vld [vmem:[%s12158_s2 + $0x98] sm:$0xff] }
  0x68   :  { %244 = vmatmul.f32.gmra.mxu0 %v156_v10 }
  0x69   :  { %357 = vmatmul.f32.gmra.mxu1 %v157_v58 }
  0x6b   :  { %1237 = vperm.xlu1 %6052, %v6668_v53  }
  0x6c   :  { %1229 = vperm.xlu2 %6050, %v6673_v54  }
  0x6d   :  { %v7054_v48 = vpop.permute.xlu2 %978 }
  0x6e   :  { %12411 = vst [vmem:[#allocation15_spill] sm:$0xff] %v7054_v48  ;;  %v160_v48 = vld [vmem:[%s12158_s2 + $0xa0] sm:$0xff] }
  0x70   :  { %247 = vmatmul.f32.gmra.mxu0 %v158_v55 }
  0x71   :  { %360 = vmatmul.f32.gmra.mxu1 %v159_v34 }
  0x73   :  { %1249 = vperm.xlu1 %6052, %v6752_v24  }
  0x74   :  { %1241 = vperm.xlu2 %6050, %v6757_v29   ;;  %v7064_v58 = vpop.permute.xlu1 %963 }
  0x75   :  { %12412 = vst [vmem:[#allocation16_spill] sm:$0xff] %v7064_v58  ;;  %v7066_v10 = vpop.permute.xlu2 %993  ;;  %v163_v58 = vld [vmem:[%s12158_s2 + $0xb8] sm:$0xff] }
  0x76   :  { %12413 = vst [vmem:[#allocation17_spill] sm:$0xff] %v7066_v10  ;;  %v162_v10 = vld [vmem:[%s12158_s2 + $0xb0] sm:$0xff] }
  0x78   :  { %250 = vmatmul.f32.gmra.mxu0 %v160_v48 }
  0x79   :  { %363 = vmatmul.f32.gmra.mxu1 %v161_v41 }
  0x7b   :  { %1261 = vperm.xlu1 %6052, %v6831_v8  }
  0x7c   :  { %1253 = vperm.xlu2 %6050, %v6836_v12   ;;  %v7076_v34 = vpop.permute.xlu1 %973 }
  0x7d   :  { %12414 = vst [vmem:[#allocation18_spill] sm:$0xff] %v7076_v34  ;;  %v7078_v55 = vpop.permute.xlu2 %1008  ;;  %v172_v34 = vld [vmem:[%s12158_s2 + $0x100] sm:$0xff] }
  0x7e   :  { %12415 = vst [vmem:[#allocation19_spill] sm:$0xff] %v7078_v55  ;;  %v164_v55 = vld [vmem:[%s12158_s2 + $0xc0] sm:$0xff] }
  0x80   :  { %253 = vmatmul.f32.gmra.mxu0 %v162_v10 }
  0x81   :  { %366 = vmatmul.f32.gmra.mxu1 %v163_v58 }
  0x83   :  { %1273 = vperm.xlu1 %6052, %v6883_v6  }
  0x84   :  { %1265 = vperm.xlu2 %6050, %v6888_v36   ;;  %v7090_v41 = vpop.permute.xlu1 %988 }
  0x85   :  { %12416 = vst [vmem:[#allocation20_spill] sm:$0xff] %v7090_v41  ;;  %v7092_v48 = vpop.permute.xlu2 %1023  ;;  %v167_v41 = vld [vmem:[%s12158_s2 + $0xd8] sm:$0xff] }
  0x86   :  { %12417 = vst [vmem:[#allocation21_spill] sm:$0xff] %v7092_v48  ;;  %v166_v48 = vld [vmem:[%s12158_s2 + $0xd0] sm:$0xff] }
  0x88   :  { %256 = vmatmul.f32.gmra.mxu0 %v164_v55 }
  0x89   :  { %369 = vmatmul.f32.gmra.mxu1 %v165_v61 }
  0x8b   :  { %1285 = vperm.xlu1 %6052, %v6910_v46  }
  0x8c   :  { %1277 = vperm.xlu2 %6050, %v6915_v49   ;;  %v7102_v58 = vpop.permute.xlu1 %1003 }
  0x8d   :  { %12418 = vst [vmem:[#allocation22_spill] sm:$0xff] %v7102_v58  ;;  %v7104_v10 = vpop.permute.xlu2 %1038  ;;  %v169_v58 = vld [vmem:[%s12158_s2 + $0xe8] sm:$0xff] }
  0x8e   :  { %12419 = vst [vmem:[#allocation23_spill] sm:$0xff] %v7104_v10  ;;  %v168_v10 = vld [vmem:[%s12158_s2 + $0xe0] sm:$0xff] }
  0x90   :  { %259 = vmatmul.f32.gmra.mxu0 %v166_v48 }
  0x91   :  { %372 = vmatmul.f32.gmra.mxu1 %v167_v41 }
  0x93   :  { %1297 = vperm.xlu1 %6052, %v6937_v63  }
  0x94   :  { %1289 = vperm.xlu2 %6050, %v6942_v3   ;;  %v7114_v61 = vpop.permute.xlu1 %1018 }
  0x95   :  { %12420 = vst [vmem:[#allocation24_spill] sm:$0xff] %v7114_v61  ;;  %v7116_v55 = vpop.permute.xlu2 %1053  ;;  %v171_v61 = vld [vmem:[%s12158_s2 + $0xf8] sm:$0xff] }
  0x96   :  { %12421 = vst [vmem:[#allocation25_spill] sm:$0xff] %v7116_v55  ;;  %v170_v55 = vld [vmem:[%s12158_s2 + $0xf0] sm:$0xff] }
  0x98   :  { %262 = vmatmul.f32.gmra.mxu0 %v168_v10 }
  0x99   :  { %375 = vmatmul.f32.gmra.mxu1 %v169_v58 }
  0x9b   :  { %1309 = vperm.xlu1 %6052, %v6961_v35  }
  0x9c   :  { %1301 = vperm.xlu2 %6050, %v6966_v42   ;;  %v7126_v41 = vpop.permute.xlu1 %1033 }
  0x9d   :  { %12422 = vst [vmem:[#allocation26_spill] sm:$0xff] %v7126_v41  ;;  %v7128_v48 = vpop.permute.xlu2 %1068 }
  0x9e   :  { %12423 = vst [vmem:[#allocation27_spill] sm:$0xff] %v7128_v48 }
  0xa0   :  { %265 = vmatmul.f32.gmra.mxu0 %v170_v55 }
  0xa1   :  { %378 = vmatmul.f32.gmra.mxu1 %v171_v61 }
  0xa3   :  { %1321 = vperm.xlu1 %6052, %v6985_v15  }
  0xa4   :  { %1313 = vperm.xlu2 %6050, %v6990_v32   ;;  %v7138_v58 = vpop.permute.xlu1 %1048 }
  0xa5   :  { %12424 = vst [vmem:[#allocation28_spill] sm:$0xff] %v7138_v58  ;;  %v7140_v10 = vpop.permute.xlu2 %1083  ;;  %v221_v41 = vpop.f32.mrf.mxu0 }
  0xa6   :  { %12425 = vst [vmem:[#allocation29_spill] sm:$0xff] %v7140_v10  ;;  %v334_v48 = vpop.f32.mrf.mxu1 }
  0xa7   :  { %v335_v55 = vadd.f32 %v334_v48, %v221_v41  ;;  %v12428_v41 = vmov 2   ;;  %v7164_v48 = vpop.permute.xlu0 %1213 }
  0xa8   :  { %268 = vmatmul.f32.gmra.mxu0 %v172_v34  ;;  %12429 = vst [vmem:[#allocation32_spill] sm:$0xff] %v7164_v48 }
  0xa9   :  { %381 = vmatmul.f32.gmra.mxu1 %v173_v11  ;;  %462 = vrot.lane.b32.xlu0 %v335_v55, %s6440_s23  ;;  %v175_v11 = vld [vmem:[%s12158_s2 + $0x118] sm:$0xff] }
  0xab   :  { %1333 = vperm.xlu1 %6052, %v7009_v60  }
  0xac   :  { %1325 = vperm.xlu2 %6050, %v7014_v22   ;;  %v7151_v61 = vpop.permute.xlu1 %1063 }
  0xad   :  { %12426 = vst [vmem:[#allocation30_spill] sm:$0xff] %v7151_v61  ;;  %v7153_v10 = vpop.permute.xlu2 %1098  ;;  %v224_v58 = vpop.f32.mrf.mxu0 }
  0xae   :  { %12427 = vst [vmem:[#allocation31_spill] sm:$0xff] %v7153_v10  ;;  %v337_v17 = vpop.f32.mrf.mxu1 }
  0xaf   :  { %v338_v34 = vadd.f32 %v337_v17, %v224_v58  ;;  %v176_v17 = vld [vmem:[%s12158_s2 + $0x120] sm:$0xff] }
  0xb0   :  { %271 = vmatmul.f32.gmra.mxu0 %v174_v30  ;;  %v177_v30 = vld [vmem:[%s12158_s2 + $0x128] sm:$0xff] }
  0xb1   :  { %384 = vmatmul.f32.gmra.mxu1 %v175_v11  ;;  %464 = vrot.lane.b32.xlu0 %v338_v34, %s6440_s23 }
  0xb3   :  { %6055 = vset.pattern.permute.xlu1 %v12428_v41 }
  0xb4   :  { %6053 = vset.pattern.permute.xlu2 %v12428_v41  ;;  %v7166_v55 = vpop.permute.xlu1 %1078  ;;  %v178_v41 = vld [vmem:[%s12158_s2 + $0x130] sm:$0xff] }
  0xb5   :  { %12430 = vst [vmem:[#allocation33_spill] sm:$0xff] %v7166_v55  ;;  %1434 = vperm.xlu2 %6053, %v6524_v2   ;;  %v227_v10 = vpop.f32.mrf.mxu0 }
  0xb6   :  { %v340_v61 = vpop.f32.mrf.mxu1  ;;  %v7175_v11 = vpop.permute.xlu2 %1209 }
  0xb7   :  { %v341_v58 = vadd.f32 %v340_v61, %v227_v10  ;;  %12431 = vst [vmem:[#allocation34_spill] sm:$0xff] %v7175_v11  ;;  %v179_v10 = vld [vmem:[%s12158_s2 + $0x138] sm:$0xff]  ;;  %v7188_v61 = vpop.permute.xlu0 %1233  ;;  %v180_v11 = vld [vmem:[%s12158_s2 + $0x140] sm:$0xff] }
  0xb8   :  { %274 = vmatmul.f32.gmra.mxu0 %v176_v17 }
  0xb9   :  { %387 = vmatmul.f32.gmra.mxu1 %v177_v30  ;;  %1458 = vperm.xlu0 %6054, %v6703_v4  }
  0xba   :  { %466 = vrot.lane.b32.xlu1 %v341_v58, %s6440_s23 }
  0xbc   :  { %v7179_v2 = vpop.permute.xlu1 %1093 }
  0xbd   :  { %12432 = vst [vmem:[#allocation35_spill] sm:$0xff] %v7179_v2  ;;  %1446 = vperm.xlu2 %6053, %v6586_v26   ;;  %v230_v34 = vpop.f32.mrf.mxu0 }
  0xbe   :  { %v343_v55 = vpop.f32.mrf.mxu1  ;;  %v7190_v30 = vpop.permute.xlu2 %1221 }
  0xbf   :  { %v344_v17 = vadd.f32 %v343_v55, %v230_v34  ;;  %12433 = vst [vmem:[#allocation36_spill] sm:$0xff] %v7190_v30  ;;  %v181_v55 = vld [vmem:[%s12158_s2 + $0x148] sm:$0xff] }
  0xc0   :  { %277 = vmatmul.f32.gmra.mxu0 %v178_v41  ;;  %v7204_v41 = vpop.permute.xlu0 %1245 }
  0xc1   :  { %390 = vmatmul.f32.gmra.mxu1 %v179_v10  ;;  %1470 = vperm.xlu0 %6054, %v6784_v44  }
  0xc2   :  { %468 = vrot.lane.b32.xlu1 %v344_v17, %s6440_s23 }
  0xc4   :  { %v7194_v26 = vpop.permute.xlu1 %1108 }
  0xc5   :  { %12434 = vst [vmem:[#allocation37_spill] sm:$0xff] %v7194_v26  ;;  %v233_v58 = vpop.f32.mrf.mxu0  ;;  %v182_v26 = vld [vmem:[%s12158_s2 + $0x150] sm:$0xff] }
  0xc6   :  { %v346_v2 = vpop.f32.mrf.mxu1  ;;  %v7202_v30 = vpop.permute.xlu2 %1229 }
  0xc7   :  { %v347_v34 = vadd.f32 %v346_v2, %v233_v58  ;;  %12435 = vst [vmem:[#allocation38_spill] sm:$0xff] %v7202_v30  ;;  %v183_v2 = vld [vmem:[%s12158_s2 + $0x158] sm:$0xff] }
  0xc8   :  { %280 = vmatmul.f32.gmra.mxu0 %v180_v11  ;;  %v192_v11 = vld [vmem:[%s12158_s2 + $0x1a0] sm:$0xff] }
  0xc9   :  { %393 = vmatmul.f32.gmra.mxu1 %v181_v55  ;;  %470 = vrot.lane.b32.xlu2 %v347_v34, %s6440_s23 }
  0xca   :  { %1442 = vperm.xlu1 %6055, %v6519_v1   ;;  %v7220_v1 = vpop.permute.xlu0 %1257  ;;  %298 = vmatmul.f32.vlgmr.msra.gmra.mxu3 %v192_v11 }
  0xcd   :  { %v236_v10 = vpop.f32.mrf.mxu0  ;;  %v7214_v30 = vpop.permute.xlu1 %1217 }
  0xce   :  { %v349_v17 = vpop.f32.mrf.mxu1  ;;  %v7216_v48 = vpop.permute.xlu2 %1241 }
  0xcf   :  { %v350_v58 = vadd.f32 %v349_v17, %v236_v10  ;;  %12436 = vst [vmem:[#allocation39_spill] sm:$0xff] %v7216_v48  ;;  %v184_v10 = vld [vmem:[%s12158_s2 + $0x160] sm:$0xff] }
  0xd0   :  { %283 = vmatmul.f32.gmra.mxu0 %v182_v26  ;;  %v185_v26 = vld [vmem:[%s12158_s2 + $0x168] sm:$0xff] }
  0xd1   :  { %396 = vmatmul.f32.gmra.mxu1 %v183_v2  ;;  %472 = vrot.lane.b32.xlu2 %v350_v58, %s6440_s23  ;;  %v194_v58 = vld [vmem:[%s12158_s2 + $0x1b0] sm:$0xff] }
  0xd2   :  { %1450 = vperm.xlu1 %6055, %v6581_v25   ;;  %301 = vmatmul.f32.gmra.mxu3 %v194_v58  ;;  %v7241_v11 = vpop.permute.xlu0 %1269  ;;  %v196_v58 = vld [vmem:[%s12158_s2 + $0x1c0] sm:$0xff] }
  0xd5   :  { %v239_v55 = vpop.f32.mrf.mxu0  ;;  %v7231_v17 = vpop.permute.xlu1 %1225 }
  0xd6   :  { %v352_v34 = vpop.f32.mrf.mxu1  ;;  %v7233_v2 = vpop.permute.xlu2 %1253 }
  0xd7   :  { %v353_v25 = vadd.f32 %v352_v34, %v239_v55  ;;  %12437 = vst [vmem:[#allocation40_spill] sm:$0xff] %v7233_v2 }
  0xd8   :  { %286 = vmatmul.f32.gmra.mxu0 %v184_v10  ;;  %v186_v10 = vld [vmem:[%s12158_s2 + $0x170] sm:$0xff] }
  0xd9   :  { %399 = vmatmul.f32.gmra.mxu1 %v185_v26  ;;  %1454 = vperm.xlu2 %6053, %v6673_v54  }
  0xda   :  { %1462 = vperm.xlu1 %6055, %v6668_v53   ;;  %474 = vrot.lane.b32.xlu0 %v353_v25, %s6440_s23  ;;  %v187_v53 = vld [vmem:[%s12158_s2 + $0x178] sm:$0xff] }
  0xdb   :  { %304 = vmatmul.f32.gmra.mxu3 %v196_v58  ;;  %v198_v58 = vld [vmem:[%s12158_s2 + $0x1d0] sm:$0xff] }
  0xdd   :  { %v242_v55 = vpop.f32.mrf.mxu0  ;;  %v7249_v26 = vpop.permute.xlu1 %1237 }
  0xde   :  { %v355_v34 = vpop.f32.mrf.mxu1  ;;  %12438 = vst [vmem:[#allocation41_spill] sm:$0xff] %v7249_v26  ;;  %v7251_v25 = vpop.permute.xlu2 %1265 }
  0xdf   :  { %v356_v54 = vadd.f32 %v355_v34, %v242_v55  ;;  %12439 = vst [vmem:[#allocation42_spill] sm:$0xff] %v7251_v25  ;;  %v188_v55 = vld [vmem:[%s12158_s2 + $0x180] sm:$0xff]  ;;  %v189_v34 = vld [vmem:[%s12158_s2 + $0x188] sm:$0xff] }
  0xe0   :  { %289 = vmatmul.f32.gmra.mxu0 %v186_v10  ;;  %v200_v25 = vld [vmem:[%s12158_s2 + $0x1e0] sm:$0xff] }
  0xe1   :  { %402 = vmatmul.f32.gmra.mxu1 %v187_v53  ;;  %1466 = vperm.xlu2 %6053, %v6757_v29  }
  0xe2   :  { %476 = vrot.lane.b32.xlu1 %v356_v54, %s6440_s23  ;;  %1482 = vperm.xlu0 %6054, %v6855_v23   ;;  %v7269_v54 = vpop.permute.xlu0 %1281 }
  0xe3   :  { %12442 = vst [vmem:[#allocation45_spill] sm:$0xff] %v7269_v54  ;;  %307 = vmatmul.f32.gmra.mxu3 %v198_v58 }
  0xe5   :  { %v245_v2 = vpop.f32.mrf.mxu0  ;;  %v7265_v10 = vpop.permute.xlu1 %1249 }
  0xe6   :  { %v358_v48 = vpop.f32.mrf.mxu1  ;;  %12440 = vst [vmem:[#allocation43_spill] sm:$0xff] %v7265_v10  ;;  %v7267_v53 = vpop.permute.xlu2 %1277 }
  0xe7   :  { %v359_v29 = vadd.f32 %v358_v48, %v245_v2  ;;  %12441 = vst [vmem:[#allocation44_spill] sm:$0xff] %v7267_v53  ;;  %v190_v53 = vld [vmem:[%s12158_s2 + $0x190] sm:$0xff] }
  0xe8   :  { %292 = vmatmul.f32.gmra.mxu0 %v188_v55  ;;  %v191_v55 = vld [vmem:[%s12158_s2 + $0x198] sm:$0xff] }
  0xe9   :  { %405 = vmatmul.f32.gmra.mxu1 %v189_v34  ;;  %478 = vrot.lane.b32.xlu2 %v359_v29, %s6440_s23 }
  0xea   :  { %1474 = vperm.xlu1 %6055, %v6752_v24   ;;  %1494 = vperm.xlu0 %6054, %v6893_v37   ;;  %v7289_v58 = vpop.permute.xlu0 %1293 }
  0xeb   :  { %12445 = vst [vmem:[#allocation48_spill] sm:$0xff] %v7289_v58  ;;  %310 = vmatmul.f32.gmra.mxu3 %v200_v25  ;;  %v202_v25 = vld [vmem:[%s12158_s2 + $0x1f0] sm:$0xff] }
  0xed   :  { %v248_v48 = vpop.f32.mrf.mxu0  ;;  %v7283_v34 = vpop.permute.xlu1 %1261 }
  0xee   :  { %v361_v2 = vpop.f32.mrf.mxu1  ;;  %12443 = vst [vmem:[#allocation46_spill] sm:$0xff] %v7283_v34  ;;  %v7285_v29 = vpop.permute.xlu2 %1289 }
  0xef   :  { %v362_v24 = vadd.f32 %v361_v2, %v248_v48  ;;  %12444 = vst [vmem:[#allocation47_spill] sm:$0xff] %v7285_v29  ;;  %v592_v48 = vld [vmem:[%s12159_s3 + $0x8] sm:$0xff] }
  0xf0   :  { %295 = vmatmul.f32.gmra.mxu0 %v190_v53  ;;  %704 = vmatpush.msrb.mxu1 %v592_v48 }
  0xf1   :  { %408 = vmatmul.f32.gmra.mxu1 %v191_v55  ;;  %1478 = vperm.xlu2 %6053, %v6836_v12   ;;  %v193_v55 = vld [vmem:[%s12158_s2 + $0x1a8] sm:$0xff] }
  0xf2   :  { %1486 = vperm.xlu1 %6055, %v6831_v8   ;;  %480 = vrot.lane.b32.xlu0 %v362_v24, %s6440_s23 }
  0xf3   :  { %6034 = vmatpush.msra.mxu2 %v592_v48  ;;  %313 = vmatmul.f32.gmra.mxu3 %v202_v25  ;;  %v7311_v48 = vpop.permute.xlu0 %1305 }
  0xf4   :  { %12448 = vst [vmem:[#allocation51_spill] sm:$0xff] %v7311_v48  ;;  %v197_v48 = vld [vmem:[%s12158_s2 + $0x1c8] sm:$0xff] }
  0xf5   :  { %v251_v53 = vpop.f32.mrf.mxu0  ;;  %v7301_v34 = vpop.permute.xlu1 %1273 }
  0xf6   :  { %v364_v2 = vpop.f32.mrf.mxu1  ;;  %12446 = vst [vmem:[#allocation49_spill] sm:$0xff] %v7301_v34  ;;  %v7303_v24 = vpop.permute.xlu2 %1301 }
  0xf7   :  { %v365_v29 = vadd.f32 %v364_v2, %v251_v53  ;;  %12447 = vst [vmem:[#allocation50_spill] sm:$0xff] %v7303_v24  ;;  %v195_v2 = vld [vmem:[%s12158_s2 + $0x1b8] sm:$0xff] }
  0xf9   :  { %411 = vmatmul.f32.gmra.mxu1 %v193_v55  ;;  %1490 = vperm.xlu2 %6053, %v6888_v36  }
  0xfa   :  { %482 = vrot.lane.b32.xlu1 %v365_v29, %s6440_s23  ;;  %1506 = vperm.xlu0 %6054, %v6921_v56  }
  0xfb   :  { %v7326_v10 = vpop.permute.xlu0 %1317 }
  0xfc   :  { %12451 = vst [vmem:[#allocation54_spill] sm:$0xff] %v7326_v10 }
  0xfd   :  { %v254_v58 = vpop.f32.mrf.mxu0  ;;  %v7316_v24 = vpop.permute.xlu1 %1285 }
  0xfe   :  { %v367_v53 = vpop.f32.mrf.mxu1  ;;  %12449 = vst [vmem:[#allocation52_spill] sm:$0xff] %v7316_v24  ;;  %v7318_v34 = vpop.permute.xlu2 %1313 }
  0xff   :  { %v368_v55 = vadd.f32 %v367_v53, %v254_v58  ;;  %12450 = vst [vmem:[#allocation53_spill] sm:$0xff] %v7318_v34 }
 0x101   :  { %414 = vmatmul.f32.gmra.mxu1 %v195_v2  ;;  %484 = vrot.lane.b32.xlu2 %v368_v55, %s6440_s23  ;;  %v591_v2 = vld [vmem:[%s12159_s3] sm:$0xff] }
 0x102   :  { %1498 = vperm.xlu1 %6055, %v6883_v6   ;;  %1518 = vperm.xlu0 %6054, %v6947_v14  }
 0x103   :  { %705 = vmatpush.msrb.mxu1 %v591_v2  ;;  %6035 = vmatpush.msra.mxu2 %v591_v2  ;;  %v201_v2 = vld [vmem:[%s12158_s2 + $0x1e8] sm:$0xff] }
 0x105   :  { %v257_v29 = vpop.f32.mrf.mxu0  ;;  %v7328_v53 = vpop.permute.xlu1 %1297 }
 0x106   :  { %v370_v25 = vpop.f32.mrf.mxu1  ;;  %12452 = vst [vmem:[#allocation55_spill] sm:$0xff] %v7328_v53  ;;  %v7333_v34 = vpop.permute.xlu2 %1325 }
 0x107   :  { %v371_v58 = vadd.f32 %v370_v25, %v257_v29  ;;  %12453 = vst [vmem:[#allocation56_spill] sm:$0xff] %v7333_v34  ;;  %v199_v29 = vld [vmem:[%s12158_s2 + $0x1d8] sm:$0xff]  ;;  %v7345_v34 = vpop.permute.xlu0 %1329 }
 0x108   :  { %12456 = vst [vmem:[#allocation59_spill] sm:$0xff] %v7345_v34  ;;  %v203_v34 = vld [vmem:[%s12158_s2 + $0x1f8] sm:$0xff] }
 0x109   :  { %417 = vmatmul.f32.gmra.mxu1 %v197_v48  ;;  %1502 = vperm.xlu2 %6053, %v6915_v49  }
 0x10a   :  { %1510 = vperm.xlu1 %6055, %v6910_v46   ;;  %486 = vrot.lane.b32.xlu0 %v371_v58, %s6440_s23 }
 0x10d   :  { %v260_v55 = vpop.f32.mrf.mxu0  ;;  %v7341_v53 = vpop.permute.xlu1 %1309 }
 0x10e   :  { %v373_v24 = vpop.f32.mrf.mxu1  ;;  %12454 = vst [vmem:[#allocation57_spill] sm:$0xff] %v7341_v53 }
 0x10f   :  { %v374_v25 = vadd.f32 %v373_v24, %v260_v55  ;;  %v7343_v10 = vpop.permute.xlu2 %1434  ;;  %v7353_v55 = vpop.permute.xlu0 %1438 }
 0x110   :  { %12455 = vst [vmem:[#allocation58_spill] sm:$0xff] %v7343_v10 }
 0x111   :  { %420 = vmatmul.f32.gmra.mxu1 %v199_v29  ;;  %1514 = vperm.xlu2 %6053, %v6942_v3   ;;  %12457 = vst [vmem:[#allocation60_spill] sm:$0xff] %v7353_v55 }
 0x112   :  { %488 = vrot.lane.b32.xlu1 %v374_v25, %s6440_s23  ;;  %1530 = vperm.xlu0 %6054, %v6971_v45  }
 0x115   :  { %v263_v48 = vpop.f32.mrf.mxu0  ;;  %v7355_v53 = vpop.permute.xlu1 %1321 }
 0x116   :  { %v376_v58 = vpop.f32.mrf.mxu1  ;;  %12458 = vst [vmem:[#allocation61_spill] sm:$0xff] %v7355_v53 }
 0x117   :  { %v377_v24 = vadd.f32 %v376_v58, %v263_v48  ;;  %v7359_v29 = vpop.permute.xlu2 %1446 }
 0x118   :  { %12459 = vst [vmem:[#allocation62_spill] sm:$0xff] %v7359_v29 }
 0x119   :  { %423 = vmatmul.f32.gmra.mxu1 %v201_v2  ;;  %490 = vrot.lane.b32.xlu2 %v377_v24, %s6440_s23 }
 0x11a   :  { %1522 = vperm.xlu1 %6055, %v6937_v63   ;;  %1542 = vperm.xlu0 %6054, %v6995_v0  }
 0x11b   :  { %v463_v58 = vpop.permute.xlu0 %462 }
 0x11c   :  { %v559_v54 = vsel %vm558_vm0, %v6862_v5, %v463_v58  ;;  %v12186_v5 = vmov 4  }
 0x11d   :  { %v266_v25 = vpop.f32.mrf.mxu0  ;;  %v7368_v2 = vpop.permute.xlu1 %1333 }
 0x11e   :  { %v379_v10 = vpop.f32.mrf.mxu1  ;;  %12460 = vst [vmem:[#allocation63_spill] sm:$0xff] %v7368_v2 }
 0x11f   :  { %v380_v48 = vadd.f32 %v379_v10, %v266_v25 }
 0x121   :  { %426 = vmatmul.f32.gmra.mxu1 %v203_v34  ;;  %1526 = vperm.xlu2 %6053, %v6966_v42  }
 0x122   :  { %1534 = vperm.xlu1 %6055, %v6961_v35   ;;  %492 = vrot.lane.b32.xlu0 %v380_v48, %s6440_s23 }
 0x123   :  { %v471_v24 = vpop.permute.xlu2 %470  ;;  %v465_v34 = vpop.permute.xlu0 %464 }
 0x125   :  { %v269_v53 = vpop.f32.mrf.mxu0 }
 0x126   :  { %v382_v29 = vpop.f32.mrf.mxu1 }
 0x127   :  { %v383_v55 = vadd.f32 %v382_v29, %v269_v53  ;;  %v560_v53 = vsel %vm558_vm0, %v6847_v18, %v465_v34 }
 0x129   :  { %5890 = vmatmul.msk.f32.vlgmr.msrb.gmra.mxu1 %vm593_vm1, %v559_v54  ;;  %1538 = vperm.xlu2 %6053, %v6990_v32  }
 0x12a   :  { %494 = vrot.lane.b32.xlu1 %v383_v55, %s6440_s23  ;;  %1554 = vperm.xlu0 %6054, %v7019_v28  }
 0x12b   :  { %v473_v25 = vpop.permute.xlu2 %472 }
 0x12c   :  { %v467_v10 = vpop.permute.xlu1 %466 }
 0x12d   :  { %v272_v48 = vpop.f32.mrf.mxu0 }
 0x12e   :  { %v385_v2 = vpop.f32.mrf.mxu1 }
 0x12f   :  { %v386_v26 = vadd.f32 %v385_v2, %v272_v48  ;;  %v561_v2 = vsel %vm558_vm0, %v6823_v7, %v467_v10  ;;  %v563_v48 = vsel %vm558_vm0, %v6798_v51, %v471_v24 }
 0x131   :  { %5891 = vmatmul.msk.f32.gmra.mxu1 %vm593_vm1, %v560_v53  ;;  %496 = vrot.lane.b32.xlu2 %v386_v26, %s6440_s23 }
 0x132   :  { %1546 = vperm.xlu1 %6055, %v6985_v15   ;;  %6057 = vset.pattern.permute.xlu0 %v12186_v5 }
 0x133   :  { %1663 = vperm.xlu0 %6057, %v6634_v43   ;;  %v7383_v55 = vpop.permute.xlu2 %1454  ;;  %v7393_v43 = vpop.permute.xlu0 %1458 }
 0x134   :  { %v469_v54 = vpop.permute.xlu1 %468  ;;  %12461 = vst [vmem:[#allocation64_spill] sm:$0xff] %v7383_v55 }
 0x135   :  { %v562_v29 = vsel %vm558_vm0, %v6805_v57, %v469_v54  ;;  %v275_v18 = vpop.f32.mrf.mxu0  ;;  %12462 = vst [vmem:[#allocation65_spill] sm:$0xff] %v7393_v43  ;;  %v7408_v54 = vld [vmem:[%s12155_s7] sm:$0xff] }
 0x136   :  { %5893 = vmatmul.msk.f32.vlgmr.msra.gmra.mxu2 %vm593_vm1, %v562_v29  ;;  %v388_v58 = vpop.f32.mrf.mxu1 }
 0x137   :  { %v389_v34 = vadd.f32 %v388_v58, %v275_v18  ;;  %v564_v18 = vsel %vm558_vm0, %v6775_v38, %v473_v25 }
 0x139   :  { %5892 = vmatmul.msk.f32.gmra.mxu1 %vm593_vm1, %v561_v2  ;;  %1550 = vperm.xlu2 %6053, %v7014_v22  }
 0x13a   :  { %1558 = vperm.xlu1 %6055, %v7009_v60  }
 0x13b   :  { %498 = vrot.lane.b32.xlu0 %v389_v34, %s6440_s23  ;;  %v7398_v57 = vpop.permute.xlu2 %1466  ;;  %v7415_v24 = vpop.permute.xlu0 %1470 }
 0x13c   :  { %v7396_v26 = vpop.permute.xlu1 %1442  ;;  %12464 = vst [vmem:[#allocation67_spill] sm:$0xff] %v7398_v57 }
 0x13d   :  { %12463 = vst [vmem:[#allocation66_spill] sm:$0xff] %v7396_v26  ;;  %v278_v7 = vpop.f32.mrf.mxu0 }
 0x13e   :  { %5894 = vmatmul.msk.f32.gmra.mxu2 %vm593_vm1, %v563_v48  ;;  %v391_v10 = vpop.f32.mrf.mxu1  ;;  %12466 = vst [vmem:[#allocation69_spill] sm:$0xff] %v7415_v24  ;;  %v7423_v48 = vld [vmem:[%s12155_s7 + $0x10] sm:$0xff] }
 0x13f   :  { %v392_v53 = vadd.f32 %v391_v10, %v278_v7 }
 0x141   :  { %6056 = vset.pattern.permute.xlu2 %v12186_v5 }
 0x142   :  { %500 = vrot.lane.b32.xlu1 %v392_v53, %s6440_s23  ;;  %1659 = vperm.xlu2 %6056, %v7408_v54  }
 0x143   :  { %6058 = vset.pattern.permute.xlu1 %v12186_v5  ;;  %1683 = vperm.xlu0 %6057, %v6703_v4   ;;  %v479_v29 = vpop.permute.xlu2 %478  ;;  %v7459_v5 = vld [vmem:[%s12155_s7 + $0x28] sm:$0xff] }
 0x144   :  { %v7413_v51 = vpop.permute.xlu1 %1450 }
 0x145   :  { %12465 = vst [vmem:[#allocation68_spill] sm:$0xff] %v7413_v51  ;;  %v281_v58 = vpop.f32.mrf.mxu0 }
 0x146   :  { %5895 = vmatmul.msk.f32.gmra.mxu2 %vm593_vm1, %v564_v18  ;;  %v394_v2 = vpop.f32.mrf.mxu1 }
 0x147   :  { %v395_v34 = vadd.f32 %v394_v2, %v281_v58  ;;  %v7438_v58 = vld [vmem:[%s12155_s7 + $0x20] sm:$0xff]  ;;  %v7444_v2 = vld [vmem:[%s12155_s7 + $0x18] sm:$0xff] }
 0x14a   :  { %1667 = vperm.xlu1 %6058, %v7423_v48   ;;  %502 = vrot.lane.b32.xlu2 %v395_v34, %s6440_s23 }
 0x14b   :  { %v7429_v10 = vpop.permute.xlu2 %1478 }
 0x14c   :  { %v7427_v4 = vpop.permute.xlu1 %1462  ;;  %v475_v7 = vpop.permute.xlu0 %474  ;;  %12468 = vst [vmem:[#allocation71_spill] sm:$0xff] %v7429_v10 }
 0x14d   :  { %12467 = vst [vmem:[#allocation70_spill] sm:$0xff] %v7427_v4  ;;  %v565_v38 = vsel %vm558_vm0, %v6741_v20, %v475_v7  ;;  %v284_v25 = vpop.f32.mrf.mxu0 }
 0x14e   :  { %v397_v53 = vpop.f32.mrf.mxu1  ;;  %5896 = vmatmul.msk.f32.gmra.mxu2 %vm593_vm1, %v565_v38 }
 0x14f   :  { %v398_v18 = vadd.f32 %v397_v53, %v284_v25 }
 0x151   :  { %504 = vrot.lane.b32.xlu0 %v398_v18, %s6440_s23 }
 0x152   :  { %1675 = vperm.xlu1 %6058, %v7438_v58   ;;  %1671 = vperm.xlu2 %6056, %v7444_v2  }
 0x153   :  { %v7449_v7 = vpop.permute.xlu2 %1490 }
 0x154   :  { %v477_v20 = vpop.permute.xlu1 %476  ;;  %v7447_v34 = vpop.permute.xlu0 %1482  ;;  %12470 = vst [vmem:[#allocation73_spill] sm:$0xff] %v7449_v7 }
 0x155   :  { %12469 = vst [vmem:[#allocation72_spill] sm:$0xff] %v7447_v34  ;;  %v566_v38 = vsel %vm558_vm0, %v6731_v16, %v477_v20  ;;  %v287_v25 = vpop.f32.mrf.mxu0  ;;  %v567_v20 = vsel %vm558_vm0, %v6714_v9, %v479_v29 }
 0x156   :  { %v400_v53 = vpop.f32.mrf.mxu1  ;;  %5897 = vmatmul.msk.f32.gmra.mxu2 %vm593_vm1, %v566_v38 }
 0x157   :  { %v401_v18 = vadd.f32 %v400_v53, %v287_v25  ;;  %v7473_v53 = vld [vmem:[%s12155_s7 + $0x38] sm:$0xff] }
 0x159   :  { %1695 = vperm.xlu0 %6057, %v6784_v44  }
 0x15a   :  { %506 = vrot.lane.b32.xlu1 %v401_v18, %s6440_s23  ;;  %1679 = vperm.xlu2 %6056, %v7459_v5  }
 0x15b   :  { %v485_v16 = vpop.permute.xlu2 %484 }
 0x15c   :  { %v7462_v7 = vpop.permute.xlu1 %1474  ;;  %v7464_v34 = vpop.permute.xlu0 %1494 }
 0x15d   :  { %12471 = vst [vmem:[#allocation74_spill] sm:$0xff] %v7462_v7  ;;  %v290_v38 = vpop.f32.mrf.mxu0 }
 0x15e   :  { %12472 = vst [vmem:[#allocation75_spill] sm:$0xff] %v7464_v34  ;;  %v403_v25 = vpop.f32.mrf.mxu1  ;;  %5898 = vmatmul.msk.f32.gmra.mxu2 %vm593_vm1, %v567_v20 }
 0x15f   :  { %v404_v44 = vadd.f32 %v403_v25, %v290_v38  ;;  %v7488_v25 = vld [vmem:[%s12155_s7 + $0x50] sm:$0xff] }
 0x161   :  { %1707 = vperm.xlu0 %6057, %v6855_v23  }
 0x162   :  { %1687 = vperm.xlu1 %6058, %v7473_v53   ;;  %508 = vrot.lane.b32.xlu2 %v404_v44, %s6440_s23  ;;  %v299_v44 = vpop.f32.mrf.mxu3 }
 0x163   :  { %v7479_v9 = vpop.permute.xlu2 %1502 }
 0x164   :  { %v7477_v18 = vpop.permute.xlu1 %1486  ;;  %v481_v34 = vpop.permute.xlu0 %480  ;;  %12474 = vst [vmem:[#allocation77_spill] sm:$0xff] %v7479_v9  ;;  %v7494_v9 = vld [vmem:[%s12155_s7 + $0x40] sm:$0xff] }
 0x165   :  { %12473 = vst [vmem:[#allocation76_spill] sm:$0xff] %v7477_v18  ;;  %v568_v29 = vsel %vm558_vm0, %v6684_v59, %v481_v34  ;;  %v293_v20 = vpop.f32.mrf.mxu0 }
 0x166   :  { %v406_v38 = vpop.f32.mrf.mxu1  ;;  %5899 = vmatmul.msk.f32.gmra.mxu2 %vm593_vm1, %v568_v29 }
 0x167   :  { %v407_v23 = vadd.f32 %v406_v38, %v293_v20 }
 0x169   :  { %510 = vrot.lane.b32.xlu0 %v407_v23, %s6440_s23 }
 0x16a   :  { %1699 = vperm.xlu1 %6058, %v7488_v25   ;;  %1691 = vperm.xlu2 %6056, %v7494_v9   ;;  %v302_v7 = vpop.f32.mrf.mxu3 }
 0x16b   :  { %v7499_v29 = vpop.permute.xlu2 %1514 }
 0x16c   :  { %v483_v59 = vpop.permute.xlu1 %482  ;;  %v7497_v34 = vpop.permute.xlu0 %1506  ;;  %12476 = vst [vmem:[#allocation79_spill] sm:$0xff] %v7499_v29 }
 0x16d   :  { %12475 = vst [vmem:[#allocation78_spill] sm:$0xff] %v7497_v34  ;;  %v569_v20 = vsel %vm558_vm0, %v6654_v50, %v483_v59  ;;  %v296_v38 = vpop.f32.mrf.mxu0  ;;  %v570_v50 = vsel %vm558_vm0, %v6647_v47, %v485_v16 }
 0x16e   :  { %v409_v23 = vpop.f32.mrf.mxu1  ;;  %5900 = vmatmul.msk.f32.gmra.mxu2 %vm593_vm1, %v569_v20 }
 0x16f   :  { %v410_v18 = vadd.f32 %v409_v23, %v296_v38 }
 0x171   :  { %1719 = vperm.xlu0 %6057, %v6893_v37  }
 0x172   :  { %512 = vrot.lane.b32.xlu1 %v410_v18, %s6440_s23  ;;  %1703 = vperm.xlu2 %6056, %v6836_v12   ;;  %v305_v47 = vpop.f32.mrf.mxu3 }
 0x173   :  { %v491_v29 = vpop.permute.xlu2 %490 }
 0x174   :  { %v7507_v10 = vpop.permute.xlu1 %1498  ;;  %v7509_v34 = vpop.permute.xlu0 %1518 }
 0x175   :  { %12477 = vst [vmem:[#allocation80_spill] sm:$0xff] %v7507_v10  ;;  %v7755_v10 = vld [vmem:[%s12155_s7 + $0x98] sm:$0xff] }
 0x176   :  { %12478 = vst [vmem:[#allocation81_spill] sm:$0xff] %v7509_v34  ;;  %v412_v59 = vpop.f32.mrf.mxu1  ;;  %5901 = vmatmul.msk.f32.gmra.mxu2 %vm593_vm1, %v570_v50  ;;  %v12512_v34 = vld [vmem:[#allocation8_spill] sm:$0xff] }
 0x177   :  { %v413_v20 = vadd.f32 %v412_v59, %v299_v44 }
 0x179   :  { %1731 = vperm.xlu0 %6057, %v6921_v56  }
 0x17a   :  { %1711 = vperm.xlu1 %6058, %v6831_v8   ;;  %514 = vrot.lane.b32.xlu2 %v413_v20, %s6440_s23  ;;  %v308_v20 = vpop.f32.mrf.mxu3 }
 0x17b   :  { %v7519_v18 = vpop.permute.xlu2 %1526 }
 0x17c   :  { %v7517_v12 = vpop.permute.xlu1 %1510  ;;  %v487_v37 = vpop.permute.xlu0 %486  ;;  %12480 = vst [vmem:[#allocation83_spill] sm:$0xff] %v7519_v18  ;;  %v7728_v18 = vld [vmem:[%s12155_s7 + $0x80] sm:$0xff] }
 0x17d   :  { %12479 = vst [vmem:[#allocation82_spill] sm:$0xff] %v7517_v12  ;;  %v571_v38 = vsel %vm558_vm0, %v6625_v40, %v487_v37  ;;  %v573_v37 = vsel %vm558_vm0, %v6589_v27, %v491_v29 }
 0x17e   :  { %v415_v23 = vpop.f32.mrf.mxu1  ;;  %5902 = vmatmul.msk.f32.gmra.mxu2 %vm593_vm1, %v571_v38 }
 0x17f   :  { %v416_v16 = vadd.f32 %v415_v23, %v302_v7 }
 0x181   :  { %516 = vrot.lane.b32.xlu0 %v416_v16, %s6440_s23 }
 0x182   :  { %1723 = vperm.xlu1 %6058, %v6883_v6   ;;  %1715 = vperm.xlu2 %6056, %v6888_v36  }
 0x183   :  { %v7529_v44 = vpop.permute.xlu2 %1538 }
 0x184   :  { %v489_v8 = vpop.permute.xlu1 %488  ;;  %v7527_v56 = vpop.permute.xlu0 %1530  ;;  %12482 = vst [vmem:[#allocation85_spill] sm:$0xff] %v7529_v44 }
 0x185   :  { %12481 = vst [vmem:[#allocation84_spill] sm:$0xff] %v7527_v56  ;;  %v572_v50 = vsel %vm558_vm0, %v6605_v33, %v489_v8  ;;  %v7722_v56 = vld [vmem:[%s12155_s7 + $0xc0] sm:$0xff] }
 0x186   :  { %v418_v40 = vpop.f32.mrf.mxu1  ;;  %5903 = vmatmul.msk.f32.gmra.mxu2 %vm593_vm1, %v572_v50 }
 0x187   :  { %v419_v59 = vadd.f32 %v418_v40, %v305_v47 }
 0x189   :  { %1743 = vperm.xlu0 %6057, %v6947_v14   ;;  %v311_v14 = vpop.f32.mrf.mxu3 }
 0x18a   :  { %518 = vrot.lane.b32.xlu1 %v419_v59, %s6440_s23  ;;  %1727 = vperm.xlu2 %6056, %v6915_v49  }
 0x18b   :  { %v497_v7 = vpop.permute.xlu2 %496 }
 0x18c   :  { %v7537_v6 = vpop.permute.xlu1 %1522  ;;  %v7539_v36 = vpop.permute.xlu0 %1542 }
 0x18d   :  { %12483 = vst [vmem:[#allocation86_spill] sm:$0xff] %v7537_v6 }
 0x18e   :  { %12484 = vst [vmem:[#allocation87_spill] sm:$0xff] %v7539_v36  ;;  %v421_v33 = vpop.f32.mrf.mxu1  ;;  %5904 = vmatmul.msk.f32.gmra.mxu2 %vm593_vm1, %v573_v37  ;;  %v576_v37 = vsel %vm558_vm0, %v6850_v19, %v497_v7  ;;  %v12509_v36 = vld [vmem:[#allocation9_spill] sm:$0xff] }
 0x18f   :  { %v422_v38 = vadd.f32 %v421_v33, %v308_v20 }
 0x191   :  { %1755 = vperm.xlu0 %6057, %v6971_v45   ;;  %v314_v45 = vpop.f32.mrf.mxu3 }
 0x192   :  { %1735 = vperm.xlu1 %6058, %v6910_v46   ;;  %520 = vrot.lane.b32.xlu2 %v422_v38, %s6440_s23  ;;  %v12188_v38 = vmov 5  }
 0x193   :  { %v7549_v47 = vpop.permute.xlu2 %1550 }
 0x194   :  { %v7547_v49 = vpop.permute.xlu1 %1534  ;;  %v493_v23 = vpop.permute.xlu0 %492  ;;  %12486 = vst [vmem:[#allocation89_spill] sm:$0xff] %v7549_v47  ;;  %v7701_v47 = vld [vmem:[%s12155_s7 + $0x68] sm:$0xff] }
 0x195   :  { %12485 = vst [vmem:[#allocation88_spill] sm:$0xff] %v7547_v49  ;;  %v574_v16 = vsel %vm558_vm0, %v6567_v21, %v493_v23  ;;  %v7622_v23 = vld [vmem:[%s12155_s7 + $0x48] sm:$0xff] }
 0x196   :  { %v424_v27 = vpop.f32.mrf.mxu1  ;;  %5905 = vmatmul.msk.f32.gmra.mxu2 %vm593_vm1, %v574_v16 }
 0x197   :  { %v425_v29 = vadd.f32 %v424_v27, %v311_v14 }
 0x199   :  { %522 = vrot.lane.b32.xlu0 %v425_v29, %s6440_s23 }
 0x19a   :  { %1747 = vperm.xlu1 %6058, %v6937_v63   ;;  %1739 = vperm.xlu2 %6056, %v6942_v3  }
 0x19c   :  { %v495_v46 = vpop.permute.xlu1 %494  ;;  %v7557_v8 = vpop.permute.xlu0 %1554 }
 0x19d   :  { %12487 = vst [vmem:[#allocation90_spill] sm:$0xff] %v7557_v8  ;;  %v7559_v50 = vpop.permute.xlu2 %1659  ;;  %v575_v40 = vsel %vm558_vm0, %v6865_v31, %v495_v46  ;;  %v7695_v8 = vld [vmem:[%s12155_s7 + $0xa8] sm:$0xff] }
 0x19e   :  { %12488 = vst [vmem:[#allocation91_spill] sm:$0xff] %v7559_v50  ;;  %v427_v21 = vpop.f32.mrf.mxu1  ;;  %5906 = vmatmul.msk.f32.gmra.mxu2 %vm593_vm1, %v575_v40 }
 0x19f   :  { %v428_v59 = vadd.f32 %v427_v21, %v314_v45  ;;  %v7639_v45 = vld [vmem:[%s12155_s7 + $0x60] sm:$0xff] }
 0x1a1   :  { %1767 = vperm.xlu0 %6057, %v6995_v0  }
 0x1a2   :  { %524 = vrot.lane.b32.xlu1 %v428_v59, %s6440_s23  ;;  %1751 = vperm.xlu2 %6056, %v6966_v42   ;;  %s6444_s23 = smov 64  }
 0x1a4   :  { %v7567_v63 = vpop.permute.xlu1 %1546 }
 0x1a5   :  { %12489 = vst [vmem:[#allocation92_spill] sm:$0xff] %v7567_v63  ;;  %v503_v3 = vpop.permute.xlu2 %502  ;;  %v7569_v20 = vpop.permute.xlu0 %1663 }
 0x1a6   :  { %12490 = vst [vmem:[#allocation93_spill] sm:$0xff] %v7569_v20  ;;  %5907 = vmatmul.msk.f32.gmra.mxu2 %vm593_vm1, %v576_v37  ;;  %v579_v14 = vsel %vm558_vm0, %v6801_v52, %v503_v3  ;;  %v2802_v20 = vld [vmem:[%s12160_s4 + $0x1a8] sm:$0xff] }
 0x1a9   :  { %1779 = vperm.xlu0 %6057, %v7019_v28   ;;  %v7589_v28 = vld [vmem:[%s12155_s7 + $0x8] sm:$0xff] }
 0x1aa   :  { %1759 = vperm.xlu1 %6058, %v6961_v35   ;;  %1763 = vperm.xlu2 %6056, %v6990_v32  }
 0x1ac   :  { %v7577_v0 = vpop.permute.xlu1 %1558 }
 0x1ad   :  { %12491 = vst [vmem:[#allocation94_spill] sm:$0xff] %v7577_v0  ;;  %v7579_v31 = vpop.permute.xlu2 %1671  ;;  %v499_v42 = vpop.permute.xlu0 %498 }
 0x1ae   :  { %12492 = vst [vmem:[#allocation95_spill] sm:$0xff] %v7579_v31  ;;  %v577_v33 = vsel %vm558_vm0, %v6839_v13, %v499_v42  ;;  %v7656_v42 = vld [vmem:[%s12155_s7 + $0x78] sm:$0xff]  ;;  %v2795_v31 = vld [vmem:[%s12160_s4 + $0x170] sm:$0xff] }
 0x1af   :  { %5908 = vmatmul.msk.f32.gmra.mxu2 %vm593_vm1, %v577_v33 }
 0x1b1   :  { %6060 = vset.pattern.permute.xlu0 %v12188_v38 }
 0x1b2   :  { %1771 = vperm.xlu1 %6058, %v6985_v15   ;;  %1888 = vperm.xlu0 %6060, %v7589_v28   ;;  %v7604_v15 = vld [vmem:[%s12155_s7 + $0x30] sm:$0xff] }
 0x1b3   :  { %1775 = vperm.xlu2 %6056, %v7014_v22  }
 0x1b4   :  { %v501_v19 = vpop.permute.xlu1 %500 }
 0x1b5   :  { %v7593_v35 = vpop.permute.xlu2 %1679  ;;  %v578_v13 = vsel %vm558_vm0, %v6818_v62, %v501_v19  ;;  %v7607_v22 = vpop.permute.xlu0 %1683 }
 0x1b6   :  { %12493 = vst [vmem:[#allocation96_spill] sm:$0xff] %v7593_v35  ;;  %v7853_v35 = vld [vmem:[%s12155_s7 + $0xf8] sm:$0xff] }
 0x1b7   :  { %5909 = vmatmul.msk.f32.gmra.mxu2 %vm593_vm1, %v578_v13  ;;  %12494 = vst [vmem:[#allocation97_spill] sm:$0xff] %v7607_v22  ;;  %v2780_v22 = vld [vmem:[%s12160_s4 + $0xf8] sm:$0xff] }
 0x1b8   :  { %3017 = vmatpush.msrb.mxu2 %v2780_v22 }
 0x1b9   :  { %v7598_v32 = vpop.f32.mrf.mxu2 }
 0x1ba   :  { %1783 = vperm.xlu1 %6058, %v7009_v60   ;;  %1908 = vperm.xlu0 %6060, %v7604_v15  }
 0x1bb   :  { %6059 = vset.pattern.permute.xlu2 %v12188_v38 }
 0x1bc   :  { %v7610_v7 = vpop.permute.xlu1 %1667  ;;  %1884 = vperm.xlu2 %6059, %v7408_v54  }
 0x1bd   :  { %12495 = vst [vmem:[#allocation98_spill] sm:$0xff] %v7610_v7  ;;  %v509_v62 = vpop.permute.xlu2 %508 }
 0x1bf   :  { %5910 = vmatmul.msk.f32.gmra.mxu2 %vm593_vm1, %v579_v14  ;;  %v12503_v14 = vld [vmem:[#allocation11_spill] sm:$0xff] }
 0x1c1   :  { %v7616_v60 = vpop.f32.mrf.mxu2 }
 0x1c2   :  { %6061 = vset.pattern.permute.xlu1 %v12188_v38  ;;  %1920 = vperm.xlu0 %6060, %v7622_v23  }
 0x1c3   :  { %1892 = vperm.xlu1 %6061, %v7423_v48   ;;  %v505_v16 = vpop.permute.xlu0 %504 }
 0x1c4   :  { %v7626_v27 = vpop.permute.xlu1 %1675  ;;  %1896 = vperm.xlu2 %6059, %v7444_v2   ;;  %v580_v29 = vsel %vm558_vm0, %v6778_v39, %v505_v16  ;;  %v12500_v39 = vld [vmem:[#allocation12_spill] sm:$0xff]  ;;  %v582_v16 = vsel %vm558_vm0, %v12503_v14, %v509_v62  ;;  %v7682_v62 = vld [vmem:[%s12155_s7 + $0x58] sm:$0xff] }
 0x1c5   :  { %12496 = vst [vmem:[#allocation99_spill] sm:$0xff] %v7626_v27  ;;  %v7629_v52 = vpop.permute.xlu2 %1691 }
 0x1c6   :  { %12497 = vst [vmem:[#allocation100_spill] sm:$0xff] %v7629_v52  ;;  %v12190_v52 = vmov 6  }
 0x1c7   :  { %5911 = vmatmul.msk.f32.gmra.mxu2 %vm593_vm1, %v580_v29 }
 0x1c9   :  { %v7634_v46 = vpop.f32.mrf.mxu2 }
 0x1ca   :  { %1932 = vperm.xlu0 %6060, %v7639_v45  }
 0x1cb   :  { %1900 = vperm.xlu1 %6061, %v7438_v58   ;;  %v7643_v40 = vpop.permute.xlu0 %1695 }
 0x1cc   :  { %12498 = vst [vmem:[#allocation101_spill] sm:$0xff] %v7643_v40  ;;  %v507_v21 = vpop.permute.xlu1 %506  ;;  %1904 = vperm.xlu2 %6059, %v7459_v5  }
 0x1cd   :  { %v7646_v59 = vpop.permute.xlu2 %1703  ;;  %v581_v3 = vsel %vm558_vm0, %v12500_v39, %v507_v21  ;;  %v7673_v21 = vld [vmem:[%s12155_s7 + $0x90] sm:$0xff] }
 0x1ce   :  { %12499 = vst [vmem:[#allocation102_spill] sm:$0xff] %v7646_v59  ;;  %v7776_v59 = vld [vmem:[%s12155_s7 + $0xf0] sm:$0xff] }
 0x1cf   :  { %5912 = vmatmul.msk.f32.gmra.mxu2 %vm593_vm1, %v581_v3 }
 0x1d1   :  { %v7651_v37 = vpop.f32.mrf.mxu2 }
 0x1d2   :  { %1944 = vperm.xlu0 %6060, %v7656_v42  }
 0x1d3   :  { %1912 = vperm.xlu1 %6061, %v7473_v53   ;;  %v7660_v33 = vpop.permute.xlu0 %1707 }
 0x1d4   :  { %12501 = vst [vmem:[#allocation12_spill] sm:$0xff] %v7660_v33  ;;  %v7662_v19 = vpop.permute.xlu1 %1687  ;;  %1916 = vperm.xlu2 %6059, %v7494_v9  }
 0x1d5   :  { %12502 = vst [vmem:[#allocation103_spill] sm:$0xff] %v7662_v19  ;;  %v515_v13 = vpop.permute.xlu2 %514 }
 0x1d6   :  { %v585_v12 = vsel %vm558_vm0, %v12512_v34, %v515_v13  ;;  %v7761_v34 = vld [vmem:[%s12155_s7 + $0xa0] sm:$0xff] }
 0x1d7   :  { %5913 = vmatmul.msk.f32.gmra.mxu2 %vm593_vm1, %v582_v16  ;;  %v12506_v16 = vld [vmem:[#allocation10_spill] sm:$0xff]  ;;  %v12514_v13 = vld [vmem:[#allocation7_spill] sm:$0xff] }
 0x1d9   :  { %v7668_v29 = vpop.f32.mrf.mxu2 }
 0x1da   :  { %1956 = vperm.xlu0 %6060, %v7673_v21  }
 0x1db   :  { %1924 = vperm.xlu1 %6061, %v7488_v25   ;;  %v511_v39 = vpop.permute.xlu0 %510 }
 0x1dc   :  { %v7677_v3 = vpop.permute.xlu1 %1699  ;;  %1928 = vperm.xlu2 %6059, %v7682_v62   ;;  %v583_v38 = vsel %vm558_vm0, %v12506_v16, %v511_v39 }
 0x1dd   :  { %12504 = vst [vmem:[#allocation11_spill] sm:$0xff] %v7677_v3  ;;  %v7685_v14 = vpop.permute.xlu2 %1715 }
 0x1de   :  { %12505 = vst [vmem:[#allocation104_spill] sm:$0xff] %v7685_v14 }
 0x1df   :  { %5914 = vmatmul.msk.f32.gmra.mxu2 %vm593_vm1, %v583_v38  ;;  %v7709_v38 = vld [vmem:[%s12155_s7 + $0x70] sm:$0xff] }
 0x1e1   :  { %v7690_v0 = vpop.f32.mrf.mxu2 }
 0x1e2   :  { %1968 = vperm.xlu0 %6060, %v7695_v8  }
 0x1e3   :  { %1936 = vperm.xlu1 %6061, %v7701_v47   ;;  %v7704_v63 = vpop.permute.xlu0 %1719 }
 0x1e4   :  { %12507 = vst [vmem:[#allocation10_spill] sm:$0xff] %v7704_v63  ;;  %1940 = vperm.xlu2 %6059, %v7709_v38   ;;  %v513_v39 = vpop.permute.xlu1 %512 }
 0x1e5   :  { %v7712_v16 = vpop.permute.xlu2 %1727  ;;  %v584_v44 = vsel %vm558_vm0, %v12509_v36, %v513_v39 }
 0x1e6   :  { %12508 = vst [vmem:[#allocation105_spill] sm:$0xff] %v7712_v16 }
 0x1e7   :  { %5915 = vmatmul.msk.f32.gmra.mxu2 %vm593_vm1, %v584_v44  ;;  %v7736_v44 = vld [vmem:[%s12155_s7 + $0x88] sm:$0xff] }
 0x1e9   :  { %v7717_v49 = vpop.f32.mrf.mxu2 }
 0x1ea   :  { %1980 = vperm.xlu0 %6060, %v7722_v56  }
 0x1eb   :  { %1948 = vperm.xlu1 %6061, %v7728_v18   ;;  %v7731_v6 = vpop.permute.xlu0 %1731 }
 0x1ec   :  { %12510 = vst [vmem:[#allocation9_spill] sm:$0xff] %v7731_v6  ;;  %1952 = vperm.xlu2 %6059, %v7736_v44   ;;  %v7739_v36 = vpop.permute.xlu1 %1711  ;;  %v7749_v6 = vld [vmem:[%s12155_s7 + $0xd8] sm:$0xff] }
 0x1ed   :  { %12511 = vst [vmem:[#allocation106_spill] sm:$0xff] %v7739_v36  ;;  %v521_v39 = vpop.permute.xlu2 %520 }
 0x1ef   :  { %5916 = vmatmul.msk.f32.gmra.mxu2 %vm593_vm1, %v585_v12 }
 0x1f1   :  { %v7744_v16 = vpop.f32.mrf.mxu2 }
 0x1f2   :  { %1992 = vperm.xlu0 %6060, %v7749_v6  }
 0x1f3   :  { %1960 = vperm.xlu1 %6061, %v7755_v10   ;;  %v517_v63 = vpop.permute.xlu0 %516 }
 0x1f4   :  { %1964 = vperm.xlu2 %6059, %v7761_v34   ;;  %v7764_v12 = vpop.permute.xlu1 %1723  ;;  %v586_v14 = vsel %vm558_vm0, %v12514_v13, %v517_v63 }
 0x1f5   :  { %12513 = vst [vmem:[#allocation8_spill] sm:$0xff] %v7764_v12  ;;  %v7768_v36 = vpop.permute.xlu2 %1739  ;;  %v7782_v12 = vld [vmem:[%s12155_s7 + $0xb0] sm:$0xff] }
 0x1f6   :  { %12515 = vst [vmem:[#allocation7_spill] sm:$0xff] %v7768_v36  ;;  %v12517_v36 = vld [vmem:[#allocation6_spill] sm:$0xff] }
 0x1f7   :  { %5917 = vmatmul.msk.f32.gmra.mxu2 %vm593_vm1, %v586_v14  ;;  %v7790_v14 = vld [vmem:[%s12155_s7 + $0xb8] sm:$0xff] }
 0x1f9   :  { %v7771_v33 = vpop.f32.mrf.mxu2 }
 0x1fa   :  { %2004 = vperm.xlu0 %6060, %v7776_v59  }
 0x1fb   :  { %1972 = vperm.xlu1 %6061, %v7782_v12   ;;  %v7785_v63 = vpop.permute.xlu0 %1743 }
 0x1fc   :  { %12516 = vst [vmem:[#allocation107_spill] sm:$0xff] %v7785_v63  ;;  %1976 = vperm.xlu2 %6059, %v7790_v14   ;;  %v519_v13 = vpop.permute.xlu1 %518  ;;  %v7804_v63 = vld [vmem:[%s12155_s7 + $0xc8] sm:$0xff] }
 0x1fd   :  { %v587_v3 = vsel %vm558_vm0, %v12517_v36, %v519_v13  ;;  %v7795_v40 = vpop.permute.xlu2 %1751 }
 0x1fe   :  { %12518 = vst [vmem:[#allocation6_spill] sm:$0xff] %v7795_v40 }
 0x1ff   :  { %5918 = vmatmul.msk.f32.gmra.mxu2 %vm593_vm1, %v587_v3  ;;  %v7813_v3 = vld [vmem:[%s12155_s7 + $0xd0] sm:$0xff] }
 0x201   :  { %v7798_v24 = vpop.f32.mrf.mxu2 }
 0x202   :  { %6063 = vset.pattern.permute.xlu0 %v12190_v52  ;;  %v12522_v52 = vld [vmem:[#allocation5_spill] sm:$0xff] }
 0x203   :  { %1984 = vperm.xlu1 %6061, %v7804_v63   ;;  %2113 = vperm.xlu0 %6063, %v7589_v28   ;;  %v7808_v57 = vpop.permute.xlu0 %1755  ;;  %v588_v40 = vsel %vm558_vm0, %v12522_v52, %v521_v39 }
 0x204   :  { %12519 = vst [vmem:[#allocation108_spill] sm:$0xff] %v7808_v57  ;;  %1988 = vperm.xlu2 %6059, %v7813_v3   ;;  %v7816_v36 = vpop.permute.xlu1 %1735  ;;  %v7828_v57 = vld [vmem:[%s12155_s7 + $0xe0] sm:$0xff] }
 0x205   :  { %12520 = vst [vmem:[#allocation109_spill] sm:$0xff] %v7816_v36  ;;  %v7818_v13 = vpop.permute.xlu2 %1763 }
 0x206   :  { %12521 = vst [vmem:[#allocation110_spill] sm:$0xff] %v7818_v13  ;;  %v7835_v13 = vld [vmem:[%s12155_s7 + $0xe8] sm:$0xff] }
 0x207   :  { %5919 = vmatmul.msk.f32.gmra.mxu2 %vm593_vm1, %v588_v40  ;;  %v12524_v40 = vld [vmem:[#allocation4_spill] sm:$0xff] }
 0x209   :  { %v7823_v19 = vpop.f32.mrf.mxu2 }
 0x20b   :  { %1996 = vperm.xlu1 %6061, %v7828_v57   ;;  %2133 = vperm.xlu0 %6063, %v7604_v15   ;;  %v523_v4 = vpop.permute.xlu0 %522 }
 0x20c   :  { %2000 = vperm.xlu2 %6059, %v7835_v13   ;;  %v7838_v52 = vpop.permute.xlu1 %1747  ;;  %v589_v39 = vsel %vm558_vm0, %v12524_v40, %v523_v4  ;;  %v12527_v40 = vmov 6  }
 0x20d   :  { %12523 = vst [vmem:[#allocation5_spill] sm:$0xff] %v7838_v52  ;;  %v7842_v36 = vpop.permute.xlu2 %1775 }
 0x20e   :  { %12525 = vst [vmem:[#allocation4_spill] sm:$0xff] %v7842_v36  ;;  %v12528_v36 = vld [vmem:[#allocation3_spill] sm:$0xff] }
 0x20f   :  { %5920 = vmatmul.msk.f32.gmra.mxu2 %vm593_vm1, %v589_v39 }
 0x211   :  { %v7848_v43 = vpop.f32.mrf.mxu2 }
 0x213   :  { %2008 = vperm.xlu1 %6061, %v7853_v35   ;;  %2145 = vperm.xlu0 %6063, %v7622_v23   ;;  %v7857_v4 = vpop.permute.xlu0 %1767 }
 0x214   :  { %12526 = vst [vmem:[#allocation111_spill] sm:$0xff] %v7857_v4  ;;  %6062 = vset.pattern.permute.xlu2 %v12527_v40  ;;  %v525_v39 = vpop.permute.xlu1 %524 }
 0x215   :  { %v590_v52 = vsel %vm558_vm0, %v12528_v36, %v525_v39  ;;  %2109 = vperm.xlu2 %6062, %v7408_v54   ;;  %v2779_v54 = vld [vmem:[%s12160_s4 + $0xf0] sm:$0xff] }
 0x216   :  { %v7863_v22 = vpop.permute.xlu2 %1884  ;;  %3018 = vmatpush.msrb.mxu2 %v2779_v54 }
 0x217   :  { %5921 = vmatmul.msk.f32.gmra.mxu2 %vm593_vm1, %v590_v52 }
 0x219   :  { %v7866_v55 = vpop.f32.mrf.mxu2 }
 0x21b   :  { %6064 = vset.pattern.permute.xlu1 %v12527_v40  ;;  %2157 = vperm.xlu0 %6063, %v7639_v45   ;;  %v7870_v27 = vpop.permute.xlu0 %1779 }
 0x21c   :  { %12529 = vst [vmem:[#allocation3_spill] sm:$0xff] %v7870_v27  ;;  %2117 = vperm.xlu1 %6064, %v7423_v48   ;;  %v7873_v4 = vpop.permute.xlu1 %1759 }
 0x21d   :  { %12530 = vst [vmem:[#allocation112_spill] sm:$0xff] %v7873_v4  ;;  %2121 = vperm.xlu2 %6062, %v7444_v2  }
 0x21e   :  { %v7876_v36 = vpop.permute.xlu2 %1896 }
 0x221   :  { %v7881_v52 = vpop.f32.mrf.mxu2 }
 0x223   :  { %2169 = vperm.xlu0 %6063, %v7656_v42  }
 0x224   :  { %2125 = vperm.xlu1 %6064, %v7438_v58   ;;  %v7885_v39 = vpop.permute.xlu1 %1771  ;;  %v7887_v48 = vpop.permute.xlu0 %1888 }
 0x225   :  { %12531 = vst [vmem:[#allocation113_spill] sm:$0xff] %v7885_v39  ;;  %2129 = vperm.xlu2 %6062, %v7459_v5   ;;  %v2778_v5 = vld [vmem:[%s12160_s4 + $0xe8] sm:$0xff]  ;;  %v2796_v39 = vld [vmem:[%s12160_s4 + $0x178] sm:$0xff] }
 0x226   :  { %v7890_v2 = vpop.permute.xlu2 %1904  ;;  %3019 = vmatpush.msrb.mxu2 %v2778_v5  ;;  %3130 = vmatpush.msrb.mxu0 %v2796_v39 }
 0x228   :  { %3131 = vmatpush.msrb.mxu0 %v2795_v31 }
 0x229   :  { %v7892_v27 = vpop.f32.mrf.mxu2 }
 0x22b   :  { %2181 = vperm.xlu0 %6063, %v7673_v21  }
 0x22c   :  { %2137 = vperm.xlu1 %6064, %v7473_v53   ;;  %v7896_v40 = vpop.permute.xlu1 %1783  ;;  %v7898_v54 = vpop.permute.xlu0 %1908 }
 0x22d   :  { %12532 = vst [vmem:[#allocation114_spill] sm:$0xff] %v7896_v40  ;;  %2141 = vperm.xlu2 %6062, %v7494_v9  }
 0x22e   :  { %v7901_v58 = vpop.permute.xlu2 %1916 }
 0x232   :  { %v7909_v4 = vpop.f32.mrf.mxu2 }
 0x233   :  { %2193 = vperm.xlu0 %6063, %v7695_v8  }
 0x234   :  { %2149 = vperm.xlu1 %6064, %v7488_v25   ;;  %v7913_v53 = vpop.permute.xlu0 %1920  ;;  %v2777_v25 = vld [vmem:[%s12160_s4 + $0xe0] sm:$0xff] }
 0x235   :  { %2153 = vperm.xlu2 %6062, %v7682_v62   ;;  %v7916_v9 = vpop.permute.xlu1 %1892  ;;  %3020 = vmatpush.msrb.mxu2 %v2777_v25  ;;  %v2803_v25 = vld [vmem:[%s12160_s4 + $0x1b0] sm:$0xff] }
 0x236   :  { %v7918_v40 = vpop.permute.xlu2 %1928 }
 0x237   :  { %12533 = vst [vmem:[#allocation115_spill] sm:$0xff] %v7918_v40 }
 0x23a   :  { %v7920_v5 = vpop.f32.mrf.mxu2 }
 0x23b   :  { %2205 = vperm.xlu0 %6063, %v7722_v56  }
 0x23c   :  { %2161 = vperm.xlu1 %6064, %v7701_v47   ;;  %v7924_v39 = vpop.permute.xlu0 %1932  ;;  %v2804_v47 = vld [vmem:[%s12160_s4 + $0x1b8] sm:$0xff] }
 0x23d   :  { %12534 = vst [vmem:[#allocation116_spill] sm:$0xff] %v7924_v39  ;;  %2165 = vperm.xlu2 %6062, %v7709_v38   ;;  %v7930_v51 = vpop.permute.xlu1 %1900  ;;  %3251 = vmatpush.msra.mxu1 %v2804_v47 }
 0x23e   :  { %v7932_v62 = vpop.permute.xlu2 %1940 }
 0x23f   :  { %12535 = vst [vmem:[#allocation117_spill] sm:$0xff] %v7932_v62  ;;  %3252 = vmatpush.msra.mxu1 %v2803_v25  ;;  %v2798_v62 = vld [vmem:[%s12160_s4 + $0x188] sm:$0xff] }
 0x241   :  { %3253 = vmatpush.msra.mxu1 %v2802_v20  ;;  %v2776_v20 = vld [vmem:[%s12160_s4 + $0xd8] sm:$0xff] }
 0x242   :  { %v7937_v26 = vpop.f32.mrf.mxu2  ;;  %3021 = vmatpush.msrb.mxu2 %v2776_v20 }
 0x243   :  { %2217 = vperm.xlu0 %6063, %v7749_v6  }
 0x244   :  { %2173 = vperm.xlu1 %6064, %v7728_v18   ;;  %v7944_v38 = vpop.permute.xlu0 %1944  ;;  %v2801_v18 = vld [vmem:[%s12160_s4 + $0x1a0] sm:$0xff] }
 0x245   :  { %12536 = vst [vmem:[#allocation118_spill] sm:$0xff] %v7944_v38  ;;  %2177 = vperm.xlu2 %6062, %v7736_v44   ;;  %v7950_v31 = vpop.permute.xlu1 %1912  ;;  %3254 = vmatpush.msra.mxu1 %v2801_v18  ;;  %v2800_v44 = vld [vmem:[%s12160_s4 + $0x198] sm:$0xff]  ;;  %v2794_v18 = vld [vmem:[%s12160_s4 + $0x168] sm:$0xff] }
 0x246   :  { %v7952_v7 = vpop.permute.xlu2 %1952  ;;  %3132 = vmatpush.msrb.mxu0 %v2794_v18 }
 0x247   :  { %12537 = vst [vmem:[#allocation119_spill] sm:$0xff] %v7952_v7  ;;  %3255 = vmatpush.msra.mxu1 %v2800_v44  ;;  %v2799_v7 = vld [vmem:[%s12160_s4 + $0x190] sm:$0xff]  ;;  %v2797_v44 = vld [vmem:[%s12160_s4 + $0x180] sm:$0xff] }
 0x249   :  { %3256 = vmatpush.msra.mxu1 %v2799_v7 }
 0x24a   :  { %v7960_v47 = vpop.f32.mrf.mxu2 }
 0x24b   :  { %2229 = vperm.xlu0 %6063, %v7776_v59   ;;  %3257 = vmatpush.msra.mxu1 %v2798_v62 }
 0x24c   :  { %2185 = vperm.xlu1 %6064, %v7755_v10   ;;  %v7967_v25 = vpop.permute.xlu0 %1956  ;;  %v707_v10 = vpop.f32.mrf.mxu1 }
 0x24d   :  { %12538 = vst [vmem:[#allocation120_spill] sm:$0xff] %v7967_v25  ;;  %2189 = vperm.xlu2 %6062, %v7761_v34   ;;  %v7979_v38 = vpop.permute.xlu1 %1924  ;;  %3258 = vmatpush.msra.mxu1 %v2797_v44  ;;  %v12541_v34 = vmov 0   ;;  %v2793_v44 = vld [vmem:[%s12160_s4 + $0x160] sm:$0xff] }
 0x24e   :  { %v7981_v25 = vpop.permute.xlu2 %1964  ;;  %3133 = vmatpush.msrb.mxu0 %v2793_v44 }
 0x24f   :  { %12539 = vst [vmem:[#allocation121_spill] sm:$0xff] %v7981_v25 }
 0x252   :  { %v7989_v50 = vpop.f32.mrf.mxu2 }
 0x253   :  { %12540 = vst [vmem:[#allocation122_spill] sm:$0xff] %v7989_v50  ;;  %6065 = vset.pattern.permute.xlu0 %v12541_v34 }
 0x254   :  { %2197 = vperm.xlu1 %6064, %v7782_v12   ;;  %958 = vperm.xlu0 %6065, %v7589_v28   ;;  %v7994_v20 = vpop.permute.xlu0 %1968  ;;  %v710_v18 = vpop.f32.mrf.mxu1  ;;  %v2775_v12 = vld [vmem:[%s12160_s4 + $0xd0] sm:$0xff] }
 0x255   :  { %12542 = vst [vmem:[#allocation123_spill] sm:$0xff] %v7994_v20  ;;  %2201 = vperm.xlu2 %6062, %v7790_v14   ;;  %v7997_v7 = vpop.permute.xlu1 %1936  ;;  %3022 = vmatpush.msrb.mxu2 %v2775_v12  ;;  %v916_v20 = vlaneseq }
 0x256   :  { %v7999_v62 = vpop.permute.xlu2 %1976 }
 0x257   :  { %12543 = vst [vmem:[#allocation124_spill] sm:$0xff] %v7999_v62 }
 0x25a   :  { %v8004_v25 = vpop.f32.mrf.mxu2 }
 0x25c   :  { %2209 = vperm.xlu1 %6064, %v7804_v63   ;;  %983 = vperm.xlu0 %6065, %v7604_v15   ;;  %v8008_v28 = vpop.permute.xlu0 %1980  ;;  %v713_v44 = vpop.f32.mrf.mxu1  ;;  %v2792_v63 = vld [vmem:[%s12160_s4 + $0x158] sm:$0xff] }
 0x25d   :  { %12544 = vst [vmem:[#allocation125_spill] sm:$0xff] %v8008_v28  ;;  %2213 = vperm.xlu2 %6062, %v7813_v3   ;;  %v8014_v14 = vpop.permute.xlu1 %1948  ;;  %v8027_v3 = vmax.f32 %v710_v18, 0.0  ;;  %v8029_v28 = vmax.f32 %v713_v44, 0.0  ;;  %3134 = vmatpush.msrb.mxu0 %v2792_v63 }
 0x25e   :  { %v8016_v62 = vpop.permute.xlu2 %1988 }
 0x25f   :  { %12545 = vst [vmem:[#allocation126_spill] sm:$0xff] %v8016_v62  ;;  %v8034_v62 = vshrl.u32 %v916_v20, 7  ;;  %v12194_v44 = vrot.slane %v8027_v3, 2 }
 0x260   :  { %12547 = vst [vmem:[#allocation128_spill] sm:$0xff] %v8027_v3 }
 0x261   :  { %12548 = vst [vmem:[#allocation129_spill] sm:$0xff] %v8029_v28  ;;  %vm1850_vm2 = vcmp.lt.s32.totalorder %v8034_v62, 6  ;;  %vm1175_vm3 = vcmp.lt.s32.totalorder %v8034_v62, 2  ;;  %vm2075_vm4 = vcmp.lt.s32.totalorder %v8034_v62, 5  ;;  %vm1625_vm6 = vcmp.lt.s32.totalorder %v8034_v62, 7 }
 0x262   :  { %v8018_v39 = vpop.f32.mrf.mxu2  ;;  %vm918_vm7 = vcmp.lt.s32.totalorder %v8034_v62, 3  ;;  %vm1400_vm8 = vcmp.lt.s32.totalorder %v8034_v62, 1 }
 0x264   :  { %2221 = vperm.xlu1 %6064, %v7828_v57   ;;  %998 = vperm.xlu0 %6065, %v7622_v23   ;;  %v8022_v15 = vpop.permute.xlu0 %1992  ;;  %v8038_v23 = vmax.f32 %v707_v10, 0.0  ;;  %v2044_v10 = vrot.slane %v8027_v3, 3 }
 0x265   :  { %12546 = vst [vmem:[#allocation127_spill] sm:$0xff] %v8022_v15  ;;  %2225 = vperm.xlu2 %6062, %v7835_v13   ;;  %v8032_v12 = vpop.permute.xlu1 %1960  ;;  %v2774_v15 = vld [vmem:[%s12160_s4 + $0xc8] sm:$0xff]  ;;  %v12193_v13 = vrot.slane %v8027_v3, 6 }
 0x266   :  { %v8036_v57 = vpop.permute.xlu2 %2000  ;;  %12550 = vst [vmem:[#allocation131_spill] sm:$0xff] %v8038_v23  ;;  %3023 = vmatpush.msrb.mxu2 %v2774_v15  ;;  %v12553_v15 = vrot.slane %v8029_v28, 6 }
 0x267   :  { %12549 = vst [vmem:[#allocation130_spill] sm:$0xff] %v8036_v57  ;;  %v12554_v57 = vrot.slane %v8038_v23, 2 }
 0x268   :  { %v1205_v20 = vsel %vm1175_vm3, %v12193_v13, %v12553_v15 }
 0x269   :  { %v1338_v50 = vmul.f32 %v7214_v30, %v1205_v20 }
 0x26a   :  { %v8048_v63 = vpop.f32.mrf.mxu2 }
 0x26b   :  { %12551 = vst [vmem:[#allocation132_spill] sm:$0xff] %v8048_v63 }
 0x26c   :  { %2233 = vperm.xlu1 %6064, %v7853_v35   ;;  %1013 = vperm.xlu0 %6065, %v7639_v45   ;;  %v8054_v18 = vpop.permute.xlu0 %2004  ;;  %v1881_v35 = vsel %vm1850_vm2, %v12554_v57, %v12194_v44  ;;  %v12195_v45 = vrot.slane %v8038_v23, 3  ;;  %v2045_v57 = vrot.slane %v8029_v28, 3 }
 0x26d   :  { %12552 = vst [vmem:[#allocation133_spill] sm:$0xff] %v8054_v18  ;;  %v8069_v63 = vpop.permute.xlu1 %1972  ;;  %6227 = vset.pattern.permute.xlu2 %v12541_v34  ;;  %v2011_v18 = vmul.f32 %v7863_v22, %v1881_v35  ;;  %v2791_v22 = vld [vmem:[%s12160_s4 + $0x150] sm:$0xff] }
 0x26e   :  { %12555 = vst [vmem:[#allocation134_spill] sm:$0xff] %v8069_v63  ;;  %v2106_v15 = vsel %vm2075_vm4, %v12195_v45, %v2044_v10  ;;  %v2105_v30 = vsel %vm2075_vm4, %v2044_v10, %v2045_v57  ;;  %3135 = vmatpush.msrb.mxu0 %v2791_v22  ;;  %v8113_v10 = vmax.f32 %v7616_v60, 0.0 }
 0x26f   :  { %v2110_v13 = vpop.permute.xlu2 %2109  ;;  %v6071_v44 = vpack.i.bf16 %v2011_v18, %v1338_v50  ;;  %v8103_v18 = vmax.f32 %v7634_v46, 0.0 }
 0x270   :  { %v2236_v40 = vmul.f32 %v2110_v13, %v2106_v15  ;;  %12560 = vst [vmem:[#allocation139_spill] sm:$0xff] %v8113_v10  ;;  %v2790_v15 = vld [vmem:[%s12160_s4 + $0x148] sm:$0xff] }
 0x271   :  { %12557 = vst [vmem:[#allocation136_spill] sm:$0xff] %v8103_v18  ;;  %3136 = vmatpush.msrb.mxu0 %v2790_v15  ;;  %v12197_v46 = vrot.slane %v8103_v18, 2  ;;  %v12199_v22 = vrot.slane %v8103_v18, 6  ;;  %v8147_v15 = vmax.f32 %v7598_v32, 0.0  ;;  %v8160_v32 = vmax.f32 %v7690_v0, 0.0 }
 0x272   :  { %5922 = vmatmul.msk.f32.vlgmr.msra.gmra.mxu1 %vm2652_vm5, %v2236_v40  ;;  %v8081_v63 = vpop.f32.mrf.mxu2  ;;  %v2773_v40 = vld [vmem:[%s12160_s4 + $0xc0] sm:$0xff]  ;;  %v2047_v0 = vrot.slane %v8113_v10, 3 }
 0x273   :  { %3024 = vmatpush.msrb.mxu2 %v2773_v40  ;;  %12563 = vst [vmem:[#allocation142_spill] sm:$0xff] %v8147_v15 }
 0x274   :  { %6072 = vrot.lane.b32.xlu1 %v6071_v44, %s6444_s23  ;;  %1028 = vperm.xlu0 %6065, %v7656_v42   ;;  %12565 = vst [vmem:[#allocation144_spill] sm:$0xff] %v8160_v32 }
 0x275   :  { %v8088_v35 = vpop.permute.xlu1 %1984  ;;  %v2114_v13 = vpop.permute.xlu0 %2113  ;;  %6226 = vset.pattern.permute.xlu1 %v12541_v34  ;;  %v8106_v34 = vmax.f32 %v7651_v37, 0.0  ;;  %v12198_v37 = vrot.slane %v8113_v10, 2 }
 0x276   :  { %12556 = vst [vmem:[#allocation135_spill] sm:$0xff] %v8088_v35  ;;  %v2237_v50 = vmul.f32 %v2114_v13, %v2105_v30 }
 0x277   :  { %12558 = vst [vmem:[#allocation137_spill] sm:$0xff] %v8106_v34  ;;  %v1877_v13 = vsel %vm1850_vm2, %v12198_v37, %v12197_v46  ;;  %v2789_v46 = vld [vmem:[%s12160_s4 + $0x140] sm:$0xff] }
 0x278   :  { %v2015_v45 = vmul.f32 %v7930_v51, %v1877_v13  ;;  %3137 = vmatpush.msrb.mxu0 %v2789_v46  ;;  %v8163_v51 = vmax.f32 %v7717_v49, 0.0  ;;  %v8170_v46 = vmax.f32 %v7668_v29, 0.0  ;;  %v2771_v49 = vld [vmem:[%s12160_s4 + $0xb0] sm:$0xff] }
 0x27a   :  { %5923 = vmatmul.msk.f32.gmra.mxu1 %vm2652_vm5, %v2237_v50  ;;  %v8097_v42 = vpop.f32.mrf.mxu2  ;;  %12566 = vst [vmem:[#allocation145_spill] sm:$0xff] %v8163_v51  ;;  %v12203_v13 = vrot.slane %v8170_v46, 2 }
 0x27b   :  { %12567 = vst [vmem:[#allocation146_spill] sm:$0xff] %v8170_v46 }
 0x27c   :  { %2432 = vrot.lane.b32.xlu1 %v8029_v28, %s6444_s23  ;;  %1043 = vperm.xlu0 %6065, %v7673_v21   ;;  %v12196_v21 = vrot.slane %v8106_v34, 6 }
 0x27d   :  { %v8108_v44 = vpop.permute.xlu1 %1996  ;;  %v8110_v20 = vpop.permute.xlu0 %2133 }
 0x27e   :  { %12559 = vst [vmem:[#allocation138_spill] sm:$0xff] %v8108_v44  ;;  %v1201_v60 = vsel %vm1175_vm3, %v12199_v22, %v12196_v21  ;;  %v2046_v22 = vrot.slane %v8147_v15, 3 }
 0x27f   :  { %v1342_v21 = vmul.f32 %v7188_v61, %v1201_v60 }
 0x281   :  { %v6091_v37 = vpack.i.bf16 %v1342_v21, %v2015_v45  ;;  %v2104_v45 = vsel %vm2075_vm4, %v2045_v57, %v2046_v22  ;;  %v12201_v57 = vrot.slane %v8160_v32, 6 }
 0x282   :  { %v8122_v30 = vpop.f32.mrf.mxu2 }
 0x283   :  { %12561 = vst [vmem:[#allocation140_spill] sm:$0xff] %v8122_v30 }
 0x284   :  { %2436 = vrot.lane.b32.xlu1 %v8113_v10, %s6444_s23  ;;  %1058 = vperm.xlu0 %6065, %v7695_v8   ;;  %v2772_v8 = vld [vmem:[%s12160_s4 + $0xb8] sm:$0xff] }
 0x285   :  { %v8139_v50 = vpop.permute.xlu1 %2008  ;;  %v8141_v40 = vpop.permute.xlu0 %2145  ;;  %3025 = vmatpush.msrb.mxu2 %v2772_v8 }
 0x286   :  { %12562 = vst [vmem:[#allocation141_spill] sm:$0xff] %v8139_v50  ;;  %v2122_v8 = vpop.permute.xlu2 %2121 }
 0x287   :  { %3026 = vmatpush.msrb.mxu2 %v2771_v49 }
 0x28a   :  { %v8155_v50 = vpop.f32.mrf.mxu2 }
 0x28b   :  { %12564 = vst [vmem:[#allocation143_spill] sm:$0xff] %v8155_v50 }
 0x28c   :  { %6092 = vrot.lane.b32.xlu1 %v6091_v37, %s6444_s23  ;;  %1073 = vperm.xlu0 %6065, %v7722_v56   ;;  %v12200_v37 = vrot.slane %v8163_v51, 6  ;;  %v12202_v56 = vrot.slane %v8160_v32, 2 }
 0x28d   :  { %v8165_v61 = vpop.permute.xlu0 %2157 }
 0x28e   :  { %v2118_v21 = vpop.permute.xlu1 %2117 }
 0x28f   :  { %v2238_v60 = vmul.f32 %v2118_v21, %v2104_v45  ;;  %v1198_v45 = vsel %vm1175_vm3, %v12201_v57, %v12200_v37  ;;  %v1874_v21 = vsel %vm1850_vm2, %v12203_v13, %v12202_v56  ;;  %v2788_v37 = vld [vmem:[%s12160_s4 + $0x138] sm:$0xff]  ;;  %v2048_v56 = vrot.slane %v8103_v18, 3 }
 0x290   :  { %v2018_v49 = vmul.f32 %v7950_v31, %v1874_v21  ;;  %v1345_v50 = vmul.f32 %v7204_v41, %v1198_v45  ;;  %3138 = vmatpush.msrb.mxu0 %v2788_v37  ;;  %v1143_v31 = vrot.slane %v8038_v23, 6  ;;  %v8215_v41 = vmax.f32 %v7771_v33, 0.0 }
 0x291   :  { %5924 = vmatmul.msk.f32.gmra.mxu1 %vm2652_vm5, %v2238_v60  ;;  %v8232_v33 = vmax.f32 %v7744_v16, 0.0  ;;  %v12577_v16 = vld [vmem:[#allocation34_spill] sm:$0xff] }
 0x292   :  { %v8181_v29 = vpop.f32.mrf.mxu2  ;;  %v6106_v57 = vpack.i.bf16 %v1345_v50, %v2018_v49  ;;  %12571 = vst [vmem:[#allocation150_spill] sm:$0xff] %v8215_v41  ;;  %v12574_v50 = vrot.slane %v8027_v3, 6  ;;  %v12576_v49 = vld [vmem:[#allocation32_spill] sm:$0xff] }
 0x293   :  { %12568 = vst [vmem:[#allocation147_spill] sm:$0xff] %v8181_v29 }
 0x294   :  { %2442 = vrot.lane.b32.xlu1 %v8170_v46, %s6444_s23  ;;  %1088 = vperm.xlu0 %6065, %v7749_v6   ;;  %v2103_v6 = vsel %vm2075_vm4, %v2046_v22, %v2047_v0  ;;  %v8218_v22 = vmax.f32 %v7798_v24, 0.0  ;;  %v1206_v37 = vsel %vm1175_vm3, %v1143_v31, %v12574_v50  ;;  %12575 = vst [vmem:[#allocation153_spill] sm:$0xff] %v8232_v33  ;;  %v1820_v24 = vrot.slane %v8029_v28, 2 }
 0x295   :  { %v8198_v60 = vpop.permute.xlu0 %2169  ;;  %v2239_v30 = vmul.f32 %v2122_v8, %v2103_v6  ;;  %v1337_v6 = vmul.f32 %v12576_v49, %v1206_v37  ;;  %v1146_v50 = vrot.slane %v8147_v15, 6  ;;  %v12212_v37 = vrot.slane %v8232_v33, 2 }
 0x296   :  { %12569 = vst [vmem:[#allocation148_spill] sm:$0xff] %v8198_v60  ;;  %v2126_v44 = vpop.permute.xlu1 %2125  ;;  %v1821_v60 = vrot.slane %v8147_v15, 2 }
 0x297   :  { %12572 = vst [vmem:[#allocation151_spill] sm:$0xff] %v8218_v22 }
 0x299   :  { %5925 = vmatmul.msk.f32.gmra.mxu1 %vm2652_vm5, %v2239_v30 }
 0x29a   :  { %v800_v13 = vpop.f32.mrf.mxu2 }
 0x29b   :  { %v8210_v21 = vmax.f32 %v800_v13, 0.0  ;;  %v2102_v13 = vsel %vm2075_vm4, %v2047_v0, %v2048_v56  ;;  %v12209_v0 = vrot.slane %v8218_v22, 6 }
 0x29c   :  { %6107 = vrot.lane.b32.xlu1 %v6106_v57, %s6444_s23  ;;  %1103 = vperm.xlu0 %6065, %v7776_v59   ;;  %v2240_v57 = vmul.f32 %v2126_v44, %v2102_v13  ;;  %v2770_v44 = vld [vmem:[%s12160_s4 + $0xa8] sm:$0xff]  ;;  %v2049_v13 = vrot.slane %v8106_v34, 3 }
 0x29d   :  { %12570 = vst [vmem:[#allocation149_spill] sm:$0xff] %v8210_v21  ;;  %v8220_v30 = vpop.permute.xlu0 %2181  ;;  %v12204_v59 = vrot.slane %v8210_v21, 6  ;;  %3027 = vmatpush.msrb.mxu2 %v2770_v44 }
 0x29e   :  { %12573 = vst [vmem:[#allocation152_spill] sm:$0xff] %v8220_v30  ;;  %v8228_v8 = vpop.permute.xlu1 %2137  ;;  %v12211_v30 = vrot.slane %v8215_v41, 2 }
 0x29f   :  { %v1207_v45 = vsel %vm1175_vm3, %v12204_v59, %v1143_v31  ;;  %v12210_v31 = vrot.slane %v8215_v41, 6  ;;  %v2130_v59 = vpop.permute.xlu2 %2129 }
 0x2a0   :  { %v1336_v29 = vmul.f32 %v12577_v16, %v1207_v45  ;;  %v12579_v16 = vrot.slane %v8027_v3, 2 }
 0x2a1   :  { %5926 = vmatmul.msk.f32.gmra.mxu1 %vm2652_vm5, %v2240_v57  ;;  %v12578_v57 = vrot.slane %v8029_v28, 6 }
 0x2a2   :  { %v6066_v49 = vpack.i.bf16 %v1337_v6, %v1336_v29  ;;  %v1880_v44 = vsel %vm1850_vm2, %v12579_v16, %v1820_v24  ;;  %v1195_v29 = vsel %vm1175_vm3, %v12210_v31, %v12209_v0  ;;  %v1871_v6 = vsel %vm1850_vm2, %v12212_v37, %v12211_v30  ;;  %v2787_v16 = vld [vmem:[%s12160_s4 + $0x130] sm:$0xff]  ;;  %v12581_v30 = vld [vmem:[#allocation36_spill] sm:$0xff] }
 0x2a3   :  { %v1204_v45 = vsel %vm1175_vm3, %v12578_v57, %v1146_v50  ;;  %v2012_v28 = vmul.f32 %v7887_v48, %v1880_v44  ;;  %v2021_v21 = vmul.f32 %v7979_v38, %v1871_v6  ;;  %v2101_v0 = vsel %vm2075_vm4, %v2048_v56, %v2049_v13  ;;  %3139 = vmatpush.msrb.mxu0 %v2787_v16 }
 0x2a4   :  { %2448 = vrot.lane.b32.xlu1 %v8232_v33, %s6444_s23  ;;  %2428 = vrot.lane.b32.xlu0 %v8038_v23, %s6444_s23  ;;  %v2241_v35 = vmul.f32 %v2130_v59, %v2101_v0  ;;  %v1339_v37 = vmul.f32 %v12581_v30, %v1204_v45  ;;  %v2050_v38 = vrot.slane %v8170_v46, 3  ;;  %v8296_v56 = vmax.f32 %v7848_v43, 0.0 }
 0x2a5   :  { %6067 = vrot.lane.b32.xlu2 %v6066_v49, %s6444_s23  ;;  %v8276_v57 = vpop.permute.xlu0 %2193  ;;  %v1348_v49 = vmul.f32 %v7220_v1, %v1195_v29  ;;  %v8299_v30 = vmax.f32 %v7866_v55, 0.0  ;;  %v8315_v55 = vmax.f32 %v7823_v19, 0.0  ;;  %v2786_v19 = vld [vmem:[%s12160_s4 + $0x128] sm:$0xff] }
 0x2a6   :  { %12580 = vst [vmem:[#allocation32_spill] sm:$0xff] %v8276_v57  ;;  %v8285_v31 = vpop.permute.xlu1 %2149  ;;  %v1147_v57 = vrot.slane %v8113_v10, 6  ;;  %v6076_v48 = vpack.i.bf16 %v2012_v28, %v1339_v37  ;;  %v2100_v43 = vsel %vm2075_vm4, %v2049_v13, %v2050_v38  ;;  %3140 = vmatpush.msrb.mxu0 %v2786_v19  ;;  %v1157_v29 = vrot.slane %v8296_v56, 6 }
 0x2a7   :  { %v6121_v44 = vpack.i.bf16 %v1348_v49, %v2021_v21  ;;  %12582 = vst [vmem:[#allocation34_spill] sm:$0xff] %v8296_v56  ;;  %v12228_v37 = vrot.slane %v8299_v30, 6  ;;  %v2142_v45 = vpop.permute.xlu2 %2141 }
 0x2a8   :  { %12583 = vst [vmem:[#allocation36_spill] sm:$0xff] %v8299_v30  ;;  %v1203_v1 = vsel %vm1175_vm3, %v1146_v50, %v1147_v57  ;;  %v2242_v50 = vmul.f32 %v8110_v20, %v2100_v43  ;;  %v2051_v20 = vrot.slane %v8160_v32, 3 }
 0x2a9   :  { %5927 = vmatmul.msk.f32.gmra.mxu1 %vm2652_vm5, %v2241_v35  ;;  %v1879_v35 = vsel %vm1850_vm2, %v1820_v24, %v1821_v60  ;;  %12584 = vst [vmem:[#allocation154_spill] sm:$0xff] %v8315_v55  ;;  %v2769_v24 = vld [vmem:[%s12160_s4 + $0xa0] sm:$0xff]  ;;  %v1340_v0 = vmul.f32 %v7231_v17, %v1203_v1  ;;  %v1831_v17 = vrot.slane %v8315_v55, 2  ;;  %v1192_v6 = vsel %vm1175_vm3, %v1157_v29, %v12228_v37 }
 0x2aa   :  { %v2013_v21 = vmul.f32 %v7916_v9, %v1879_v35  ;;  %3028 = vmatpush.msrb.mxu2 %v2769_v24  ;;  %v12213_v9 = vrot.slane %v8296_v56, 2  ;;  %v12587_v1 = vrot.slane %v8113_v10, 2  ;;  %v2099_v43 = vsel %vm2075_vm4, %v2050_v38, %v2051_v20 }
 0x2ab   :  { %v1351_v19 = vmul.f32 %v7241_v11, %v1192_v6  ;;  %v12589_v11 = vrot.slane %v8106_v34, 6 }
 0x2ac   :  { %6122 = vrot.lane.b32.xlu1 %v6121_v44, %s6444_s23  ;;  %6077 = vrot.lane.b32.xlu0 %v6076_v48, %s6444_s23  ;;  %v6081_v13 = vpack.i.bf16 %v1340_v0, %v2013_v21  ;;  %v1868_v16 = vsel %vm1850_vm2, %v1831_v17, %v12213_v9  ;;  %v12586_v48 = vrot.slane %v8103_v18, 6  ;;  %v1878_v35 = vsel %vm1850_vm2, %v1821_v60, %v12587_v1 }
 0x2ad   :  { %2430 = vrot.lane.b32.xlu2 %v8027_v3, %s6444_s23  ;;  %v8307_v28 = vpop.permute.xlu0 %2205  ;;  %v2024_v21 = vmul.f32 %v7997_v7, %v1868_v16  ;;  %v2014_v24 = vmul.f32 %v7876_v36, %v1878_v35  ;;  %v2243_v0 = vmul.f32 %v8228_v8, %v2099_v43  ;;  %v1824_v9 = vrot.slane %v8106_v34, 2 }
 0x2ae   :  { %v8312_v59 = vpop.permute.xlu1 %2161  ;;  %v1202_v44 = vsel %vm1175_vm3, %v1147_v57, %v12586_v48  ;;  %v1150_v48 = vrot.slane %v8170_v46, 6  ;;  %v2052_v60 = vrot.slane %v8163_v51, 3  ;;  %v12590_v8 = vrot.slane %v8103_v18, 2 }
 0x2af   :  { %v6136_v7 = vpack.i.bf16 %v1351_v19, %v2024_v21  ;;  %v8371_v16 = vpop.permute.xlu2 %2153  ;;  %v8388_v1 = vmax.f32 %v7909_v4, 0.0  ;;  %v2785_v4 = vld [vmem:[%s12160_s4 + $0x120] sm:$0xff] }
 0x2b0   :  { %v1200_v36 = vsel %vm1175_vm3, %v12589_v11, %v1150_v48  ;;  %v1876_v6 = vsel %vm1850_vm2, %v12590_v8, %v1824_v9  ;;  %v2098_v43 = vsel %vm2075_vm4, %v2051_v20, %v2052_v60  ;;  %3141 = vmatpush.msrb.mxu0 %v2785_v4  ;;  %v12596_v8 = vrot.slane %v8170_v46, 2 }
 0x2b1   :  { %5928 = vmatmul.msk.f32.gmra.mxu1 %vm2652_vm5, %v2242_v50  ;;  %12592 = vst [vmem:[#allocation156_spill] sm:$0xff] %v8388_v1  ;;  %v2016_v21 = vmul.f32 %v7890_v2, %v1876_v6  ;;  %v2244_v19 = vmul.f32 %v2142_v45, %v2098_v43  ;;  %v12215_v2 = vrot.slane %v8388_v1, 6  ;;  %v2784_v45 = vld [vmem:[%s12160_s4 + $0x118] sm:$0xff]  ;;  %v12597_v4 = vrot.slane %v8160_v32, 6 }
 0x2b2   :  { %3142 = vmatpush.msrb.mxu0 %v2784_v45  ;;  %v1875_v6 = vsel %vm1850_vm2, %v1824_v9, %v12596_v8  ;;  %v2763_v9 = vld [vmem:[%s12160_s4 + $0x70] sm:$0xff] }
 0x2b3   :  { %v2017_v8 = vmul.f32 %v7898_v54, %v1875_v6  ;;  %v2781_v54 = vld [vmem:[%s12160_s4 + $0x100] sm:$0xff] }
 0x2b4   :  { %2454 = vrot.lane.b32.xlu1 %v8315_v55, %s6444_s23  ;;  %6082 = vrot.lane.b32.xlu0 %v6081_v13, %s6444_s23  ;;  %v12588_v13 = vld [vmem:[#allocation38_spill] sm:$0xff] }
 0x2b5   :  { %2434 = vrot.lane.b32.xlu2 %v8147_v15, %s6444_s23  ;;  %v8348_v49 = vpop.permute.xlu0 %2217  ;;  %v1341_v57 = vmul.f32 %v12588_v13, %v1202_v44  ;;  %v8385_v44 = vmax.f32 %v7892_v27, 0.0  ;;  %v2768_v27 = vld [vmem:[%s12160_s4 + $0x98] sm:$0xff]  ;;  %v12595_v13 = vld [vmem:[#allocation41_spill] sm:$0xff] }
 0x2b6   :  { %12585 = vst [vmem:[#allocation155_spill] sm:$0xff] %v8348_v49  ;;  %v8361_v50 = vpop.permute.xlu1 %2173  ;;  %3029 = vmatpush.msrb.mxu2 %v2768_v27  ;;  %v2783_v27 = vld [vmem:[%s12160_s4 + $0x110] sm:$0xff] }
 0x2b7   :  { %v6086_v38 = vpack.i.bf16 %v1341_v57, %v2014_v24  ;;  %12591 = vst [vmem:[#allocation38_spill] sm:$0xff] %v8385_v44  ;;  %v1343_v57 = vmul.f32 %v12595_v13, %v1200_v36  ;;  %v12214_v20 = vrot.slane %v8385_v44, 2  ;;  %v12221_v11 = vrot.slane %v8385_v44, 6  ;;  %3143 = vmatpush.msrb.mxu0 %v2783_v27 }
 0x2b8   :  { %v1199_v13 = vsel %vm1175_vm3, %v1150_v48, %v12597_v4  ;;  %v2761_v48 = vld [vmem:[%s12160_s4 + $0x60] sm:$0xff]  ;;  %v1827_v27 = vrot.slane %v8163_v51, 2 }
 0x2b9   :  { %5929 = vmatmul.msk.f32.gmra.mxu1 %vm2652_vm5, %v2243_v0  ;;  %v8399_v0 = vmax.f32 %v7881_v52, 0.0  ;;  %v2764_v52 = vld [vmem:[%s12160_s4 + $0x78] sm:$0xff] }
 0x2ba   :  { %2904 = vmatpush.msrb.mxu3 %v2764_v52 }
 0x2bb   :  { %12594 = vst [vmem:[#allocation158_spill] sm:$0xff] %v8399_v0  ;;  %v12220_v36 = vrot.slane %v8399_v0, 2 }
 0x2bc   :  { %6137 = vrot.lane.b32.xlu1 %v6136_v7, %s6444_s23  ;;  %2438 = vrot.lane.b32.xlu0 %v8103_v18, %s6444_s23  ;;  %v6096_v7 = vpack.i.bf16 %v1343_v57, %v2016_v21  ;;  %v1189_v21 = vsel %vm1175_vm3, %v12221_v11, %v12215_v2  ;;  %v2762_v2 = vld [vmem:[%s12160_s4 + $0x68] sm:$0xff] }
 0x2bd   :  { %6087 = vrot.lane.b32.xlu2 %v6086_v38, %s6444_s23  ;;  %v8391_v35 = vpop.permute.xlu0 %2229  ;;  %v2053_v38 = vrot.slane %v8232_v33, 3  ;;  %v1865_v43 = vsel %vm1850_vm2, %v12220_v36, %v12214_v20  ;;  %2905 = vmatpush.msrb.mxu3 %v2763_v9  ;;  %v1153_v9 = vrot.slane %v8232_v33, 6  ;;  %v1830_v36 = vrot.slane %v8218_v22, 2 }
 0x2be   :  { %12593 = vst [vmem:[#allocation157_spill] sm:$0xff] %v8391_v35  ;;  %v8396_v24 = vpop.permute.xlu1 %2185  ;;  %v2027_v57 = vmul.f32 %v8014_v14, %v1865_v43  ;;  %v2782_v14 = vld [vmem:[%s12160_s4 + $0x108] sm:$0xff]  ;;  %v12623_v35 = vld [vmem:[#allocation51_spill] sm:$0xff] }
 0x2bf   :  { %v2097_v52 = vsel %vm2075_vm4, %v2052_v60, %v2053_v38  ;;  %v12598_v60 = vld [vmem:[#allocation45_spill] sm:$0xff]  ;;  %2906 = vmatpush.msrb.mxu3 %v2762_v2  ;;  %3144 = vmatpush.msrb.mxu0 %v2782_v14  ;;  %v2760_v2 = vld [vmem:[%s12160_s4 + $0x58] sm:$0xff] }
 0x2c0   :  { %v2245_v20 = vmul.f32 %v8141_v40, %v2097_v52  ;;  %v1354_v43 = vmul.f32 %v12598_v60, %v1189_v21  ;;  %v12599_v40 = vld [vmem:[#allocation39_spill] sm:$0xff]  ;;  %v2054_v52 = vrot.slane %v8215_v41, 3  ;;  %v2759_v60 = vld [vmem:[%s12160_s4 + $0x50] sm:$0xff] }
 0x2c1   :  { %5930 = vmatmul.msk.f32.gmra.mxu1 %vm2652_vm5, %v2244_v19  ;;  %v8439_v19 = vpop.permute.xlu2 %2165  ;;  %v1344_v6 = vmul.f32 %v12599_v40, %v1199_v13  ;;  %2907 = vmatpush.msrb.mxu3 %v2761_v48  ;;  %v12600_v13 = vrot.slane %v8163_v51, 6  ;;  %v8495_v48 = vmax.f32 %v7937_v26, 0.0 }
 0x2c2   :  { %v6151_v4 = vpack.i.bf16 %v1354_v43, %v2027_v57  ;;  %3145 = vmatpush.msrb.mxu0 %v2781_v54  ;;  %v12601_v57 = vrot.slane %v8160_v32, 2  ;;  %v2767_v43 = vld [vmem:[%s12160_s4 + $0x90] sm:$0xff]  ;;  %v2096_v26 = vsel %vm2075_vm4, %v2053_v38, %v2054_v52  ;;  %v2757_v38 = vld [vmem:[%s12160_s4 + $0x40] sm:$0xff] }
 0x2c3   :  { %v6101_v21 = vpack.i.bf16 %v1344_v6, %v2017_v8  ;;  %12602 = vst [vmem:[#allocation41_spill] sm:$0xff] %v8495_v48  ;;  %v8498_v8 = vmax.f32 %v7960_v47, 0.0  ;;  %2908 = vmatpush.msrb.mxu3 %v2760_v2  ;;  %3030 = vmatpush.msrb.mxu2 %v2767_v43  ;;  %v8515_v6 = vmax.f32 %v7920_v5, 0.0  ;;  %v2246_v2 = vmul.f32 %v8285_v31, %v2096_v26 }
 0x2c4   :  { %2460 = vrot.lane.b32.xlu1 %v8399_v0, %s6444_s23  ;;  %6097 = vrot.lane.b32.xlu0 %v6096_v7, %s6444_s23  ;;  %v1873_v14 = vsel %vm1850_vm2, %v12601_v57, %v1827_v27  ;;  %v12216_v57 = vrot.slane %v8495_v48, 2  ;;  %v2055_v31 = vrot.slane %v8218_v22, 3 }
 0x2c5   :  { %2440 = vrot.lane.b32.xlu2 %v8106_v34, %s6444_s23  ;;  %12603 = vst [vmem:[#allocation45_spill] sm:$0xff] %v8498_v8  ;;  %v2019_v54 = vmul.f32 %v7901_v58, %v1873_v14  ;;  %2909 = vmatpush.msrb.mxu3 %v2759_v60  ;;  %v2758_v58 = vld [vmem:[%s12160_s4 + $0x48] sm:$0xff]  ;;  %v12217_v5 = vrot.slane %v8498_v8, 6  ;;  %v2756_v60 = vld [vmem:[%s12160_s4 + $0x38] sm:$0xff]  ;;  %v12218_v43 = vrot.slane %v8515_v6, 2 }
 0x2c6   :  { %v8456_v45 = vpop.permute.xlu1 %2197  ;;  %v8458_v7 = vpop.permute.xlu0 %958  ;;  %12604 = vst [vmem:[#allocation39_spill] sm:$0xff] %v8515_v6 }
 0x2c7   :  { %2910 = vmatpush.msrb.mxu3 %v2758_v58  ;;  %v1862_v26 = vsel %vm1850_vm2, %v12218_v43, %v12216_v57  ;;  %v12606_v58 = vrot.slane %v8215_v41, 6  ;;  %v2095_v57 = vsel %vm2075_vm4, %v2054_v52, %v2055_v31  ;;  %v12610_v52 = vld [vmem:[#allocation40_spill] sm:$0xff] }
 0x2c9   :  { %5931 = vmatmul.msk.f32.gmra.mxu1 %vm2652_vm5, %v2245_v20  ;;  %v1197_v20 = vsel %vm1175_vm3, %v12600_v13, %v1153_v9  ;;  %2911 = vmatpush.msrb.mxu3 %v2757_v38 }
 0x2cb   :  { %2912 = vmatpush.msrb.mxu3 %v2756_v60 }
 0x2cc   :  { %6152 = vrot.lane.b32.xlu1 %v6151_v4, %s6444_s23  ;;  %2444 = vrot.lane.b32.xlu0 %v8160_v32, %s6444_s23  ;;  %v8517_v4 = vpop.permute.xlu2 %2177 }
 0x2cd   :  { %6102 = vrot.lane.b32.xlu2 %v6101_v21, %s6444_s23  ;;  %v12605_v21 = vld [vmem:[#allocation43_spill] sm:$0xff] }
 0x2ce   :  { %v8510_v40 = vpop.permute.xlu1 %2209  ;;  %v8512_v47 = vpop.permute.xlu0 %983  ;;  %v1346_v13 = vmul.f32 %v12605_v21, %v1197_v20  ;;  %v12219_v20 = vrot.slane %v8495_v48, 6  ;;  %v1196_v21 = vsel %vm1175_vm3, %v1153_v9, %v12606_v58  ;;  %v2754_v9 = vld [vmem:[%s12160_s4 + $0x28] sm:$0xff] }
 0x2cf   :  { %v12609_v58 = vld [vmem:[#allocation48_spill] sm:$0xff] }
 0x2d0   :  { %v6111_v14 = vpack.i.bf16 %v1346_v13, %v2019_v54  ;;  %v1186_v54 = vsel %vm1175_vm3, %v12219_v20, %v12217_v5  ;;  %v12607_v13 = vrot.slane %v8232_v33, 2  ;;  %v2247_v20 = vmul.f32 %v8371_v16, %v2095_v57  ;;  %v2766_v16 = vld [vmem:[%s12160_s4 + $0x88] sm:$0xff] }
 0x2d1   :  { %5932 = vmatmul.msk.f32.gmra.mxu1 %vm2652_vm5, %v2246_v2  ;;  %v2755_v2 = vld [vmem:[%s12160_s4 + $0x30] sm:$0xff]  ;;  %3031 = vmatpush.msrb.mxu2 %v2766_v16 }
 0x2d2   :  { %v1872_v38 = vsel %vm1850_vm2, %v1827_v27, %v12607_v13  ;;  %2913 = vmatpush.msrb.mxu3 %v2755_v2  ;;  %v1357_v27 = vmul.f32 %v12609_v58, %v1186_v54  ;;  %v1156_v13 = vrot.slane %v8315_v55, 6  ;;  %v2056_v54 = vrot.slane %v8315_v55, 3  ;;  %v2752_v2 = vld [vmem:[%s12160_s4 + $0x18] sm:$0xff] }
 0x2d3   :  { %v2020_v43 = vmul.f32 %v7913_v53, %v1872_v38  ;;  %v8605_v58 = vmax.f32 %v8004_v25, 0.0  ;;  %v12617_v25 = vld [vmem:[#allocation122_spill] sm:$0xff] }
 0x2d4   :  { %2466 = vrot.lane.b32.xlu1 %v8515_v6, %s6444_s23  ;;  %6112 = vrot.lane.b32.xlu0 %v6111_v14, %s6444_s23  ;;  %v2030_v14 = vmul.f32 %v8032_v12, %v1862_v26  ;;  %v2753_v12 = vld [vmem:[%s12160_s4 + $0x20] sm:$0xff]  ;;  %v1347_v26 = vmul.f32 %v12610_v52, %v1196_v21  ;;  %v8583_v53 = vpop.permute.xlu2 %2189 }
 0x2d5   :  { %2446 = vrot.lane.b32.xlu2 %v8163_v51, %s6444_s23  ;;  %2914 = vmatpush.msrb.mxu3 %v2754_v9 }
 0x2d6   :  { %v8567_v60 = vpop.permute.xlu1 %2221  ;;  %v8569_v5 = vpop.permute.xlu0 %998  ;;  %v6166_v57 = vpack.i.bf16 %v1357_v27, %v2030_v14  ;;  %v6116_v21 = vpack.i.bf16 %v1347_v26, %v2020_v43  ;;  %v12612_v14 = vrot.slane %v8215_v41, 2  ;;  %v8608_v43 = vmax.f32 %v8018_v39, 0.0  ;;  %v2751_v27 = vld [vmem:[%s12160_s4 + $0x10] sm:$0xff] }
 0x2d7   :  { %12608 = vst [vmem:[#allocation43_spill] sm:$0xff] %v8567_v60  ;;  %2915 = vmatpush.msrb.mxu3 %v2753_v12  ;;  %v12614_v12 = vld [vmem:[#allocation115_spill] sm:$0xff]  ;;  %v2094_v26 = vsel %vm2075_vm4, %v2055_v31, %v2056_v54 }
 0x2d8   :  { %v1870_v9 = vsel %vm1850_vm2, %v12612_v14, %v1830_v36  ;;  %12613 = vst [vmem:[#allocation48_spill] sm:$0xff] %v8608_v43  ;;  %v2248_v39 = vmul.f32 %v8165_v61, %v2094_v26  ;;  %v12223_v14 = vrot.slane %v8027_v3, 1  ;;  %v2749_v31 = vld [vmem:[%s12160_s4] sm:$0xff] }
 0x2d9   :  { %5933 = vmatmul.msk.f32.gmra.mxu1 %vm2652_vm5, %v2247_v20  ;;  %v12611_v20 = vrot.slane %v8218_v22, 6  ;;  %2916 = vmatpush.msrb.mxu3 %v2752_v2  ;;  %v2022_v52 = vmul.f32 %v12614_v12, %v1870_v9  ;;  %v12618_v2 = vld [vmem:[#allocation46_spill] sm:$0xff]  ;;  %v2750_v9 = vld [vmem:[%s12160_s4 + $0x8] sm:$0xff]  ;;  %v12224_v12 = vrot.slane %v8608_v43, 6 }
 0x2db   :  { %v1194_v38 = vsel %vm1175_vm3, %v12611_v20, %v1156_v13  ;;  %v8622_v20 = vmax.f32 %v12617_v25, 0.0  ;;  %2917 = vmatpush.msrb.mxu3 %v2751_v27  ;;  %v12225_v25 = vrot.slane %v8605_v58, 2  ;;  %v12222_v27 = vrot.slane %v8038_v23, 1 }
 0x2dc   :  { %6167 = vrot.lane.b32.xlu1 %v6166_v57, %s6444_s23  ;;  %2450 = vrot.lane.b32.xlu0 %v8215_v41, %s6444_s23  ;;  %v8641_v11 = vpop.permute.xlu2 %2201 }
 0x2dd   :  { %6117 = vrot.lane.b32.xlu2 %v6116_v21, %s6444_s23  ;;  %v1349_v21 = vmul.f32 %v12618_v2, %v1194_v38  ;;  %2918 = vmatpush.msrb.mxu3 %v2750_v9  ;;  %v2057_v38 = vrot.slane %v8296_v56, 3  ;;  %v12226_v26 = vrot.slane %v8622_v20, 2  ;;  %v12227_v2 = vrot.slane %v8605_v58, 6 }
 0x2de   :  { %v8617_v16 = vpop.permute.xlu1 %2233  ;;  %v8619_v57 = vpop.permute.xlu0 %1013  ;;  %v1193_v9 = vsel %vm1175_vm3, %v1156_v13, %v1157_v29  ;;  %v12622_v13 = vld [vmem:[#allocation91_spill] sm:$0xff] }
 0x2df   :  { %12615 = vst [vmem:[#allocation40_spill] sm:$0xff] %v8617_v16  ;;  %v6126_v61 = vpack.i.bf16 %v1349_v21, %v2022_v52  ;;  %2919 = vmatpush.msrb.mxu3 %v2749_v31  ;;  %v1656_v52 = vsel %vm1625_vm6, %v12222_v27, %v12223_v14  ;;  %v1859_v21 = vsel %vm1850_vm2, %v12226_v26, %v12225_v25  ;;  %v12621_v26 = vld [vmem:[#allocation116_spill] sm:$0xff] }
 0x2e0   :  { %12616 = vst [vmem:[#allocation115_spill] sm:$0xff] %v8619_v57  ;;  %v1869_v31 = vsel %vm1850_vm2, %v1830_v36, %v1831_v17  ;;  %v2093_v14 = vsel %vm2075_vm4, %v2056_v54, %v2057_v38  ;;  %v1786_v16 = vmul.f32 %v12622_v13, %v1656_v52  ;;  %v12624_v17 = vld [vmem:[#allocation42_spill] sm:$0xff]  ;;  %v1833_v54 = vrot.slane %v8299_v30, 2  ;;  %v12656_v57 = vld [vmem:[#allocation52_spill] sm:$0xff] }
 0x2e1   :  { %5934 = vmatmul.msk.f32.gmra.mxu1 %vm2652_vm5, %v2248_v39  ;;  %v1183_v39 = vsel %vm1175_vm3, %v12227_v2, %v12224_v12  ;;  %v2023_v2 = vmul.f32 %v12621_v26, %v1869_v31  ;;  %v2249_v37 = vmul.f32 %v8312_v59, %v2093_v14  ;;  %v1350_v36 = vmul.f32 %v12624_v17, %v1193_v9 }
 0x2e2   :  { %v1360_v55 = vmul.f32 %v12623_v35, %v1183_v39  ;;  %v2058_v26 = vrot.slane %v8299_v30, 3  ;;  %v8693_v14 = vmax.f32 %v8097_v42, 0.0  ;;  %v2765_v35 = vld [vmem:[%s12160_s4 + $0x80] sm:$0xff]  ;;  %s6448_s4 = smov 80  }
 0x2e3   :  { %v6131_v59 = vpack.i.bf16 %v1350_v36, %v2023_v2  ;;  %3032 = vmatpush.msrb.mxu2 %v2765_v35  ;;  %v12634_v36 = vld [vmem:[#allocation49_spill] sm:$0xff] }
 0x2e4   :  { %2472 = vrot.lane.b32.xlu1 %v8622_v20, %s6444_s23  ;;  %6127 = vrot.lane.b32.xlu0 %v6126_v61, %s6444_s23  ;;  %v12619_v61 = vld [vmem:[#allocation134_spill] sm:$0xff]  ;;  %12625 = vst [vmem:[#allocation46_spill] sm:$0xff] %v8693_v14  ;;  %v8712_v2 = vpop.permute.xlu2 %2213  ;;  %v2092_v39 = vsel %vm2075_vm4, %v2057_v38, %v2058_v26  ;;  %v12232_v17 = vrot.slane %v8693_v14, 6 }
 0x2e5   :  { %2452 = vrot.lane.b32.xlu2 %v8218_v22, %s6444_s23  ;;  %v2033_v27 = vmul.f32 %v12619_v61, %v1859_v21  ;;  %v1159_v21 = vrot.slane %v8399_v0, 6  ;;  %v12657_v22 = vld [vmem:[#allocation13_spill] sm:$0xff] }
 0x2e6   :  { %v8677_v12 = vpop.permute.xlu1 %6072  ;;  %v8679_v25 = vpop.permute.xlu0 %1028 }
 0x2e7   :  { %12620 = vst [vmem:[#allocation122_spill] sm:$0xff] %v8679_v25  ;;  %v6075_v29 = vunpack.i.h.bf16 %v8677_v12  ;;  %v6181_v25 = vpack.i.bf16 %v1360_v55, %v2033_v27  ;;  %v8710_v27 = vmax.f32 %v8081_v63, 0.0  ;;  %v2250_v63 = vmul.f32 %v8439_v19, %v2092_v39 }
 0x2e9   :  { %5935 = vmatmul.msk.f32.gmra.mxu1 %vm2652_vm5, %v2249_v37  ;;  %v2717_v61 = vsel %vm2652_vm5, %v1786_v16, %v6075_v29  ;;  %v12626_v37 = vrot.slane %v8299_v30, 6  ;;  %v12627_v16 = vrot.slane %v8296_v56, 2  ;;  %12628 = vst [vmem:[#allocation134_spill] sm:$0xff] %v8710_v27  ;;  %v12632_v29 = vld [vmem:[#allocation132_spill] sm:$0xff]  ;;  %v12234_v35 = vrot.slane %v8710_v27, 6 }
 0x2ea   :  { %3146 = vmatmul.f32.vlgmr.msrb.gmra.mxu0 %v2717_v61  ;;  %v8723_v13 = vmax.f32 %v12632_v29, 0.0 }
 0x2eb   :  { %v1191_v55 = vsel %vm1175_vm3, %v12626_v37, %v1159_v21  ;;  %v1867_v42 = vsel %vm1850_vm2, %v12627_v16, %v1833_v54  ;;  %v2059_v37 = vrot.slane %v8399_v0, 3  ;;  %v1180_v19 = vsel %vm1175_vm3, %v12234_v35, %v12232_v17 }
 0x2ec   :  { %6182 = vrot.lane.b32.xlu1 %v6181_v25, %s6444_s23  ;;  %2456 = vrot.lane.b32.xlu0 %v8296_v56, %s6444_s23  ;;  %v12629_v25 = vld [vmem:[#allocation117_spill] sm:$0xff]  ;;  %12633 = vst [vmem:[#allocation51_spill] sm:$0xff] %v8723_v13  ;;  %v1352_v61 = vmul.f32 %v12634_v36, %v1191_v55  ;;  %v12233_v16 = vrot.slane %v8723_v13, 2 }
 0x2ed   :  { %6132 = vrot.lane.b32.xlu2 %v6131_v59, %s6444_s23  ;;  %v2025_v52 = vmul.f32 %v12629_v25, %v1867_v42  ;;  %v12231_v59 = vrot.slane %v8710_v27, 2  ;;  %v12635_v42 = vrot.slane %v8385_v44, 6  ;;  %v2091_v29 = vsel %vm2075_vm4, %v2058_v26, %v2059_v37 }
 0x2ee   :  { %v8718_v9 = vpop.permute.xlu1 %2432  ;;  %v8720_v31 = vpop.permute.xlu0 %1043  ;;  %v1836_v26 = vrot.slane %v8388_v1, 2 }
 0x2ef   :  { %12630 = vst [vmem:[#allocation116_spill] sm:$0xff] %v8718_v9  ;;  %v6141_v38 = vpack.i.bf16 %v1352_v61, %v2025_v52  ;;  %v1856_v55 = vsel %vm1850_vm2, %v12233_v16, %v12231_v59  ;;  %v1190_v25 = vsel %vm1175_vm3, %v1159_v21, %v12635_v42  ;;  %v12636_v52 = vrot.slane %v8399_v0, 2  ;;  %v12639_v61 = vld [vmem:[#allocation54_spill] sm:$0xff]  ;;  %v12641_v16 = vld [vmem:[#allocation148_spill] sm:$0xff]  ;;  %v12643_v21 = vld [vmem:[#allocation135_spill] sm:$0xff] }
 0x2f0   :  { %12631 = vst [vmem:[#allocation91_spill] sm:$0xff] %v8720_v31  ;;  %v12640_v59 = vld [vmem:[#allocation118_spill] sm:$0xff]  ;;  %v2251_v35 = vmul.f32 %v12641_v16, %v2091_v29  ;;  %v8767_v31 = vpop.permute.xlu2 %2225  ;;  %v2036_v42 = vmul.f32 %v12643_v21, %v1856_v55  ;;  %v12644_v0 = vld [vmem:[#allocation44_spill] sm:$0xff]  ;;  %v884_v29 = vrot.slane %v8038_v23, 5  ;;  %v12649_v55 = vrot.slane %v8385_v44, 2  ;;  %v12652_v21 = vld [vmem:[#allocation119_spill] sm:$0xff] }
 0x2f1   :  { %5936 = vmatmul.msk.f32.gmra.mxu1 %vm2652_vm5, %v2250_v63  ;;  %v1866_v39 = vsel %vm1850_vm2, %v1833_v54, %v12636_v52  ;;  %12642 = vst [vmem:[#allocation132_spill] sm:$0xff] %v8767_v31  ;;  %v1162_v54 = vrot.slane %v8515_v6, 6  ;;  %v12645_v52 = vld [vmem:[#allocation149_spill] sm:$0xff] }
 0x2f2   :  { %v2026_v17 = vmul.f32 %v12640_v59, %v1866_v39  ;;  %v12646_v39 = vld [vmem:[#allocation147_spill] sm:$0xff] }
 0x2f3   :  { %v8777_v16 = vmax.f32 %v12646_v39, 0.0 }
 0x2f4   :  { %2478 = vrot.lane.b32.xlu1 %v8723_v13, %s6444_s23  ;;  %6142 = vrot.lane.b32.xlu0 %v6141_v38, %s6444_s23  ;;  %v1363_v38 = vmul.f32 %v12639_v61, %v1180_v19  ;;  %v2060_v19 = vrot.slane %v8385_v44, 3 }
 0x2f5   :  { %2458 = vrot.lane.b32.xlu2 %v8299_v30, %s6444_s23  ;;  %v1353_v30 = vmul.f32 %v12644_v0, %v1190_v25  ;;  %12647 = vst [vmem:[#allocation49_spill] sm:$0xff] %v8777_v16  ;;  %v12648_v0 = vrot.slane %v8388_v1, 6  ;;  %v12246_v56 = vrot.slane %v8777_v16, 6 }
 0x2f6   :  { %v8760_v63 = vpop.permute.xlu1 %2436  ;;  %v8762_v36 = vpop.permute.xlu0 %1058  ;;  %v6196_v61 = vpack.i.bf16 %v1363_v38, %v2036_v42 }
 0x2f7   :  { %12637 = vst [vmem:[#allocation42_spill] sm:$0xff] %v8760_v63  ;;  %v6146_v59 = vpack.i.bf16 %v1353_v30, %v2026_v17  ;;  %v1864_v30 = vsel %vm1850_vm2, %v12649_v55, %v1836_v26  ;;  %v12650_v17 = vld [vmem:[#allocation143_spill] sm:$0xff]  ;;  %v12654_v55 = vld [vmem:[#allocation140_spill] sm:$0xff] }
 0x2f8   :  { %12638 = vst [vmem:[#allocation117_spill] sm:$0xff] %v8762_v36  ;;  %v12243_v36 = vrot.slane %v12645_v52, 5  ;;  %v8793_v25 = vmax.f32 %v12650_v17, 0.0  ;;  %v2028_v42 = vmul.f32 %v12652_v21, %v1864_v30  ;;  %v2061_v21 = vrot.slane %v8388_v1, 3 }
 0x2f9   :  { %5937 = vmatmul.msk.f32.gmra.mxu1 %vm2652_vm5, %v2251_v35  ;;  %v1188_v35 = vsel %vm1175_vm3, %v12648_v0, %v1162_v54 }
 0x2fa   :  { %12651 = vst [vmem:[#allocation54_spill] sm:$0xff] %v8793_v25  ;;  %v950_v38 = vsel %vm918_vm7, %v12243_v36, %v884_v29  ;;  %v1355_v31 = vmul.f32 %v12656_v57, %v1188_v35 }
 0x2fb   :  { %v1111_v30 = vmul.f32 %v12657_v22, %v950_v38  ;;  %v12659_v38 = vrot.slane %v8515_v6, 2 }
 0x2fc   :  { %6197 = vrot.lane.b32.xlu1 %v6196_v61, %s6444_s23  ;;  %2462 = vrot.lane.b32.xlu0 %v8385_v44, %s6444_s23  ;;  %v2090_v61 = vsel %vm2075_vm4, %v2059_v37, %v2060_v19  ;;  %v8808_v44 = vmax.f32 %v12654_v55, 0.0  ;;  %v12247_v37 = vrot.slane %v8793_v25, 6  ;;  %v6156_v55 = vpack.i.bf16 %v1355_v31, %v2028_v42 }
 0x2fd   :  { %6147 = vrot.lane.b32.xlu2 %v6146_v59, %s6444_s23  ;;  %v2252_v17 = vmul.f32 %v8361_v50, %v2090_v61  ;;  %v885_v50 = vrot.slane %v8027_v3, 5  ;;  %v2089_v31 = vsel %vm2075_vm4, %v2060_v19, %v2061_v21  ;;  %v1863_v19 = vsel %vm1850_vm2, %v1836_v26, %v12659_v38 }
 0x2fe   :  { %v8803_v39 = vpop.permute.xlu1 %6092  ;;  %v8805_v0 = vpop.permute.xlu0 %1073  ;;  %12655 = vst [vmem:[#allocation148_spill] sm:$0xff] %v8808_v44  ;;  %v1177_v22 = vsel %vm1175_vm3, %v12247_v37, %v12246_v56  ;;  %v12249_v57 = vrot.slane %v8808_v44, 2  ;;  %v12663_v56 = vld [vmem:[#allocation120_spill] sm:$0xff] }
 0x2ff   :  { %12653 = vst [vmem:[#allocation118_spill] sm:$0xff] %v8805_v0  ;;  %v6068_v59 = vpop.permute.xlu2 %6067  ;;  %v12248_v0 = vrot.slane %v8793_v25, 2  ;;  %v2029_v37 = vmul.f32 %v12663_v56, %v1863_v19  ;;  %v12667_v56 = vld [vmem:[#allocation129_spill] sm:$0xff] }
 0x300   :  { %v6069_v36 = vunpack.i.l.bf16 %v6068_v59  ;;  %v6070_v42 = vunpack.i.h.bf16 %v6068_v59  ;;  %v12665_v59 = vld [vmem:[#allocation138_spill] sm:$0xff] }
 0x301   :  { %5938 = vmatmul.msk.f32.gmra.mxu1 %vm2652_vm5, %v2252_v17 }
 0x302   :  { %v2653_v60 = vsel %vm2652_vm5, %v1111_v30, %v6069_v36  ;;  %v12658_v36 = vrot.slane %v8495_v48, 6  ;;  %v12662_v30 = vld [vmem:[#allocation59_spill] sm:$0xff] }
 0x303   :  { %2920 = vmatmul.f32.vlgmr.msrb.gmra.mxu3 %v2653_v60  ;;  %v1853_v60 = vsel %vm1850_vm2, %v12249_v57, %v12248_v0  ;;  %v2253_v0 = vmul.f32 %v8517_v4, %v2089_v31  ;;  %v949_v57 = vsel %vm918_vm7, %v884_v29, %v885_v50  ;;  %v2062_v4 = vrot.slane %v8515_v6, 3 }
 0x304   :  { %2484 = vrot.lane.b32.xlu1 %v8808_v44, %s6444_s23  ;;  %6157 = vrot.lane.b32.xlu0 %v6156_v55, %s6444_s23  ;;  %v1187_v35 = vsel %vm1175_vm3, %v1162_v54, %v12658_v36  ;;  %v1366_v55 = vmul.f32 %v12662_v30, %v1177_v22  ;;  %v1165_v36 = vrot.slane %v8622_v20, 6  ;;  %v1112_v26 = vmul.f32 %v8458_v7, %v949_v57 }
 0x305   :  { %2464 = vrot.lane.b32.xlu2 %v8388_v1, %s6444_s23  ;;  %v2039_v38 = vmul.f32 %v12665_v59, %v1853_v60  ;;  %v12666_v1 = vld [vmem:[#allocation47_spill] sm:$0xff]  ;;  %v886_v22 = vrot.slane %v12667_v56, 5  ;;  %v12668_v30 = vrot.slane %v8498_v8, 6  ;;  %v6074_v57 = vunpack.i.l.bf16 %v8677_v12 }
 0x306   :  { %v8848_v61 = vpop.permute.xlu1 %2442  ;;  %v8850_v17 = vpop.permute.xlu0 %1088  ;;  %v1356_v41 = vmul.f32 %v12666_v1, %v1187_v35  ;;  %v2654_v29 = vsel %vm2652_vm5, %v1112_v26, %v6070_v42  ;;  %v12669_v1 = vrot.slane %v8495_v48, 2  ;;  %v12670_v35 = vld [vmem:[#allocation55_spill] sm:$0xff]  ;;  %v1368_v12 = vrot.slane %v8038_v23, 7 }
 0x307   :  { %12660 = vst [vmem:[#allocation135_spill] sm:$0xff] %v8848_v61  ;;  %v8857_v54 = vpop.permute.xlu2 %2430  ;;  %v6211_v31 = vpack.i.bf16 %v1366_v55, %v2039_v38  ;;  %v1185_v7 = vsel %vm1175_vm3, %v12668_v30, %v1165_v36  ;;  %v12671_v55 = vld [vmem:[#allocation152_spill] sm:$0xff] }
 0x308   :  { %12661 = vst [vmem:[#allocation44_spill] sm:$0xff] %v8850_v17  ;;  %v1839_v17 = vrot.slane %v8498_v8, 2  ;;  %v6161_v19 = vpack.i.bf16 %v1356_v41, %v2029_v37  ;;  %v948_v41 = vsel %vm918_vm7, %v885_v50, %v886_v22  ;;  %v2088_v37 = vsel %vm2075_vm4, %v2061_v21, %v2062_v4  ;;  %v12675_v50 = vld [vmem:[#allocation16_spill] sm:$0xff] }
 0x309   :  { %12664 = vst [vmem:[#allocation147_spill] sm:$0xff] %v8857_v54  ;;  %5939 = vmatmul.msk.f32.gmra.mxu1 %vm2652_vm5, %v2253_v0  ;;  %v1358_v42 = vmul.f32 %v12670_v35, %v1185_v7  ;;  %v2254_v26 = vmul.f32 %v12671_v55, %v2088_v37  ;;  %v1113_v30 = vmul.f32 %v12675_v50, %v948_v41  ;;  %v2063_v21 = vrot.slane %v8495_v48, 3 }
 0x30a   :  { %v1861_v0 = vsel %vm1850_vm2, %v12669_v1, %v1839_v17 }
 0x30b   :  { %2923 = vmatmul.f32.gmra.mxu3 %v2654_v29  ;;  %v12254_v29 = vrot.slane %v12645_v52, 7  ;;  %v2655_v7 = vsel %vm2652_vm5, %v1113_v30, %v6074_v57  ;;  %v12677_v57 = vrot.slane %v8622_v20, 2  ;;  %v12681_v30 = vld [vmem:[#allocation50_spill] sm:$0xff] }
 0x30c   :  { %6212 = vrot.lane.b32.xlu1 %v6211_v31, %s6444_s23  ;;  %2468 = vrot.lane.b32.xlu0 %v8495_v48, %s6444_s23  ;;  %v12674_v31 = vld [vmem:[#allocation121_spill] sm:$0xff] }
 0x30d   :  { %6162 = vrot.lane.b32.xlu2 %v6161_v19, %s6444_s23  ;;  %v2031_v19 = vmul.f32 %v12674_v31, %v1861_v0  ;;  %v1432_v37 = vsel %vm1400_vm8, %v12254_v29, %v1368_v12  ;;  %v12676_v0 = vrot.slane %v8605_v58, 6  ;;  %v1860_v35 = vsel %vm1850_vm2, %v1839_v17, %v12677_v57 }
 0x30e   :  { %v8885_v60 = vpop.permute.xlu1 %6107  ;;  %v8891_v38 = vpop.permute.xlu0 %1103  ;;  %v1595_v17 = vrot.slane %v12667_v56, 1  ;;  %v887_v57 = vrot.slane %v8147_v15, 5  ;;  %v12684_v29 = vrot.slane %v8608_v43, 6 }
 0x30f   :  { %v8889_v59 = vpop.permute.xlu2 %2434  ;;  %12673 = vst [vmem:[#allocation119_spill] sm:$0xff] %v8891_v38  ;;  %v6171_v1 = vpack.i.bf16 %v1358_v42, %v2031_v19  ;;  %v1184_v41 = vsel %vm1175_vm3, %v1165_v36, %v12676_v0  ;;  %v2087_v42 = vsel %vm2075_vm4, %v2062_v4, %v2063_v21  ;;  %v1168_v0 = vrot.slane %v8723_v13, 6 }
 0x310   :  { %12672 = vst [vmem:[#allocation143_spill] sm:$0xff] %v8889_v59  ;;  %v2255_v19 = vmul.f32 %v8396_v24, %v2087_v42  ;;  %v1842_v24 = vrot.slane %v8608_v43, 2  ;;  %v2064_v42 = vrot.slane %v8498_v8, 3 }
 0x311   :  { %5940 = vmatmul.msk.f32.gmra.mxu1 %vm2652_vm5, %v2254_v26  ;;  %v12679_v26 = vld [vmem:[#allocation58_spill] sm:$0xff] }
 0x312   :  { %v1561_v31 = vmul.f32 %v12679_v26, %v1432_v37  ;;  %v12682_v37 = vld [vmem:[#allocation123_spill] sm:$0xff] }
 0x313   :  { %2926 = vmatmul.f32.gmra.mxu3 %v2655_v7  ;;  %v1359_v7 = vmul.f32 %v12681_v30, %v1184_v41  ;;  %v2032_v26 = vmul.f32 %v12682_v37, %v1860_v35  ;;  %v8941_v41 = vld [vmem:[%s12155_s7 + $0x108] sm:$0xff]  ;;  %v1182_v35 = vsel %vm1175_vm3, %v12684_v29, %v1168_v0 }
 0x314   :  { %2490 = vrot.lane.b32.xlu1 %v12645_v52, %s6444_s23  ;;  %6172 = vrot.lane.b32.xlu0 %v6171_v1, %s6444_s23  ;;  %v1369_v1 = vrot.slane %v8027_v3, 7  ;;  %12683 = vst [vmem:[#allocation13_spill] sm:$0xff] %v8941_v41 }
 0x315   :  { %2470 = vrot.lane.b32.xlu2 %v8498_v8, %s6444_s23  ;;  %v6176_v30 = vpack.i.bf16 %v1359_v7, %v2032_v26  ;;  %v2086_v7 = vsel %vm2075_vm4, %v2063_v21, %v2064_v42  ;;  %v12269_v8 = vrot.slane %v8147_v15, 1 }
 0x316   :  { %v8920_v55 = vpop.permute.xlu1 %2448  ;;  %v8926_v36 = vpop.permute.xlu0 %2428 }
 0x317   :  { %12678 = vst [vmem:[#allocation140_spill] sm:$0xff] %v8920_v55  ;;  %v8924_v50 = vpop.permute.xlu2 %6087  ;;  %v2685_v4 = vsel %vm2652_vm5, %v1561_v31, %v8926_v36  ;;  %v1431_v31 = vsel %vm1400_vm8, %v1368_v12, %v1369_v1  ;;  %v12686_v12 = vrot.slane %v8605_v58, 2  ;;  %v12691_v55 = vld [vmem:[#allocation93_spill] sm:$0xff] }
 0x318   :  { %12680 = vst [vmem:[#allocation52_spill] sm:$0xff] %v8926_v36  ;;  %3033 = vmatmul.f32.vlgmr.msrb.gmra.mxu2 %v2685_v4  ;;  %v12685_v4 = vrot.slane %v8027_v3, 1  ;;  %v12688_v3 = vld [vmem:[#allocation57_spill] sm:$0xff] }
 0x319   :  { %5941 = vmatmul.msk.f32.gmra.mxu1 %vm2652_vm5, %v2255_v19  ;;  %v947_v19 = vsel %vm918_vm7, %v886_v22, %v887_v57  ;;  %v1858_v29 = vsel %vm1850_vm2, %v12686_v12, %v1842_v24  ;;  %v12687_v22 = vld [vmem:[#allocation60_spill] sm:$0xff]  ;;  %v1361_v38 = vmul.f32 %v12688_v3, %v1182_v35  ;;  %v888_v35 = vrot.slane %v8113_v10, 5 }
 0x31a   :  { %v1655_v37 = vsel %vm1625_vm6, %v12685_v4, %v1595_v17  ;;  %v1562_v36 = vmul.f32 %v12687_v22, %v1431_v31  ;;  %v1370_v4 = vrot.slane %v12667_v56, 7  ;;  %v12692_v22 = vld [vmem:[#allocation124_spill] sm:$0xff] }
 0x31b   :  { %v1787_v49 = vmul.f32 %v12691_v55, %v1655_v37  ;;  %v2034_v3 = vmul.f32 %v12692_v22, %v1858_v29  ;;  %v1371_v29 = vrot.slane %v8147_v15, 7  ;;  %v12698_v22 = vld [vmem:[#allocation32_spill] sm:$0xff] }
 0x31c   :  { %2474 = vrot.lane.b32.xlu0 %v8605_v58, %s6444_s23  ;;  %3539 = vperm.xlu1 %6226, %v8941_v41   ;;  %v12690_v41 = vld [vmem:[#allocation14_spill] sm:$0xff]  ;;  %v2686_v31 = vsel %vm2652_vm5, %v1562_v36, %v8857_v54  ;;  %v1654_v36 = vsel %vm1625_vm6, %v1595_v17, %v12269_v8  ;;  %v1430_v37 = vsel %vm1400_vm8, %v1369_v1, %v1370_v4 }
 0x31d   :  { %6177 = vrot.lane.b32.xlu2 %v6176_v30, %s6444_s23  ;;  %v2256_v30 = vmul.f32 %v8583_v53, %v2086_v7  ;;  %v1114_v12 = vmul.f32 %v12690_v41, %v947_v19  ;;  %v8985_v53 = vld [vmem:[%s12155_s7 + $0x118] sm:$0xff]  ;;  %v2065_v41 = vrot.slane %v8622_v20, 3  ;;  %v6186_v19 = vpack.i.bf16 %v1361_v38, %v2034_v3 }
 0x31e   :  { %v8966_v26 = vpop.permute.xlu1 %6122  ;;  %v6078_v6 = vpop.permute.xlu0 %6077  ;;  %v12693_v7 = vrot.slane %v8710_v27, 6  ;;  %v12694_v38 = vld [vmem:[#allocation98_spill] sm:$0xff] }
 0x31f   :  { %v8973_v48 = vpop.permute.xlu2 %2440  ;;  %v6080_v21 = vunpack.i.h.bf16 %v6078_v6  ;;  %v6079_v33 = vunpack.i.l.bf16 %v6078_v6  ;;  %v1788_v17 = vmul.f32 %v12694_v38, %v1654_v36  ;;  %v2085_v1 = vsel %vm2075_vm4, %v2064_v42, %v2065_v41 }
 0x320   :  { %12689 = vst [vmem:[#allocation59_spill] sm:$0xff] %v8973_v48  ;;  %3036 = vmatmul.f32.gmra.mxu2 %v2686_v31  ;;  %v12697_v31 = vrot.slane %v8723_v13, 2  ;;  %v2257_v3 = vmul.f32 %v12698_v22, %v2085_v1  ;;  %v1429_v36 = vsel %vm1400_vm8, %v1370_v4, %v1371_v29  ;;  %v1171_v42 = vrot.slane %v8808_v44, 6  ;;  %v12701_v1 = vld [vmem:[#allocation125_spill] sm:$0xff] }
 0x321   :  { %5942 = vmatmul.msk.f32.gmra.mxu1 %vm2652_vm5, %v2256_v30  ;;  %v2656_v55 = vsel %vm2652_vm5, %v1114_v12, %v6079_v33  ;;  %v2718_v6 = vsel %vm2652_vm5, %v1787_v49, %v6080_v21  ;;  %v1181_v33 = vsel %vm1175_vm3, %v1168_v0, %v12693_v7  ;;  %v946_v49 = vsel %vm918_vm7, %v887_v57, %v888_v35  ;;  %v12696_v12 = vld [vmem:[#allocation66_spill] sm:$0xff]  ;;  %v12699_v57 = vld [vmem:[#allocation53_spill] sm:$0xff] }
 0x322   :  { %2929 = vmatmul.f32.gmra.mxu3 %v2656_v55  ;;  %3149 = vmatmul.f32.gmra.mxu0 %v2718_v6  ;;  %v1563_v21 = vmul.f32 %v12696_v12, %v1430_v37  ;;  %v1857_v0 = vsel %vm1850_vm2, %v1842_v24, %v12697_v31  ;;  %v12700_v12 = vld [vmem:[#allocation18_spill] sm:$0xff]  ;;  %v889_v24 = vrot.slane %v8103_v18, 5  ;;  %v1845_v4 = vrot.slane %v8693_v14, 2  ;;  %v9035_v22 = vld [vmem:[%s12155_s7 + $0x130] sm:$0xff] }
 0x323   :  { %v1115_v8 = vmul.f32 %v12700_v12, %v946_v49  ;;  %v2035_v31 = vmul.f32 %v12701_v1, %v1857_v0  ;;  %v12702_v0 = vrot.slane %v8693_v14, 6  ;;  %v1372_v1 = vrot.slane %v8113_v10, 7 }
 0x324   :  { %6187 = vrot.lane.b32.xlu0 %v6186_v19, %s6444_s23  ;;  %3549 = vperm.xlu1 %6226, %v8985_v53   ;;  %v1362_v19 = vmul.f32 %v12699_v57, %v1181_v33  ;;  %v2687_v37 = vsel %vm2652_vm5, %v1563_v21, %v8718_v9  ;;  %v1597_v33 = vrot.slane %v8113_v10, 1  ;;  %v2066_v21 = vrot.slane %v8605_v58, 3  ;;  %v12709_v10 = vld [vmem:[#allocation15_spill] sm:$0xff]  ;;  %v12711_v9 = vld [vmem:[#allocation126_spill] sm:$0xff] }
 0x325   :  { %2476 = vrot.lane.b32.xlu2 %v8608_v43, %s6444_s23  ;;  %v1179_v57 = vsel %vm1175_vm3, %v12702_v0, %v1171_v42 }
 0x326   :  { %v9010_v30 = vpop.permute.xlu1 %2454  ;;  %v6083_v6 = vpop.permute.xlu0 %6082 }
 0x327   :  { %12695 = vst [vmem:[#allocation120_spill] sm:$0xff] %v9010_v30  ;;  %v9018_v55 = vpop.permute.xlu2 %6102  ;;  %v6085_v7 = vunpack.i.h.bf16 %v6083_v6  ;;  %v6084_v38 = vunpack.i.l.bf16 %v6083_v6 }
 0x328   :  { %3039 = vmatmul.f32.gmra.mxu2 %v2687_v37  ;;  %v12703_v37 = vld [vmem:[#allocation62_spill] sm:$0xff] }
 0x329   :  { %5943 = vmatmul.msk.f32.gmra.mxu1 %vm2652_vm5, %v2257_v3  ;;  %v2657_v49 = vsel %vm2652_vm5, %v1115_v8, %v6085_v7  ;;  %v2719_v6 = vsel %vm2652_vm5, %v1788_v17, %v6084_v38  ;;  %v6191_v3 = vpack.i.bf16 %v1362_v19, %v2035_v31  ;;  %v1564_v12 = vmul.f32 %v12703_v37, %v1429_v36 }
 0x32a   :  { %2932 = vmatmul.f32.gmra.mxu3 %v2657_v49  ;;  %3152 = vmatmul.f32.gmra.mxu0 %v2719_v6  ;;  %v945_v8 = vsel %vm918_vm7, %v888_v35, %v889_v24  ;;  %v12704_v17 = vrot.slane %v8147_v15, 1  ;;  %v12705_v7 = vrot.slane %v8710_v27, 2  ;;  %v2084_v36 = vsel %vm2075_vm4, %v2065_v41, %v2066_v21  ;;  %v12706_v6 = vld [vmem:[#allocation61_spill] sm:$0xff]  ;;  %v12710_v41 = vld [vmem:[#allocation95_spill] sm:$0xff] }
 0x32b   :  { %v6090_v31 = vunpack.i.h.bf16 %v8924_v50  ;;  %v6089_v49 = vunpack.i.l.bf16 %v8924_v50  ;;  %v2258_v0 = vmul.f32 %v8456_v45, %v2084_v36  ;;  %v1116_v15 = vmul.f32 %v12709_v10, %v945_v8 }
 0x32c   :  { %2480 = vrot.lane.b32.xlu0 %v8710_v27, %s6444_s23  ;;  %3564 = vperm.xlu1 %6226, %v9035_v22   ;;  %v1653_v19 = vsel %vm1625_vm6, %v12704_v17, %v1597_v33  ;;  %v1855_v38 = vsel %vm1850_vm2, %v12705_v7, %v1845_v4  ;;  %v2688_v7 = vsel %vm2652_vm5, %v1564_v12, %v8889_v59  ;;  %v1598_v45 = vrot.slane %v8103_v18, 1 }
 0x32d   :  { %6192 = vrot.lane.b32.xlu2 %v6191_v3, %s6444_s23  ;;  %v1364_v3 = vmul.f32 %v12706_v6, %v1179_v57  ;;  %v1789_v56 = vmul.f32 %v12710_v41, %v1653_v19  ;;  %v2037_v54 = vmul.f32 %v12711_v9, %v1855_v38  ;;  %v1428_v50 = vsel %vm1400_vm8, %v1371_v29, %v1372_v1  ;;  %v9084_v57 = vld [vmem:[%s12155_s7 + $0x148] sm:$0xff]  ;;  %v9090_v38 = vpop.f32.mrf.mxu1 }
 0x32e   :  { %v9064_v35 = vpop.permute.xlu1 %6137  ;;  %v9070_v17 = vpop.permute.xlu0 %2438  ;;  %v2067_v12 = vrot.slane %v8608_v43, 3  ;;  %v2658_v10 = vsel %vm2652_vm5, %v1116_v15, %v6090_v31  ;;  %v890_v19 = vrot.slane %v8106_v34, 5  ;;  %v12712_v29 = vrot.slane %v8793_v25, 6  ;;  %v12713_v15 = vld [vmem:[#allocation68_spill] sm:$0xff] }
 0x32f   :  { %v9068_v37 = vpop.permute.xlu2 %2446  ;;  %12708 = vst [vmem:[#allocation47_spill] sm:$0xff] %v9070_v17  ;;  %v2720_v8 = vsel %vm2652_vm5, %v1789_v56, %v6089_v49  ;;  %v6201_v9 = vpack.i.bf16 %v1364_v3, %v2037_v54  ;;  %v1565_v54 = vmul.f32 %v12713_v15, %v1428_v50  ;;  %v1652_v56 = vsel %vm1625_vm6, %v1597_v33, %v1598_v45 }
 0x330   :  { %12707 = vst [vmem:[#allocation138_spill] sm:$0xff] %v9068_v37  ;;  %3042 = vmatmul.f32.gmra.mxu2 %v2688_v7  ;;  %v1178_v36 = vsel %vm1175_vm3, %v1171_v42, %v12712_v29  ;;  %v2083_v49 = vsel %vm2075_vm4, %v2066_v21, %v2067_v12  ;;  %v6095_v6 = vunpack.i.h.bf16 %v8803_v39  ;;  %v6094_v3 = vunpack.i.l.bf16 %v8803_v39  ;;  %v12716_v21 = vld [vmem:[#allocation56_spill] sm:$0xff]  ;;  %v12717_v29 = vld [vmem:[#allocation99_spill] sm:$0xff] }
 0x331   :  { %5944 = vmatmul.msk.f32.gmra.mxu1 %vm2652_vm5, %v2258_v0  ;;  %v12715_v0 = vrot.slane %v8808_v44, 2  ;;  %v2259_v41 = vmul.f32 %v8641_v11, %v2083_v49  ;;  %v944_v33 = vsel %vm918_vm7, %v889_v24, %v890_v19  ;;  %v2689_v39 = vsel %vm2652_vm5, %v1565_v54, %v8760_v63  ;;  %v12718_v11 = vld [vmem:[#allocation127_spill] sm:$0xff] }
 0x332   :  { %2935 = vmatmul.f32.gmra.mxu3 %v2658_v10  ;;  %3155 = vmatmul.f32.gmra.mxu0 %v2720_v8  ;;  %v1365_v8 = vmul.f32 %v12716_v21, %v1178_v36  ;;  %v1790_v15 = vmul.f32 %v12717_v29, %v1652_v56  ;;  %v1599_v31 = vrot.slane %v8106_v34, 1  ;;  %v891_v24 = vrot.slane %v8170_v46, 5 }
 0x333   :  { %v1854_v7 = vsel %vm1850_vm2, %v1845_v4, %v12715_v0  ;;  %v1848_v49 = vrot.slane %v8777_v16, 2  ;;  %v2068_v36 = vrot.slane %v8723_v13, 3  ;;  %v12719_v0 = vrot.slane %v8103_v18, 7 }
 0x334   :  { %6202 = vrot.lane.b32.xlu0 %v6201_v9, %s6444_s23  ;;  %3579 = vperm.xlu1 %6226, %v9084_v57   ;;  %v1117_v9 = vmul.f32 %v8512_v47, %v944_v33  ;;  %v2038_v4 = vmul.f32 %v12718_v11, %v1854_v7  ;;  %v9132_v47 = vld [vmem:[%s12155_s7 + $0x160] sm:$0xff]  ;;  %v2721_v56 = vsel %vm2652_vm5, %v1790_v15, %v6094_v3  ;;  %v12720_v33 = vrot.slane %v12645_v52, 6 }
 0x335   :  { %2482 = vrot.lane.b32.xlu2 %v8693_v14, %s6444_s23  ;;  %v1427_v7 = vsel %vm1400_vm8, %v1372_v1, %v12719_v0  ;;  %v12721_v21 = vrot.slane %v8777_v16, 6  ;;  %v12722_v1 = vld [vmem:[#allocation64_spill] sm:$0xff]  ;;  %v2082_v15 = vsel %vm2075_vm4, %v2067_v12, %v2068_v36  ;;  %v9162_v11 = vpop.f32.mrf.mxu1  ;;  %v1849_v13 = vrot.slane %v12645_v52, 2 }
 0x336   :  { %v9108_v42 = vpop.permute.xlu1 %2460  ;;  %v6098_v10 = vpop.permute.xlu0 %6097  ;;  %v2659_v54 = vsel %vm2652_vm5, %v1117_v9, %v6095_v6  ;;  %v1651_v6 = vsel %vm1625_vm6, %v1598_v45, %v1599_v31  ;;  %v1566_v3 = vmul.f32 %v12722_v1, %v1427_v7  ;;  %v12723_v9 = vrot.slane %v8793_v25, 2 }
 0x337   :  { %12714 = vst [vmem:[#allocation55_spill] sm:$0xff] %v9108_v42  ;;  %v9117_v50 = vpop.permute.xlu2 %6117  ;;  %v6100_v45 = vunpack.i.h.bf16 %v6098_v10  ;;  %v2260_v7 = vmul.f32 %v8307_v28, %v2082_v15  ;;  %v1374_v1 = vrot.slane %v8106_v34, 7  ;;  %v1600_v28 = vrot.slane %v8170_v46, 1 }
 0x338   :  { %3045 = vmatmul.f32.gmra.mxu2 %v2689_v39  ;;  %v1176_v39 = vsel %vm1175_vm3, %v12721_v21, %v12720_v33  ;;  %v1852_v29 = vsel %vm1850_vm2, %v12723_v9, %v1848_v49  ;;  %v12727_v33 = vld [vmem:[#allocation96_spill] sm:$0xff]  ;;  %v2690_v12 = vsel %vm2652_vm5, %v1566_v3, %v9070_v17  ;;  %v2069_v3 = vrot.slane %v8710_v27, 3  ;;  %v12736_v17 = vld [vmem:[#allocation97_spill] sm:$0xff] }
 0x339   :  { %5945 = vmatmul.msk.f32.gmra.mxu1 %vm2652_vm5, %v2259_v41  ;;  %v6206_v41 = vpack.i.bf16 %v1365_v8, %v2038_v4  ;;  %v943_v8 = vsel %vm918_vm7, %v890_v19, %v891_v24  ;;  %v6099_v4 = vunpack.i.l.bf16 %v6098_v10  ;;  %v1791_v21 = vmul.f32 %v12727_v33, %v1651_v6  ;;  %v12728_v9 = vld [vmem:[#allocation20_spill] sm:$0xff]  ;;  %v12729_v10 = vld [vmem:[#allocation130_spill] sm:$0xff] }
 0x33a   :  { %2938 = vmatmul.f32.gmra.mxu3 %v2659_v54  ;;  %3158 = vmatmul.f32.gmra.mxu0 %v2721_v56  ;;  %v12724_v56 = vld [vmem:[#allocation63_spill] sm:$0xff]  ;;  %v1118_v63 = vmul.f32 %v12728_v9, %v943_v8  ;;  %v2040_v59 = vmul.f32 %v12729_v10, %v1852_v29  ;;  %v9185_v6 = vld [vmem:[%s12155_s7 + $0x178] sm:$0xff]  ;;  %v1851_v33 = vsel %vm1850_vm2, %v1848_v49, %v1849_v13  ;;  %v12732_v9 = vld [vmem:[#allocation65_spill] sm:$0xff] }
 0x33b   :  { %v1367_v0 = vmul.f32 %v12724_v56, %v1176_v39  ;;  %v892_v39 = vrot.slane %v8160_v32, 5  ;;  %v2722_v29 = vsel %vm2652_vm5, %v1791_v21, %v6099_v4  ;;  %v12730_v56 = vrot.slane %v8103_v18, 7 }
 0x33c   :  { %2486 = vrot.lane.b32.xlu0 %v8793_v25, %s6444_s23  ;;  %3594 = vperm.xlu1 %6226, %v9132_v47   ;;  %v2660_v8 = vsel %vm2652_vm5, %v1118_v63, %v6100_v45  ;;  %v1650_v45 = vsel %vm1625_vm6, %v1599_v31, %v1600_v28  ;;  %v2081_v4 = vsel %vm2075_vm4, %v2068_v36, %v2069_v3  ;;  %v12733_v31 = vld [vmem:[#allocation133_spill] sm:$0xff] }
 0x33d   :  { %6207 = vrot.lane.b32.xlu2 %v6206_v41, %s6444_s23  ;;  %v6216_v15 = vpack.i.bf16 %v1367_v0, %v2040_v59  ;;  %v942_v59 = vsel %vm918_vm7, %v891_v24, %v892_v39  ;;  %v9210_v49 = vpop.f32.mrf.mxu1  ;;  %v6105_v0 = vunpack.i.h.bf16 %v9018_v55  ;;  %v1792_v27 = vmul.f32 %v12736_v17, %v1650_v45  ;;  %v9246_v45 = vld [vmem:[%s12155_s7 + $0x110] sm:$0xff] }
 0x33e   :  { %v9164_v54 = vpop.permute.xlu1 %6152  ;;  %v9170_v19 = vpop.permute.xlu0 %2444 }
 0x33f   :  { %v9168_v41 = vpop.permute.xlu2 %2452  ;;  %12726 = vst [vmem:[#allocation121_spill] sm:$0xff] %v9170_v19 }
 0x340   :  { %12725 = vst [vmem:[#allocation152_spill] sm:$0xff] %v9168_v41  ;;  %3048 = vmatmul.f32.gmra.mxu2 %v2690_v12  ;;  %v12731_v12 = vrot.slane %v8038_v23, 2 }
 0x341   :  { %5946 = vmatmul.msk.f32.gmra.mxu1 %vm2652_vm5, %v2260_v7  ;;  %v1426_v7 = vsel %vm1400_vm8, %v12730_v56, %v1374_v1  ;;  %v12734_v56 = vld [vmem:[#allocation141_spill] sm:$0xff] }
 0x342   :  { %2941 = vmatmul.f32.gmra.mxu3 %v2660_v8  ;;  %3161 = vmatmul.f32.gmra.mxu0 %v2722_v29  ;;  %v1882_v63 = vsel %vm1850_vm2, %v1849_v13, %v12731_v12  ;;  %v6104_v13 = vunpack.i.l.bf16 %v9018_v55  ;;  %v1567_v10 = vmul.f32 %v12732_v9, %v1426_v7  ;;  %v2261_v8 = vmul.f32 %v8510_v40, %v2081_v4  ;;  %v12735_v55 = vld [vmem:[#allocation17_spill] sm:$0xff]  ;;  %v9233_v40 = vld [vmem:[%s12155_s7 + $0x100] sm:$0xff] }
 0x343   :  { %v2042_v36 = vmul.f32 %v12734_v56, %v1882_v63  ;;  %v1375_v12 = vrot.slane %v8170_v46, 7  ;;  %v1119_v18 = vmul.f32 %v12735_v55, %v942_v59  ;;  %v1601_v7 = vrot.slane %v8160_v32, 1  ;;  %v12747_v46 = vld [vmem:[#allocation100_spill] sm:$0xff] }
 0x344   :  { %6217 = vrot.lane.b32.xlu0 %v6216_v15, %s6444_s23  ;;  %3609 = vperm.xlu1 %6226, %v9185_v6   ;;  %v2041_v15 = vmul.f32 %v12733_v31, %v1851_v33  ;;  %v2691_v34 = vsel %vm2652_vm5, %v1567_v10, %v8973_v48  ;;  %v2070_v33 = vrot.slane %v8693_v14, 3  ;;  %v2723_v4 = vsel %vm2652_vm5, %v1792_v27, %v6104_v13  ;;  %v12738_v13 = vld [vmem:[#allocation70_spill] sm:$0xff] }
 0x345   :  { %2488 = vrot.lane.b32.xlu2 %v8777_v16, %s6444_s23  ;;  %v2661_v63 = vsel %vm2652_vm5, %v1119_v18, %v6105_v0  ;;  %v893_v59 = vrot.slane %v8163_v51, 5  ;;  %v1425_v17 = vsel %vm1400_vm8, %v1374_v1, %v1375_v12  ;;  %v12737_v9 = vmov 1  }
 0x346   :  { %v9214_v21 = vpop.permute.xlu1 %2466  ;;  %v9220_v24 = vpop.permute.xlu0 %6112  ;;  %v1649_v18 = vsel %vm1625_vm6, %v1600_v28, %v1601_v7  ;;  %v2080_v27 = vsel %vm2075_vm4, %v2069_v3, %v2070_v33  ;;  %v6110_v1 = vunpack.i.h.bf16 %v8885_v60  ;;  %v6109_v0 = vunpack.i.l.bf16 %v8885_v60 }
 0x347   :  { %v9218_v29 = vpop.permute.xlu2 %6132  ;;  %v1568_v10 = vmul.f32 %v12738_v13, %v1425_v17  ;;  %v941_v31 = vsel %vm918_vm7, %v892_v39, %v893_v59  ;;  %v1376_v28 = vrot.slane %v8160_v32, 7  ;;  %v9267_v3 = vpop.f32.mrf.mxu1  ;;  %v9278_v39 = vld [vmem:[%s12155_s7 + $0x128] sm:$0xff]  ;;  %v2071_v17 = vrot.slane %v8808_v44, 3  ;;  %v12755_v44 = vld [vmem:[#allocation101_spill] sm:$0xff] }
 0x348   :  { %3051 = vmatmul.f32.gmra.mxu2 %v2691_v34  ;;  %v6221_v34 = vpack.i.bf16 %v2042_v36, %v2041_v15  ;;  %v1120_v36 = vmul.f32 %v8569_v5, %v941_v31  ;;  %v1602_v5 = vrot.slane %v8163_v51, 1  ;;  %v12743_v31 = vmov 2  }
 0x349   :  { %5947 = vmatmul.msk.f32.gmra.mxu1 %vm2652_vm5, %v2261_v8  ;;  %v2262_v8 = vmul.f32 %v8712_v2, %v2080_v27  ;;  %v2692_v60 = vsel %vm2652_vm5, %v1568_v10, %v8848_v61 }
 0x34a   :  { %2944 = vmatmul.f32.gmra.mxu3 %v2661_v63  ;;  %3164 = vmatmul.f32.gmra.mxu0 %v2723_v4  ;;  %v12741_v63 = vld [vmem:[#allocation103_spill] sm:$0xff]  ;;  %v12742_v4 = vld [vmem:[#allocation153_spill] sm:$0xff]  ;;  %v2662_v27 = vsel %vm2652_vm5, %v1120_v36, %v6110_v1  ;;  %v2079_v1 = vsel %vm2075_vm4, %v2070_v33, %v2071_v17  ;;  %v6114_v36 = vunpack.i.l.bf16 %v9220_v24  ;;  %v12746_v33 = vld [vmem:[#allocation22_spill] sm:$0xff] }
 0x34b   :  { %v1793_v2 = vmul.f32 %v12741_v63, %v1649_v18  ;;  %v1424_v18 = vsel %vm1400_vm8, %v1375_v12, %v1376_v28  ;;  %v12744_v12 = vld [vmem:[#allocation67_spill] sm:$0xff] }
 0x34c   :  { %3534 = vperm.xlu0 %6065, %v9233_v40   ;;  %6230 = vset.pattern.permute.xlu1 %v12737_v9  ;;  %v12745_v63 = vld [vmem:[#allocation155_spill] sm:$0xff] }
 0x34d   :  { %6222 = vrot.lane.b32.xlu2 %v6221_v34, %s6444_s23  ;;  %3669 = vperm.xlu1 %6230, %v9246_v45   ;;  %v894_v34 = vrot.slane %v12742_v4, 5  ;;  %v2724_v13 = vsel %vm2652_vm5, %v1793_v2, %v6109_v0  ;;  %v6115_v0 = vunpack.i.h.bf16 %v9220_v24  ;;  %v2263_v2 = vmul.f32 %v12745_v63, %v2079_v1  ;;  %v12748_v24 = vld [vmem:[#allocation150_spill] sm:$0xff] }
 0x34e   :  { %v9263_v56 = vpop.permute.xlu0 %2450  ;;  %v9269_v55 = vpop.permute.xlu1 %6167  ;;  %v895_v48 = vrot.slane %v12748_v24, 5  ;;  %v1603_v1 = vrot.slane %v12742_v4, 1 }
 0x34f   :  { %v9261_v15 = vpop.permute.xlu2 %2458  ;;  %12740 = vst [vmem:[#allocation58_spill] sm:$0xff] %v9263_v56  ;;  %v940_v10 = vsel %vm918_vm7, %v893_v59, %v894_v34  ;;  %v9319_v63 = vpop.f32.mrf.mxu1 }
 0x350   :  { %12739 = vst [vmem:[#allocation16_spill] sm:$0xff] %v9261_v15  ;;  %3054 = vmatmul.f32.gmra.mxu2 %v2692_v60  ;;  %v1569_v60 = vmul.f32 %v12744_v12, %v1424_v18  ;;  %v1121_v32 = vmul.f32 %v12746_v33, %v940_v10  ;;  %v9315_v18 = vld [vmem:[%s12155_s7 + $0x140] sm:$0xff]  ;;  %v2072_v12 = vrot.slane %v8793_v25, 3  ;;  %v12751_v33 = vld [vmem:[#allocation69_spill] sm:$0xff] }
 0x351   :  { %5948 = vmatmul.msk.f32.gmra.mxu1 %vm2652_vm5, %v2262_v8  ;;  %v1648_v8 = vsel %vm1625_vm6, %v1601_v7, %v1602_v5  ;;  %v1377_v7 = vrot.slane %v8163_v51, 7  ;;  %12749 = vst [vmem:[#allocation50_spill] sm:$0xff] %v9319_v63 }
 0x352   :  { %2947 = vmatmul.f32.gmra.mxu3 %v2662_v27  ;;  %3167 = vmatmul.f32.gmra.mxu0 %v2724_v13  ;;  %v2693_v13 = vsel %vm2652_vm5, %v1569_v60, %v9170_v19  ;;  %v1794_v61 = vmul.f32 %v12747_v46, %v1648_v8  ;;  %v2663_v46 = vsel %vm2652_vm5, %v1121_v32, %v6115_v0  ;;  %v9328_v8 = vld [vmem:[%s12155_s7 + $0x120] sm:$0xff]  ;;  %v6120_v0 = vunpack.i.h.bf16 %v9117_v50 }
 0x353   :  { %v1647_v32 = vsel %vm1625_vm6, %v1602_v5, %v1603_v1 }
 0x354   :  { %3559 = vperm.xlu0 %6065, %v9278_v39   ;;  %v2725_v10 = vsel %vm2652_vm5, %v1794_v61, %v6114_v36  ;;  %v2078_v61 = vsel %vm2075_vm4, %v2071_v17, %v2072_v12  ;;  %v6119_v36 = vunpack.i.l.bf16 %v9117_v50  ;;  %v12754_v17 = vld [vmem:[#allocation19_spill] sm:$0xff]  ;;  %v1795_v14 = vmul.f32 %v12755_v44, %v1647_v32  ;;  %v9358_v50 = vld [vmem:[%s12155_s7 + $0x158] sm:$0xff] }
 0x355   :  { %3544 = vperm.xlu2 %6227, %v9246_v45   ;;  %6231 = vset.pattern.permute.xlu1 %v12743_v31  ;;  %v9367_v44 = vld [vmem:[%s12155_s7 + $0x138] sm:$0xff] }
 0x356   :  { %3773 = vperm.xlu1 %6231, %v9233_v40   ;;  %v9303_v59 = vpop.permute.xlu0 %6127  ;;  %v9321_v60 = vpop.permute.xlu1 %2472 }
 0x357   :  { %v9301_v27 = vpop.permute.xlu2 %6147  ;;  %12750 = vst [vmem:[#allocation123_spill] sm:$0xff] %v9321_v60  ;;  %v2074_v60 = vrot.slane %v12645_v52, 3 }
 0x358   :  { %3057 = vmatmul.f32.gmra.mxu2 %v2693_v13  ;;  %v939_v13 = vsel %vm918_vm7, %v894_v34, %v895_v48  ;;  %v1378_v34 = vrot.slane %v12742_v4, 7 }
 0x359   :  { %5949 = vmatmul.msk.f32.gmra.mxu1 %vm2652_vm5, %v2263_v2  ;;  %v1423_v2 = vsel %vm1400_vm8, %v1376_v28, %v1377_v7  ;;  %v12752_v28 = vld [vmem:[#allocation43_spill] sm:$0xff]  ;;  %v1122_v25 = vmul.f32 %v12754_v17, %v939_v13  ;;  %v12760_v17 = vld [vmem:[#allocation132_spill] sm:$0xff] }
 0x35a   :  { %2950 = vmatmul.f32.gmra.mxu3 %v2663_v46  ;;  %3170 = vmatmul.f32.gmra.mxu0 %v2725_v10  ;;  %v1570_v46 = vmul.f32 %v12751_v33, %v1423_v2  ;;  %v2264_v10 = vmul.f32 %v12752_v28, %v2078_v61  ;;  %v2073_v2 = vrot.slane %v8777_v16, 3  ;;  %v2726_v33 = vsel %vm2652_vm5, %v1795_v14, %v6119_v36  ;;  %v12756_v13 = vld [vmem:[#allocation151_spill] sm:$0xff]  ;;  %v9372_v28 = vpop.f32.mrf.mxu1 }
 0x35b   :  { %v2664_v61 = vsel %vm2652_vm5, %v1122_v25, %v6120_v0  ;;  %v896_v32 = vrot.slane %v12756_v13, 5  ;;  %12757 = vst [vmem:[#allocation57_spill] sm:$0xff] %v9372_v28  ;;  %v6125_v0 = vunpack.i.h.bf16 %v8966_v26  ;;  %v6124_v36 = vunpack.i.l.bf16 %v8966_v26  ;;  %v12762_v26 = vld [vmem:[#allocation140_spill] sm:$0xff] }
 0x35c   :  { %3574 = vperm.xlu0 %6065, %v9315_v18   ;;  %v2694_v5 = vsel %vm2652_vm5, %v1570_v46, %v9068_v37  ;;  %v1422_v46 = vsel %vm1400_vm8, %v1377_v7, %v1378_v34  ;;  %v2077_v25 = vsel %vm2075_vm4, %v2072_v12, %v2073_v2  ;;  %v12761_v12 = vld [vmem:[#allocation115_spill] sm:$0xff] }
 0x35d   :  { %3554 = vperm.xlu2 %6227, %v9328_v8  }
 0x35e   :  { %3781 = vperm.xlu1 %6231, %v9246_v45   ;;  %v9347_v19 = vpop.permute.xlu0 %2456  ;;  %v1604_v45 = vrot.slane %v12748_v24, 1 }
 0x35f   :  { %v9345_v51 = vpop.permute.xlu2 %2464  ;;  %12753 = vst [vmem:[#allocation60_spill] sm:$0xff] %v9347_v19 }
 0x360   :  { %3060 = vmatmul.f32.gmra.mxu2 %v2694_v5  ;;  %v1646_v14 = vsel %vm1625_vm6, %v1603_v1, %v1604_v45  ;;  %v12759_v5 = vld [vmem:[#allocation74_spill] sm:$0xff]  ;;  %v1379_v1 = vrot.slane %v12748_v24, 7  ;;  %v1605_v24 = vrot.slane %v12756_v13, 1 }
 0x361   :  { %5950 = vmatmul.msk.f32.gmra.mxu1 %vm2652_vm5, %v2264_v10  ;;  %v9374_v10 = vpop.permute.xlu1 %6182  ;;  %v1571_v7 = vmul.f32 %v12759_v5, %v1422_v46  ;;  %v12763_v5 = vld [vmem:[#allocation11_spill] sm:$0xff] }
 0x362   :  { %2953 = vmatmul.f32.gmra.mxu3 %v2664_v61  ;;  %3173 = vmatmul.f32.gmra.mxu0 %v2726_v33  ;;  %12758 = vst [vmem:[#allocation14_spill] sm:$0xff] %v9374_v10  ;;  %v2265_v61 = vmul.f32 %v12760_v17, %v2077_v25  ;;  %v938_v33 = vsel %vm918_vm7, %v895_v48, %v896_v32  ;;  %v9403_v48 = vld [vmem:[%s12155_s7 + $0x170] sm:$0xff]  ;;  %v12764_v25 = vld [vmem:[#allocation154_spill] sm:$0xff] }
 0x363   :  { %v1123_v16 = vmul.f32 %v12761_v12, %v938_v33  ;;  %v2695_v46 = vsel %vm2652_vm5, %v1571_v7, %v12762_v26  ;;  %v1796_v28 = vmul.f32 %v12763_v5, %v1646_v14  ;;  %v897_v17 = vrot.slane %v12764_v25, 5  ;;  %v9413_v14 = vld [vmem:[%s12155_s7 + $0x150] sm:$0xff]  ;;  %v12767_v5 = vld [vmem:[#allocation71_spill] sm:$0xff] }
 0x364   :  { %3589 = vperm.xlu0 %6065, %v9358_v50  }
 0x365   :  { %3569 = vperm.xlu2 %6227, %v9367_v44   ;;  %v2665_v33 = vsel %vm2652_vm5, %v1123_v16, %v6125_v0  ;;  %v2727_v7 = vsel %vm2652_vm5, %v1796_v28, %v6124_v36  ;;  %v937_v12 = vsel %vm918_vm7, %v896_v32, %v897_v17  ;;  %v1645_v16 = vsel %vm1625_vm6, %v1604_v45, %v1605_v24  ;;  %v9425_v0 = vpop.f32.mrf.mxu1 }
 0x366   :  { %6233 = vset.pattern.permute.xlu1 %v12737_v9  ;;  %v9391_v37 = vpop.permute.xlu0 %6142  ;;  %v2076_v28 = vsel %vm2075_vm4, %v2073_v2, %v2074_v60  ;;  %12765 = vst [vmem:[#allocation93_spill] sm:$0xff] %v9425_v0  ;;  %v6130_v36 = vunpack.i.h.bf16 %v9303_v59  ;;  %v1380_v45 = vrot.slane %v12756_v13, 7  ;;  %v12769_v0 = vld [vmem:[#allocation24_spill] sm:$0xff] }
 0x367   :  { %v9389_v4 = vpop.permute.xlu2 %6162  ;;  %3681 = vperm.xlu1 %6233, %v9278_v39   ;;  %v1124_v10 = vmul.f32 %v12769_v0, %v937_v12  ;;  %v12777_v13 = vld [vmem:[#allocation12_spill] sm:$0xff] }
 0x368   :  { %3063 = vmatmul.f32.gmra.mxu2 %v2695_v46  ;;  %v6129_v46 = vunpack.i.l.bf16 %v9303_v59  ;;  %v12770_v59 = vld [vmem:[#allocation102_spill] sm:$0xff]  ;;  %v1420_v12 = vsel %vm1400_vm8, %v1379_v1, %v1380_v45 }
 0x369   :  { %5951 = vmatmul.msk.f32.gmra.mxu1 %vm2652_vm5, %v2265_v61  ;;  %v1421_v61 = vsel %vm1400_vm8, %v1378_v34, %v1379_v1  ;;  %v9429_v34 = vpop.permute.xlu1 %2478  ;;  %v1797_v43 = vmul.f32 %v12770_v59, %v1645_v16  ;;  %v12773_v16 = vrot.slane %v8038_v23, 3  ;;  %v6134_v1 = vunpack.i.l.bf16 %v9218_v29 }
 0x36a   :  { %2956 = vmatmul.f32.gmra.mxu3 %v2665_v33  ;;  %3176 = vmatmul.f32.gmra.mxu0 %v2727_v7  ;;  %12766 = vst [vmem:[#allocation124_spill] sm:$0xff] %v9429_v34  ;;  %v1572_v33 = vmul.f32 %v12767_v5, %v1421_v61  ;;  %v12768_v7 = vld [vmem:[#allocation157_spill] sm:$0xff]  ;;  %v12771_v34 = vld [vmem:[#allocation34_spill] sm:$0xff]  ;;  %v1606_v61 = vrot.slane %v12764_v25, 1 }
 0x36b   :  { %v2266_v26 = vmul.f32 %v12768_v7, %v2076_v28  ;;  %v898_v63 = vrot.slane %v12771_v34, 5  ;;  %v2666_v28 = vsel %vm2652_vm5, %v1124_v10, %v6130_v36  ;;  %v2728_v5 = vsel %vm2652_vm5, %v1797_v43, %v6129_v46  ;;  %v9451_v7 = vld [vmem:[%s12155_s7 + $0x168] sm:$0xff] }
 0x36c   :  { %3604 = vperm.xlu0 %6065, %v9403_v48   ;;  %v2696_v2 = vsel %vm2652_vm5, %v1572_v33, %v9263_v56  ;;  %v1644_v43 = vsel %vm1625_vm6, %v1605_v24, %v1606_v61  ;;  %v2107_v0 = vsel %vm2075_vm4, %v2074_v60, %v12773_v16  ;;  %v6135_v36 = vunpack.i.h.bf16 %v9218_v29  ;;  %v12774_v46 = vld [vmem:[#allocation72_spill] sm:$0xff]  ;;  %v12776_v60 = vld [vmem:[#allocation21_spill] sm:$0xff] }
 0x36d   :  { %3584 = vperm.xlu2 %6227, %v9413_v14   ;;  %v936_v10 = vsel %vm918_vm7, %v897_v17, %v898_v63  ;;  %v1573_v33 = vmul.f32 %v12774_v46, %v1420_v12  ;;  %v1381_v17 = vrot.slane %v12764_v25, 7  ;;  %v1798_v56 = vmul.f32 %v12777_v13, %v1644_v43  ;;  %v9481_v29 = vpop.f32.mrf.mxu1 }
 0x36e   :  { %v9435_v32 = vpop.permute.xlu0 %2462  ;;  %v1125_v16 = vmul.f32 %v12776_v60, %v936_v10  ;;  %v6140_v43 = vunpack.i.h.bf16 %v9064_v35  ;;  %v1382_v60 = vrot.slane %v12771_v34, 7 }
 0x36f   :  { %v9433_v52 = vpop.permute.xlu2 %2470  ;;  %3685 = vperm.xlu1 %6233, %v9035_v22   ;;  %v2697_v24 = vsel %vm2652_vm5, %v1573_v33, %v9168_v41  ;;  %v12778_v33 = vld [vmem:[#allocation36_spill] sm:$0xff]  ;;  %v1419_v13 = vsel %vm1400_vm8, %v1380_v45, %v1381_v17 }
 0x370   :  { %3066 = vmatmul.f32.gmra.mxu2 %v2696_v2  ;;  %v12775_v2 = vld [vmem:[#allocation40_spill] sm:$0xff]  ;;  %v2667_v46 = vsel %vm2652_vm5, %v1125_v16, %v6135_v36  ;;  %v899_v25 = vrot.slane %v12778_v33, 5  ;;  %v6139_v36 = vunpack.i.l.bf16 %v9064_v35  ;;  %v12781_v16 = vld [vmem:[#allocation122_spill] sm:$0xff] }
 0x371   :  { %5952 = vmatmul.msk.f32.gmra.mxu1 %vm2652_vm5, %v2266_v26  ;;  %v12772_v26 = vld [vmem:[#allocation13_spill] sm:$0xff]  ;;  %v2267_v59 = vmul.f32 %v12775_v2, %v2107_v0  ;;  %v9483_v12 = vpop.permute.xlu1 %6197  ;;  %v1607_v0 = vrot.slane %v12771_v34, 1  ;;  %v2729_v2 = vsel %vm2652_vm5, %v1798_v56, %v6134_v1  ;;  %v12779_v56 = vld [vmem:[#allocation76_spill] sm:$0xff] }
 0x372   :  { %2959 = vmatmul.f32.gmra.mxu3 %v2666_v28  ;;  %3179 = vmatmul.f32.gmra.mxu0 %v2728_v5  ;;  %v1574_v1 = vmul.f32 %v12779_v56, %v1419_v13 }
 0x373   :  { %v1643_v10 = vsel %vm1625_vm6, %v1606_v61, %v1607_v0 }
 0x374   :  { %6229 = vset.pattern.permute.xlu0 %v12737_v9  ;;  %v2698_v61 = vsel %vm2652_vm5, %v1574_v1, %v9010_v30  ;;  %v1418_v1 = vsel %vm1400_vm8, %v1381_v17, %v1382_v60  ;;  %v1383_v17 = vrot.slane %v12778_v33, 7 }
 0x375   :  { %3599 = vperm.xlu2 %6227, %v9451_v7   ;;  %3665 = vperm.xlu0 %6229, %v12772_v26  }
 0x376   :  { %v9472_v5 = vpop.permute.xlu0 %6157 }
 0x377   :  { %v9470_v28 = vpop.permute.xlu2 %6177  ;;  %6234 = vset.pattern.permute.xlu1 %v12743_v31 }
 0x378   :  { %3801 = vperm.xlu1 %6234, %v9367_v44   ;;  %3069 = vmatmul.f32.gmra.mxu2 %v2697_v24 }
 0x379   :  { %5953 = vmatmul.msk.f32.gmra.mxu1 %vm2652_vm5, %v2267_v59  ;;  %v935_v59 = vsel %vm918_vm7, %v898_v63, %v899_v25  ;;  %v1608_v63 = vrot.slane %v12778_v33, 1  ;;  %v9516_v23 = vpop.permute.xlu1 %2484 }
 0x37a   :  { %2962 = vmatmul.f32.gmra.mxu3 %v2667_v46  ;;  %3182 = vmatmul.f32.gmra.mxu0 %v2729_v2  ;;  %v1126_v46 = vmul.f32 %v12781_v16, %v935_v59  ;;  %v12782_v2 = vld [vmem:[#allocation106_spill] sm:$0xff]  ;;  %v6145_v16 = vunpack.i.h.bf16 %v9391_v37 }
 0x37b   :  { %v1799_v35 = vmul.f32 %v12782_v2, %v1643_v10  ;;  %v1642_v59 = vsel %vm1625_vm6, %v1607_v0, %v1608_v63  ;;  %v12786_v0 = vld [vmem:[#allocation104_spill] sm:$0xff] }
 0x37c   :  { %v2668_v56 = vsel %vm2652_vm5, %v1126_v46, %v6140_v43  ;;  %v6144_v43 = vunpack.i.l.bf16 %v9391_v37  ;;  %v12787_v37 = vld [vmem:[#allocation38_spill] sm:$0xff] }
 0x37d   :  { %6228 = vset.pattern.permute.xlu2 %v12737_v9  ;;  %3677 = vperm.xlu0 %6229, %v9328_v8   ;;  %v2730_v41 = vsel %vm2652_vm5, %v1799_v35, %v6139_v36  ;;  %v12784_v36 = vld [vmem:[#allocation73_spill] sm:$0xff]  ;;  %v1800_v35 = vmul.f32 %v12786_v0, %v1642_v59  ;;  %v12790_v0 = vld [vmem:[#allocation10_spill] sm:$0xff] }
 0x37e   :  { %3661 = vperm.xlu2 %6228, %v9233_v40   ;;  %v9504_v45 = vpop.permute.xlu0 %2468  ;;  %v12783_v40 = vld [vmem:[#allocation158_spill] sm:$0xff]  ;;  %v1575_v46 = vmul.f32 %v12784_v36, %v1418_v1 }
 0x37f   :  { %v9502_v24 = vpop.permute.xlu2 %2476  ;;  %v900_v13 = vrot.slane %v12783_v40, 5  ;;  %v1609_v1 = vrot.slane %v12783_v40, 1  ;;  %v2731_v34 = vsel %vm2652_vm5, %v1800_v35, %v6144_v43 }
 0x380   :  { %12780 = vst [vmem:[#allocation98_spill] sm:$0xff] %v9502_v24  ;;  %3805 = vperm.xlu1 %6234, %v9315_v18   ;;  %3072 = vmatmul.f32.gmra.mxu2 %v2698_v61 }
 0x381   :  { %v934_v10 = vsel %vm918_vm7, %v899_v25, %v900_v13  ;;  %v12785_v25 = vld [vmem:[#allocation26_spill] sm:$0xff]  ;;  %v9546_v59 = vpop.permute.xlu1 %6212 }
 0x382   :  { %2965 = vmatmul.f32.gmra.mxu3 %v2668_v56  ;;  %3185 = vmatmul.f32.gmra.mxu0 %v2730_v41  ;;  %v1127_v2 = vmul.f32 %v12785_v25, %v934_v10  ;;  %v901_v56 = vrot.slane %v12787_v37, 5  ;;  %v1417_v10 = vsel %vm1400_vm8, %v1382_v60, %v1383_v17  ;;  %v6150_v25 = vunpack.i.h.bf16 %v9301_v27 }
 0x384   :  { %v2669_v33 = vsel %vm2652_vm5, %v1127_v2, %v6145_v16  ;;  %v6149_v16 = vunpack.i.l.bf16 %v9301_v27  ;;  %v1610_v27 = vrot.slane %v12787_v37, 1 }
 0x385   :  { %3689 = vperm.xlu0 %6229, %v9367_v44   ;;  %v2699_v44 = vsel %vm2652_vm5, %v1575_v46, %v9347_v19  ;;  %v933_v46 = vsel %vm918_vm7, %v900_v13, %v901_v56 }
 0x386   :  { %3673 = vperm.xlu2 %6228, %v8985_v53   ;;  %v9532_v61 = vpop.permute.xlu0 %6172  ;;  %v2921_v36 = vpop.f32.mrf.mxu3 }
 0x387   :  { %v9529_v41 = vpop.permute.xlu2 %6192 }
 0x388   :  { %6236 = vset.pattern.permute.xlu1 %v12737_v9  ;;  %3075 = vmatmul.f32.gmra.mxu2 %v2699_v44  ;;  %v1641_v44 = vsel %vm1625_vm6, %v1608_v63, %v1609_v1  ;;  %v12789_v63 = vld [vmem:[#allocation23_spill] sm:$0xff] }
 0x389   :  { %3705 = vperm.xlu1 %6236, %v9358_v50   ;;  %v1128_v2 = vmul.f32 %v12789_v63, %v933_v46  ;;  %v1801_v35 = vmul.f32 %v12790_v0, %v1641_v44  ;;  %v1640_v44 = vsel %vm1625_vm6, %v1609_v1, %v1610_v27  ;;  %v9586_v0 = vld [vmem:[%s12161_s6] ss:$0 sm:$0xff]  ;;  %v1385_v1 = vrot.slane %v12787_v37, 7 }
 0x38a   :  { %2968 = vmatmul.f32.gmra.mxu3 %v2669_v33  ;;  %3188 = vmatmul.f32.gmra.mxu0 %v2731_v34  ;;  %v12788_v34 = vld [vmem:[#allocation75_spill] sm:$0xff] }
 0x38b   :  { %v1576_v33 = vmul.f32 %v12788_v34, %v1417_v10  ;;  %v2670_v10 = vsel %vm2652_vm5, %v1128_v2, %v6150_v25  ;;  %v12791_v34 = vld [vmem:[#allocation156_spill] sm:$0xff]  ;;  %v6154_v25 = vunpack.i.l.bf16 %v9164_v54 }
 0x38c   :  { %v1611_v30 = vrot.slane %v12791_v34, 1 }
 0x38d   :  { %3693 = vperm.xlu0 %6229, %v9315_v18   ;;  %v1384_v18 = vrot.slane %v12783_v40, 7  ;;  %v2700_v13 = vsel %vm2652_vm5, %v1576_v33, %v9261_v15  ;;  %v902_v40 = vrot.slane %v12791_v34, 5  ;;  %v12796_v15 = vld [vmem:[#allocation39_spill] sm:$0xff] }
 0x38e   :  { %6232 = vset.pattern.permute.xlu2 %v12743_v31  ;;  %v9561_v60 = vpop.permute.xlu0 %2474  ;;  %v2924_v33 = vpop.f32.mrf.mxu3  ;;  %v903_v19 = vrot.slane %v12796_v15, 5 }
 0x38f   :  { %v9557_v43 = vpop.permute.xlu2 %2482  ;;  %3777 = vperm.xlu2 %6232, %v12772_v26   ;;  %v2732_v26 = vsel %vm2652_vm5, %v1801_v35, %v6149_v16  ;;  %v1416_v46 = vsel %vm1400_vm8, %v1383_v17, %v1384_v18  ;;  %v12792_v16 = vld [vmem:[#allocation80_spill] sm:$0xff]  ;;  %v932_v2 = vsel %vm918_vm7, %v901_v56, %v902_v40  ;;  %v9588_v17 = vpop.permute.xlu1 %2490  ;;  %v12794_v35 = vld [vmem:[#allocation91_spill] sm:$0xff] }
 0x390   :  { %3078 = vmatmul.f32.gmra.mxu2 %v2700_v13  ;;  %v6155_v13 = vunpack.i.h.bf16 %v9164_v54  ;;  %v1577_v63 = vmul.f32 %v12792_v16, %v1416_v46  ;;  %12793 = vst [vmem:[#allocation66_spill] sm:$0xff] %v9588_v17  ;;  %v1129_v54 = vmul.f32 %v12794_v35, %v932_v2  ;;  %v12795_v46 = vld [vmem:[#allocation8_spill] sm:$0xff]  ;;  %v2922_v2 = vadd.f32 %v9586_v0, %v2921_v36 }
 0x391   :  { %6239 = vset.pattern.permute.xlu1 %v12743_v31  ;;  %v1802_v16 = vmul.f32 %v12795_v46, %v1640_v44 }
 0x392   :  { %3821 = vperm.xlu1 %6239, %v9132_v47   ;;  %2971 = vmatmul.f32.gmra.mxu3 %v2670_v10  ;;  %v3147_v10 = vpop.f32.mrf.mxu0  ;;  %v2701_v56 = vsel %vm2652_vm5, %v1577_v63, %v9108_v42  ;;  %v2671_v17 = vsel %vm2652_vm5, %v1129_v54, %v6155_v13  ;;  %v1415_v63 = vsel %vm1400_vm8, %v1384_v18, %v1385_v1  ;;  %v6159_v54 = vunpack.i.l.bf16 %v9472_v5 }
 0x393   :  { %3191 = vmatmul.f32.gmra.mxu0 %v2732_v26  ;;  %v1639_v13 = vsel %vm1625_vm6, %v1610_v27, %v1611_v30 }
 0x395   :  { %3709 = vperm.xlu0 %6229, %v9132_v47  }
 0x396   :  { %v9595_v26 = vpop.permute.xlu0 %6187  ;;  %v2927_v36 = vpop.f32.mrf.mxu3 }
 0x397   :  { %v9590_v47 = vpop.permute.xlu2 %6207  ;;  %3785 = vperm.xlu2 %6232, %v8985_v53   ;;  %v2733_v53 = vsel %vm2652_vm5, %v1802_v16, %v6154_v25  ;;  %v6160_v25 = vunpack.i.h.bf16 %v9472_v5  ;;  %v9617_v18 = vpop.permute.xlu1 %3539 }
 0x398   :  { %3081 = vmatmul.f32.gmra.mxu2 %v2701_v56  ;;  %v931_v56 = vsel %vm918_vm7, %v902_v40, %v903_v19  ;;  %12798 = vst [vmem:[#allocation32_spill] sm:$0xff] %v9617_v18  ;;  %v1386_v40 = vrot.slane %v12791_v34, 7 }
 0x39a   :  { %3825 = vperm.xlu1 %6239, %v9451_v7   ;;  %2974 = vmatmul.f32.gmra.mxu3 %v2671_v17  ;;  %v12797_v17 = vld [vmem:[#allocation77_spill] sm:$0xff] }
 0x39b   :  { %3194 = vmatmul.f32.gmra.mxu0 %v2733_v53  ;;  %v3034_v35 = vpop.f32.mrf.mxu2  ;;  %v1578_v46 = vmul.f32 %v12797_v17, %v1415_v63  ;;  %v12803_v63 = vld [vmem:[#allocation41_spill] sm:$0xff] }
 0x39c   :  { %v3035_v44 = vadd.f32 %v3034_v35, %v2922_v2  ;;  %v12801_v35 = vld [vmem:[#allocation28_spill] sm:$0xff]  ;;  %v904_v17 = vrot.slane %v12803_v63, 5 }
 0x39d   :  { %6238 = vset.pattern.permute.xlu0 %v12743_v31  ;;  %v2702_v5 = vsel %vm2652_vm5, %v1578_v46, %v9435_v32  ;;  %v1130_v37 = vmul.f32 %v12801_v35, %v931_v56  ;;  %v2925_v46 = vadd.f32 %v9586_v0, %v2924_v33  ;;  %v1414_v56 = vsel %vm1400_vm8, %v1385_v1, %v1386_v40  ;;  %v12805_v35 = vld [vmem:[#allocation25_spill] sm:$0xff] }
 0x39e   :  { %3789 = vperm.xlu0 %6238, %v9328_v8   ;;  %v3148_v16 = vadd.f32 %v3147_v10, %v3035_v44  ;;  %v9623_v2 = vpop.permute.xlu0 %2480  ;;  %v12802_v8 = vld [vmem:[#allocation105_spill] sm:$0xff]  ;;  %v1612_v44 = vrot.slane %v12796_v15, 1  ;;  %v6165_v33 = vunpack.i.h.bf16 %v9389_v4 }
 0x39f   :  { %v9619_v53 = vpop.permute.xlu2 %2488  ;;  %3793 = vperm.xlu2 %6232, %v9278_v39   ;;  %12800 = vst [vmem:[#allocation18_spill] sm:$0xff] %v9623_v2  ;;  %v3150_v27 = vpop.f32.mrf.mxu0  ;;  %v1803_v42 = vmul.f32 %v12802_v8, %v1639_v13  ;;  %v2672_v39 = vsel %vm2652_vm5, %v1130_v37, %v6160_v25  ;;  %v930_v37 = vsel %vm918_vm7, %v903_v19, %v904_v17  ;;  %v6164_v25 = vunpack.i.l.bf16 %v9389_v4  ;;  %v12806_v8 = vld [vmem:[#allocation9_spill] sm:$0xff] }
 0x3a0   :  { %12799 = vst [vmem:[#allocation53_spill] sm:$0xff] %v9619_v53  ;;  %v3261_v10 = vadd.f32 %v9090_v38, %v3148_v16  ;;  %3084 = vmatmul.f32.gmra.mxu2 %v2702_v5  ;;  %v1131_v4 = vmul.f32 %v12805_v35, %v930_v37  ;;  %v12809_v35 = vmov 5  }
 0x3a1   :  { %v2734_v18 = vsel %vm2652_vm5, %v1803_v42, %v6159_v54  ;;  %v1638_v42 = vsel %vm1625_vm6, %v1611_v30, %v1612_v44 }
 0x3a2   :  { %6241 = vset.pattern.permute.xlu1 %v12737_v9  ;;  %v3356_v34 = vmax.f32 %v3261_v10, 0.0  ;;  %2977 = vmatmul.f32.gmra.mxu3 %v2672_v39  ;;  %v1804_v10 = vmul.f32 %v12806_v8, %v1638_v42  ;;  %v9658_v39 = vpop.permute.xlu1 %3549 }
 0x3a3   :  { %3197 = vmatmul.f32.gmra.mxu0 %v2734_v18  ;;  %v3037_v13 = vpop.f32.mrf.mxu2  ;;  %3721 = vperm.xlu1 %6241, %v9185_v6   ;;  %v12804_v18 = vld [vmem:[#allocation78_spill] sm:$0xff]  ;;  %12807 = vst [vmem:[#allocation125_spill] sm:$0xff] %v9658_v39 }
 0x3a4   :  { %3389 = vst.msk [vmem:[#allocation2] sm:$0xff] %vm3388_vm9, %v3356_v34  ;;  %v3038_v38 = vadd.f32 %v3037_v13, %v2925_v46  ;;  %v1579_v16 = vmul.f32 %v12804_v18, %v1414_v56  ;;  %v1387_v34 = vrot.slane %v12796_v15, 7  ;;  %v1613_v46 = vrot.slane %v12803_v63, 1  ;;  %v12808_v13 = vld [vmem:[#allocation45_spill] sm:$0xff] }
 0x3a5   :  { %v2930_v54 = vpop.f32.mrf.mxu3  ;;  %v2735_v56 = vsel %vm2652_vm5, %v1804_v10, %v6164_v25  ;;  %v2928_v18 = vadd.f32 %v9586_v0, %v2927_v36  ;;  %v6170_v25 = vunpack.i.h.bf16 %v9269_v55 }
 0x3a6   :  { %3809 = vperm.xlu0 %6238, %v9084_v57   ;;  %v3151_v1 = vadd.f32 %v3150_v27, %v3038_v38  ;;  %v9652_v19 = vpop.permute.xlu0 %6202  ;;  %v2703_v30 = vsel %vm2652_vm5, %v1579_v16, %v9345_v51  ;;  %v905_v38 = vrot.slane %v12808_v13, 5  ;;  %v1413_v37 = vsel %vm1400_vm8, %v1386_v40, %v1387_v34 }
 0x3a7   :  { %v9648_v6 = vpop.permute.xlu2 %6222  ;;  %3797 = vperm.xlu2 %6232, %v9035_v22   ;;  %v3153_v5 = vpop.f32.mrf.mxu0  ;;  %v2673_v22 = vsel %vm2652_vm5, %v1131_v4, %v6165_v33  ;;  %v1637_v33 = vsel %vm1625_vm6, %v1612_v44, %v1613_v46  ;;  %v12812_v44 = vld [vmem:[#allocation117_spill] sm:$0xff] }
 0x3a8   :  { %v3264_v27 = vadd.f32 %v9162_v11, %v3151_v1  ;;  %3087 = vmatmul.f32.gmra.mxu2 %v2703_v30  ;;  %v6169_v1 = vunpack.i.l.bf16 %v9269_v55  ;;  %v12810_v30 = vld [vmem:[#allocation82_spill] sm:$0xff]  ;;  %v929_v40 = vsel %vm918_vm7, %v904_v17, %v905_v38  ;;  %v9689_v17 = vpop.f32.mrf.mxu1 }
 0x3a9   :  { %v1580_v4 = vmul.f32 %v12810_v30, %v1413_v37 }
 0x3aa   :  { %v3357_v16 = vmax.f32 %v3264_v27, 0.0  ;;  %2980 = vmatmul.f32.gmra.mxu3 %v2673_v22  ;;  %v1388_v27 = vrot.slane %v12803_v63, 7  ;;  %v1132_v22 = vmul.f32 %v12812_v44, %v929_v40  ;;  %v2931_v44 = vadd.f32 %v9586_v0, %v2930_v54 }
 0x3ab   :  { %3200 = vmatmul.f32.gmra.mxu0 %v2735_v56  ;;  %v3040_v42 = vpop.f32.mrf.mxu2  ;;  %6328 = vset.pattern.permute.xlu1 %v12809_v35  ;;  %v6175_v54 = vunpack.i.h.bf16 %v9532_v61 }
 0x3ac   :  { %3390 = vst.msk [vmem:[#allocation2 + $0x8] sm:$0xff] %vm3388_vm9, %v3357_v16  ;;  %v3041_v11 = vadd.f32 %v3040_v42, %v2928_v18  ;;  %v2704_v18 = vsel %vm2652_vm5, %v1580_v4, %v9214_v21  ;;  %v12813_v16 = vld [vmem:[#allocation109_spill] sm:$0xff]  ;;  %v906_v42 = vrot.slane %v8622_v20, 5  ;;  %v2674_v30 = vsel %vm2652_vm5, %v1132_v22, %v6170_v25  ;;  %v9697_v4 = vpop.permute.xlu1 %3564 }
 0x3ad   :  { %v2933_v36 = vpop.f32.mrf.mxu3  ;;  %v1805_v37 = vmul.f32 %v12813_v16, %v1637_v33  ;;  %12814 = vst [vmem:[#allocation61_spill] sm:$0xff] %v9697_v4  ;;  %v12815_v16 = vld [vmem:[#allocation79_spill] sm:$0xff] }
 0x3ae   :  { %3813 = vperm.xlu0 %6238, %v9413_v14   ;;  %v3154_v8 = vadd.f32 %v3153_v5, %v3041_v11  ;;  %v9683_v56 = vpop.permute.xlu0 %2486  ;;  %v1614_v11 = vrot.slane %v12808_v13, 1 }
 0x3af   :  { %v9678_v10 = vpop.permute.xlu2 %3544  ;;  %6235 = vset.pattern.permute.xlu2 %v12737_v9  ;;  %v3156_v55 = vpop.f32.mrf.mxu0  ;;  %v2736_v40 = vsel %vm2652_vm5, %v1805_v37, %v6169_v1  ;;  %v6174_v1 = vunpack.i.l.bf16 %v9532_v61 }
 0x3b0   :  { %12811 = vst [vmem:[#allocation62_spill] sm:$0xff] %v9678_v10  ;;  %3697 = vperm.xlu2 %6235, %v9084_v57   ;;  %v3267_v5 = vadd.f32 %v9210_v49, %v3154_v8  ;;  %3090 = vmatmul.f32.gmra.mxu2 %v2704_v18  ;;  %v1412_v57 = vsel %vm1400_vm8, %v1387_v34, %v1388_v27 }
 0x3b1   :  { %v928_v18 = vsel %vm918_vm7, %v905_v38, %v906_v42  ;;  %v1636_v25 = vsel %vm1625_vm6, %v1613_v46, %v1614_v11  ;;  %v1581_v37 = vmul.f32 %v12815_v16, %v1412_v57  ;;  %v907_v57 = vrot.slane %v8605_v58, 5 }
 0x3b2   :  { %v3358_v33 = vmax.f32 %v3267_v5, 0.0  ;;  %2983 = vmatmul.f32.gmra.mxu3 %v2674_v30  ;;  %v1389_v30 = vrot.slane %v12808_v13, 7 }
 0x3b3   :  { %3203 = vmatmul.f32.gmra.mxu0 %v2736_v40  ;;  %v3043_v49 = vpop.f32.mrf.mxu2  ;;  %v2705_v46 = vsel %vm2652_vm5, %v1581_v37, %v9504_v45  ;;  %v2934_v37 = vadd.f32 %v9586_v0, %v2933_v36  ;;  %v6180_v36 = vunpack.i.h.bf16 %v9470_v28 }
 0x3b4   :  { %3391 = vst.msk [vmem:[#allocation2 + $0x10] sm:$0xff] %vm3388_vm9, %v3358_v33  ;;  %v3044_v8 = vadd.f32 %v3043_v49, %v2931_v44  ;;  %v12817_v44 = vld [vmem:[#allocation30_spill] sm:$0xff]  ;;  %v12818_v49 = vld [vmem:[#allocation7_spill] sm:$0xff] }
 0x3b5   :  { %v2936_v22 = vpop.f32.mrf.mxu3  ;;  %v1133_v33 = vmul.f32 %v12817_v44, %v928_v18  ;;  %v1806_v61 = vmul.f32 %v12818_v49, %v1636_v25  ;;  %v9730_v44 = vpop.permute.xlu1 %3579 }
 0x3b6   :  { %3829 = vperm.xlu0 %6238, %v9403_v48   ;;  %v3157_v34 = vadd.f32 %v3156_v55, %v3044_v8  ;;  %v9713_v40 = vpop.permute.xlu0 %6217  ;;  %v1615_v8 = vrot.slane %v8622_v20, 1  ;;  %12819 = vst [vmem:[#allocation95_spill] sm:$0xff] %v9730_v44 }
 0x3b7   :  { %v9710_v5 = vpop.permute.xlu2 %3554  ;;  %v3159_v38 = vpop.f32.mrf.mxu0  ;;  %v2675_v16 = vsel %vm2652_vm5, %v1133_v33, %v6175_v54  ;;  %v2737_v4 = vsel %vm2652_vm5, %v1806_v61, %v6174_v1  ;;  %v927_v54 = vsel %vm918_vm7, %v906_v42, %v907_v57  ;;  %v1390_v61 = vrot.slane %v8622_v20, 7 }
 0x3b8   :  { %12816 = vst [vmem:[#allocation15_spill] sm:$0xff] %v9710_v5  ;;  %3701 = vperm.xlu2 %6235, %v9413_v14   ;;  %v3270_v55 = vadd.f32 %v9267_v3, %v3157_v34  ;;  %3093 = vmatmul.f32.gmra.mxu2 %v2705_v46  ;;  %v9725_v5 = vpop.f32.mrf.mxu1  ;;  %v1411_v14 = vsel %vm1400_vm8, %v1388_v27, %v1389_v30  ;;  %v6179_v34 = vunpack.i.l.bf16 %v9470_v28  ;;  %v12820_v46 = vld [vmem:[#allocation81_spill] sm:$0xff] }
 0x3b9   :  { %v1635_v1 = vsel %vm1625_vm6, %v1614_v11, %v1615_v8  ;;  %v1582_v33 = vmul.f32 %v12820_v46, %v1411_v14  ;;  %v12825_v14 = vld [vmem:[#allocation50_spill] sm:$0xff]  ;;  %v3453_v46 = vld [vmem:[#allocation2 + $0x1] ss:$2 sm:$0xff] }
 0x3ba   :  { %v3359_v18 = vmax.f32 %v3270_v55, 0.0  ;;  %2986 = vmatmul.f32.gmra.mxu3 %v2675_v16  ;;  %v12823_v16 = vld [vmem:[#allocation27_spill] sm:$0xff] }
 0x3bb   :  { %3206 = vmatmul.f32.gmra.mxu0 %v2737_v4  ;;  %v3046_v25 = vpop.f32.mrf.mxu2  ;;  %v2706_v11 = vsel %vm2652_vm5, %v1582_v33, %v9433_v52  ;;  %v12826_v33 = vld [vmem:[#allocation48_spill] sm:$0xff] }
 0x3bc   :  { %3392 = vst.msk [vmem:[#allocation2 + $0x18] sm:$0xff] %vm3388_vm9, %v3359_v18  ;;  %v3047_v3 = vadd.f32 %v3046_v25, %v2934_v37  ;;  %v1134_v37 = vmul.f32 %v12823_v16, %v927_v54  ;;  %v12824_v18 = vld [vmem:[#allocation107_spill] sm:$0xff]  ;;  %v908_v39 = vrot.slane %v12826_v33, 5  ;;  %v2937_v54 = vadd.f32 %v9586_v0, %v2936_v22 }
 0x3bd   :  { %v2939_v4 = vpop.f32.mrf.mxu3  ;;  %v1807_v28 = vmul.f32 %v12824_v18, %v1635_v1 }
 0x3be   :  { %6335 = vset.pattern.permute.xlu0 %v12809_v35  ;;  %v3160_v27 = vadd.f32 %v3159_v38, %v3047_v3  ;;  %v9744_v55 = vpop.permute.xlu0 %3534  ;;  %v1616_v38 = vrot.slane %v8605_v58, 1  ;;  %v3421_v3 = vld [vmem:[#allocation2] ss:$2 sm:$0xff]  ;;  %v2676_v44 = vsel %vm2652_vm5, %v1134_v37, %v6180_v36  ;;  %v926_v10 = vsel %vm918_vm7, %v907_v57, %v908_v39  ;;  %v12836_v35 = vld [vmem:[#allocation57_spill] sm:$0xff] }
 0x3bf   :  { %v9741_v49 = vpop.permute.xlu2 %3569  ;;  %12822 = vst [vmem:[#allocation68_spill] sm:$0xff] %v9744_v55  ;;  %v3162_v42 = vpop.f32.mrf.mxu0 }
 0x3c0   :  { %12821 = vst [vmem:[#allocation126_spill] sm:$0xff] %v9741_v49  ;;  %6237 = vset.pattern.permute.xlu2 %v12743_v31  ;;  %v3273_v25 = vadd.f32 %v12825_v14, %v3160_v27  ;;  %3096 = vmatmul.f32.gmra.mxu2 %v2706_v11  ;;  %v2738_v49 = vsel %vm2652_vm5, %v1807_v28, %v6179_v34  ;;  %v9760_v18 = vpop.f32.mrf.mxu1  ;;  %v12829_v14 = vld [vmem:[#allocation86_spill] sm:$0xff]  ;;  %v9774_v55 = vpop.permute.xlu1 %3594 }
 0x3c1   :  { %3817 = vperm.xlu2 %6237, %v9358_v50   ;;  %v1410_v27 = vsel %vm1400_vm8, %v1389_v30, %v1390_v61  ;;  %v9765_v34 = vmax.f32 %v3421_v3, %v3453_v46  ;;  %v1634_v22 = vsel %vm1625_vm6, %v1615_v8, %v1616_v38  ;;  %12830 = vst [vmem:[#allocation99_spill] sm:$0xff] %v9774_v55  ;;  %v1391_v8 = vrot.slane %v8605_v58, 7  ;;  %v12832_v46 = vld [vmem:[#allocation118_spill] sm:$0xff] }
 0x3c2   :  { %v3360_v1 = vmax.f32 %v3273_v25, 0.0  ;;  %2989 = vmatmul.f32.gmra.mxu3 %v2676_v44  ;;  %v12828_v44 = vld [vmem:[#allocation14_spill] sm:$0xff]  ;;  %v1583_v25 = vmul.f32 %v12829_v14, %v1410_v27  ;;  %v12835_v14 = vld [vmem:[#allocation5_spill] sm:$0xff] }
 0x3c3   :  { %3209 = vmatmul.f32.gmra.mxu0 %v2738_v49  ;;  %v3049_v11 = vpop.f32.mrf.mxu2  ;;  %v3423_v50 = vld [vmem:[#allocation2 + $0x10] ss:$2 sm:$0xff]  ;;  %v3455_v16 = vld [vmem:[#allocation2 + $0x11] ss:$2 sm:$0xff]  ;;  %v6185_v49 = vunpack.i.h.bf16 %v12828_v44  ;;  %v6184_v28 = vunpack.i.l.bf16 %v12828_v44  ;;  %v12834_v44 = vld [vmem:[#allocation123_spill] sm:$0xff]  ;;  %v1808_v57 = vmul.f32 %v12835_v14, %v1634_v22 }
 0x3c4   :  { %3393 = vst.msk [vmem:[#allocation2 + $0x20] sm:$0xff] %vm3388_vm9, %v3360_v1  ;;  %v3050_v36 = vadd.f32 %v3049_v11, %v2937_v54  ;;  %v9763_v37 = vmax.f32 %v3423_v50, %v3455_v16  ;;  %v1135_v11 = vmul.f32 %v12832_v46, %v926_v10  ;;  %v2707_v27 = vsel %vm2652_vm5, %v1583_v25, %v12834_v44 }
 0x3c5   :  { %v2942_v30 = vpop.f32.mrf.mxu3  ;;  %v2739_v46 = vsel %vm2652_vm5, %v1808_v57, %v6184_v28  ;;  %v2940_v25 = vadd.f32 %v9586_v0, %v2939_v4  ;;  %v6190_v4 = vunpack.i.h.bf16 %v9595_v26  ;;  %v12841_v57 = vld [vmem:[#allocation33_spill] sm:$0xff] }
 0x3c6   :  { %12827 = vst [vmem:[#allocation56_spill] sm:$0xff] %v9763_v37  ;;  %v3163_v54 = vadd.f32 %v3162_v42, %v3050_v36  ;;  %v6243_v3 = vpack.i.bf16 %v9763_v37, %v9765_v34  ;;  %v9782_v50 = vpop.permute.xlu0 %3559  ;;  %v12837_v42 = vld [vmem:[#allocation51_spill] sm:$0xff]  ;;  %v2677_v10 = vsel %vm2652_vm5, %v1135_v11, %v6185_v49 }
 0x3c7   :  { %v9776_v1 = vpop.permute.xlu2 %3584  ;;  %12833 = vst [vmem:[#allocation64_spill] sm:$0xff] %v9782_v50  ;;  %v3165_v16 = vpop.f32.mrf.mxu0  ;;  %v909_v36 = vrot.slane %v12837_v42, 5 }
 0x3c8   :  { %12831 = vst [vmem:[#allocation127_spill] sm:$0xff] %v9776_v1  ;;  %v3276_v55 = vadd.f32 %v12836_v35, %v3163_v54  ;;  %3099 = vmatmul.f32.gmra.mxu2 %v2707_v27  ;;  %6244 = vrot.lane.b32.xlu0 %v6243_v3, %s6445_s25  ;;  %v1617_v1 = vrot.slane %v12826_v33, 1  ;;  %v1409_v35 = vsel %vm1400_vm8, %v1390_v61, %v1391_v8  ;;  %v12838_v3 = vld [vmem:[#allocation83_spill] sm:$0xff]  ;;  %v9806_v61 = vpop.f32.mrf.mxu1 }
 0x3c9   :  { %6240 = vset.pattern.permute.xlu2 %v12737_v9  ;;  %v925_v49 = vsel %vm918_vm7, %v908_v39, %v909_v36  ;;  %v1584_v11 = vmul.f32 %v12838_v3, %v1409_v35  ;;  %v9818_v35 = vpop.permute.xlu1 %3609  ;;  %v12845_v3 = vld [vmem:[#allocation93_spill] sm:$0xff] }
 0x3ca   :  { %v3361_v50 = vmax.f32 %v3276_v55, 0.0  ;;  %2992 = vmatmul.f32.gmra.mxu3 %v2677_v10  ;;  %3713 = vperm.xlu2 %6240, %v9451_v7   ;;  %v1633_v9 = vsel %vm1625_vm6, %v1616_v38, %v1617_v1  ;;  %v6189_v55 = vunpack.i.l.bf16 %v9595_v26  ;;  %v1136_v10 = vmul.f32 %v12841_v57, %v925_v49  ;;  %12844 = vst [vmem:[#allocation20_spill] sm:$0xff] %v9818_v35 }
 0x3cb   :  { %3212 = vmatmul.f32.gmra.mxu0 %v2739_v46  ;;  %v3052_v22 = vpop.f32.mrf.mxu2  ;;  %v2708_v38 = vsel %vm2652_vm5, %v1584_v11, %v9561_v60  ;;  %v12842_v46 = vld [vmem:[#allocation6_spill] sm:$0xff] }
 0x3cc   :  { %3394 = vst.msk [vmem:[#allocation2 + $0x28] sm:$0xff] %vm3388_vm9, %v3361_v50  ;;  %v3053_v54 = vadd.f32 %v3052_v22, %v2940_v25  ;;  %v1392_v50 = vrot.slane %v12826_v33, 7  ;;  %v1809_v26 = vmul.f32 %v12842_v46, %v1633_v9  ;;  %v12843_v25 = vld [vmem:[#allocation134_spill] sm:$0xff]  ;;  %v2943_v33 = vadd.f32 %v9586_v0, %v2942_v30 }
 0x3cd   :  { %v2945_v28 = vpop.f32.mrf.mxu3  ;;  %v910_v22 = vrot.slane %v12843_v25, 5  ;;  %v6195_v30 = vunpack.i.h.bf16 %v9529_v41 }
 0x3ce   :  { %v3166_v27 = vadd.f32 %v3165_v16, %v3053_v54  ;;  %v9811_v14 = vpop.permute.xlu0 %3574  ;;  %v1618_v54 = vrot.slane %v12837_v42, 1  ;;  %v1408_v49 = vsel %vm1400_vm8, %v1391_v8, %v1392_v50 }
 0x3cf   :  { %v9808_v7 = vpop.permute.xlu2 %3599  ;;  %12840 = vst [vmem:[#allocation96_spill] sm:$0xff] %v9811_v14  ;;  %v3168_v39 = vpop.f32.mrf.mxu0  ;;  %v2740_v14 = vsel %vm2652_vm5, %v1809_v26, %v6189_v55  ;;  %v6194_v55 = vunpack.i.l.bf16 %v9529_v41 }
 0x3d0   :  { %12839 = vst [vmem:[#allocation63_spill] sm:$0xff] %v9808_v7  ;;  %v3279_v16 = vadd.f32 %v12845_v3, %v3166_v27  ;;  %3102 = vmatmul.f32.gmra.mxu2 %v2708_v38  ;;  %v2678_v7 = vsel %vm2652_vm5, %v1136_v10, %v6190_v4  ;;  %v924_v38 = vsel %vm918_vm7, %v909_v36, %v910_v22  ;;  %v1393_v10 = vrot.slane %v12837_v42, 7  ;;  %v12848_v36 = vld [vmem:[#allocation29_spill] sm:$0xff] }
 0x3d1   :  { %v1632_v4 = vsel %vm1625_vm6, %v1617_v1, %v1618_v54  ;;  %v1137_v26 = vmul.f32 %v12848_v36, %v924_v38  ;;  %v12849_v1 = vld [vmem:[#allocation108_spill] sm:$0xff]  ;;  %v9852_v35 = vpop.permute.xlu1 %3669  ;;  %v2946_v38 = vadd.f32 %v9586_v0, %v2945_v28  ;;  %v12336_v42 = vrot.slane %v9763_v37, 6 }
 0x3d2   :  { %v3362_v11 = vmax.f32 %v3279_v16, 0.0  ;;  %2995 = vmatmul.f32.gmra.mxu3 %v2678_v7  ;;  %3717 = vperm.xlu2 %6240, %v9403_v48   ;;  %v1810_v3 = vmul.f32 %v12849_v1, %v1632_v4 }
 0x3d3   :  { %3215 = vmatmul.f32.gmra.mxu0 %v2740_v14  ;;  %v3055_v9 = vpop.f32.mrf.mxu2  ;;  %v12846_v14 = vld [vmem:[#allocation84_spill] sm:$0xff] }
 0x3d4   :  { %3395 = vst.msk [vmem:[#allocation2 + $0x30] sm:$0xff] %vm3388_vm9, %v3362_v11  ;;  %v3056_v27 = vadd.f32 %v3055_v9, %v2943_v33  ;;  %v1585_v57 = vmul.f32 %v12846_v14, %v1408_v49  ;;  %v1619_v11 = vrot.slane %v12843_v25, 1  ;;  %v2679_v49 = vsel %vm2652_vm5, %v1137_v26, %v6195_v30  ;;  %v12851_v26 = vld [vmem:[#allocation88_spill] sm:$0xff] }
 0x3d5   :  { %v2948_v7 = vpop.f32.mrf.mxu3  ;;  %v2741_v9 = vsel %vm2652_vm5, %v1810_v3, %v6194_v55  ;;  %v6417_v55 = vld [vmem:[%s12155_s7 + $0x178] sm:$0xff] }
 0x3d6   :  { %v3169_v8 = vadd.f32 %v3168_v39, %v3056_v27  ;;  %v9837_v48 = vpop.permute.xlu0 %3589  ;;  %v2709_v33 = vsel %vm2652_vm5, %v1585_v57, %v9502_v24  ;;  %v9847_v39 = vpop.f32.mrf.mxu1  ;;  %v12850_v27 = vld [vmem:[#allocation46_spill] sm:$0xff]  ;;  %v1631_v28 = vsel %vm1625_vm6, %v1618_v54, %v1619_v11  ;;  %v3457_v54 = vld [vmem:[#allocation2 + $0x21] ss:$2 sm:$0xff] }
 0x3d7   :  { %12847 = vst [vmem:[#allocation130_spill] sm:$0xff] %v9837_v48  ;;  %v3171_v41 = vpop.f32.mrf.mxu0  ;;  %v911_v14 = vrot.slane %v12850_v27, 5  ;;  %v12855_v48 = vld [vmem:[#allocation112_spill] sm:$0xff]  ;;  %v12865_v24 = vld [vmem:[#allocation35_spill] sm:$0xff] }
 0x3d8   :  { %v9839_v46 = vpop.permute.xlu2 %3661  ;;  %v3282_v16 = vadd.f32 %v9481_v29, %v3169_v8  ;;  %3105 = vmatmul.f32.gmra.mxu2 %v2709_v33  ;;  %v1407_v29 = vsel %vm1400_vm8, %v1392_v50, %v1393_v10  ;;  %v5278_v50 = vld [vmem:[%s12162_s10 + $0x78] sm:$0xff]  ;;  %v6200_v33 = vunpack.i.h.bf16 %v9483_v12 }
 0x3d9   :  { %v1586_v1 = vmul.f32 %v12851_v26, %v1407_v29  ;;  %5401 = vmatpush.msra.mxu2 %v5278_v50  ;;  %v923_v3 = vsel %vm918_vm7, %v910_v22, %v911_v14  ;;  %v1811_v29 = vmul.f32 %v12855_v48, %v1631_v28  ;;  %v5277_v22 = vld [vmem:[%s12162_s10 + $0x70] sm:$0xff]  ;;  %v2949_v28 = vadd.f32 %v9586_v0, %v2948_v7  ;;  %v5275_v7 = vld [vmem:[%s12162_s10 + $0x60] sm:$0xff] }
 0x3da   :  { %v3363_v57 = vmax.f32 %v3282_v16, 0.0  ;;  %2998 = vmatmul.f32.gmra.mxu3 %v2679_v49  ;;  %6242 = vset.pattern.permute.xlu2 %v12743_v31  ;;  %v6199_v31 = vunpack.i.l.bf16 %v9483_v12  ;;  %v3425_v16 = vld [vmem:[#allocation2 + $0x20] ss:$2 sm:$0xff] }
 0x3db   :  { %3218 = vmatmul.f32.gmra.mxu0 %v2741_v9  ;;  %v3058_v4 = vpop.f32.mrf.mxu2  ;;  %3833 = vperm.xlu2 %6242, %v6417_v55   ;;  %v12854_v12 = vld [vmem:[#allocation124_spill] sm:$0xff]  ;;  %v9893_v9 = vmax.f32 %v3425_v16, %v3457_v54 }
 0x3dc   :  { %3396 = vst.msk [vmem:[#allocation2 + $0x38] sm:$0xff] %vm3388_vm9, %v3363_v57  ;;  %v3059_v30 = vadd.f32 %v3058_v4, %v2946_v38  ;;  %v12852_v38 = vld [vmem:[#allocation44_spill] sm:$0xff]  ;;  %v2710_v8 = vsel %vm2652_vm5, %v1586_v1, %v12854_v12  ;;  %v2742_v48 = vsel %vm2652_vm5, %v1811_v29, %v6199_v31  ;;  %5402 = vmatpush.msra.mxu2 %v5277_v22  ;;  %v9911_v22 = vpop.permute.xlu1 %3773 }
 0x3dd   :  { %v9870_v36 = vpop.f32.mrf.mxu3  ;;  %v1138_v57 = vmul.f32 %v12852_v38, %v923_v3  ;;  %v12857_v3 = vld [vmem:[#allocation148_spill] sm:$0xff]  ;;  %12858 = vst [vmem:[#allocation133_spill] sm:$0xff] %v9893_v9 }
 0x3de   :  { %v3172_v49 = vadd.f32 %v3171_v41, %v3059_v30  ;;  %v9877_v4 = vpop.permute.xlu0 %3604  ;;  %v12856_v30 = vrot.slane %v12843_v25, 7  ;;  %v12332_v38 = vrot.slane %v12857_v3, 5  ;;  %v9905_v54 = vpop.f32.mrf.mxu1 }
 0x3df   :  { %12853 = vst [vmem:[#allocation65_spill] sm:$0xff] %v9877_v4  ;;  %v3174_v41 = vpop.f32.mrf.mxu0  ;;  %v2680_v1 = vsel %vm2652_vm5, %v1138_v57, %v6200_v33  ;;  %v12860_v57 = vld [vmem:[#allocation85_spill] sm:$0xff] }
 0x3e0   :  { %v9879_v55 = vpop.permute.xlu2 %3673  ;;  %v3285_v50 = vadd.f32 %v9689_v17, %v3172_v49  ;;  %3108 = vmatmul.f32.gmra.mxu2 %v2710_v8  ;;  %v1406_v26 = vsel %vm1400_vm8, %v1393_v10, %v12856_v30  ;;  %v5276_v17 = vld [vmem:[%s12162_s10 + $0x68] sm:$0xff]  ;;  %v12859_v10 = vrot.slane %v12850_v27, 1 }
 0x3e1   :  { %v1587_v29 = vmul.f32 %v12860_v57, %v1406_v26  ;;  %5403 = vmatpush.msra.mxu2 %v5276_v17  ;;  %v5274_v26 = vld [vmem:[%s12162_s10 + $0x58] sm:$0xff]  ;;  %v6205_v17 = vunpack.i.h.bf16 %v9652_v19 }
 0x3e2   :  { %v3364_v8 = vmax.f32 %v3285_v50, 0.0  ;;  %3001 = vmatmul.f32.gmra.mxu3 %v2680_v1  ;;  %v1630_v16 = vsel %vm1625_vm6, %v1619_v11, %v12859_v10  ;;  %v922_v11 = vsel %vm918_vm7, %v911_v14, %v12332_v38  ;;  %v3630_v10 = vrot.slane %v9893_v9, 6  ;;  %v12864_v1 = vld [vmem:[#allocation54_spill] sm:$0xff] }
 0x3e3   :  { %3221 = vmatmul.f32.gmra.mxu0 %v2742_v48  ;;  %v3427_v33 = vld [vmem:[#allocation2 + $0x30] ss:$2 sm:$0xff]  ;;  %v3459_v49 = vld [vmem:[#allocation2 + $0x31] ss:$2 sm:$0xff]  ;;  %v3061_v31 = vpop.f32.mrf.mxu2  ;;  %v12862_v48 = vmov 6   ;;  %5404 = vmatpush.msra.mxu2 %v5275_v7  ;;  %v12337_v4 = vrot.slane %v12864_v1, 5  ;;  %v2711_v12 = vsel %vm2652_vm5, %v1587_v29, %v9623_v2 }
 0x3e4   :  { %3397 = vst.msk [vmem:[#allocation2 + $0x40] sm:$0xff] %vm3388_vm9, %v3364_v8  ;;  %v9914_v50 = vmax.f32 %v3427_v33, %v3459_v49  ;;  %v3062_v30 = vadd.f32 %v3061_v31, %v2949_v28  ;;  %6334 = vset.pattern.permute.xlu2 %v12862_v48  ;;  %v6204_v8 = vunpack.i.l.bf16 %v9652_v19  ;;  %v12863_v33 = vld [vmem:[#allocation110_spill] sm:$0xff] }
 0x3e5   :  { %v9928_v28 = vpop.f32.mrf.mxu3  ;;  %v1812_v49 = vmul.f32 %v12863_v33, %v1630_v16  ;;  %v1139_v16 = vmul.f32 %v12865_v24, %v922_v11  ;;  %5405 = vmatpush.msra.mxu2 %v5274_v26  ;;  %v3657_v24 = vsel %vm1175_vm3, %v12336_v42, %v3630_v10  ;;  %v12866_v26 = vrot.slane %v12850_v27, 7 }
 0x3e6   :  { %12861 = vst [vmem:[#allocation141_spill] sm:$0xff] %v9914_v50  ;;  %v12335_v14 = vrot.slane %v9914_v50, 6  ;;  %v3175_v31 = vadd.f32 %v3174_v41, %v3062_v30  ;;  %v6248_v57 = vpack.i.bf16 %v9914_v50, %v9893_v9  ;;  %v5273_v41 = vld [vmem:[%s12162_s10 + $0x50] sm:$0xff]  ;;  %v9995_v42 = vpop.f32.mrf.mxu1 }
 0x3e7   :  { %v9937_v19 = vpop.permute.xlu0 %3665  ;;  %v3177_v38 = vpop.f32.mrf.mxu0  ;;  %v2681_v29 = vsel %vm2652_vm5, %v1139_v16, %v6205_v17  ;;  %v2743_v11 = vsel %vm2652_vm5, %v1812_v49, %v6204_v8  ;;  %5406 = vmatpush.msra.mxu2 %v5273_v41  ;;  %v6210_v49 = vunpack.i.h.bf16 %v9590_v47  ;;  %v12869_v41 = vrot.slane %v12857_v3, 1 }
 0x3e8   :  { %v3656_v7 = vsel %vm1175_vm3, %v3630_v10, %v12335_v14  ;;  %v3288_v30 = vadd.f32 %v9725_v5, %v3175_v31  ;;  %3111 = vmatmul.f32.gmra.mxu2 %v2711_v12  ;;  %6249 = vrot.lane.b32.xlu2 %v6248_v57, %s6445_s25  ;;  %v12867_v14 = vrot.slane %v12843_v25, 7  ;;  %v5272_v12 = vld [vmem:[%s12162_s10 + $0x48] sm:$0xff]  ;;  %v3742_v31 = vrot.slane %v9893_v9, 7  ;;  %v12873_v9 = vld [vmem:[#allocation111_spill] sm:$0xff] }
 0x3e9   :  { %v9950_v33 = vpop.permute.xlu2 %3777  ;;  %v2952_v10 = vadd.f32 %v9586_v0, %v9870_v36  ;;  %v3727_v17 = vmul.f32 %v9879_v55, %v3656_v7  ;;  %5407 = vmatpush.msra.mxu2 %v5272_v12  ;;  %v5271_v55 = vld [vmem:[%s12162_s10 + $0x40] sm:$0xff]  ;;  %v3726_v7 = vmul.f32 %v9852_v35, %v3657_v24  ;;  %v6209_v12 = vunpack.i.l.bf16 %v9590_v47  ;;  %v3782_v24 = vpop.permute.xlu1 %3781 }
 0x3ea   :  { %v1405_v5 = vsel %vm1400_vm8, %v12867_v14, %v12866_v26  ;;  %v3365_v8 = vmax.f32 %v3288_v30, 0.0  ;;  %3004 = vmatmul.f32.gmra.mxu3 %v2681_v29  ;;  %v12868_v14 = vrot.slane %v12857_v3, 5  ;;  %v12870_v26 = vrot.slane %v12850_v27, 1 }
 0x3eb   :  { %3224 = vmatmul.f32.gmra.mxu0 %v2743_v11  ;;  %v3064_v57 = vpop.f32.mrf.mxu2  ;;  %v12342_v30 = vrot.slane %v9763_v37, 7  ;;  %5408 = vmatpush.msra.mxu2 %v5271_v55  ;;  %v12872_v11 = vld [vmem:[#allocation31_spill] sm:$0xff]  ;;  %v12874_v35 = vrot.slane %v9914_v50, 7 }
 0x3ec   :  { %v921_v16 = vsel %vm918_vm7, %v12868_v14, %v12337_v4  ;;  %v1629_v36 = vsel %vm1625_vm6, %v12870_v26, %v12869_v41  ;;  %3398 = vst.msk [vmem:[#allocation2 + $0x48] sm:$0xff] %vm3388_vm9, %v3365_v8  ;;  %v3065_v29 = vadd.f32 %v3064_v57, %v2952_v10  ;;  %v5270_v14 = vld [vmem:[%s12162_s10 + $0x38] sm:$0xff]  ;;  %v12871_v26 = vld [vmem:[#allocation87_spill] sm:$0xff]  ;;  %v6253_v8 = vpack.i.bf16 %v3727_v17, %v3726_v7  ;;  %v12875_v7 = vld [vmem:[#allocation49_spill] sm:$0xff] }
 0x3ed   :  { %v9998_v41 = vpop.f32.mrf.mxu3  ;;  %v1588_v4 = vmul.f32 %v12871_v26, %v1405_v5  ;;  %v3769_v10 = vsel %vm1400_vm8, %v12342_v30, %v3742_v31  ;;  %v1140_v25 = vmul.f32 %v12872_v11, %v921_v16  ;;  %v1813_v5 = vmul.f32 %v12873_v9, %v1629_v36  ;;  %5409 = vmatpush.msra.mxu2 %v5270_v14  ;;  %v5269_v9 = vld [vmem:[%s12162_s10 + $0x30] sm:$0xff] }
 0x3ee   :  { %v3178_v57 = vadd.f32 %v3177_v38, %v3065_v29  ;;  %v3768_v30 = vsel %vm1400_vm8, %v3742_v31, %v12874_v35  ;;  %v3838_v16 = vmul.f32 %v3782_v24, %v3769_v10  ;;  %v914_v29 = vrot.slane %v12875_v7, 5 }
 0x3ef   :  { %v10007_v2 = vpop.permute.xlu0 %3677  ;;  %v2712_v47 = vsel %vm2652_vm5, %v1588_v4, %v9557_v43  ;;  %v3180_v17 = vpop.f32.mrf.mxu0  ;;  %v2682_v38 = vsel %vm2652_vm5, %v1140_v25, %v6210_v49  ;;  %v1622_v4 = vrot.slane %v12864_v1, 1  ;;  %v2744_v31 = vsel %vm2652_vm5, %v1813_v5, %v6209_v12  ;;  %5410 = vmatpush.msra.mxu2 %v5269_v9  ;;  %v5285_v12 = vld [vmem:[%s12162_s10 + $0xb0] sm:$0xff]  ;;  %v5284_v5 = vld [vmem:[%s12162_s10 + $0xa8] sm:$0xff] }
 0x3f0   :  { %v3291_v55 = vadd.f32 %v9760_v18, %v3178_v57  ;;  %3114 = vmatmul.f32.gmra.mxu2 %v2712_v47  ;;  %6254 = vrot.lane.b32.xlu2 %v6253_v8, %s6446_s24  ;;  %v5286_v18 = vld [vmem:[%s12162_s10 + $0xb8] sm:$0xff]  ;;  %v2955_v25 = vadd.f32 %v9586_v0, %v9928_v28  ;;  %v12876_v11 = vrot.slane %v12857_v3, 7  ;;  %v12877_v14 = vrot.slane %v12850_v27, 7  ;;  %v5267_v47 = vld [vmem:[%s12162_s10 + $0x20] sm:$0xff]  ;;  %v12879_v9 = vld [vmem:[#allocation92_spill] sm:$0xff] }
 0x3f1   :  { %v3786_v26 = vpop.permute.xlu2 %3785  ;;  %5522 = vmatpush.msra.mxu0 %v5286_v18  ;;  %v12878_v8 = vrot.slane %v12857_v3, 1 }
 0x3f2   :  { %v3839_v36 = vmul.f32 %v3786_v26, %v3768_v30  ;;  %v3366_v49 = vmax.f32 %v3291_v55, 0.0  ;;  %3007 = vmatmul.f32.gmra.mxu3 %v2682_v38  ;;  %v1404_v35 = vsel %vm1400_vm8, %v12877_v14, %v12876_v11  ;;  %v5268_v30 = vld [vmem:[%s12162_s10 + $0x28] sm:$0xff]  ;;  %v6215_v55 = vunpack.i.h.bf16 %v9546_v59  ;;  %v12881_v11 = vld [vmem:[#allocation119_spill] sm:$0xff] }
 0x3f3   :  { %3227 = vmatmul.f32.gmra.mxu0 %v2744_v31  ;;  %v3067_v28 = vpop.f32.mrf.mxu2  ;;  %5411 = vmatpush.msra.mxu2 %v5268_v30  ;;  %v1628_v57 = vsel %vm1625_vm6, %v12878_v8, %v1622_v4  ;;  %v6214_v26 = vunpack.i.l.bf16 %v9546_v59  ;;  %v1589_v18 = vmul.f32 %v12879_v9, %v1404_v35  ;;  %v5266_v59 = vld [vmem:[%s12162_s10 + $0x18] sm:$0xff]  ;;  %v10073_v35 = vpop.f32.mrf.mxu1  ;;  %v1623_v8 = vrot.slane %v12875_v7, 1  ;;  %v5265_v9 = vld [vmem:[%s12162_s10 + $0x10] sm:$0xff] }
 0x3f4   :  { %v6258_v24 = vpack.i.bf16 %v3839_v36, %v3838_v16  ;;  %5523 = vmatpush.msra.mxu0 %v5285_v12  ;;  %3399 = vst.msk [vmem:[#allocation2 + $0x50] sm:$0xff] %vm3388_vm9, %v3366_v49  ;;  %v3068_v10 = vadd.f32 %v3067_v28, %v2955_v25  ;;  %v12880_v16 = vrot.slane %v12864_v1, 5  ;;  %v1397_v25 = vrot.slane %v12864_v1, 7  ;;  %v5283_v49 = vld [vmem:[%s12162_s10 + $0xa0] sm:$0xff]  ;;  %v12882_v12 = vld [vmem:[#allocation113_spill] sm:$0xff] }
 0x3f5   :  { %v10058_v38 = vpop.f32.mrf.mxu3  ;;  %5412 = vmatpush.msra.mxu2 %v5267_v47 }
 0x3f6   :  { %6259 = vrot.lane.b32.xlu1 %v6258_v24, %s6444_s23  ;;  %v920_v36 = vsel %vm918_vm7, %v12880_v16, %v914_v29  ;;  %v3181_v31 = vadd.f32 %v3180_v17, %v3068_v10  ;;  %5524 = vmatpush.msra.mxu0 %v5284_v5  ;;  %v2713_v17 = vsel %vm2652_vm5, %v1589_v18, %v9516_v23 }
 0x3f7   :  { %v1141_v14 = vmul.f32 %v12881_v11, %v920_v36  ;;  %v10075_v30 = vpop.permute.xlu0 %3689  ;;  %v1814_v24 = vmul.f32 %v12882_v12, %v1628_v57  ;;  %5413 = vmatpush.msra.mxu2 %v5266_v59  ;;  %v3183_v10 = vpop.f32.mrf.mxu0  ;;  %v5282_v57 = vld [vmem:[%s12162_s10 + $0x98] sm:$0xff]  ;;  %v5264_v36 = vld [vmem:[%s12162_s10 + $0x8] sm:$0xff]  ;;  %v12884_v59 = vld [vmem:[#allocation149_spill] sm:$0xff]  ;;  %v6219_v12 = vunpack.i.l.bf16 %v9713_v40 }
 0x3f8   :  { %v3294_v28 = vadd.f32 %v9806_v61, %v3181_v31  ;;  %3117 = vmatmul.f32.gmra.mxu2 %v2713_v17  ;;  %5525 = vmatpush.msra.mxu0 %v5283_v49  ;;  %v2958_v61 = vadd.f32 %v9586_v0, %v9998_v41  ;;  %v5281_v41 = vld [vmem:[%s12162_s10 + $0x90] sm:$0xff]  ;;  %v12885_v49 = vrot.slane %v12884_v59, 5  ;;  %v6220_v17 = vunpack.i.h.bf16 %v9713_v40 }
 0x3f9   :  { %v2683_v47 = vsel %vm2652_vm5, %v1141_v14, %v6215_v55  ;;  %v2745_v5 = vsel %vm2652_vm5, %v1814_v24, %v6214_v26  ;;  %v12883_v55 = vrot.slane %v12857_v3, 7  ;;  %5414 = vmatpush.msra.mxu2 %v5265_v9  ;;  %v1627_v14 = vsel %vm1625_vm6, %v1622_v4, %v1623_v8 }
 0x3fa   :  { %v3367_v18 = vmax.f32 %v3294_v28, 0.0  ;;  %3010 = vmatmul.f32.gmra.mxu3 %v2683_v47  ;;  %5526 = vmatpush.msra.mxu0 %v5282_v57  ;;  %v919_v11 = vsel %vm918_vm7, %v914_v29, %v12885_v49  ;;  %v12886_v28 = vld [vmem:[#allocation89_spill] sm:$0xff]  ;;  %v5280_v29 = vld [vmem:[%s12162_s10 + $0x88] sm:$0xff]  ;;  %v1398_v4 = vrot.slane %v12875_v7, 7  ;;  %v1624_v49 = vrot.slane %v12884_v59, 1 }
 0x3fb   :  { %3230 = vmatmul.f32.gmra.mxu0 %v2745_v5  ;;  %v1403_v26 = vsel %vm1400_vm8, %v12883_v55, %v1397_v25  ;;  %v3070_v16 = vpop.f32.mrf.mxu2  ;;  %5415 = vmatpush.msra.mxu2 %v5264_v36  ;;  %v5263_v5 = vld [vmem:[%s12162_s10] sm:$0xff]  ;;  %v12887_v55 = vld [vmem:[#allocation37_spill] sm:$0xff] }
 0x3fc   :  { %3400 = vst.msk [vmem:[#allocation2 + $0x58] sm:$0xff] %vm3388_vm9, %v3367_v18  ;;  %v3071_v31 = vadd.f32 %v3070_v16, %v2958_v61  ;;  %v1590_v47 = vmul.f32 %v12886_v28, %v1403_v26  ;;  %5527 = vmatpush.msra.mxu0 %v5281_v41  ;;  %v3429_v57 = vld [vmem:[#allocation2 + $0x40] ss:$2 sm:$0xff]  ;;  %v3461_v61 = vld [vmem:[#allocation2 + $0x41] ss:$2 sm:$0xff]  ;;  %v1142_v26 = vmul.f32 %v12887_v55, %v919_v11  ;;  %v10134_v28 = vpop.f32.mrf.mxu1 }
 0x3fd   :  { %v2963_v24 = vpop.f32.mrf.mxu3  ;;  %v12888_v16 = vld [vmem:[#allocation4_spill] sm:$0xff]  ;;  %5416 = vmatpush.msra.mxu2 %v5263_v5  ;;  %v5279_v41 = vld [vmem:[%s12162_s10 + $0x80] sm:$0xff]  ;;  %v2961_v5 = vadd.f32 %v9586_v0, %v10058_v38  ;;  %v6224_v0 = vunpack.i.l.bf16 %v9648_v6 }
 0x3fe   :  { %v3184_v9 = vadd.f32 %v3183_v10, %v3071_v31  ;;  %v2714_v40 = vsel %vm2652_vm5, %v1590_v47, %v9683_v56  ;;  %v1815_v36 = vmul.f32 %v12888_v16, %v1627_v14  ;;  %5528 = vmatpush.msra.mxu0 %v5280_v29  ;;  %v2684_v47 = vsel %vm2652_vm5, %v1142_v26, %v6220_v17 }
 0x3ff   :  { %v10123_v18 = vpop.permute.xlu0 %3693  ;;  %v3186_v31 = vpop.f32.mrf.mxu0  ;;  %v10138_v14 = vmax.f32 %v3429_v57, %v3461_v61  ;;  %v1626_v57 = vsel %vm1625_vm6, %v1623_v8, %v1624_v49  ;;  %v12890_v61 = vld [vmem:[#allocation90_spill] sm:$0xff] }
 0x400   :  { %v3297_v10 = vadd.f32 %v9847_v39, %v3184_v9  ;;  %3120 = vmatmul.f32.gmra.mxu2 %v2714_v40  ;;  %v2746_v11 = vsel %vm2652_vm5, %v1815_v36, %v6219_v12  ;;  %5529 = vmatpush.msra.mxu0 %v5279_v41  ;;  %v1402_v39 = vsel %vm1400_vm8, %v1397_v25, %v1398_v4 }
 0x401   :  { %12889 = vst [vmem:[#allocation17_spill] sm:$0xff] %v10138_v14  ;;  %v1591_v26 = vmul.f32 %v12890_v61, %v1402_v39  ;;  %v3632_v16 = vrot.slane %v10138_v14, 6  ;;  %v3682_v39 = vpop.permute.xlu1 %3681 }
 0x402   :  { %v3368_v29 = vmax.f32 %v3297_v10, 0.0  ;;  %3013 = vmatmul.f32.gmra.mxu3 %v2684_v47 }
 0x403   :  { %3233 = vmatmul.f32.gmra.mxu0 %v2746_v11  ;;  %v3431_v9 = vld [vmem:[#allocation2 + $0x50] ss:$2 sm:$0xff]  ;;  %v3463_v40 = vld [vmem:[#allocation2 + $0x51] ss:$2 sm:$0xff]  ;;  %v3073_v55 = vpop.f32.mrf.mxu2  ;;  %v2715_v10 = vsel %vm2652_vm5, %v1591_v26, %v9619_v53  ;;  %v12891_v11 = vld [vmem:[#allocation3_spill] sm:$0xff]  ;;  %v12893_v26 = vrot.slane %v12884_v59, 7 }
 0x404   :  { %3401 = vst.msk [vmem:[#allocation2 + $0x60] sm:$0xff] %vm3388_vm9, %v3368_v29  ;;  %v10147_v17 = vmax.f32 %v3431_v9, %v3463_v40  ;;  %v3074_v12 = vadd.f32 %v3073_v55, %v2961_v5  ;;  %v1816_v8 = vmul.f32 %v12891_v11, %v1626_v57  ;;  %v12892_v55 = vrot.slane %v9914_v50, 6 }
 0x405   :  { %v2966_v38 = vpop.f32.mrf.mxu3 }
 0x406   :  { %v3187_v36 = vadd.f32 %v3186_v31, %v3074_v12  ;;  %v12343_v25 = vrot.slane %v10147_v17, 6  ;;  %v6263_v47 = vpack.i.bf16 %v10147_v17, %v10138_v14  ;;  %v12347_v9 = vrot.slane %v10147_v17, 7 }
 0x407   :  { %v10155_v41 = vpop.permute.xlu0 %3709  ;;  %v3189_v29 = vpop.f32.mrf.mxu0  ;;  %v2747_v40 = vsel %vm2652_vm5, %v1816_v8, %v6224_v0  ;;  %v3655_v12 = vsel %vm1175_vm3, %v12892_v55, %v3632_v16  ;;  %v12894_v8 = vld [vmem:[#allocation131_spill] sm:$0xff] }
 0x408   :  { %v3300_v5 = vadd.f32 %v9905_v54, %v3187_v36  ;;  %3123 = vmatmul.f32.gmra.mxu2 %v2715_v10  ;;  %v3654_v31 = vsel %vm1175_vm3, %v3632_v16, %v12343_v25  ;;  %6264 = vrot.lane.b32.xlu1 %v6263_v47, %s6445_s25  ;;  %v10177_v54 = vld [vmem:[%s12161_s6] ss:$0 sm:$0xff]  ;;  %v1401_v36 = vsel %vm1400_vm8, %v1398_v4, %v12893_v26  ;;  %v10184_v0 = vpop.f32.mrf.mxu1  ;;  %v3744_v10 = vrot.slane %v10138_v14, 7 }
 0x409   :  { %v2964_v57 = vadd.f32 %v10177_v54, %v2963_v24  ;;  %v3729_v47 = vmul.f32 %v3682_v39, %v3654_v31  ;;  %v12895_v55 = vrot.slane %v12894_v8, 1  ;;  %v12896_v39 = vld [vmem:[#allocation94_spill] sm:$0xff]  ;;  %v12897_v14 = vrot.slane %v9914_v50, 7 }
 0x40a   :  { %v3369_v61 = vmax.f32 %v3300_v5, 0.0  ;;  %v6225_v5 = vunpack.i.h.bf16 %v9648_v6  ;;  %v3766_v4 = vsel %vm1400_vm8, %v3744_v10, %v12347_v9  ;;  %v1592_v31 = vmul.f32 %v12896_v39, %v1401_v36  ;;  %v12898_v6 = vld [vmem:[#allocation66_spill] sm:$0xff] }
 0x40b   :  { %3236 = vmatmul.f32.gmra.mxu0 %v2747_v40  ;;  %v3076_v16 = vpop.f32.mrf.mxu2  ;;  %v1657_v24 = vsel %vm1625_vm6, %v1624_v49, %v12895_v55  ;;  %v3728_v40 = vmul.f32 %v10007_v2, %v3655_v12  ;;  %v3767_v49 = vsel %vm1400_vm8, %v12897_v14, %v3744_v10  ;;  %v12899_v12 = vld [vmem:[#allocation114_spill] sm:$0xff]  ;;  %v2967_v36 = vadd.f32 %v10177_v54, %v2966_v38  ;;  %v4846_v14 = vld [vmem:[%s12163_s8] sm:$0xff]  ;;  %v12900_v10 = vld [vmem:[#allocation52_spill] sm:$0xff] }
 0x40c   :  { %3402 = vst.msk [vmem:[#allocation2 + $0x68] sm:$0xff] %vm3388_vm9, %v3369_v61  ;;  %v3077_v11 = vadd.f32 %v3076_v16, %v2964_v57  ;;  %v3794_v61 = vpop.permute.xlu2 %3793  ;;  %v2716_v2 = vsel %vm2652_vm5, %v1592_v31, %v12898_v6  ;;  %v1817_v55 = vmul.f32 %v12899_v12, %v1657_v24 }
 0x40d   :  { %v2969_v26 = vpop.f32.mrf.mxu3  ;;  %v6268_v57 = vpack.i.bf16 %v3729_v47, %v3728_v40  ;;  %v3841_v59 = vmul.f32 %v3794_v61, %v3766_v4 }
 0x40e   :  { %v3190_v25 = vadd.f32 %v3189_v29, %v3077_v11  ;;  %v2748_v29 = vsel %vm2652_vm5, %v1817_v55, %v6225_v5 }
 0x410   :  { %v3790_v16 = vpop.permute.xlu0 %3789  ;;  %v3303_v9 = vadd.f32 %v9995_v42, %v3190_v25  ;;  %v3192_v7 = vpop.f32.mrf.mxu0  ;;  %3126 = vmatmul.f32.gmra.mxu2 %v2716_v2  ;;  %6269 = vrot.lane.b32.xlu1 %v6268_v57, %s6446_s24  ;;  %v4814_v42 = vsel %vm2652_vm5, %v12894_v8, %v12900_v10  ;;  %v2970_v57 = vadd.f32 %v10177_v54, %v2969_v26  ;;  %v12902_v2 = vld [vmem:[#allocation128_spill] sm:$0xff]  ;;  %v4849_v26 = vld [vmem:[%s12163_s8 + $0x18] sm:$0xff] }
 0x411   :  { %v3840_v53 = vmul.f32 %v3790_v16, %v3767_v49  ;;  %v10218_v5 = vpop.f32.mrf.mxu1  ;;  %v12901_v49 = vld [vmem:[#allocation147_spill] sm:$0xff] }
 0x412   :  { %v3370_v47 = vmax.f32 %v3303_v9, 0.0  ;;  %v4815_v12 = vsel %vm2652_vm5, %v12902_v2, %v12901_v49 }
 0x413   :  { %v6273_v11 = vpack.i.bf16 %v3841_v59, %v3840_v53  ;;  %3239 = vmatmul.f32.gmra.mxu0 %v2748_v29  ;;  %v3079_v25 = vpop.f32.mrf.mxu2  ;;  %v4847_v53 = vld [vmem:[%s12163_s8 + $0x8] sm:$0xff]  ;;  %v4910_v59 = vmul.f32 %v4846_v14, %v4814_v42 }
 0x414   :  { %3403 = vst.msk [vmem:[#allocation2 + $0x70] sm:$0xff] %vm3388_vm9, %v3370_v47  ;;  %v3080_v24 = vadd.f32 %v3079_v25, %v2967_v36  ;;  %v4911_v39 = vmul.f32 %v4847_v53, %v12894_v8  ;;  %v3433_v31 = vld [vmem:[#allocation2 + $0x60] ss:$2 sm:$0xff]  ;;  %v3465_v61 = vld [vmem:[#allocation2 + $0x61] ss:$2 sm:$0xff]  ;;  %v3686_v36 = vpop.permute.xlu1 %3685  ;;  %v4913_v25 = vmul.f32 %v4849_v26, %v12902_v2  ;;  %v12906_v2 = vrot.slane %v10147_v17, 7 }
 0x415   :  { %6274 = vrot.lane.b32.xlu2 %v6273_v11, %s6444_s23  ;;  %v2972_v38 = vpop.f32.mrf.mxu3  ;;  %v10234_v8 = vmax.f32 %v3433_v31, %v3465_v61  ;;  %v12903_v53 = vld [vmem:[#allocation116_spill] sm:$0xff]  ;;  %v12907_v26 = vrot.slane %v10147_v17, 6 }
 0x416   :  { %v3193_v9 = vadd.f32 %v3192_v7, %v3080_v24  ;;  %v4848_v7 = vld [vmem:[%s12163_s8 + $0x10] sm:$0xff] }
 0x417   :  { %v4912_v11 = vmul.f32 %v4848_v7, %v4815_v12  ;;  %v3746_v24 = vrot.slane %v10234_v8, 7  ;;  %v4851_v7 = vld [vmem:[%s12163_s8 + $0x28] sm:$0xff] }
 0x418   :  { %v3306_v40 = vadd.f32 %v10073_v35, %v3193_v9  ;;  %v3195_v4 = vpop.f32.mrf.mxu0  ;;  %5417 = vmatmul.f32.vlgmr.msra.gmra.mxu2 %v4910_v59  ;;  %v12904_v59 = vld [vmem:[#allocation129_spill] sm:$0xff] }
 0x419   :  { %v10239_v14 = vpop.f32.mrf.mxu1  ;;  %v4816_v9 = vsel %vm2652_vm5, %v12904_v59, %v12903_v53 }
 0x41a   :  { %v3371_v16 = vmax.f32 %v3306_v40, 0.0  ;;  %v2973_v40 = vadd.f32 %v10177_v54, %v2972_v38  ;;  %v3765_v38 = vsel %vm1400_vm8, %v12906_v2, %v3746_v24 }
 0x41b   :  { %5970 = vmatmul.msk.f32.vlgmr.msra.gmra.mxu0 %vm2652_vm5, %v4911_v39  ;;  %v3082_v55 = vpop.f32.mrf.mxu2  ;;  %v3634_v39 = vrot.slane %v10234_v8, 6 }
 0x41c   :  { %3404 = vst.msk [vmem:[#allocation2 + $0x78] sm:$0xff] %vm3388_vm9, %v3371_v16  ;;  %v3083_v35 = vadd.f32 %v3082_v55, %v2970_v57 }
 0x41d   :  { %v2975_v29 = vpop.f32.mrf.mxu3 }
 0x41e   :  { %v3196_v47 = vadd.f32 %v3195_v4, %v3083_v35 }
 0x420   :  { %v3309_v10 = vadd.f32 %v10134_v28, %v3196_v47  ;;  %v3198_v42 = vpop.f32.mrf.mxu0  ;;  %5420 = vmatmul.f32.gmra.mxu2 %v4912_v11  ;;  %v4850_v28 = vld [vmem:[%s12163_s8 + $0x20] sm:$0xff]  ;;  %v3653_v47 = vsel %vm1175_vm3, %v12907_v26, %v3634_v39 }
 0x421   :  { %v4914_v55 = vmul.f32 %v4850_v28, %v4816_v9 }
 0x422   :  { %v3372_v4 = vmax.f32 %v3309_v10, 0.0  ;;  %v3802_v10 = vpop.permute.xlu1 %3801 }
 0x423   :  { %5971 = vmatmul.msk.f32.gmra.mxu0 %vm2652_vm5, %v4913_v25  ;;  %v3435_v31 = vld [vmem:[#allocation2 + $0x70] ss:$2 sm:$0xff]  ;;  %v3467_v61 = vld [vmem:[#allocation2 + $0x71] ss:$2 sm:$0xff]  ;;  %v3085_v57 = vpop.f32.mrf.mxu2 }
 0x424   :  { %v10253_v16 = vmax.f32 %v3435_v31, %v3467_v61  ;;  %3405 = vst.msk [vmem:[#allocation2 + $0x80] sm:$0xff] %vm3388_vm9, %v3372_v4  ;;  %v3086_v49 = vadd.f32 %v3085_v57, %v2973_v40  ;;  %v3798_v40 = vpop.permute.xlu2 %3797  ;;  %v4915_v31 = vmul.f32 %v4851_v7, %v12904_v59  ;;  %v3320_v61 = vpop.f32.mrf.mxu1 }
 0x425   :  { %v2978_v12 = vpop.f32.mrf.mxu3  ;;  %v3842_v57 = vmul.f32 %v3798_v40, %v3765_v38 }
 0x426   :  { %12905 = vst [vmem:[#allocation97_spill] sm:$0xff] %v10253_v16  ;;  %v12350_v35 = vrot.slane %v10253_v16, 6  ;;  %v3199_v11 = vadd.f32 %v3198_v42, %v3086_v49  ;;  %v12351_v25 = vrot.slane %v10253_v16, 7  ;;  %v6278_v53 = vpack.i.bf16 %v10253_v16, %v10234_v8 }
 0x427   :  { %v3730_v49 = vmul.f32 %v3686_v36, %v3653_v47  ;;  %v4852_v36 = vld [vmem:[%s12163_s8 + $0x30] sm:$0xff] }
 0x428   :  { %v3652_v9 = vsel %vm1175_vm3, %v3634_v39, %v12350_v35  ;;  %v3312_v4 = vadd.f32 %v10184_v0, %v3199_v11  ;;  %v3201_v28 = vpop.f32.mrf.mxu0  ;;  %5423 = vmatmul.f32.gmra.mxu2 %v4914_v55  ;;  %v3764_v42 = vsel %vm1400_vm8, %v3746_v24, %v12351_v25  ;;  %6279 = vrot.lane.b32.xlu2 %v6278_v53, %s6445_s25  ;;  %v12908_v55 = vld [vmem:[#allocation143_spill] sm:$0xff]  ;;  %v12909_v11 = vld [vmem:[#allocation142_spill] sm:$0xff] }
 0x429   :  { %v3731_v2 = vmul.f32 %v10075_v30, %v3652_v9  ;;  %v3843_v26 = vmul.f32 %v3802_v10, %v3764_v42  ;;  %v2976_v39 = vadd.f32 %v10177_v54, %v2975_v29  ;;  %v4817_v35 = vsel %vm2652_vm5, %v12909_v11, %v12908_v55  ;;  %v4853_v29 = vld [vmem:[%s12163_s8 + $0x38] sm:$0xff] }
 0x42a   :  { %v3373_v0 = vmax.f32 %v3312_v4, 0.0  ;;  %v4916_v47 = vmul.f32 %v4852_v36, %v4817_v35  ;;  %v4917_v40 = vmul.f32 %v4853_v29, %v12909_v11  ;;  %v2979_v9 = vadd.f32 %v10177_v54, %v2978_v12  ;;  %v12910_v42 = vld [vmem:[#allocation42_spill] sm:$0xff]  ;;  %v4854_v35 = vld [vmem:[%s12163_s8 + $0x40] sm:$0xff]  ;;  %v4855_v12 = vld [vmem:[%s12163_s8 + $0x48] sm:$0xff] }
 0x42b   :  { %5972 = vmatmul.msk.f32.gmra.mxu0 %vm2652_vm5, %v4915_v31  ;;  %v6283_v24 = vpack.i.bf16 %v3731_v2, %v3730_v49  ;;  %v6288_v25 = vpack.i.bf16 %v3843_v26, %v3842_v57  ;;  %v3088_v59 = vpop.f32.mrf.mxu2  ;;  %v12911_v31 = vld [vmem:[#allocation139_spill] sm:$0xff]  ;;  %v12913_v36 = vld [vmem:[#allocation136_spill] sm:$0xff] }
 0x42c   :  { %3406 = vst.msk [vmem:[#allocation2 + $0x88] sm:$0xff] %vm3388_vm9, %v3373_v0  ;;  %v3089_v30 = vadd.f32 %v3088_v59, %v2976_v39  ;;  %v3323_v57 = vpop.f32.mrf.mxu1  ;;  %v4919_v55 = vmul.f32 %v4855_v12, %v12911_v31  ;;  %v12912_v59 = vld [vmem:[#allocation47_spill] sm:$0xff] }
 0x42d   :  { %v2981_v38 = vpop.f32.mrf.mxu3  ;;  %6284 = vrot.lane.b32.xlu0 %v6283_v24, %s6446_s24  ;;  %6289 = vrot.lane.b32.xlu1 %v6288_v25, %s6444_s23  ;;  %v4818_v25 = vsel %vm2652_vm5, %v12911_v31, %v12910_v42 }
 0x42e   :  { %v3202_v7 = vadd.f32 %v3201_v28, %v3089_v30  ;;  %v4918_v26 = vmul.f32 %v4854_v35, %v4818_v25  ;;  %v2982_v11 = vadd.f32 %v10177_v54, %v2981_v38  ;;  %v4819_v30 = vsel %vm2652_vm5, %v12913_v36, %v12912_v59  ;;  %v12915_v35 = vld [vmem:[#allocation59_spill] sm:$0xff] }
 0x430   :  { %v3315_v10 = vadd.f32 %v10218_v5, %v3202_v7  ;;  %v3204_v53 = vpop.f32.mrf.mxu0  ;;  %5426 = vmatmul.f32.gmra.mxu2 %v4916_v47 }
 0x432   :  { %v3374_v4 = vmax.f32 %v3315_v10, 0.0 }
 0x433   :  { %5973 = vmatmul.msk.f32.gmra.mxu0 %vm2652_vm5, %v4917_v40  ;;  %v3091_v49 = vpop.f32.mrf.mxu2  ;;  %v3437_v29 = vld [vmem:[#allocation2 + $0x80] ss:$2 sm:$0xff]  ;;  %v3469_v7 = vld [vmem:[#allocation2 + $0x81] ss:$2 sm:$0xff]  ;;  %v4857_v40 = vld [vmem:[%s12163_s8 + $0x58] sm:$0xff] }
 0x434   :  { %3407 = vst.msk [vmem:[#allocation2 + $0x90] sm:$0xff] %vm3388_vm9, %v3374_v4  ;;  %v3092_v5 = vadd.f32 %v3091_v49, %v2979_v9  ;;  %v10327_v9 = vmax.f32 %v3437_v29, %v3469_v7  ;;  %v4921_v49 = vmul.f32 %v4857_v40, %v12913_v36  ;;  %v4859_v29 = vld [vmem:[%s12163_s8 + $0x68] sm:$0xff]  ;;  %v3806_v7 = vpop.permute.xlu1 %3805 }
 0x435   :  { %v2984_v28 = vpop.f32.mrf.mxu3 }
 0x436   :  { %v3205_v2 = vadd.f32 %v3204_v53, %v3092_v5  ;;  %v10322_v53 = vpop.f32.mrf.mxu1  ;;  %12914 = vst [vmem:[#allocation70_spill] sm:$0xff] %v10327_v9  ;;  %v12916_v5 = vld [vmem:[#allocation137_spill] sm:$0xff] }
 0x437   :  { %v4820_v12 = vsel %vm2652_vm5, %v12916_v5, %v12915_v35 }
 0x438   :  { %v3318_v39 = vadd.f32 %v10239_v14, %v3205_v2  ;;  %v3207_v0 = vpop.f32.mrf.mxu0  ;;  %5429 = vmatmul.f32.gmra.mxu2 %v4918_v26  ;;  %v4856_v14 = vld [vmem:[%s12163_s8 + $0x50] sm:$0xff]  ;;  %v2985_v2 = vadd.f32 %v10177_v54, %v2984_v28  ;;  %v3748_v26 = vrot.slane %v10327_v9, 7 }
 0x439   :  { %v4920_v42 = vmul.f32 %v4856_v14, %v4819_v30  ;;  %v12918_v14 = vrot.slane %v10253_v16, 7 }
 0x43a   :  { %v3375_v24 = vmax.f32 %v3318_v39, 0.0 }
 0x43b   :  { %5974 = vmatmul.msk.f32.gmra.mxu0 %vm2652_vm5, %v4919_v55  ;;  %v3094_v47 = vpop.f32.mrf.mxu2 }
 0x43c   :  { %3408 = vst.msk [vmem:[#allocation2 + $0x98] sm:$0xff] %vm3388_vm9, %v3375_v24  ;;  %v3095_v10 = vadd.f32 %v3094_v47, %v2982_v11  ;;  %v3636_v24 = vrot.slane %v10327_v9, 6 }
 0x43d   :  { %v2987_v38 = vpop.f32.mrf.mxu3 }
 0x43e   :  { %v3208_v4 = vadd.f32 %v3207_v0, %v3095_v10  ;;  %v4858_v0 = vld [vmem:[%s12163_s8 + $0x60] sm:$0xff]  ;;  %v3763_v10 = vsel %vm1400_vm8, %v12918_v14, %v3748_v26  ;;  %v2988_v14 = vadd.f32 %v10177_v54, %v2987_v38 }
 0x43f   :  { %v4922_v30 = vmul.f32 %v4858_v0, %v4820_v12  ;;  %v3810_v12 = vpop.permute.xlu0 %3809 }
 0x440   :  { %v3321_v31 = vadd.f32 %v3320_v61, %v3208_v4  ;;  %v3210_v25 = vpop.f32.mrf.mxu0  ;;  %5432 = vmatmul.f32.gmra.mxu2 %v4920_v42  ;;  %v3329_v42 = vpop.f32.mrf.mxu1 }
 0x442   :  { %v3376_v39 = vmax.f32 %v3321_v31, 0.0 }
 0x443   :  { %5975 = vmatmul.msk.f32.gmra.mxu0 %vm2652_vm5, %v4921_v49  ;;  %v3439_v61 = vld [vmem:[#allocation2 + $0x90] ss:$2 sm:$0xff]  ;;  %v3471_v55 = vld [vmem:[#allocation2 + $0x91] ss:$2 sm:$0xff]  ;;  %v3097_v11 = vpop.f32.mrf.mxu2  ;;  %v12919_v49 = vrot.slane %v10253_v16, 6 }
 0x444   :  { %v10340_v59 = vmax.f32 %v3439_v61, %v3471_v55  ;;  %3409 = vst.msk [vmem:[#allocation2 + $0xa0] sm:$0xff] %vm3388_vm9, %v3376_v39  ;;  %v3098_v36 = vadd.f32 %v3097_v11, %v2985_v2  ;;  %v3698_v61 = vpop.permute.xlu2 %3697  ;;  %v3844_v55 = vmul.f32 %v3806_v7, %v3763_v10  ;;  %v4860_v10 = vld [vmem:[%s12163_s8 + $0x70] sm:$0xff] }
 0x445   :  { %v2990_v28 = vpop.f32.mrf.mxu3  ;;  %v3651_v35 = vsel %vm1175_vm3, %v12919_v49, %v3636_v24 }
 0x446   :  { %12917 = vst [vmem:[#allocation103_spill] sm:$0xff] %v10340_v59  ;;  %v3749_v47 = vrot.slane %v10340_v59, 7  ;;  %v3211_v40 = vadd.f32 %v3210_v25, %v3098_v36  ;;  %v6293_v4 = vpack.i.bf16 %v10340_v59, %v10327_v9  ;;  %v3637_v31 = vrot.slane %v10340_v59, 6 }
 0x447   :  { %v4923_v25 = vmul.f32 %v4859_v29, %v12916_v5 }
 0x448   :  { %v3762_v2 = vsel %vm1400_vm8, %v3748_v26, %v3749_v47  ;;  %v3324_v39 = vadd.f32 %v3323_v57, %v3211_v40  ;;  %v3213_v0 = vpop.f32.mrf.mxu0  ;;  %5435 = vmatmul.f32.gmra.mxu2 %v4922_v30  ;;  %6294 = vrot.lane.b32.xlu1 %v6293_v4, %s6445_s25  ;;  %v3650_v36 = vsel %vm1175_vm3, %v3636_v24, %v3637_v31  ;;  %v12920_v30 = vld [vmem:[#allocation135_spill] sm:$0xff]  ;;  %v12921_v40 = vld [vmem:[#allocation146_spill] sm:$0xff] }
 0x449   :  { %v3845_v11 = vmul.f32 %v3810_v12, %v3762_v2  ;;  %v3732_v57 = vmul.f32 %v10123_v18, %v3651_v35  ;;  %v3733_v26 = vmul.f32 %v3698_v61, %v3650_v36  ;;  %v4821_v5 = vsel %vm2652_vm5, %v12921_v40, %v12920_v30  ;;  %v4861_v18 = vld [vmem:[%s12163_s8 + $0x78] sm:$0xff]  ;;  %v3332_v61 = vpop.f32.mrf.mxu1  ;;  %v12922_v36 = vld [vmem:[#allocation121_spill] sm:$0xff] }
 0x44a   :  { %v3377_v49 = vmax.f32 %v3324_v39, 0.0  ;;  %v4924_v12 = vmul.f32 %v4860_v10, %v4821_v5 }
 0x44b   :  { %5976 = vmatmul.msk.f32.gmra.mxu0 %vm2652_vm5, %v4923_v25  ;;  %v6303_v29 = vpack.i.bf16 %v3845_v11, %v3844_v55  ;;  %v3100_v7 = vpop.f32.mrf.mxu2  ;;  %v6298_v38 = vpack.i.bf16 %v3733_v26, %v3732_v57  ;;  %v4925_v25 = vmul.f32 %v4861_v18, %v12921_v40  ;;  %v2991_v55 = vadd.f32 %v10177_v54, %v2990_v28  ;;  %v4862_v57 = vld [vmem:[%s12163_s8 + $0x80] sm:$0xff]  ;;  %v4863_v28 = vld [vmem:[%s12163_s8 + $0x88] sm:$0xff]  ;;  %v12925_v18 = vld [vmem:[#allocation145_spill] sm:$0xff] }
 0x44c   :  { %3410 = vst.msk [vmem:[#allocation2 + $0xa8] sm:$0xff] %vm3388_vm9, %v3377_v49  ;;  %v3101_v24 = vadd.f32 %v3100_v7, %v2988_v14  ;;  %v12923_v14 = vld [vmem:[#allocation144_spill] sm:$0xff] }
 0x44d   :  { %v2993_v4 = vpop.f32.mrf.mxu3  ;;  %6304 = vrot.lane.b32.xlu0 %v6303_v29, %s6444_s23  ;;  %6299 = vrot.lane.b32.xlu2 %v6298_v38, %s6446_s24  ;;  %v4822_v49 = vsel %vm2652_vm5, %v12923_v14, %v12922_v36  ;;  %v4927_v7 = vmul.f32 %v4863_v28, %v12923_v14  ;;  %v12924_v38 = vld [vmem:[#allocation138_spill] sm:$0xff] }
 0x44e   :  { %v3214_v35 = vadd.f32 %v3213_v0, %v3101_v24  ;;  %v4926_v40 = vmul.f32 %v4862_v57, %v4822_v49  ;;  %v2994_v10 = vadd.f32 %v10177_v54, %v2993_v4  ;;  %v4865_v4 = vld [vmem:[%s12163_s8 + $0x98] sm:$0xff] }
 0x44f   :  { %v4929_v28 = vmul.f32 %v4865_v4, %v12925_v18 }
 0x450   :  { %v3327_v2 = vadd.f32 %v10322_v53, %v3214_v35  ;;  %v3216_v39 = vpop.f32.mrf.mxu0  ;;  %5438 = vmatmul.f32.gmra.mxu2 %v4924_v12  ;;  %v4823_v35 = vsel %vm2652_vm5, %v12925_v18, %v12924_v38 }
 0x452   :  { %v3378_v11 = vmax.f32 %v3327_v2, 0.0 }
 0x453   :  { %5977 = vmatmul.msk.f32.gmra.mxu0 %vm2652_vm5, %v4925_v25  ;;  %v3103_v0 = vpop.f32.mrf.mxu2  ;;  %v3441_v12 = vld [vmem:[#allocation2 + $0xa0] ss:$2 sm:$0xff]  ;;  %v3473_v2 = vld [vmem:[#allocation2 + $0xa1] ss:$2 sm:$0xff] }
 0x454   :  { %3411 = vst.msk [vmem:[#allocation2 + $0xb0] sm:$0xff] %vm3388_vm9, %v3378_v11  ;;  %v3104_v53 = vadd.f32 %v3103_v0, %v2991_v55  ;;  %v10410_v49 = vmax.f32 %v3441_v12, %v3473_v2  ;;  %v3702_v0 = vpop.permute.xlu2 %3701 }
 0x455   :  { %v2996_v26 = vpop.f32.mrf.mxu3 }
 0x456   :  { %v3217_v30 = vadd.f32 %v3216_v39, %v3104_v53  ;;  %v3335_v39 = vpop.f32.mrf.mxu1  ;;  %12926 = vst [vmem:[#allocation67_spill] sm:$0xff] %v10410_v49  ;;  %v3750_v18 = vrot.slane %v10410_v49, 7 }
 0x458   :  { %v3330_v5 = vadd.f32 %v3329_v42, %v3217_v30  ;;  %v3219_v29 = vpop.f32.mrf.mxu0  ;;  %5441 = vmatmul.f32.gmra.mxu2 %v4926_v40  ;;  %v4864_v42 = vld [vmem:[%s12163_s8 + $0x90] sm:$0xff]  ;;  %v12927_v30 = vld [vmem:[#allocation140_spill] sm:$0xff] }
 0x459   :  { %v4928_v14 = vmul.f32 %v4864_v42, %v4823_v35  ;;  %v12928_v40 = vld [vmem:[#allocation153_spill] sm:$0xff] }
 0x45a   :  { %v3379_v24 = vmax.f32 %v3330_v5, 0.0  ;;  %v4824_v5 = vsel %vm2652_vm5, %v12928_v40, %v12927_v30  ;;  %v3761_v30 = vsel %vm1400_vm8, %v3749_v47, %v3750_v18 }
 0x45b   :  { %5978 = vmatmul.msk.f32.gmra.mxu0 %vm2652_vm5, %v4927_v7  ;;  %v3106_v25 = vpop.f32.mrf.mxu2  ;;  %v2997_v7 = vadd.f32 %v10177_v54, %v2996_v26 }
 0x45c   :  { %3412 = vst.msk [vmem:[#allocation2 + $0xb8] sm:$0xff] %vm3388_vm9, %v3379_v24  ;;  %v3107_v55 = vadd.f32 %v3106_v25, %v2994_v10  ;;  %v3638_v24 = vrot.slane %v10410_v49, 6  ;;  %v4867_v25 = vld [vmem:[%s12163_s8 + $0xa8] sm:$0xff] }
 0x45d   :  { %v2999_v36 = vpop.f32.mrf.mxu3 }
 0x45e   :  { %v3220_v11 = vadd.f32 %v3219_v29, %v3107_v55  ;;  %v4866_v29 = vld [vmem:[%s12163_s8 + $0xa0] sm:$0xff]  ;;  %v3338_v42 = vpop.f32.mrf.mxu1 }
 0x45f   :  { %v4930_v26 = vmul.f32 %v4866_v29, %v4824_v5  ;;  %v3818_v29 = vpop.permute.xlu2 %3817 }
 0x460   :  { %v3333_v57 = vadd.f32 %v3332_v61, %v3220_v11  ;;  %v3222_v53 = vpop.f32.mrf.mxu0  ;;  %5444 = vmatmul.f32.gmra.mxu2 %v4928_v14  ;;  %v3649_v14 = vsel %vm1175_vm3, %v3637_v31, %v3638_v24 }
 0x462   :  { %v3380_v10 = vmax.f32 %v3333_v57, 0.0  ;;  %v3706_v57 = vpop.permute.xlu1 %3705 }
 0x463   :  { %5979 = vmatmul.msk.f32.gmra.mxu0 %vm2652_vm5, %v4929_v28  ;;  %v3443_v61 = vld [vmem:[#allocation2 + $0xb0] ss:$2 sm:$0xff]  ;;  %v3475_v38 = vld [vmem:[#allocation2 + $0xb1] ss:$2 sm:$0xff]  ;;  %v3109_v35 = vpop.f32.mrf.mxu2 }
 0x464   :  { %3413 = vst.msk [vmem:[#allocation2 + $0xc0] sm:$0xff] %vm3388_vm9, %v3380_v10  ;;  %v3110_v12 = vadd.f32 %v3109_v35, %v2997_v7  ;;  %v10424_v2 = vmax.f32 %v3443_v61, %v3475_v38  ;;  %v4931_v10 = vmul.f32 %v4867_v25, %v12928_v40  ;;  %v3814_v61 = vpop.permute.xlu0 %3813  ;;  %v3734_v38 = vmul.f32 %v3702_v0, %v3649_v14  ;;  %v12929_v25 = vld [vmem:[#allocation58_spill] sm:$0xff]  ;;  %v4868_v0 = vld [vmem:[%s12163_s8 + $0xb0] sm:$0xff] }
 0x465   :  { %v3846_v40 = vmul.f32 %v3814_v61, %v3761_v30 }
 0x466   :  { %v3223_v55 = vadd.f32 %v3222_v53, %v3110_v12  ;;  %v6308_v4 = vpack.i.bf16 %v10424_v2, %v10410_v49  ;;  %v12352_v11 = vrot.slane %v10424_v2, 6  ;;  %v12353_v28 = vrot.slane %v10424_v2, 7  ;;  %v3002_v53 = vpop.f32.mrf.mxu3 }
 0x467   :  { %v3003_v61 = vadd.f32 %v10177_v54, %v3002_v53  ;;  %v4871_v53 = vld [vmem:[%s12163_s8 + $0xc8] sm:$0xff] }
 0x468   :  { %v3336_v5 = vadd.f32 %v3335_v39, %v3223_v55  ;;  %v3225_v7 = vpop.f32.mrf.mxu0  ;;  %5447 = vmatmul.f32.gmra.mxu2 %v4930_v26  ;;  %6309 = vrot.lane.b32.xlu0 %v6308_v4, %s6445_s25  ;;  %v3648_v31 = vsel %vm1175_vm3, %v3638_v24, %v12352_v11  ;;  %v3760_v47 = vsel %vm1400_vm8, %v3750_v18, %v12353_v28  ;;  %v12930_v55 = vld [vmem:[#allocation150_spill] sm:$0xff]  ;;  %v12946_v28 = vrot.slane %v9763_v37, 7 }
 0x469   :  { %v3735_v35 = vmul.f32 %v3706_v57, %v3648_v31  ;;  %v3000_v39 = vadd.f32 %v10177_v54, %v2999_v36  ;;  %v3847_v26 = vmul.f32 %v3818_v29, %v3760_v47  ;;  %v4825_v24 = vsel %vm2652_vm5, %v12930_v55, %v12929_v25  ;;  %v4869_v36 = vld [vmem:[%s12163_s8 + $0xb8] sm:$0xff]  ;;  %v10468_v29 = vld [vmem:[%s12155_s7 + $0x108] sm:$0xff]  ;;  %v12932_v47 = vld [vmem:[#allocation151_spill] sm:$0xff] }
 0x46a   :  { %v3381_v12 = vmax.f32 %v3336_v5, 0.0  ;;  %v4932_v30 = vmul.f32 %v4868_v0, %v4825_v24  ;;  %v3341_v5 = vpop.f32.mrf.mxu1  ;;  %v4935_v0 = vmul.f32 %v4871_v53, %v12932_v47  ;;  %v12936_v53 = vld [vmem:[#allocation34_spill] sm:$0xff] }
 0x46b   :  { %5980 = vmatmul.msk.f32.gmra.mxu0 %vm2652_vm5, %v4931_v10  ;;  %v3112_v4 = vpop.f32.mrf.mxu2  ;;  %v6313_v11 = vpack.i.bf16 %v3735_v35, %v3734_v38  ;;  %v6318_v14 = vpack.i.bf16 %v3847_v26, %v3846_v40  ;;  %v12931_v35 = vld [vmem:[#allocation152_spill] sm:$0xff] }
 0x46c   :  { %3414 = vst.msk [vmem:[#allocation2 + $0xc8] sm:$0xff] %vm3388_vm9, %v3381_v12  ;;  %v3113_v18 = vadd.f32 %v3112_v4, %v3000_v39  ;;  %v4870_v12 = vld [vmem:[%s12163_s8 + $0xc0] sm:$0xff]  ;;  %v10487_v4 = vld [vmem:[%s12155_s7 + $0x110] sm:$0xff] }
 0x46d   :  { %6314 = vrot.lane.b32.xlu1 %v6313_v11, %s6446_s24  ;;  %6319 = vrot.lane.b32.xlu2 %v6318_v14, %s6444_s23  ;;  %v4933_v11 = vmul.f32 %v4869_v36, %v12930_v55 }
 0x46e   :  { %v3226_v57 = vadd.f32 %v3225_v7, %v3113_v18  ;;  %v3005_v7 = vpop.f32.mrf.mxu3 }
 0x46f   :  { %v3006_v14 = vadd.f32 %v10177_v54, %v3005_v7 }
 0x470   :  { %v3339_v10 = vadd.f32 %v3338_v42, %v3226_v57  ;;  %v3228_v31 = vpop.f32.mrf.mxu0  ;;  %5450 = vmatmul.f32.gmra.mxu2 %v4932_v30  ;;  %4001 = vperm.xlu0 %6335, %v10468_v29   ;;  %v4826_v42 = vsel %vm2652_vm5, %v12932_v47, %v12931_v35  ;;  %v12933_v57 = vld [vmem:[#allocation120_spill] sm:$0xff]  ;;  %v12934_v30 = vld [vmem:[#allocation154_spill] sm:$0xff] }
 0x471   :  { %v4934_v25 = vmul.f32 %v4870_v12, %v4826_v42 }
 0x472   :  { %v3382_v38 = vmax.f32 %v3339_v10, 0.0  ;;  %v3344_v18 = vpop.f32.mrf.mxu1 }
 0x473   :  { %5981 = vmatmul.msk.f32.gmra.mxu0 %vm2652_vm5, %v4933_v11  ;;  %v3115_v39 = vpop.f32.mrf.mxu2 }
 0x474   :  { %3415 = vst.msk [vmem:[#allocation2 + $0xd0] sm:$0xff] %vm3388_vm9, %v3382_v38  ;;  %v3116_v40 = vadd.f32 %v3115_v39, %v3003_v61  ;;  %v4873_v38 = vld [vmem:[%s12163_s8 + $0xd8] sm:$0xff] }
 0x475   :  { %v4937_v39 = vmul.f32 %v4873_v38, %v12934_v30 }
 0x476   :  { %v3229_v26 = vadd.f32 %v3228_v31, %v3116_v40  ;;  %v4872_v31 = vld [vmem:[%s12163_s8 + $0xd0] sm:$0xff]  ;;  %v3008_v11 = vpop.f32.mrf.mxu3  ;;  %v12935_v40 = vld [vmem:[#allocation60_spill] sm:$0xff] }
 0x478   :  { %v3342_v55 = vadd.f32 %v3341_v5, %v3229_v26  ;;  %v3231_v24 = vpop.f32.mrf.mxu0  ;;  %5453 = vmatmul.f32.gmra.mxu2 %v4934_v25  ;;  %4005 = vperm.xlu0 %6335, %v10487_v4   ;;  %v4827_v5 = vsel %vm2652_vm5, %v12934_v30, %v12933_v57  ;;  %v4828_v26 = vsel %vm2652_vm5, %v12936_v53, %v12935_v40 }
 0x479   :  { %v4936_v35 = vmul.f32 %v4872_v31, %v4827_v5  ;;  %v3009_v25 = vadd.f32 %v10177_v54, %v3008_v11  ;;  %v12937_v11 = vld [vmem:[#allocation16_spill] sm:$0xff] }
 0x47a   :  { %v3383_v36 = vmax.f32 %v3342_v55, 0.0  ;;  %v4874_v55 = vld [vmem:[%s12163_s8 + $0xe0] sm:$0xff] }
 0x47b   :  { %5982 = vmatmul.msk.f32.gmra.mxu0 %vm2652_vm5, %v4935_v0  ;;  %v3118_v10 = vpop.f32.mrf.mxu2  ;;  %v4938_v57 = vmul.f32 %v4874_v55, %v4828_v26 }
 0x47c   :  { %3416 = vst.msk [vmem:[#allocation2 + $0xd8] sm:$0xff] %vm3388_vm9, %v3383_v36  ;;  %v3119_v61 = vadd.f32 %v3118_v10, %v3006_v14  ;;  %v4875_v14 = vld [vmem:[%s12163_s8 + $0xe8] sm:$0xff] }
 0x47d   :  { %v4939_v10 = vmul.f32 %v4875_v14, %v12936_v53  ;;  %v12940_v14 = vld [vmem:[#allocation158_spill] sm:$0xff] }
 0x47e   :  { %v3232_v7 = vadd.f32 %v3231_v24, %v3119_v61  ;;  %v3347_v24 = vpop.f32.mrf.mxu1  ;;  %v3011_v36 = vpop.f32.mrf.mxu3  ;;  %v12938_v61 = vld [vmem:[#allocation36_spill] sm:$0xff] }
 0x47f   :  { %v4829_v38 = vsel %vm2652_vm5, %v12938_v61, %v12937_v11  ;;  %v4879_v11 = vld [vmem:[%s12163_s8 + $0x108] sm:$0xff] }
 0x480   :  { %v3345_v47 = vadd.f32 %v3344_v18, %v3232_v7  ;;  %v3234_v42 = vpop.f32.mrf.mxu0  ;;  %5456 = vmatmul.f32.gmra.mxu2 %v4936_v35  ;;  %v3012_v7 = vadd.f32 %v10177_v54, %v3011_v36 }
 0x482   :  { %v3384_v12 = vmax.f32 %v3345_v47, 0.0  ;;  %v4876_v47 = vld [vmem:[%s12163_s8 + $0xf0] sm:$0xff] }
 0x483   :  { %5983 = vmatmul.msk.f32.gmra.mxu0 %vm2652_vm5, %v4937_v39  ;;  %v3121_v0 = vpop.f32.mrf.mxu2  ;;  %v4940_v53 = vmul.f32 %v4876_v47, %v4829_v38  ;;  %v10542_v38 = vpop.permute.xlu2 %3713 }
 0x484   :  { %3417 = vst.msk [vmem:[#allocation2 + $0xe0] sm:$0xff] %vm3388_vm9, %v3384_v12  ;;  %v3122_v18 = vadd.f32 %v3121_v0, %v3009_v25  ;;  %v4877_v12 = vld [vmem:[%s12163_s8 + $0xf8] sm:$0xff] }
 0x486   :  { %v3235_v30 = vadd.f32 %v3234_v42, %v3122_v18  ;;  %v3350_v40 = vpop.f32.mrf.mxu1  ;;  %v3014_v25 = vpop.f32.mrf.mxu3  ;;  %v12939_v18 = vld [vmem:[#allocation55_spill] sm:$0xff] }
 0x487   :  { %v4830_v36 = vsel %vm2652_vm5, %v12940_v14, %v12939_v18  ;;  %v4881_v18 = vld [vmem:[%s12163_s8 + $0x118] sm:$0xff] }
 0x488   :  { %v3237_v5 = vpop.f32.mrf.mxu0  ;;  %5459 = vmatmul.f32.gmra.mxu2 %v4938_v57  ;;  %v3348_v31 = vadd.f32 %v3347_v24, %v3235_v30  ;;  %v4941_v24 = vmul.f32 %v4877_v12, %v12938_v61  ;;  %v3015_v57 = vadd.f32 %v10177_v54, %v3014_v25  ;;  %v12941_v12 = vld [vmem:[#allocation38_spill] sm:$0xff] }
 0x48a   :  { %v3385_v35 = vmax.f32 %v3348_v31, 0.0 }
 0x48b   :  { %5984 = vmatmul.msk.f32.gmra.mxu0 %vm2652_vm5, %v4939_v10  ;;  %v3124_v39 = vpop.f32.mrf.mxu2  ;;  %v4878_v10 = vld [vmem:[%s12163_s8 + $0x100] sm:$0xff] }
 0x48c   :  { %3418 = vst.msk [vmem:[#allocation2 + $0xe8] sm:$0xff] %vm3388_vm9, %v3385_v35  ;;  %v3125_v42 = vadd.f32 %v3124_v39, %v3012_v7  ;;  %v4942_v61 = vmul.f32 %v4878_v10, %v4830_v36  ;;  %v10544_v7 = vpop.permute.xlu1 %3821  ;;  %v4943_v39 = vmul.f32 %v4879_v11, %v12940_v14  ;;  %v3447_v36 = vld [vmem:[#allocation2 + $0xd0] ss:$2 sm:$0xff] }
 0x48e   :  { %v3238_v26 = vadd.f32 %v3237_v5, %v3125_v42  ;;  %v3353_v54 = vpop.f32.mrf.mxu1 }
 0x490   :  { %v3240_v55 = vpop.f32.mrf.mxu0  ;;  %5462 = vmatmul.f32.gmra.mxu2 %v4940_v53  ;;  %v3351_v0 = vadd.f32 %v3350_v40, %v3238_v26  ;;  %v4831_v40 = vsel %vm2652_vm5, %v12941_v12, %v9435_v32  ;;  %v4880_v26 = vld [vmem:[%s12163_s8 + $0x110] sm:$0xff] }
 0x491   :  { %v4944_v14 = vmul.f32 %v4880_v26, %v4831_v40 }
 0x492   :  { %v3386_v30 = vmax.f32 %v3351_v0, 0.0 }
 0x493   :  { %5985 = vmatmul.msk.f32.gmra.mxu0 %vm2652_vm5, %v4941_v24  ;;  %v3127_v5 = vpop.f32.mrf.mxu2  ;;  %v3449_v24 = vld [vmem:[#allocation2 + $0xe0] ss:$2 sm:$0xff] }
 0x494   :  { %3419 = vst.msk [vmem:[#allocation2 + $0xf0] sm:$0xff] %vm3388_vm9, %v3386_v30  ;;  %v3128_v31 = vadd.f32 %v3127_v5, %v3015_v57  ;;  %v3479_v57 = vld [vmem:[#allocation2 + $0xd1] ss:$2 sm:$0xff]  ;;  %v4945_v30 = vmul.f32 %v4881_v18, %v12941_v12  ;;  %v3718_v5 = vpop.permute.xlu2 %3717 }
 0x495   :  { %v10565_v11 = vmax.f32 %v3447_v36, %v3479_v57  ;;  %v3740_v36 = vrot.slane %v9765_v34, 7 }
 0x496   :  { %v3241_v35 = vadd.f32 %v3240_v55, %v3128_v31  ;;  %v3481_v55 = vld [vmem:[#allocation2 + $0xe1] ss:$2 sm:$0xff]  ;;  %v10563_v31 = vpop.permute.xlu1 %3825 }
 0x497   :  { %v10561_v10 = vmax.f32 %v3449_v24, %v3481_v55  ;;  %v3628_v55 = vrot.slane %v9765_v34, 6  ;;  %v3641_v18 = vrot.slane %v10565_v11, 6 }
 0x498   :  { %v5531_v47 = vpop.f32.mrf.mxu0  ;;  %5465 = vmatmul.f32.gmra.mxu2 %v4942_v61  ;;  %v3354_v42 = vadd.f32 %v3353_v54, %v3241_v35  ;;  %v4883_v61 = vld [vmem:[%s12163_s8 + $0x128] sm:$0xff] }
 0x499   :  { %12942 = vst [vmem:[#allocation155_spill] sm:$0xff] %v10561_v10  ;;  %v12943_v35 = vld [vmem:[#allocation156_spill] sm:$0xff]  ;;  %v3754_v40 = vrot.slane %v10561_v10, 7 }
 0x49a   :  { %v3387_v53 = vmax.f32 %v3354_v42, 0.0  ;;  %v4832_v54 = vsel %vm2652_vm5, %v12943_v35, %v9345_v51  ;;  %v4947_v24 = vmul.f32 %v4883_v61, %v12943_v35  ;;  %v4833_v61 = vsel %vm2652_vm5, %v12796_v15, %v9214_v21 }
 0x49b   :  { %5986 = vmatmul.msk.f32.gmra.mxu0 %vm2652_vm5, %v4943_v39  ;;  %v5418_v25 = vpop.f32.mrf.mxu2  ;;  %v12945_v35 = vrot.slane %v9763_v37, 6  ;;  %v3770_v21 = vsel %vm1400_vm8, %v3740_v36, %v12946_v28 }
 0x49c   :  { %3420 = vst.msk [vmem:[#allocation2 + $0xf8] sm:$0xff] %vm3388_vm9, %v3387_v53  ;;  %v10555_v0 = vadd.f32 %v5531_v47, %v5418_v25  ;;  %v4882_v47 = vld [vmem:[%s12163_s8 + $0x120] sm:$0xff]  ;;  %v3642_v53 = vrot.slane %v10561_v10, 6 }
 0x49d   :  { %v4946_v51 = vmul.f32 %v4882_v47, %v4832_v54  ;;  %v3658_v54 = vsel %vm1175_vm3, %v3628_v55, %v12945_v35 }
 0x49e   :  { %v3722_v49 = vpop.permute.xlu1 %3721 }
 0x4a0   :  { %v5534_v32 = vpop.f32.mrf.mxu0  ;;  %5468 = vmatmul.f32.gmra.mxu2 %v4944_v14  ;;  %v12354_v14 = vrot.slane %v10565_v11, 7 }
 0x4a3   :  { %5987 = vmatmul.msk.f32.gmra.mxu0 %vm2652_vm5, %v4945_v30  ;;  %v3451_v39 = vld [vmem:[#allocation2 + $0xf0] ss:$2 sm:$0xff]  ;;  %v3483_v42 = vld [vmem:[#allocation2 + $0xf1] ss:$2 sm:$0xff]  ;;  %v5421_v12 = vpop.f32.mrf.mxu2 }
 0x4a4   :  { %v10579_v26 = vadd.f32 %v5534_v32, %v5421_v12  ;;  %v10581_v25 = vmax.f32 %v3451_v39, %v3483_v42  ;;  %v3757_v39 = vsel %vm1400_vm8, %v12354_v14, %v3754_v40  ;;  %v3645_v42 = vsel %vm1175_vm3, %v3641_v18, %v3642_v53  ;;  %v4604_v14 = vld [vmem:[%s12164_s5 + $0x78] sm:$0xff] }
 0x4a5   :  { %v3725_v12 = vmul.f32 %v9937_v19, %v3658_v54  ;;  %v3830_v19 = vpop.permute.xlu0 %3829  ;;  %4668 = vmatpush.msra.mxu3 %v4604_v14 }
 0x4a6   :  { %12944 = vst [vmem:[#allocation22_spill] sm:$0xff] %v10581_v25  ;;  %v6353_v57 = vpack.i.bf16 %v10581_v25, %v10561_v10  ;;  %v3643_v30 = vrot.slane %v10581_v25, 6  ;;  %v3755_v32 = vrot.slane %v10581_v25, 7  ;;  %v3837_v10 = vmul.f32 %v9950_v33, %v3770_v21  ;;  %v3477_v21 = vld [vmem:[#allocation2 + $0xc1] ss:$2 sm:$0xff] }
 0x4a7   :  { %v10627_v59 = vmul.f32 %v3830_v19, %v3757_v39  ;;  %v4887_v19 = vld [vmem:[%s12163_s8 + $0x148] sm:$0xff] }
 0x4a8   :  { %v5537_v47 = vpop.f32.mrf.mxu0  ;;  %5471 = vmatmul.f32.gmra.mxu2 %v4946_v51  ;;  %6354 = vrot.lane.b32.xlu0 %v6353_v57, %s6445_s25  ;;  %v3659_v51 = vsel %vm1175_vm3, %v3643_v30, %v3628_v55  ;;  %v3771_v35 = vsel %vm1400_vm8, %v3755_v32, %v3740_v36  ;;  %v3834_v57 = vpop.permute.xlu2 %3833  ;;  %v4884_v55 = vld [vmem:[%s12163_s8 + $0x130] sm:$0xff]  ;;  %v3756_v36 = vsel %vm1400_vm8, %v3754_v40, %v3755_v32  ;;  %v4885_v40 = vld [vmem:[%s12163_s8 + $0x138] sm:$0xff] }
 0x4a9   :  { %v3724_v54 = vmul.f32 %v9839_v46, %v3659_v51  ;;  %v3836_v28 = vmul.f32 %v9911_v22, %v3771_v35  ;;  %v3644_v33 = vsel %vm1175_vm3, %v3642_v53, %v3643_v30  ;;  %v3445_v46 = vld [vmem:[#allocation2 + $0xc0] ss:$2 sm:$0xff]  ;;  %v10633_v35 = vmul.f32 %v3834_v57, %v3756_v36  ;;  %v4596_v53 = vld [vmem:[%s12164_s5 + $0x38] sm:$0xff] }
 0x4aa   :  { %v10635_v9 = vmul.f32 %v3722_v49, %v3644_v33  ;;  %v10648_v30 = vmax.f32 %v3445_v46, %v3477_v21  ;;  %v4949_v32 = vmul.f32 %v4885_v40, %v12796_v15  ;;  %v4951_v36 = vmul.f32 %v4887_v19, %v12803_v63  ;;  %v4603_v33 = vld [vmem:[%s12164_s5 + $0x70] sm:$0xff]  ;;  %v4889_v40 = vld [vmem:[%s12163_s8 + $0x158] sm:$0xff] }
 0x4ab   :  { %5988 = vmatmul.msk.f32.gmra.mxu0 %vm2652_vm5, %v4947_v24  ;;  %v10631_v24 = vmul.f32 %v3718_v5, %v3645_v42  ;;  %v5424_v22 = vpop.f32.mrf.mxu2  ;;  %v6323_v14 = vpack.i.bf16 %v3725_v12, %v3724_v54  ;;  %v6329_v51 = vpack.i.bf16 %v3837_v10, %v3836_v28  ;;  %v4948_v5 = vmul.f32 %v4884_v55, %v4833_v61  ;;  %v4886_v61 = vld [vmem:[%s12163_s8 + $0x140] sm:$0xff]  ;;  %v4599_v10 = vld [vmem:[%s12164_s5 + $0x50] sm:$0xff] }
 0x4ac   :  { %12948 = vst [vmem:[#allocation69_spill] sm:$0xff] %v10635_v9  ;;  %v10637_v16 = vadd.f32 %v5537_v47, %v5424_v22  ;;  %v4834_v47 = vsel %vm2652_vm5, %v12803_v63, %v9504_v45  ;;  %v3640_v39 = vrot.slane %v10648_v30, 6  ;;  %v10669_v45 = vld [vmem:[%s12155_s7 + $0x100] sm:$0xff]  ;;  %v12950_v28 = vrot.slane %v10424_v2, 6  ;;  %4669 = vmatpush.msra.mxu3 %v4603_v33  ;;  %v4888_v22 = vld [vmem:[%s12163_s8 + $0x150] sm:$0xff] }
 0x4ad   :  { %12947 = vst [vmem:[#allocation100_spill] sm:$0xff] %v10631_v24  ;;  %6324 = vrot.lane.b32.xlu1 %v6323_v14, %s6446_s24  ;;  %6330 = vrot.lane.b32.xlu2 %v6329_v51, %s6444_s23  ;;  %v4950_v54 = vmul.f32 %v4886_v61, %v4834_v47  ;;  %v4835_v21 = vsel %vm2652_vm5, %v12808_v13, %v9433_v52  ;;  %v3752_v63 = vrot.slane %v10648_v30, 7 }
 0x4ae   :  { %v3646_v15 = vsel %vm1175_vm3, %v3640_v39, %v3641_v18  ;;  %12949 = vst [vmem:[#allocation43_spill] sm:$0xff] %v10669_v45  ;;  %v3647_v57 = vsel %vm1175_vm3, %v12950_v28, %v3640_v39  ;;  %v4952_v52 = vmul.f32 %v4888_v22, %v4835_v21  ;;  %v4953_v61 = vmul.f32 %v4889_v40, %v12808_v13  ;;  %v4892_v21 = vld [vmem:[%s12163_s8 + $0x170] sm:$0xff] }
 0x4af   :  { %v3737_v18 = vmul.f32 %v10542_v38, %v3646_v15  ;;  %v3736_v46 = vmul.f32 %v10155_v41, %v3647_v57  ;;  %v12951_v41 = vrot.slane %v10565_v11, 7  ;;  %v4836_v19 = vsel %vm2652_vm5, %v8622_v20, %v12834_v44  ;;  %v4890_v15 = vld [vmem:[%s12163_s8 + $0x160] sm:$0xff]  ;;  %v4891_v57 = vld [vmem:[%s12163_s8 + $0x168] sm:$0xff] }
 0x4b0   :  { %v5540_v49 = vpop.f32.mrf.mxu0  ;;  %5474 = vmatmul.f32.gmra.mxu2 %v4948_v5  ;;  %v6346_v13 = vpack.i.bf16 %v10565_v11, %v10648_v30  ;;  %v4954_v44 = vmul.f32 %v4890_v15, %v4836_v19  ;;  %v10776_v19 = vld [vmem:[%s12155_s7 + $0x120] sm:$0xff] }
 0x4b1   :  { %v6336_v14 = vpack.i.bf16 %v3737_v18, %v3736_v46  ;;  %v3758_v5 = vsel %vm1400_vm8, %v3752_v63, %v12951_v41  ;;  %v4602_v18 = vld [vmem:[%s12164_s5 + $0x68] sm:$0xff]  ;;  %v4837_v46 = vsel %vm2652_vm5, %v8605_v58, %v9561_v60  ;;  %12957 = vst [vmem:[#allocation101_spill] sm:$0xff] %v10776_v19 }
 0x4b2   :  { %v3849_v39 = vmul.f32 %v10563_v31, %v3758_v5  ;;  %4670 = vmatpush.msra.mxu3 %v4602_v18  ;;  %v4956_v60 = vmul.f32 %v4892_v21, %v4837_v46  ;;  %v12955_v5 = vld [vmem:[#allocation98_spill] sm:$0xff]  ;;  %v4896_v46 = vld [vmem:[%s12163_s8 + $0x190] sm:$0xff] }
 0x4b3   :  { %5989 = vmatmul.msk.f32.gmra.mxu0 %vm2652_vm5, %v4949_v32  ;;  %v5427_v42 = vpop.f32.mrf.mxu2 }
 0x4b4   :  { %v10659_v12 = vadd.f32 %v5540_v49, %v5427_v42  ;;  %v12952_v49 = vrot.slane %v10424_v2, 7  ;;  %v10709_v42 = vpop.permute.xlu0 %6244 }
 0x4b5   :  { %3997 = vperm.xlu1 %6328, %v10669_v45   ;;  %4109 = vperm.xlu2 %6334, %v10669_v45  }
 0x4b6   :  { %v3759_v32 = vsel %vm1400_vm8, %v12952_v49, %v3752_v63 }
 0x4b8   :  { %v5543_v55 = vpop.f32.mrf.mxu0  ;;  %5477 = vmatmul.f32.gmra.mxu2 %v4950_v54 }
 0x4bb   :  { %5990 = vmatmul.msk.f32.gmra.mxu0 %vm2652_vm5, %v4951_v36  ;;  %v5430_v38 = vpop.f32.mrf.mxu2  ;;  %v4955_v36 = vmul.f32 %v4891_v57, %v8622_v20  ;;  %v4893_v20 = vld [vmem:[%s12163_s8 + $0x178] sm:$0xff]  ;;  %v5301_v57 = vld [vmem:[%s12162_s10 + $0x130] sm:$0xff] }
 0x4bc   :  { %v10691_v51 = vadd.f32 %v5543_v55, %v5430_v38  ;;  %v10733_v33 = vpop.permute.xlu0 %6284  ;;  %v10751_v38 = vld [vmem:[%s12155_s7 + $0x118] sm:$0xff]  ;;  %v4957_v40 = vmul.f32 %v4893_v20, %v8605_v58  ;;  %v10769_v58 = vpop.permute.xlu2 %6249 }
 0x4bd   :  { %6337 = vrot.lane.b32.xlu1 %v6336_v14, %s6446_s24  ;;  %4113 = vperm.xlu2 %6334, %v10468_v29   ;;  %v3848_v29 = vmul.f32 %v10544_v7, %v3759_v32  ;;  %v12953_v7 = vmov 5   ;;  %v4894_v32 = vld [vmem:[%s12163_s8 + $0x180] sm:$0xff]  ;;  %v4897_v20 = vld [vmem:[%s12163_s8 + $0x198] sm:$0xff] }
 0x4be   :  { %6351 = vset.pattern.permute.xlu1 %v12862_v48 }
 0x4bf   :  { %v6341_v28 = vpack.i.bf16 %v3849_v39, %v3848_v29  ;;  %v4895_v39 = vld [vmem:[%s12163_s8 + $0x188] sm:$0xff] }
 0x4c0   :  { %v5546_v47 = vpop.f32.mrf.mxu0  ;;  %5480 = vmatmul.f32.gmra.mxu2 %v4952_v52  ;;  %v12956_v52 = vld [vmem:[#allocation48_spill] sm:$0xff] }
 0x4c1   :  { %v4838_v49 = vsel %vm2652_vm5, %v12956_v52, %v12955_v5  ;;  %v12961_v5 = vld [vmem:[#allocation133_spill] sm:$0xff] }
 0x4c2   :  { %v4958_v29 = vmul.f32 %v4894_v32, %v4838_v49  ;;  %v10815_v49 = vld [vmem:[%s12155_s7 + $0x128] sm:$0xff] }
 0x4c3   :  { %5991 = vmatmul.msk.f32.gmra.mxu0 %vm2652_vm5, %v4953_v61  ;;  %v5433_v54 = vpop.f32.mrf.mxu2  ;;  %12962 = vst [vmem:[#allocation132_spill] sm:$0xff] %v10815_v49 }
 0x4c4   :  { %v10721_v31 = vadd.f32 %v5546_v47, %v5433_v54  ;;  %v10755_v41 = vpop.permute.xlu0 %6304  ;;  %v4959_v54 = vmul.f32 %v4895_v39, %v12956_v52  ;;  %v12365_v52 = vrot.slane %v12961_v5, 2  ;;  %v10818_v32 = vpop.permute.xlu2 %6254 }
 0x4c5   :  { %6342 = vrot.lane.b32.xlu1 %v6341_v28, %s6444_s23  ;;  %6347 = vrot.lane.b32.xlu2 %v6346_v13, %s6445_s25  ;;  %12954 = vst [vmem:[#allocation19_spill] sm:$0xff] %v10755_v41  ;;  %v5302_v28 = vld [vmem:[%s12162_s10 + $0x138] sm:$0xff]  ;;  %v4601_v13 = vld [vmem:[%s12164_s5 + $0x60] sm:$0xff] }
 0x4c6   :  { %6352 = vset.pattern.permute.xlu2 %v12953_v7  ;;  %5675 = vmatpush.msrb.mxu1 %v5302_v28 }
 0x4c7   :  { %4671 = vmatpush.msra.mxu3 %v4601_v13 }
 0x4c8   :  { %v5549_v55 = vpop.f32.mrf.mxu0  ;;  %5483 = vmatmul.f32.gmra.mxu2 %v4954_v44  ;;  %5676 = vmatpush.msrb.mxu1 %v5301_v57  ;;  %v12963_v57 = vld [vmem:[#allocation18_spill] sm:$0xff] }
 0x4cb   :  { %5992 = vmatmul.msk.f32.gmra.mxu0 %vm2652_vm5, %v4955_v36  ;;  %v5436_v22 = vpop.f32.mrf.mxu2  ;;  %v12960_v36 = vld [vmem:[#allocation51_spill] sm:$0xff] }
 0x4cc   :  { %v10742_v63 = vadd.f32 %v5549_v55, %v5436_v22  ;;  %v12959_v55 = vld [vmem:[#allocation124_spill] sm:$0xff]  ;;  %v4961_v39 = vmul.f32 %v4897_v20, %v12960_v36 }
 0x4cd   :  { %4117 = vperm.xlu1 %6351, %v10487_v4   ;;  %4009 = vperm.xlu2 %6352, %v10751_v38   ;;  %v4839_v18 = vsel %vm2652_vm5, %v12960_v36, %v12959_v55  ;;  %v12964_v55 = vld [vmem:[#allocation134_spill] sm:$0xff]  ;;  %v4899_v20 = vld [vmem:[%s12163_s8 + $0x1a8] sm:$0xff] }
 0x4ce   :  { %v4840_v36 = vsel %vm2652_vm5, %v12964_v55, %v12963_v57  ;;  %v5293_v57 = vld [vmem:[%s12162_s10 + $0xf0] sm:$0xff] }
 0x4d0   :  { %v5552_v14 = vpop.f32.mrf.mxu0  ;;  %5486 = vmatmul.f32.gmra.mxu2 %v4956_v60  ;;  %v5300_v60 = vld [vmem:[%s12162_s10 + $0x128] sm:$0xff] }
 0x4d1   :  { %5677 = vmatpush.msrb.mxu1 %v5300_v60  ;;  %v5296_v60 = vld [vmem:[%s12162_s10 + $0x108] sm:$0xff] }
 0x4d3   :  { %5993 = vmatmul.msk.f32.gmra.mxu0 %vm2652_vm5, %v4957_v40  ;;  %v5439_v47 = vpop.f32.mrf.mxu2  ;;  %v4960_v40 = vmul.f32 %v4896_v46, %v4839_v18  ;;  %v4898_v46 = vld [vmem:[%s12163_s8 + $0x1a0] sm:$0xff] }
 0x4d4   :  { %v10764_v61 = vadd.f32 %v5552_v14, %v5439_v47  ;;  %v5299_v14 = vld [vmem:[%s12162_s10 + $0x120] sm:$0xff] }
 0x4d5   :  { %4121 = vperm.xlu1 %6351, %v10751_v38   ;;  %6359 = vset.pattern.permute.xlu2 %v12862_v48 }
 0x4d6   :  { %4125 = vperm.xlu2 %6359, %v10776_v19   ;;  %5678 = vmatpush.msrb.mxu1 %v5299_v14  ;;  %v5295_v14 = vld [vmem:[%s12162_s10 + $0x100] sm:$0xff] }
 0x4d8   :  { %v5555_v15 = vpop.f32.mrf.mxu0  ;;  %5489 = vmatmul.f32.gmra.mxu2 %v4958_v29  ;;  %v12366_v29 = vrot.slane %v9763_v37, 2 }
 0x4da   :  { %v10790_v44 = vpop.permute.xlu0 %6309  ;;  %v3993_v13 = vsel %vm1850_vm2, %v12366_v29, %v12365_v52 }
 0x4db   :  { %5994 = vmatmul.msk.f32.gmra.mxu0 %vm2652_vm5, %v4959_v54  ;;  %12958 = vst [vmem:[#allocation74_spill] sm:$0xff] %v10790_v44  ;;  %v5442_v21 = vpop.f32.mrf.mxu2  ;;  %v5297_v54 = vld [vmem:[%s12162_s10 + $0x110] sm:$0xff] }
 0x4dc   :  { %v10798_v22 = vadd.f32 %v5555_v15, %v5442_v21  ;;  %v5298_v15 = vld [vmem:[%s12162_s10 + $0x118] sm:$0xff]  ;;  %v4595_v44 = vld [vmem:[%s12164_s5 + $0x30] sm:$0xff] }
 0x4dd   :  { %6358 = vset.pattern.permute.xlu1 %v12953_v7  ;;  %5679 = vmatpush.msrb.mxu1 %v5298_v15 }
 0x4de   :  { %4013 = vperm.xlu1 %6358, %v10776_v19   ;;  %4129 = vperm.xlu2 %6359, %v10815_v49  }
 0x4df   :  { %5680 = vmatpush.msrb.mxu1 %v5297_v54  ;;  %v4963_v54 = vmul.f32 %v4899_v20, %v12964_v55  ;;  %v4841_v55 = vsel %vm2652_vm5, %v12850_v27, %v9557_v43  ;;  %v10884_v20 = vld [vmem:[%s12155_s7 + $0x138] sm:$0xff] }
 0x4e0   :  { %v10820_v47 = vpop.f32.mrf.mxu0  ;;  %5492 = vmatmul.f32.gmra.mxu2 %v4960_v40  ;;  %v4962_v40 = vmul.f32 %v4898_v46, %v4840_v36  ;;  %v4900_v36 = vld [vmem:[%s12163_s8 + $0x1b0] sm:$0xff]  ;;  %v10879_v46 = vpop.permute.xlu1 %6259  ;;  %v4901_v43 = vld [vmem:[%s12163_s8 + $0x1b8] sm:$0xff] }
 0x4e1   :  { %5681 = vmatpush.msrb.mxu1 %v5296_v60  ;;  %v5292_v60 = vld [vmem:[%s12162_s10 + $0xe8] sm:$0xff] }
 0x4e2   :  { %v4002_v28 = vpop.permute.xlu0 %4001 }
 0x4e3   :  { %5995 = vmatmul.msk.f32.gmra.mxu0 %vm2652_vm5, %v4961_v39  ;;  %v4061_v18 = vmul.f32 %v4002_v28, %v3993_v13  ;;  %v10843_v21 = vpop.f32.mrf.mxu2  ;;  %v10856_v39 = vpop.permute.xlu2 %6274  ;;  %5682 = vmatpush.msrb.mxu1 %v5295_v14  ;;  %v5294_v28 = vld [vmem:[%s12162_s10 + $0xf8] sm:$0xff]  ;;  %v5291_v14 = vld [vmem:[%s12162_s10 + $0xe0] sm:$0xff] }
 0x4e4   :  { %v4600_v13 = vld [vmem:[%s12164_s5 + $0x58] sm:$0xff] }
 0x4e5   :  { %4398 = vrot.lane.b32.xlu0 %v4061_v18, %s6446_s24  ;;  %5683 = vmatpush.msrb.mxu1 %v5294_v28 }
 0x4e6   :  { %4017 = vperm.xlu1 %6358, %v10815_v49   ;;  %4672 = vmatpush.msra.mxu3 %v4600_v13  ;;  %v4965_v13 = vmul.f32 %v4901_v43, %v12850_v27  ;;  %v4598_v27 = vld [vmem:[%s12164_s5 + $0x48] sm:$0xff]  ;;  %v4902_v43 = vld [vmem:[%s12163_s8 + $0x1c0] sm:$0xff]  ;;  %v12970_v49 = vld [vmem:[#allocation49_spill] sm:$0xff] }
 0x4e7   :  { %5684 = vmatpush.msrb.mxu1 %v5293_v57  ;;  %v5290_v57 = vld [vmem:[%s12162_s10 + $0xd8] sm:$0xff] }
 0x4e8   :  { %v10858_v15 = vpop.f32.mrf.mxu0  ;;  %5495 = vmatmul.f32.gmra.mxu2 %v4962_v40  ;;  %v4964_v40 = vmul.f32 %v4900_v36, %v4841_v55  ;;  %v5289_v55 = vld [vmem:[%s12162_s10 + $0xd0] sm:$0xff]  ;;  %v4842_v36 = vsel %vm2652_vm5, %v12857_v3, %v9516_v23  ;;  %4673 = vmatpush.msra.mxu3 %v4599_v10  ;;  %v5288_v23 = vld [vmem:[%s12162_s10 + $0xc8] sm:$0xff]  ;;  %v4597_v10 = vld [vmem:[%s12164_s5 + $0x40] sm:$0xff] }
 0x4e9   :  { %5685 = vmatpush.msrb.mxu1 %v5292_v60 }
 0x4ea   :  { %4674 = vmatpush.msra.mxu3 %v4598_v27 }
 0x4eb   :  { %5996 = vmatmul.msk.f32.gmra.mxu0 %vm2652_vm5, %v4963_v54  ;;  %v10877_v18 = vpop.f32.mrf.mxu2  ;;  %v10896_v54 = vpop.permute.xlu2 %6279  ;;  %5686 = vmatpush.msrb.mxu1 %v5291_v14  ;;  %v4903_v14 = vld [vmem:[%s12163_s8 + $0x1c8] sm:$0xff] }
 0x4ec   :  { %12965 = vst [vmem:[#allocation115_spill] sm:$0xff] %v10896_v54  ;;  %4675 = vmatpush.msra.mxu3 %v4597_v10  ;;  %v4967_v29 = vmul.f32 %v4903_v14, %v12857_v3  ;;  %v4904_v3 = vld [vmem:[%s12163_s8 + $0x1d0] sm:$0xff]  ;;  %v4905_v14 = vld [vmem:[%s12163_s8 + $0x1d8] sm:$0xff] }
 0x4ed   :  { %4025 = vperm.xlu0 %6335, %v10884_v20   ;;  %5687 = vmatpush.msrb.mxu1 %v5290_v57  ;;  %v5287_v57 = vld [vmem:[%s12162_s10 + $0xc0] sm:$0xff] }
 0x4ee   :  { %4676 = vmatpush.msra.mxu3 %v4596_v53 }
 0x4ef   :  { %5688 = vmatpush.msrb.mxu1 %v5289_v55  ;;  %v4966_v55 = vmul.f32 %v4902_v43, %v4842_v36  ;;  %v4594_v36 = vld [vmem:[%s12164_s5 + $0x28] sm:$0xff]  ;;  %v4843_v43 = vsel %vm2652_vm5, %v12864_v1, %v9683_v56  ;;  %v4592_v56 = vld [vmem:[%s12164_s5 + $0x18] sm:$0xff] }
 0x4f0   :  { %v10898_v28 = vpop.f32.mrf.mxu0  ;;  %5498 = vmatmul.f32.gmra.mxu2 %v4964_v40  ;;  %v10925_v40 = vpop.permute.xlu1 %6264  ;;  %4677 = vmatpush.msra.mxu3 %v4595_v44 }
 0x4f1   :  { %5689 = vmatpush.msrb.mxu1 %v5288_v23  ;;  %v4968_v23 = vmul.f32 %v4904_v3, %v4843_v43  ;;  %v4906_v3 = vld [vmem:[%s12163_s8 + $0x1e0] sm:$0xff] }
 0x4f2   :  { %4678 = vmatpush.msra.mxu3 %v4594_v36  ;;  %v12969_v36 = vld [vmem:[#allocation53_spill] sm:$0xff] }
 0x4f3   :  { %5997 = vmatmul.msk.f32.gmra.mxu0 %vm2652_vm5, %v4965_v13  ;;  %v10920_v60 = vpop.f32.mrf.mxu2  ;;  %v10930_v13 = vld [vmem:[%s12155_s7 + $0x140] sm:$0xff]  ;;  %v10945_v27 = vpop.permute.xlu2 %6299  ;;  %5690 = vmatpush.msrb.mxu1 %v5287_v57  ;;  %v4844_v43 = vsel %vm2652_vm5, %v12970_v49, %v12969_v36 }
 0x4f4   :  { %12966 = vst [vmem:[#allocation11_spill] sm:$0xff] %v10930_v13 }
 0x4f5   :  { %4029 = vperm.xlu0 %6335, %v10930_v13   ;;  %12967 = vst [vmem:[#allocation71_spill] sm:$0xff] %v10945_v27 }
 0x4f8   :  { %v10947_v52 = vpop.f32.mrf.mxu0  ;;  %5501 = vmatmul.f32.gmra.mxu2 %v4966_v55  ;;  %v10973_v10 = vpop.permute.xlu1 %6269  ;;  %v4969_v55 = vmul.f32 %v4905_v14, %v12864_v1  ;;  %v4907_v14 = vld [vmem:[%s12163_s8 + $0x1e8] sm:$0xff] }
 0x4f9   :  { %v4971_v41 = vmul.f32 %v4907_v14, %v12970_v49  ;;  %v12381_v49 = vrot.slane %v9765_v34, 3 }
 0x4fb   :  { %5998 = vmatmul.msk.f32.gmra.mxu0 %vm2652_vm5, %v4967_v29  ;;  %v5454_v53 = vpop.f32.mrf.mxu2  ;;  %v4593_v29 = vld [vmem:[%s12164_s5 + $0x20] sm:$0xff]  ;;  %v10975_v44 = vpop.permute.xlu2 %6319 }
 0x4fc   :  { %4679 = vmatpush.msra.mxu3 %v4593_v29  ;;  %12968 = vst [vmem:[#allocation157_spill] sm:$0xff] %v10975_v44  ;;  %v4591_v29 = vld [vmem:[%s12164_s5 + $0x10] sm:$0xff] }
 0x4fd   :  { %6364 = vset.pattern.permute.xlu0 %v12862_v48 }
 0x4fe   :  { %4680 = vmatpush.msra.mxu3 %v4592_v56  ;;  %v4589_v56 = vld [vmem:[%s12164_s5] sm:$0xff] }
 0x500   :  { %v5570_v57 = vpop.f32.mrf.mxu0  ;;  %5504 = vmatmul.f32.gmra.mxu2 %v4968_v23  ;;  %v4590_v23 = vld [vmem:[%s12164_s5 + $0x8] sm:$0xff]  ;;  %4681 = vmatpush.msra.mxu3 %v4591_v29  ;;  %v10997_v36 = vpop.permute.xlu1 %6289  ;;  %v12972_v29 = vld [vmem:[#allocation149_spill] sm:$0xff] }
 0x501   :  { %12971 = vst [vmem:[#allocation24_spill] sm:$0xff] %v10997_v36  ;;  %v4845_v27 = vsel %vm2652_vm5, %v12972_v29, %v12898_v6 }
 0x502   :  { %4682 = vmatpush.msra.mxu3 %v4590_v23  ;;  %v4077_v23 = vrot.slane %v9763_v37, 3 }
 0x503   :  { %5999 = vmatmul.msk.f32.gmra.mxu0 %vm2652_vm5, %v4969_v55  ;;  %v5457_v1 = vpop.f32.mrf.mxu2  ;;  %v4970_v55 = vmul.f32 %v4906_v3, %v4844_v43  ;;  %v4908_v43 = vld [vmem:[%s12163_s8 + $0x1f0] sm:$0xff] }
 0x504   :  { %4683 = vmatpush.msra.mxu3 %v4589_v56  ;;  %v4972_v14 = vmul.f32 %v4908_v43, %v4845_v27  ;;  %v4106_v6 = vsel %vm2075_vm4, %v12381_v49, %v4077_v23  ;;  %v5571_v36 = vadd.f32 %v5570_v57, %v5457_v1  ;;  %v12386_v49 = vrot.slane %v10581_v25, 5 }
 0x505   :  { %v5562_v1 = vadd.f32 %v10858_v15, %v10877_v18 }
 0x507   :  { %v10999_v45 = vpop.permute.xlu2 %6330 }
 0x508   :  { %v5573_v44 = vpop.f32.mrf.mxu0  ;;  %5507 = vmatmul.f32.gmra.mxu2 %v4970_v55  ;;  %v4909_v55 = vld [vmem:[%s12163_s8 + $0x1f8] sm:$0xff]  ;;  %v11014_v56 = vpop.permute.xlu1 %6294 }
 0x509   :  { %12973 = vst [vmem:[#allocation102_spill] sm:$0xff] %v11014_v56  ;;  %v4973_v24 = vmul.f32 %v4909_v55, %v12972_v29  ;;  %v6332_v55 = vunpack.i.l.bf16 %v10999_v45 }
 0x50b   :  { %6000 = vmatmul.msk.f32.gmra.mxu0 %vm2652_vm5, %v4971_v41  ;;  %v5460_v3 = vpop.f32.mrf.mxu2 }
 0x50c   :  { %v5574_v56 = vadd.f32 %v5573_v44, %v5460_v3  ;;  %v5565_v44 = vadd.f32 %v10898_v28, %v10920_v60  ;;  %v5559_v3 = vadd.f32 %v10820_v47, %v10843_v21  ;;  %v12975_v28 = vld [vmem:[#allocation68_spill] sm:$0xff] }
 0x50f   :  { %v4110_v19 = vpop.permute.xlu2 %4109 }
 0x510   :  { %v5576_v41 = vpop.f32.mrf.mxu0  ;;  %5510 = vmatmul.f32.gmra.mxu2 %v4972_v14  ;;  %v4172_v9 = vmul.f32 %v4110_v19, %v4106_v6  ;;  %v11025_v13 = vpop.permute.xlu1 %6314  ;;  %v5568_v14 = vadd.f32 %v10947_v52, %v5454_v53  ;;  %v3500_v19 = vrot.slane %v9765_v34, 5  ;;  %v3501_v53 = vrot.slane %v9763_v37, 5 }
 0x512   :  { %4460 = vrot.lane.b32.xlu2 %v4172_v9, %s6444_s23  ;;  %v3531_v52 = vsel %vm918_vm7, %v12386_v49, %v3500_v19 }
 0x513   :  { %6001 = vmatmul.msk.f32.gmra.mxu0 %vm2652_vm5, %v4973_v24  ;;  %v5463_v27 = vpop.f32.mrf.mxu2  ;;  %v11032_v24 = vld [vmem:[%s12155_s7 + $0x130] sm:$0xff] }
 0x514   :  { %v5577_v43 = vadd.f32 %v5576_v41, %v5463_v27  ;;  %v6246_v41 = vunpack.i.l.bf16 %v10709_v42  ;;  %v12976_v27 = vmov 4  }
 0x516   :  { %5814 = vmatpush.msra.mxu1 %v5577_v43  ;;  %v3967_v43 = vrot.slane %v9914_v50, 2 }
 0x517   :  { %v11054_v6 = vpop.permute.xlu2 %4113 }
 0x518   :  { %v5579_v54 = vpop.f32.mrf.mxu0  ;;  %5815 = vmatpush.msra.mxu1 %v5574_v56  ;;  %v3530_v56 = vsel %vm918_vm7, %v3500_v19, %v3501_v53  ;;  %v12978_v19 = vld [vmem:[#allocation32_spill] sm:$0xff] }
 0x51a   :  { %5816 = vmatpush.msra.mxu1 %v5571_v36  ;;  %4133 = vperm.xlu2 %6359, %v11032_v24  }
 0x51b   :  { %v5466_v9 = vpop.f32.mrf.mxu2 }
 0x51c   :  { %v11038_v57 = vadd.f32 %v5579_v54, %v5466_v9  ;;  %5817 = vmatpush.msra.mxu1 %v5568_v14  ;;  %v3612_v54 = vmul.f32 %v12975_v28, %v3531_v52  ;;  %v12382_v52 = vrot.slane %v9765_v34, 2 }
 0x51e   :  { %12974 = vst [vmem:[#allocation13_spill] sm:$0xff] %v11038_v57  ;;  %5818 = vmatpush.msra.mxu1 %v5565_v44  ;;  %v3613_v44 = vmul.f32 %v12978_v19, %v3530_v56  ;;  %v12981_v19 = vld [vmem:[#allocation62_spill] sm:$0xff] }
 0x51f   :  { %v6325_v29 = vpop.permute.xlu1 %6324 }
 0x520   :  { %v5582_v36 = vpop.f32.mrf.mxu0  ;;  %v6326_v60 = vunpack.i.l.bf16 %v6325_v29  ;;  %5819 = vmatpush.msra.mxu1 %v5562_v1  ;;  %v6327_v15 = vunpack.i.h.bf16 %v6325_v29  ;;  %v4006_v1 = vpop.permute.xlu0 %4005  ;;  %v6333_v29 = vunpack.i.h.bf16 %v10999_v45 }
 0x522   :  { %v4508_v18 = vsel %vm3388_vm9, %v3612_v54, %v6326_v60  ;;  %5820 = vmatpush.msra.mxu1 %v5559_v3  ;;  %6360 = vset.pattern.permute.xlu2 %v12976_v27  ;;  %v3502_v54 = vrot.slane %v12961_v5, 5  ;;  %v12980_v60 = vrot.slane %v12961_v5, 2 }
 0x523   :  { %v5469_v47 = vpop.f32.mrf.mxu2  ;;  %3893 = vperm.xlu2 %6360, %v10487_v4   ;;  %v4524_v21 = vsel %vm2652_vm5, %v4508_v18, %v6332_v55  ;;  %v4509_v4 = vsel %vm3388_vm9, %v3613_v44, %v6327_v15 }
 0x524   :  { %v11061_v14 = vadd.f32 %v5582_v36, %v5469_v47  ;;  %5821 = vmatpush.msra.mxu1 %v10798_v22  ;;  %v4541_v9 = vsel %vm4540_vm10, %v4524_v21, %v6246_v41  ;;  %v12979_v36 = vrot.slane %v9763_v37, 2  ;;  %v4525_v56 = vsel %vm2652_vm5, %v4509_v4, %v6333_v29  ;;  %v11092_v21 = vpop.permute.xlu2 %6347 }
 0x525   :  { %4684 = vmatmul.f32.vlgmr.msra.gmra.mxu3 %v4541_v9  ;;  %v6247_v41 = vunpack.i.h.bf16 %v10709_v42  ;;  %v3529_v18 = vsel %vm918_vm7, %v3501_v53, %v3502_v54  ;;  %v6256_v47 = vunpack.i.l.bf16 %v10818_v32  ;;  %v6261_v9 = vunpack.i.l.bf16 %v10879_v46 }
 0x526   :  { %12977 = vst [vmem:[#allocation72_spill] sm:$0xff] %v11061_v14  ;;  %5822 = vmatpush.msra.mxu1 %v10764_v61  ;;  %v3994_v22 = vsel %vm1850_vm2, %v12382_v52, %v12979_v36  ;;  %v3992_v61 = vsel %vm1850_vm2, %v12980_v60, %v3967_v43  ;;  %v3614_v44 = vmul.f32 %v12981_v19, %v3529_v18  ;;  %v3512_v29 = vrot.slane %v10648_v30, 5  ;;  %v12982_v60 = vld [vmem:[#allocation17_spill] sm:$0xff] }
 0x527   :  { %v3998_v28 = vpop.permute.xlu1 %3997  ;;  %v4062_v45 = vmul.f32 %v4006_v1, %v3992_v61  ;;  %v4542_v42 = vsel %vm4540_vm10, %v4525_v56, %v6247_v41  ;;  %v4078_v36 = vrot.slane %v12961_v5, 3  ;;  %v3968_v61 = vrot.slane %v12982_v60, 2 }
 0x528   :  { %v5585_v3 = vpop.f32.mrf.mxu0  ;;  %v4060_v55 = vmul.f32 %v3998_v28, %v3994_v22  ;;  %5823 = vmatpush.msra.mxu1 %v10742_v63  ;;  %v4510_v4 = vsel %vm3388_vm9, %v3614_v44, %v6256_v47  ;;  %v6257_v28 = vunpack.i.h.bf16 %v10818_v32  ;;  %v3504_v41 = vrot.slane %v12982_v60, 5 }
 0x529   :  { %v4526_v22 = vsel %vm2652_vm5, %v4510_v4, %v6261_v9  ;;  %v3991_v47 = vsel %vm1850_vm2, %v3967_v43, %v3968_v61  ;;  %v12984_v4 = vld [vmem:[#allocation99_spill] sm:$0xff] }
 0x52a   :  { %5824 = vmatpush.msra.mxu1 %v10721_v31  ;;  %4396 = vrot.lane.b32.xlu1 %v4060_v55, %s6446_s24  ;;  %v3503_v31 = vrot.slane %v9914_v50, 5 }
 0x52b   :  { %v5472_v15 = vpop.f32.mrf.mxu2  ;;  %4400 = vrot.lane.b32.xlu2 %v4062_v45, %s6446_s24  ;;  %v12983_v45 = vld [vmem:[#allocation125_spill] sm:$0xff] }
 0x52c   :  { %v11094_v63 = vadd.f32 %v5585_v3, %v5472_v15  ;;  %5825 = vmatpush.msra.mxu1 %v10691_v51  ;;  %v3528_v51 = vsel %vm918_vm7, %v3502_v54, %v3503_v31  ;;  %v12387_v3 = vrot.slane %v10565_v11, 5  ;;  %v6262_v54 = vunpack.i.h.bf16 %v10879_v46 }
 0x52d   :  { %4687 = vmatmul.f32.gmra.mxu3 %v4542_v42  ;;  %v3615_v56 = vmul.f32 %v12983_v45, %v3528_v51  ;;  %v4010_v42 = vpop.permute.xlu2 %4009  ;;  %v6349_v45 = vunpack.i.l.bf16 %v11092_v21 }
 0x52e   :  { %5826 = vmatpush.msra.mxu1 %v10659_v12  ;;  %v6251_v12 = vunpack.i.l.bf16 %v10769_v58 }
 0x52f   :  { %v6338_v1 = vpop.permute.xlu1 %6337  ;;  %v4511_v9 = vsel %vm3388_vm9, %v3615_v56, %v6257_v28  ;;  %v4063_v28 = vmul.f32 %v4010_v42, %v3991_v47  ;;  %v3505_v42 = vrot.slane %v10147_v17, 5 }
 0x530   :  { %v5588_v53 = vpop.f32.mrf.mxu0  ;;  %5827 = vmatpush.msra.mxu1 %v10637_v16  ;;  %v3511_v16 = vrot.slane %v10424_v2, 5  ;;  %v4543_v32 = vsel %vm4540_vm10, %v4526_v22, %v6251_v12  ;;  %v6340_v46 = vunpack.i.h.bf16 %v6338_v1  ;;  %v6339_v18 = vunpack.i.l.bf16 %v6338_v1 }
 0x531   :  { %v3527_v1 = vsel %vm918_vm7, %v3503_v31, %v3504_v41  ;;  %v6350_v12 = vunpack.i.h.bf16 %v11092_v21  ;;  %v6271_v31 = vunpack.i.l.bf16 %v10973_v10 }
 0x532   :  { %5828 = vmatpush.msra.mxu1 %v10579_v26  ;;  %4021 = vperm.xlu1 %6358, %v11032_v24   ;;  %v3519_v26 = vsel %vm918_vm7, %v3511_v16, %v3512_v29 }
 0x533   :  { %v5475_v55 = vpop.f32.mrf.mxu2  ;;  %3897 = vperm.xlu2 %6360, %v10751_v38   ;;  %v3518_v38 = vsel %vm918_vm7, %v3512_v29, %v12387_v3  ;;  %v3624_v51 = vmul.f32 %v12984_v4, %v3519_v26 }
 0x534   :  { %v11120_v15 = vadd.f32 %v5588_v53, %v5475_v55  ;;  %5829 = vmatpush.msra.mxu1 %v10555_v0  ;;  %v4105_v0 = vsel %vm2075_vm4, %v4077_v23, %v4078_v36  ;;  %v4527_v53 = vsel %vm2652_vm5, %v4511_v9, %v6262_v54  ;;  %v12985_v23 = vld [vmem:[#allocation63_spill] sm:$0xff] }
 0x535   :  { %4690 = vmatmul.f32.gmra.mxu3 %v4543_v32  ;;  %v3625_v29 = vmul.f32 %v12985_v23, %v3518_v38  ;;  %v4173_v22 = vmul.f32 %v11054_v6, %v4105_v0  ;;  %v4520_v56 = vsel %vm3388_vm9, %v3624_v51, %v6339_v18  ;;  %v6252_v32 = vunpack.i.h.bf16 %v10769_v58  ;;  %v12986_v0 = vld [vmem:[#allocation15_spill] sm:$0xff] }
 0x536   :  { %v3616_v47 = vmul.f32 %v12986_v0, %v3527_v1  ;;  %v4080_v1 = vrot.slane %v12982_v60, 3 }
 0x537   :  { %v6343_v44 = vpop.permute.xlu1 %6342  ;;  %v4521_v54 = vsel %vm3388_vm9, %v3625_v29, %v6340_v46  ;;  %v4544_v18 = vsel %vm4540_vm10, %v4527_v53, %v6252_v32  ;;  %v6266_v53 = vunpack.i.l.bf16 %v10925_v40  ;;  %v6272_v29 = vunpack.i.h.bf16 %v10973_v10 }
 0x538   :  { %v5591_v19 = vpop.f32.mrf.mxu0  ;;  %v6345_v55 = vunpack.i.h.bf16 %v6343_v44  ;;  %v6344_v43 = vunpack.i.l.bf16 %v6343_v44  ;;  %v4512_v9 = vsel %vm3388_vm9, %v3616_v47, %v6271_v31  ;;  %v6276_v44 = vunpack.i.l.bf16 %v10856_v39 }
 0x53a   :  { %4462 = vrot.lane.b32.xlu1 %v4173_v22, %s6444_s23  ;;  %v4536_v26 = vsel %vm2652_vm5, %v4520_v56, %v6344_v43  ;;  %v4537_v6 = vsel %vm2652_vm5, %v4521_v54, %v6345_v55  ;;  %v4528_v23 = vsel %vm2652_vm5, %v4512_v9, %v6276_v44  ;;  %v4079_v22 = vrot.slane %v9914_v50, 3  ;;  %v11187_v55 = vld [vmem:[%s12155_s7 + $0x148] sm:$0xff] }
 0x53b   :  { %v5478_v38 = vpop.f32.mrf.mxu2  ;;  %4402 = vrot.lane.b32.xlu2 %v4063_v28, %s6446_s24  ;;  %6361 = vset.pattern.permute.xlu1 %v12862_v48  ;;  %v11163_v21 = vsel %vm4540_vm10, %v4536_v26, %v6349_v45  ;;  %v11166_v46 = vsel %vm4540_vm10, %v4537_v6, %v6350_v12  ;;  %v12987_v45 = vld [vmem:[#allocation64_spill] sm:$0xff]  ;;  %v3506_v28 = vrot.slane %v10234_v8, 5  ;;  %v6277_v54 = vunpack.i.h.bf16 %v10856_v39 }
 0x53c   :  { %v11168_v58 = vadd.f32 %v5591_v19, %v5478_v38  ;;  %6363 = vset.pattern.permute.xlu2 %v12953_v7  ;;  %v3526_v19 = vsel %vm918_vm7, %v3504_v41, %v3505_v42  ;;  %v4545_v41 = vsel %vm4540_vm10, %v4528_v23, %v6266_v53  ;;  %v4104_v32 = vsel %vm2075_vm4, %v4078_v36, %v4079_v22  ;;  %v12989_v23 = vld [vmem:[#allocation61_spill] sm:$0xff] }
 0x53d   :  { %4693 = vmatmul.f32.gmra.mxu3 %v4544_v18  ;;  %v3617_v10 = vmul.f32 %v12987_v45, %v3526_v19  ;;  %v4103_v26 = vsel %vm2075_vm4, %v4079_v22, %v4080_v1  ;;  %v3525_v47 = vsel %vm918_vm7, %v3505_v42, %v3506_v28  ;;  %v6267_v9 = vunpack.i.h.bf16 %v10925_v40  ;;  %v12990_v19 = vld [vmem:[#allocation24_spill] sm:$0xff] }
 0x53e   :  { %v6286_v39 = vunpack.i.l.bf16 %v10733_v33  ;;  %v12988_v44 = vpack.i.bf16 %v10633_v35, %v10627_v59  ;;  %v3618_v40 = vmul.f32 %v12989_v23, %v3525_v47  ;;  %v6291_v53 = vunpack.i.l.bf16 %v12990_v19 }
 0x53f   :  { %v4118_v51 = vpop.permute.xlu1 %4117  ;;  %v4513_v56 = vsel %vm3388_vm9, %v3617_v10, %v6272_v29  ;;  %v12991_v29 = vld [vmem:[#allocation97_spill] sm:$0xff]  ;;  %v6292_v47 = vunpack.i.h.bf16 %v12990_v19 }
 0x540   :  { %v5594_v4 = vpop.f32.mrf.mxu0  ;;  %v4174_v38 = vmul.f32 %v4118_v51, %v4104_v32  ;;  %v4529_v0 = vsel %vm2652_vm5, %v4513_v56, %v6277_v54  ;;  %v3507_v22 = vrot.slane %v12991_v29, 5  ;;  %v12992_v54 = vld [vmem:[#allocation115_spill] sm:$0xff] }
 0x541   :  { %v4546_v42 = vsel %vm4540_vm10, %v4529_v0, %v6267_v9  ;;  %v6281_v32 = vunpack.i.l.bf16 %v12992_v54  ;;  %v12995_v9 = vld [vmem:[#allocation70_spill] sm:$0xff] }
 0x542   :  { %4137 = vperm.xlu1 %6361, %v10884_v20   ;;  %v3524_v56 = vsel %vm918_vm7, %v3506_v28, %v3507_v22 }
 0x543   :  { %v5481_v12 = vpop.f32.mrf.mxu2  ;;  %4033 = vperm.xlu2 %6363, %v11187_v55  }
 0x544   :  { %v11190_v43 = vadd.f32 %v5594_v4, %v5481_v12  ;;  %v4081_v4 = vrot.slane %v10147_v17, 3  ;;  %v4126_v12 = vpop.permute.xlu2 %4125 }
 0x545   :  { %4696 = vmatmul.f32.gmra.mxu3 %v4545_v41  ;;  %v4514_v41 = vsel %vm3388_vm9, %v3618_v40, %v6286_v39  ;;  %v3969_v40 = vrot.slane %v10147_v17, 2 }
 0x546   :  { %v4102_v59 = vsel %vm2075_vm4, %v4080_v1, %v4081_v4  ;;  %v4530_v10 = vsel %vm2652_vm5, %v4514_v41, %v6291_v53  ;;  %v11251_v41 = vld [vmem:[%s12155_s7 + $0x150] sm:$0xff] }
 0x547   :  { %v4122_v6 = vpop.permute.xlu1 %4121  ;;  %v4176_v35 = vmul.f32 %v4126_v12, %v4102_v59  ;;  %v4547_v1 = vsel %vm4540_vm10, %v4530_v10, %v6281_v32  ;;  %v12999_v12 = vld [vmem:[#allocation101_spill] sm:$0xff]  ;;  %v4082_v10 = vrot.slane %v10234_v8, 3  ;;  %v13001_v32 = vld [vmem:[#allocation19_spill] sm:$0xff] }
 0x548   :  { %v5597_v31 = vpop.f32.mrf.mxu0  ;;  %v4175_v18 = vmul.f32 %v4122_v6, %v4103_v26  ;;  %v12993_v26 = vld [vmem:[#allocation11_spill] sm:$0xff] }
 0x54a   :  { %4466 = vrot.lane.b32.xlu0 %v4175_v18, %s6444_s23  ;;  %4464 = vrot.lane.b32.xlu1 %v4174_v38, %s6444_s23  ;;  %v12994_v18 = vld [vmem:[#allocation126_spill] sm:$0xff] }
 0x54b   :  { %v5484_v36 = vpop.f32.mrf.mxu2  ;;  %6371 = vrot.lane.b32.xlu2 %v12988_v44, %s6444_s23  ;;  %v3619_v0 = vmul.f32 %v12994_v18, %v3524_v56  ;;  %v12996_v44 = vld [vmem:[#allocation69_spill] sm:$0xff]  ;;  %v13002_v18 = vld [vmem:[#allocation96_spill] sm:$0xff] }
 0x54c   :  { %v11215_v51 = vadd.f32 %v5597_v31, %v5484_v36  ;;  %v6287_v31 = vunpack.i.h.bf16 %v10733_v33  ;;  %v3508_v33 = vrot.slane %v12995_v9, 5  ;;  %v6282_v36 = vunpack.i.h.bf16 %v12992_v54 }
 0x54d   :  { %4699 = vmatmul.f32.gmra.mxu3 %v4546_v42  ;;  %v12997_v42 = vld [vmem:[#allocation100_spill] sm:$0xff] }
 0x54e   :  { %v4515_v28 = vsel %vm3388_vm9, %v3619_v0, %v6287_v31  ;;  %v12998_v23 = vpack.i.bf16 %v12996_v44, %v12997_v42  ;;  %v3523_v59 = vsel %vm918_vm7, %v3507_v22, %v3508_v33  ;;  %v6306_v31 = vunpack.i.l.bf16 %v13001_v32 }
 0x54f   :  { %v4531_v39 = vsel %vm2652_vm5, %v4515_v28, %v6292_v47  ;;  %v3620_v0 = vmul.f32 %v13002_v18, %v3523_v59  ;;  %v13003_v47 = vld [vmem:[#allocation103_spill] sm:$0xff]  ;;  %v4101_v22 = vsel %vm2075_vm4, %v4081_v4, %v4082_v10  ;;  %v3990_v44 = vsel %vm1850_vm2, %v3968_v61, %v3969_v40 }
 0x550   :  { %v5600_v45 = vpop.f32.mrf.mxu0  ;;  %v4548_v54 = vsel %vm4540_vm10, %v4531_v39, %v6282_v36  ;;  %v3509_v28 = vrot.slane %v13003_v47, 5  ;;  %v6307_v59 = vunpack.i.h.bf16 %v13001_v32  ;;  %v13008_v32 = vld [vmem:[#allocation132_spill] sm:$0xff] }
 0x552   :  { %4145 = vperm.xlu0 %6364, %v11187_v55   ;;  %4141 = vperm.xlu1 %6361, %v12993_v26   ;;  %v3522_v4 = vsel %vm918_vm7, %v3508_v33, %v3509_v28 }
 0x553   :  { %v5487_v6 = vpop.f32.mrf.mxu2  ;;  %4468 = vrot.lane.b32.xlu2 %v4176_v35, %s6444_s23  ;;  %v13000_v35 = vld [vmem:[#allocation71_spill] sm:$0xff] }
 0x554   :  { %v11232_v38 = vadd.f32 %v5600_v45, %v5487_v6  ;;  %v6301_v45 = vunpack.i.l.bf16 %v13000_v35  ;;  %v4130_v6 = vpop.permute.xlu2 %4129 }
 0x555   :  { %4702 = vmatmul.f32.gmra.mxu3 %v4547_v1  ;;  %v4014_v1 = vpop.permute.xlu1 %4013  ;;  %v4177_v39 = vmul.f32 %v4130_v6, %v4101_v22  ;;  %v13007_v22 = vld [vmem:[#allocation43_spill] sm:$0xff] }
 0x556   :  { %v4516_v42 = vsel %vm3388_vm9, %v3620_v0, %v6301_v45  ;;  %v4064_v36 = vmul.f32 %v4014_v1, %v3990_v44  ;;  %v13005_v45 = vld [vmem:[#allocation67_spill] sm:$0xff]  ;;  %v6316_v0 = vunpack.i.l.bf16 %v11025_v13  ;;  %v3970_v44 = vrot.slane %v10234_v8, 2 }
 0x558   :  { %v5603_v53 = vpop.f32.mrf.mxu0 }
 0x55a   :  { %6366 = vrot.lane.b32.xlu0 %v12998_v23, %s6446_s24  ;;  %6362 = vset.pattern.permute.xlu1 %v12976_v27  ;;  %v4532_v23 = vsel %vm2652_vm5, %v4516_v42, %v6306_v31  ;;  %v13006_v31 = vld [vmem:[#allocation95_spill] sm:$0xff]  ;;  %v11297_v42 = vld [vmem:[%s12155_s7 + $0x158] sm:$0xff] }
 0x55b   :  { %v5490_v19 = vpop.f32.mrf.mxu2  ;;  %3901 = vperm.xlu1 %6362, %v12999_v12   ;;  %4037 = vperm.xlu2 %6363, %v11251_v41   ;;  %v6302_v12 = vunpack.i.h.bf16 %v13000_v35  ;;  %v3621_v6 = vmul.f32 %v13006_v31, %v3522_v4  ;;  %v13010_v4 = vld [vmem:[#allocation157_spill] sm:$0xff]  ;;  %v4083_v31 = vrot.slane %v12991_v29, 3 }
 0x55c   :  { %v11258_v56 = vadd.f32 %v5603_v53, %v5490_v19  ;;  %v13004_v53 = vld [vmem:[#allocation102_spill] sm:$0xff] }
 0x55d   :  { %4705 = vmatmul.f32.gmra.mxu3 %v4548_v54  ;;  %v6296_v19 = vunpack.i.l.bf16 %v13004_v53  ;;  %v3510_v54 = vrot.slane %v13005_v45, 5  ;;  %v4517_v1 = vsel %vm3388_vm9, %v3621_v6, %v6302_v12  ;;  %v6297_v35 = vunpack.i.h.bf16 %v13004_v53  ;;  %v4018_v53 = vpop.permute.xlu1 %4017 }
 0x55e   :  { %v4533_v18 = vsel %vm2652_vm5, %v4517_v1, %v6307_v59  ;;  %v6321_v12 = vunpack.i.l.bf16 %v13010_v4  ;;  %v3989_v59 = vsel %vm1850_vm2, %v3969_v40, %v3970_v44  ;;  %v4100_v40 = vsel %vm2075_vm4, %v4082_v10, %v4083_v31 }
 0x55f   :  { %v4549_v61 = vsel %vm4540_vm10, %v4532_v23, %v6296_v19  ;;  %v3521_v33 = vsel %vm918_vm7, %v3509_v28, %v3510_v54  ;;  %v4065_v6 = vmul.f32 %v4018_v53, %v3989_v59 }
 0x562   :  { %4149 = vperm.xlu0 %6364, %v11251_v41  }
 0x563   :  { %4404 = vrot.lane.b32.xlu1 %v4064_v36, %s6446_s24  ;;  %4470 = vrot.lane.b32.xlu2 %v4177_v39, %s6444_s23  ;;  %v4550_v39 = vsel %vm4540_vm10, %v4533_v18, %v6297_v35  ;;  %v13009_v36 = vld [vmem:[#allocation127_spill] sm:$0xff]  ;;  %v3520_v18 = vsel %vm918_vm7, %v3510_v54, %v3511_v16  ;;  %v13012_v16 = vld [vmem:[#allocation130_spill] sm:$0xff] }
 0x564   :  { %6377 = vset.pattern.permute.xlu2 %v12862_v48  ;;  %v3622_v23 = vmul.f32 %v13009_v36, %v3521_v33  ;;  %v13011_v33 = vld [vmem:[#allocation74_spill] sm:$0xff]  ;;  %v3623_v54 = vmul.f32 %v13012_v16, %v3520_v18  ;;  %v12384_v18 = vrot.slane %v12961_v5, 1 }
 0x565   :  { %4708 = vmatmul.f32.gmra.mxu3 %v4549_v61  ;;  %v11306_v61 = vpop.permute.xlu0 %6354  ;;  %v6311_v35 = vunpack.i.l.bf16 %v13011_v33  ;;  %v6312_v10 = vunpack.i.h.bf16 %v13011_v33  ;;  %v3972_v33 = vrot.slane %v12995_v9, 2 }
 0x566   :  { %v4518_v19 = vsel %vm3388_vm9, %v3622_v23, %v6316_v0  ;;  %v6317_v0 = vunpack.i.h.bf16 %v11025_v13  ;;  %v6322_v23 = vunpack.i.h.bf16 %v13010_v4  ;;  %v11345_v4 = vld [vmem:[%s12155_s7 + $0x160] sm:$0xff] }
 0x567   :  { %v4534_v1 = vsel %vm2652_vm5, %v4518_v19, %v6321_v12 }
 0x568   :  { %v4519_v36 = vsel %vm3388_vm9, %v3623_v54, %v6317_v0 }
 0x569   :  { %v4535_v19 = vsel %vm2652_vm5, %v4519_v36, %v6322_v23  ;;  %v12383_v36 = vrot.slane %v12982_v60, 1  ;;  %v11379_v23 = vld [vmem:[%s12155_s7 + $0x168] sm:$0xff] }
 0x56a   :  { %6375 = vset.pattern.permute.xlu0 %v12976_v27  ;;  %v4552_v12 = vsel %vm4540_vm10, %v4535_v19, %v6312_v10 }
 0x56b   :  { %3885 = vperm.xlu0 %6375, %v13007_v22   ;;  %3905 = vperm.xlu1 %6362, %v13008_v32   ;;  %v6431_v22 = vld [vmem:[%s12155_s7 + $0x108] sm:$0xff] }
 0x56c   :  { %4153 = vperm.xlu2 %6377, %v11297_v42   ;;  %v11300_v28 = vpop.permute.xlu2 %4460 }
 0x56d   :  { %4711 = vmatmul.f32.gmra.mxu3 %v4550_v39  ;;  %v4551_v39 = vsel %vm4540_vm10, %v4534_v1, %v6311_v35  ;;  %v11333_v53 = vpop.permute.xlu0 %4398 }
 0x573   :  { %3889 = vperm.xlu0 %6375, %v6431_v22   ;;  %4406 = vrot.lane.b32.xlu1 %v4065_v6, %s6446_s24  ;;  %v3855_v6 = vrot.slane %v9914_v50, 1  ;;  %v3971_v22 = vrot.slane %v12991_v29, 2 }
 0x574   :  { %v4134_v32 = vpop.permute.xlu2 %4133  ;;  %6376 = vset.pattern.permute.xlu1 %v12953_v7 }
 0x575   :  { %v4178_v13 = vmul.f32 %v4134_v32, %v4100_v40  ;;  %4714 = vmatmul.f32.gmra.mxu3 %v4551_v39  ;;  %v4026_v1 = vpop.permute.xlu0 %4025  ;;  %v3987_v32 = vsel %vm1850_vm2, %v3971_v22, %v3972_v33 }
 0x576   :  { %v4067_v39 = vmul.f32 %v4026_v1, %v3987_v32 }
 0x577   :  { %4472 = vrot.lane.b32.xlu2 %v4178_v13, %s6444_s23 }
 0x57b   :  { %3909 = vperm.xlu0 %6375, %v11032_v24   ;;  %4041 = vperm.xlu1 %6376, %v11297_v42   ;;  %v3880_v24 = vsel %vm1625_vm6, %v12384_v18, %v3855_v6 }
 0x57d   :  { %v3894_v59 = vpop.permute.xlu2 %3893  ;;  %4717 = vmatmul.f32.gmra.mxu3 %v4552_v12  ;;  %v4030_v16 = vpop.permute.xlu0 %4029  ;;  %v12385_v12 = vrot.slane %v13005_v45, 2 }
 0x57e   :  { %v3950_v35 = vmul.f32 %v3894_v59, %v3880_v24  ;;  %v11390_v59 = vld [vmem:[%s12155_s7 + $0x170] sm:$0xff] }
 0x57f   :  { %4157 = vperm.xlu2 %6377, %v11345_v4  }
 0x583   :  { %3913 = vperm.xlu0 %6375, %v10884_v20   ;;  %v3973_v20 = vrot.slane %v13003_v47, 2 }
 0x585   :  { %v4401_v0 = vpop.permute.xlu2 %4400  ;;  %4720 = vmatmul.f32.gmra.mxu3 %v11163_v21  ;;  %v3986_v21 = vsel %vm1850_vm2, %v3972_v33, %v3973_v20  ;;  %v3985_v1 = vsel %vm1850_vm2, %v3973_v20, %v12385_v12 }
 0x586   :  { %v11358_v40 = vsel %vm3388_vm9, %v3950_v35, %v4401_v0  ;;  %v4068_v13 = vmul.f32 %v4030_v16, %v3986_v21  ;;  %v11404_v35 = vpop.f32.mrf.mxu0  ;;  %v3988_v0 = vsel %vm1850_vm2, %v3970_v44, %v3971_v22  ;;  %v4616_v16 = vld [vmem:[%s12164_s5 + $0xd8] sm:$0xff]  ;;  %v4615_v44 = vld [vmem:[%s12164_s5 + $0xd0] sm:$0xff]  ;;  %v4614_v22 = vld [vmem:[%s12164_s5 + $0xc8] sm:$0xff] }
 0x587   :  { %6378 = vset.pattern.permute.xlu2 %v12976_v27  ;;  %4737 = vmatpush.msrb.mxu3 %v4616_v16 }
 0x588   :  { %3917 = vperm.xlu2 %6378, %v12993_v26   ;;  %v3879_v26 = vsel %vm1625_vm6, %v3855_v6, %v12383_v36 }
 0x589   :  { %4738 = vmatpush.msrb.mxu3 %v4615_v44 }
 0x58b   :  { %4410 = vrot.lane.b32.xlu0 %v4067_v39, %s6446_s24  ;;  %4739 = vmatpush.msrb.mxu3 %v4614_v22  ;;  %v4609_v22 = vld [vmem:[%s12164_s5 + $0xa0] sm:$0xff] }
 0x58c   :  { %6379 = vset.pattern.permute.xlu0 %v12953_v7 }
 0x58d   :  { %v3898_v54 = vpop.permute.xlu2 %3897  ;;  %4723 = vmatmul.f32.gmra.mxu3 %v11166_v46 }
 0x58e   :  { %v3951_v19 = vmul.f32 %v3898_v54, %v3879_v26  ;;  %v11434_v26 = vpop.f32.mrf.mxu0 }
 0x590   :  { %4412 = vrot.lane.b32.xlu2 %v4068_v13, %s6446_s24 }
 0x593   :  { %4049 = vperm.xlu0 %6379, %v11379_v23  }
 0x595   :  { %v4403_v10 = vpop.permute.xlu2 %4402 }
 0x596   :  { %v11383_v46 = vsel %vm3388_vm9, %v3951_v19, %v4403_v10  ;;  %v4613_v19 = vld [vmem:[%s12164_s5 + $0xc0] sm:$0xff]  ;;  %v4084_v10 = vrot.slane %v12995_v9, 3 }
 0x597   :  { %4740 = vmatpush.msrb.mxu3 %v4613_v19  ;;  %v11462_v19 = vpop.f32.mrf.mxu0 }
 0x598   :  { %3921 = vperm.xlu2 %6378, %v11187_v55   ;;  %v11401_v55 = vpop.f32.mrf.mxu2 }
 0x59b   :  { %4053 = vperm.xlu0 %6379, %v11390_v59  }
 0x59c   :  { %v11393_v6 = vpop.permute.xlu1 %4396 }
 0x59d   :  { %v4034_v24 = vpop.permute.xlu2 %4033 }
 0x59e   :  { %v4069_v33 = vmul.f32 %v4034_v24, %v3985_v1  ;;  %v4612_v1 = vld [vmem:[%s12164_s5 + $0xb8] sm:$0xff]  ;;  %v4611_v24 = vld [vmem:[%s12164_s5 + $0xb0] sm:$0xff] }
 0x59f   :  { %4741 = vmatpush.msrb.mxu3 %v4612_v1  ;;  %v4607_v1 = vld [vmem:[%s12164_s5 + $0x90] sm:$0xff]  ;;  %v11491_v52 = vpop.f32.mrf.mxu0 }
 0x5a0   :  { %4414 = vrot.lane.b32.xlu2 %v4069_v33, %s6446_s24  ;;  %v11428_v21 = vpop.f32.mrf.mxu2  ;;  %v4610_v33 = vld [vmem:[%s12164_s5 + $0xa8] sm:$0xff] }
 0x5a1   :  { %6382 = vset.pattern.permute.xlu2 %v12953_v7  ;;  %v11416_v7 = vld [vmem:[%s12155_s7 + $0x178] sm:$0xff]  ;;  %4742 = vmatpush.msrb.mxu3 %v4611_v24  ;;  %v4606_v24 = vld [vmem:[%s12164_s5 + $0x88] sm:$0xff] }
 0x5a2   :  { %13013 = vst [vmem:[#allocation40_spill] sm:$0xff] %v11416_v7 }
 0x5a3   :  { %6383 = vset.pattern.permute.xlu0 %v12862_v48  ;;  %4743 = vmatpush.msrb.mxu3 %v4610_v33 }
 0x5a4   :  { %v4022_v32 = vpop.permute.xlu1 %4021 }
 0x5a5   :  { %v4066_v39 = vmul.f32 %v4022_v32, %v3988_v0  ;;  %v11410_v20 = vpop.permute.xlu2 %6371  ;;  %v4099_v0 = vsel %vm2075_vm4, %v4083_v31, %v4084_v10  ;;  %4744 = vmatpush.msrb.mxu3 %v4609_v22  ;;  %v4608_v31 = vld [vmem:[%s12164_s5 + $0x98] sm:$0xff]  ;;  %v4086_v22 = vrot.slane %v13005_v45, 3 }
 0x5a6   :  { %v6374_v14 = vunpack.i.h.bf16 %v11410_v20 }
 0x5a7   :  { %4408 = vrot.lane.b32.xlu1 %v4066_v39, %s6446_s24  ;;  %4745 = vmatpush.msrb.mxu3 %v4608_v31  ;;  %v4605_v31 = vld [vmem:[%s12164_s5 + $0x80] sm:$0xff] }
 0x5a8   :  { %4057 = vperm.xlu2 %6382, %v11416_v7   ;;  %v11456_v44 = vpop.f32.mrf.mxu2 }
 0x5a9   :  { %4746 = vmatpush.msrb.mxu3 %v4607_v1  ;;  %v5304_v1 = vld [vmem:[%s12162_s10 + $0x148] sm:$0xff] }
 0x5ab   :  { %4747 = vmatpush.msrb.mxu3 %v4606_v24  ;;  %v5303_v24 = vld [vmem:[%s12162_s10 + $0x140] sm:$0xff] }
 0x5ac   :  { %v11430_v54 = vpop.permute.xlu1 %4462 }
 0x5ad   :  { %v11432_v13 = vpop.permute.xlu2 %4468  ;;  %4748 = vmatpush.msrb.mxu3 %v4605_v31 }
 0x5ae   :  { %13014 = vst [vmem:[#allocation21_spill] sm:$0xff] %v11432_v13  ;;  %v13021_v13 = vld [vmem:[#allocation20_spill] sm:$0xff] }
 0x5af   :  { %4045 = vperm.xlu1 %6376, %v11345_v4   ;;  %5754 = vmatpush.msra.mxu3 %v5304_v1  ;;  %v13017_v1 = vrot.slane %v10565_v11, 5 }
 0x5b1   :  { %5755 = vmatpush.msra.mxu3 %v5303_v24  ;;  %v13020_v24 = vld [vmem:[#allocation65_spill] sm:$0xff] }
 0x5b4   :  { %v4138_v32 = vpop.permute.xlu1 %4137 }
 0x5b5   :  { %v4179_v39 = vmul.f32 %v4138_v32, %v4099_v0  ;;  %v11454_v16 = vpop.permute.xlu2 %4037  ;;  %v11481_v32 = vpop.f32.mrf.mxu2 }
 0x5b7   :  { %4474 = vrot.lane.b32.xlu1 %v4179_v39, %s6444_s23  ;;  %v4085_v39 = vrot.slane %v13003_v47, 3  ;;  %v13016_v47 = vld [vmem:[#allocation155_spill] sm:$0xff] }
 0x5b8   :  { %6380 = vset.pattern.permute.xlu1 %v12862_v48  ;;  %v3514_v9 = vrot.slane %v13016_v47, 5 }
 0x5b9   :  { %v4097_v36 = vsel %vm2075_vm4, %v4085_v39, %v4086_v22  ;;  %v4098_v12 = vsel %vm2075_vm4, %v4084_v10, %v4085_v39  ;;  %v13018_v10 = vrot.slane %v10581_v25, 5  ;;  %v6357_v25 = vunpack.i.h.bf16 %v11306_v61 }
 0x5bc   :  { %v11474_v33 = vpop.permute.xlu0 %4466  ;;  %v11476_v0 = vpop.permute.xlu1 %4464 }
 0x5bd   :  { %v11478_v48 = vpop.permute.xlu2 %4470  ;;  %v11503_v29 = vpop.f32.mrf.mxu2 }
 0x5be   :  { %13015 = vst [vmem:[#allocation12_spill] sm:$0xff] %v11478_v48  ;;  %v3517_v48 = vsel %vm918_vm7, %v13017_v1, %v3514_v9  ;;  %v6373_v1 = vunpack.i.l.bf16 %v11410_v20  ;;  %v4088_v20 = vrot.slane %v10648_v30, 3 }
 0x5bf   :  { %4161 = vperm.xlu1 %6380, %v11379_v23   ;;  %v3626_v47 = vmul.f32 %v13020_v24, %v3517_v48  ;;  %v4087_v48 = vrot.slane %v10424_v2, 3 }
 0x5c4   :  { %v4146_v18 = vpop.permute.xlu0 %4145  ;;  %v4142_v49 = vpop.permute.xlu1 %4141 }
 0x5c5   :  { %v4181_v3 = vmul.f32 %v4146_v18, %v4097_v36  ;;  %v4180_v50 = vmul.f32 %v4142_v49, %v4098_v12  ;;  %v3516_v49 = vsel %vm918_vm7, %v3514_v9, %v13018_v10  ;;  %v11513_v18 = vpop.f32.mrf.mxu3  ;;  %v5618_v36 = vpop.f32.mrf.mxu0  ;;  %v6356_v9 = vunpack.i.l.bf16 %v11306_v61 }
 0x5c6   :  { %v4154_v31 = vpop.permute.xlu2 %4153  ;;  %13019 = vst [vmem:[#allocation76_spill] sm:$0xff] %v11513_v18  ;;  %v3627_v57 = vmul.f32 %v13021_v13, %v3516_v49 }
 0x5c7   :  { %4478 = vrot.lane.b32.xlu0 %v4181_v3, %s6444_s23  ;;  %4476 = vrot.lane.b32.xlu1 %v4180_v50, %s6444_s23 }
 0x5cc   :  { %v6367_v12 = vpop.permute.xlu0 %6366 }
 0x5cd   :  { %v6369_v3 = vunpack.i.h.bf16 %v6367_v12  ;;  %v6368_v39 = vunpack.i.l.bf16 %v6367_v12  ;;  %v11515_v50 = vpop.permute.xlu1 %3901 }
 0x5cf   :  { %4169 = vperm.xlu0 %6383, %v11416_v7   ;;  %4165 = vperm.xlu1 %6380, %v11390_v59   ;;  %v4522_v10 = vsel %vm3388_vm9, %v3626_v47, %v6368_v39  ;;  %v4523_v12 = vsel %vm3388_vm9, %v3627_v57, %v6369_v3  ;;  %v5508_v7 = vpop.f32.mrf.mxu2  ;;  %v4096_v47 = vsel %vm2075_vm4, %v4086_v22, %v4087_v48  ;;  %v11537_v3 = vpop.f32.mrf.mxu3  ;;  %v12397_v22 = vrot.slane %v10565_v11, 3 }
 0x5d0   :  { %v4538_v13 = vsel %vm2652_vm5, %v4522_v10, %v6373_v1  ;;  %v4539_v49 = vsel %vm2652_vm5, %v4523_v12, %v6374_v14  ;;  %v4095_v39 = vsel %vm2075_vm4, %v4087_v48, %v4088_v20  ;;  %v5621_v10 = vpop.f32.mrf.mxu0 }
 0x5d1   :  { %v11531_v24 = vpop.permute.xlu2 %4472  ;;  %v4555_v61 = vsel %vm4540_vm10, %v4538_v13, %v6356_v9  ;;  %v4556_v18 = vsel %vm4540_vm10, %v4539_v49, %v6357_v25  ;;  %v4183_v12 = vmul.f32 %v4154_v31, %v4095_v39  ;;  %v3975_v25 = vrot.slane %v10424_v2, 2 }
 0x5d2   :  { %4726 = vmatmul.f32.gmra.mxu3 %v4555_v61  ;;  %v3853_v9 = vrot.slane %v9763_v37, 1  ;;  %v12396_v13 = vrot.slane %v9765_v34, 1  ;;  %v13022_v31 = vrot.slane %v13005_v45, 2 }
 0x5d4   :  { %v4150_v57 = vpop.permute.xlu0 %4149  ;;  %v3882_v49 = vsel %vm1625_vm6, %v12396_v13, %v3853_v9 }
 0x5d5   :  { %v4182_v14 = vmul.f32 %v4150_v57, %v4096_v47  ;;  %v11541_v1 = vpop.permute.xlu1 %4404 }
 0x5d7   :  { %6381 = vset.pattern.permute.xlu1 %v12976_v27  ;;  %4480 = vrot.lane.b32.xlu2 %v4182_v14, %s6444_s23  ;;  %v3984_v27 = vsel %vm1850_vm2, %v13022_v31, %v3975_v25  ;;  %v5511_v47 = vpop.f32.mrf.mxu2 }
 0x5d8   :  { %4482 = vrot.lane.b32.xlu0 %v4183_v12, %s6444_s23  ;;  %3925 = vperm.xlu1 %6381, %v11251_v41   ;;  %v4094_v41 = vsel %vm2075_vm4, %v4088_v20, %v12397_v22  ;;  %v4070_v57 = vmul.f32 %v11454_v16, %v3984_v27  ;;  %v11566_v12 = vpop.f32.mrf.mxu3  ;;  %v5624_v31 = vpop.f32.mrf.mxu0  ;;  %v5622_v22 = vadd.f32 %v5621_v10, %v5508_v7 }
 0x5d9   :  { %v4158_v48 = vpop.permute.xlu2 %4157  ;;  %v5625_v20 = vadd.f32 %v5624_v31, %v5511_v47  ;;  %v5619_v16 = vadd.f32 %v5618_v36, %v11503_v29  ;;  %v5613_v29 = vadd.f32 %v11462_v19, %v11456_v44  ;;  %v3976_v36 = vrot.slane %v10648_v30, 2 }
 0x5da   :  { %4729 = vmatmul.f32.gmra.mxu3 %v4556_v18  ;;  %v4184_v39 = vmul.f32 %v4158_v48, %v4094_v41  ;;  %v13023_v48 = vrot.slane %v12961_v5, 1 }
 0x5dd   :  { %v3886_v61 = vpop.permute.xlu0 %3885  ;;  %v11563_v18 = vpop.permute.xlu1 %3905 }
 0x5de   :  { %v3948_v14 = vmul.f32 %v3886_v61, %v3882_v49  ;;  %v5616_v61 = vadd.f32 %v11491_v52, %v11481_v32  ;;  %v5610_v52 = vadd.f32 %v11434_v26, %v11428_v21  ;;  %v13027_v21 = vld [vmem:[#allocation21_spill] sm:$0xff] }
 0x5e0   :  { %v4557_v37 = vsel %vm3388_vm9, %v3948_v14, %v11393_v6  ;;  %4484 = vrot.lane.b32.xlu0 %v4184_v39, %s6444_s23  ;;  %4416 = vrot.lane.b32.xlu1 %v4070_v57, %s6446_s24  ;;  %v3881_v6 = vsel %vm1625_vm6, %v3853_v9, %v13023_v48 }
 0x5e1   :  { %v4573_v13 = vsel %vm2652_vm5, %v4557_v37, %v11300_v28  ;;  %v11587_v28 = vpop.f32.mrf.mxu3 }
 0x5e2   :  { %5954 = vmatmul.msk.f32.vlgmr.msrb.gmra.mxu3 %vm4540_vm10, %v4573_v13  ;;  %v3918_v10 = vpop.permute.xlu2 %3917  ;;  %v13030_v13 = vld [vmem:[#allocation97_spill] sm:$0xff] }
 0x5e3   :  { %5837 = vmatpush.msrb.mxu3 %v5625_v20 }
 0x5e5   :  { %5838 = vmatpush.msrb.mxu3 %v5622_v22  ;;  %v3890_v27 = vpop.permute.xlu0 %3889  ;;  %v4407_v41 = vpop.permute.xlu1 %4406 }
 0x5e6   :  { %v3949_v49 = vmul.f32 %v3890_v27, %v3881_v6  ;;  %v3977_v6 = vrot.slane %v10565_v11, 2 }
 0x5e7   :  { %5839 = vmatpush.msrb.mxu3 %v5619_v16 }
 0x5e8   :  { %v4558_v37 = vsel %vm3388_vm9, %v3949_v49, %v11333_v53  ;;  %3929 = vperm.xlu1 %6381, %v11297_v42   ;;  %v5607_v42 = vadd.f32 %v11404_v35, %v11401_v55  ;;  %v3983_v53 = vsel %vm1850_vm2, %v3975_v25, %v3976_v36  ;;  %v3857_v35 = vrot.slane %v10147_v17, 1  ;;  %v11649_v25 = vld [vmem:[%s12161_s6] ss:$0 sm:$0xff]  ;;  %v13031_v49 = vld [vmem:[#allocation70_spill] sm:$0xff]  ;;  %s6447_s6 = smov 48  }
 0x5e9   :  { %5840 = vmatpush.msrb.mxu3 %v5616_v61  ;;  %v4574_v7 = vsel %vm2652_vm5, %v4558_v37, %v11430_v54  ;;  %v4575_v54 = vsel %vm2652_vm5, %v11358_v40, %v11476_v0  ;;  %v11606_v55 = vpop.f32.mrf.mxu3  ;;  %v3982_v27 = vsel %vm1850_vm2, %v3976_v36, %v3977_v6  ;;  %v3860_v61 = vrot.slane %v13031_v49, 1 }
 0x5ea   :  { %5955 = vmatmul.msk.f32.gmra.mxu3 %vm4540_vm10, %v4574_v7  ;;  %v4413_v39 = vpop.permute.xlu2 %4412 }
 0x5eb   :  { %5841 = vmatpush.msrb.mxu3 %v5613_v29 }
 0x5ed   :  { %5842 = vmatpush.msrb.mxu3 %v5610_v52  ;;  %v4042_v44 = vpop.permute.xlu1 %4041  ;;  %v3910_v32 = vpop.permute.xlu0 %3909  ;;  %v13032_v52 = vld [vmem:[#allocation155_spill] sm:$0xff] }
 0x5ee   :  { %v4071_v19 = vmul.f32 %v4042_v44, %v3983_v53 }
 0x5ef   :  { %5843 = vmatpush.msrb.mxu3 %v5607_v42  ;;  %v3978_v42 = vrot.slane %v13032_v52, 2 }
 0x5f0   :  { %4418 = vrot.lane.b32.xlu2 %v4071_v19, %s6446_s24  ;;  %3933 = vperm.xlu1 %6381, %v11345_v4   ;;  %v4576_v4 = vsel %vm2652_vm5, %v11383_v46, %v11474_v33  ;;  %v13026_v46 = vld [vmem:[#allocation13_spill] sm:$0xff] }
 0x5f1   :  { %5844 = vmatpush.msrb.mxu3 %v11258_v56  ;;  %v13024_v56 = vrot.slane %v12982_v60, 1  ;;  %v3981_v36 = vsel %vm1850_vm2, %v3977_v6, %v3978_v42 }
 0x5f2   :  { %5956 = vmatmul.msk.f32.gmra.mxu3 %vm4540_vm10, %v4575_v54  ;;  %v3922_v29 = vpop.permute.xlu2 %3921 }
 0x5f3   :  { %5845 = vmatpush.msrb.mxu3 %v11232_v38  ;;  %v3878_v38 = vsel %vm1625_vm6, %v13024_v56, %v3857_v35 }
 0x5f5   :  { %5846 = vmatpush.msrb.mxu3 %v11215_v51  ;;  %v3952_v51 = vmul.f32 %v11515_v50, %v3878_v38  ;;  %v13028_v50 = vld [vmem:[#allocation40_spill] sm:$0xff]  ;;  %v3914_v9 = vpop.permute.xlu0 %3913  ;;  %v13033_v38 = vld [vmem:[#allocation22_spill] sm:$0xff] }
 0x5f7   :  { %5847 = vmatpush.msrb.mxu3 %v11190_v43  ;;  %v11624_v43 = vpop.f32.mrf.mxu3  ;;  %v4561_v40 = vsel %vm3388_vm9, %v3952_v51, %v11541_v1  ;;  %v3979_v51 = vrot.slane %v13033_v38, 2 }
 0x5f8   :  { %3937 = vperm.xlu1 %6381, %v11379_v23   ;;  %v13025_v23 = vld [vmem:[#allocation72_spill] sm:$0xff] }
 0x5f9   :  { %5848 = vmatpush.msrb.mxu3 %v11168_v58  ;;  %v3858_v58 = vrot.slane %v10234_v8, 1 }
 0x5fa   :  { %5957 = vmatmul.msk.f32.gmra.mxu3 %vm4540_vm10, %v4576_v4  ;;  %v4415_v56 = vpop.permute.xlu2 %4414 }
 0x5fb   :  { %5849 = vmatpush.msrb.mxu3 %v11120_v15  ;;  %v4577_v15 = vsel %vm2652_vm5, %v4561_v40, %v13027_v21  ;;  %v3877_v26 = vsel %vm1625_vm6, %v3857_v35, %v3858_v58  ;;  %v4090_v40 = vrot.slane %v13032_v52, 3  ;;  %v13034_v21 = vrot.slane %v10565_v11, 3 }
 0x5fd   :  { %5850 = vmatpush.msrb.mxu3 %v11094_v63  ;;  %v3953_v63 = vmul.f32 %v11563_v18, %v3877_v26  ;;  %v3859_v18 = vrot.slane %v13030_v13, 1  ;;  %v4411_v16 = vpop.permute.xlu0 %4410 }
 0x5ff   :  { %5851 = vmatpush.msrb.mxu3 %v13025_v23  ;;  %v4562_v33 = vsel %vm3388_vm9, %v3953_v63, %v4407_v41  ;;  %v11640_v0 = vpop.f32.mrf.mxu3  ;;  %v3876_v47 = vsel %vm1625_vm6, %v3858_v58, %v3859_v18  ;;  %v13035_v63 = vld [vmem:[#allocation103_spill] sm:$0xff] }
 0x600   :  { %3941 = vperm.xlu1 %6381, %v11390_v59   ;;  %v13029_v59 = vld [vmem:[#allocation12_spill] sm:$0xff]  ;;  %v3954_v57 = vmul.f32 %v3910_v32, %v3876_v47 }
 0x601   :  { %5852 = vmatpush.msrb.mxu3 %v13026_v46  ;;  %v4578_v1 = vsel %vm2652_vm5, %v4562_v33, %v13029_v59  ;;  %v3980_v46 = vsel %vm1850_vm2, %v3978_v42, %v3979_v51  ;;  %v3861_v33 = vrot.slane %v13035_v63, 1 }
 0x602   :  { %5958 = vmatmul.msk.f32.gmra.mxu3 %vm4540_vm10, %v4577_v15  ;;  %v4093_v15 = vsel %vm2075_vm4, %v13034_v21, %v4090_v40 }
 0x603   :  { %v3874_v59 = vsel %vm1625_vm6, %v3860_v61, %v3861_v33 }
 0x605   :  { %v4050_v53 = vpop.permute.xlu0 %4049 }
 0x606   :  { %v4073_v35 = vmul.f32 %v4050_v53, %v3981_v36  ;;  %v13037_v36 = vrot.slane %v9765_v34, 3 }
 0x607   :  { %v11653_v22 = vpop.f32.mrf.mxu3 }
 0x608   :  { %3945 = vperm.xlu1 %6381, %v13028_v50  }
 0x60a   :  { %5959 = vmatmul.msk.f32.gmra.mxu3 %vm4540_vm10, %v4578_v1  ;;  %v3956_v1 = vmul.f32 %v3918_v10, %v3874_v59 }
 0x60d   :  { %v4054_v23 = vpop.permute.xlu0 %4053 }
 0x60e   :  { %v4074_v32 = vmul.f32 %v4054_v23, %v3980_v46 }
 0x60f   :  { %v11659_v20 = vpop.f32.mrf.mxu3 }
 0x610   :  { %4617 = vrot.lane.b32.xlu1 %v11649_v25, %s6445_s25 }
 0x617   :  { %v11669_v7 = vpop.f32.mrf.mxu3 }
 0x619   :  { %v4409_v14 = vpop.permute.xlu1 %4408 }
 0x61a   :  { %v4563_v31 = vsel %vm3388_vm9, %v3954_v57, %v4409_v14  ;;  %v13036_v57 = vrot.slane %v9765_v34, 2 }
 0x61b   :  { %v4579_v48 = vsel %vm2652_vm5, %v4563_v31, %v11531_v24  ;;  %v3875_v24 = vsel %vm1625_vm6, %v3859_v18, %v3860_v61  ;;  %v4565_v18 = vsel %vm3388_vm9, %v3956_v1, %v4413_v39  ;;  %v4091_v39 = vrot.slane %v13033_v38, 3 }
 0x61c   :  { %5960 = vmatmul.msk.f32.gmra.mxu3 %vm4540_vm10, %v4579_v48  ;;  %v3955_v44 = vmul.f32 %v3914_v9, %v3875_v24  ;;  %v4058_v9 = vpop.permute.xlu2 %4057  ;;  %v3995_v14 = vsel %vm1850_vm2, %v3979_v51, %v13036_v57 }
 0x61d   :  { %v4075_v48 = vmul.f32 %v4058_v9, %v3995_v14 }
 0x61e   :  { %v4564_v19 = vsel %vm3388_vm9, %v3955_v44, %v4411_v16  ;;  %v3862_v16 = vrot.slane %v13005_v45, 1 }
 0x61f   :  { %v11682_v58 = vpop.f32.mrf.mxu3 }
 0x621   :  { %v4046_v41 = vpop.permute.xlu1 %4045 }
 0x622   :  { %v4072_v37 = vmul.f32 %v4046_v41, %v3982_v27  ;;  %v3873_v27 = vsel %vm1625_vm6, %v3861_v33, %v3862_v16  ;;  %v3864_v33 = vrot.slane %v10648_v30, 1 }
 0x623   :  { %v3957_v41 = vmul.f32 %v3922_v29, %v3873_v27  ;;  %v4107_v29 = vsel %vm2075_vm4, %v4091_v39, %v13037_v36  ;;  %v3865_v27 = vrot.slane %v10565_v11, 1 }
 0x624   :  { %4420 = vrot.lane.b32.xlu2 %v4072_v37, %s6446_s24  ;;  %v4092_v37 = vsel %vm2075_vm4, %v4090_v40, %v4091_v39 }
 0x625   :  { %v4566_v61 = vsel %vm3388_vm9, %v3957_v41, %v4415_v56 }
 0x627   :  { %v11696_v47 = vpop.f32.mrf.mxu3 }
 0x629   :  { %v4475_v54 = vpop.permute.xlu1 %4474 }
 0x62a   :  { %v4580_v4 = vsel %vm2652_vm5, %v4564_v19, %v4475_v54 }
 0x62b   :  { %5961 = vmatmul.msk.f32.gmra.mxu3 %vm4540_vm10, %v4580_v4  ;;  %v3863_v4 = vrot.slane %v10424_v2, 1 }
 0x62c   :  { %4422 = vrot.lane.b32.xlu2 %v4073_v35, %s6446_s24 }
 0x62d   :  { %v3872_v51 = vsel %vm1625_vm6, %v3862_v16, %v3863_v4 }
 0x62f   :  { %v11713_v44 = vpop.f32.mrf.mxu3 }
 0x631   :  { %v4162_v26 = vpop.permute.xlu1 %4161  ;;  %v4481_v46 = vpop.permute.xlu2 %4480 }
 0x632   :  { %v4185_v50 = vmul.f32 %v4162_v26, %v4093_v15 }
 0x634   :  { %4424 = vrot.lane.b32.xlu2 %v4074_v32, %s6446_s24  ;;  %4486 = vrot.lane.b32.xlu0 %v4185_v50, %s6444_s23  ;;  %v3871_v32 = vsel %vm1625_vm6, %v3863_v4, %v3864_v33 }
 0x637   :  { %v11723_v56 = vpop.f32.mrf.mxu3 }
 0x639   :  { %v4477_v31 = vpop.permute.xlu1 %4476  ;;  %v4479_v10 = vpop.permute.xlu0 %4478 }
 0x63a   :  { %v4581_v6 = vsel %vm2652_vm5, %v4565_v18, %v4477_v31  ;;  %v4582_v53 = vsel %vm2652_vm5, %v4566_v61, %v4479_v10  ;;  %v3870_v61 = vsel %vm1625_vm6, %v3864_v33, %v3865_v27 }
 0x63b   :  { %5962 = vmatmul.msk.f32.gmra.mxu3 %vm4540_vm10, %v4581_v6 }
 0x63c   :  { %4426 = vrot.lane.b32.xlu2 %v4075_v48, %s6446_s24 }
 0x641   :  { %v4166_v42 = vpop.permute.xlu1 %4165  ;;  %v4170_v19 = vpop.permute.xlu0 %4169 }
 0x642   :  { %v4186_v24 = vmul.f32 %v4166_v42, %v4092_v37  ;;  %v4187_v54 = vmul.f32 %v4170_v19, %v4107_v29 }
 0x643   :  { %5963 = vmatmul.msk.f32.gmra.mxu3 %vm4540_vm10, %v4582_v53 }
 0x644   :  { %4488 = vrot.lane.b32.xlu0 %v4186_v24, %s6444_s23 }
 0x64a   :  { %v3926_v35 = vpop.permute.xlu1 %3925  ;;  %v4419_v1 = vpop.permute.xlu2 %4418 }
 0x64b   :  { %v3958_v40 = vmul.f32 %v3926_v35, %v3872_v51  ;;  %v4483_v9 = vpop.permute.xlu0 %4482  ;;  %v13038_v35 = vld [vmem:[#allocation76_spill] sm:$0xff] }
 0x64c   :  { %4490 = vrot.lane.b32.xlu0 %v4187_v54, %s6444_s23 }
 0x652   :  { %v4417_v23 = vpop.permute.xlu1 %4416 }
 0x653   :  { %v4567_v21 = vsel %vm3388_vm9, %v3958_v40, %v4417_v23  ;;  %v4485_v24 = vpop.permute.xlu0 %4484 }
 0x654   :  { %v4583_v15 = vsel %vm2652_vm5, %v4567_v21, %v4481_v46 }
 0x655   :  { %v11729_v26 = vpop.f32.mrf.mxu3  ;;  %5964 = vmatmul.msk.f32.gmra.mxu3 %vm4540_vm10, %v4583_v15 }
 0x65a   :  { %v3930_v50 = vpop.permute.xlu1 %3929 }
 0x65b   :  { %v3959_v59 = vmul.f32 %v3930_v50, %v3871_v32 }
 0x65d   :  { %v4568_v18 = vsel %vm3388_vm9, %v3959_v59, %v4419_v1  ;;  %v11736_v57 = vpop.f32.mrf.mxu3 }
 0x65e   :  { %v4584_v14 = vsel %vm2652_vm5, %v4568_v18, %v4483_v9 }
 0x65f   :  { %5965 = vmatmul.msk.f32.gmra.mxu3 %vm4540_vm10, %v4584_v14 }
 0x662   :  { %v3934_v31 = vpop.permute.xlu1 %3933 }
 0x663   :  { %v3960_v37 = vmul.f32 %v3934_v31, %v3870_v61 }
 0x665   :  { %v4750_v16 = vpop.f32.mrf.mxu3 }
 0x66a   :  { %v3938_v48 = vpop.permute.xlu1 %3937 }
 0x66d   :  { %v4753_v6 = vpop.f32.mrf.mxu3 }
 0x672   :  { %v3942_v10 = vpop.permute.xlu1 %3941 }
 0x675   :  { %v4756_v39 = vpop.f32.mrf.mxu3 }
 0x67a   :  { %v11741_v41 = vpop.permute.xlu1 %3945 }
 0x67d   :  { %v4759_v42 = vpop.f32.mrf.mxu3 }
 0x67e   :  { %v4421_v53 = vpop.permute.xlu2 %4420 }
 0x67f   :  { %v4569_v19 = vsel %vm3388_vm9, %v3960_v37, %v4421_v53 }
 0x680   :  { %v4585_v36 = vsel %vm2652_vm5, %v4569_v19, %v4485_v24 }
 0x681   :  { %5966 = vmatmul.msk.f32.gmra.mxu3 %vm4540_vm10, %v4585_v36 }
 0x682   :  { %v11748_v29 = vpop.permute.xlu1 %4617 }
 0x683   :  { %v4689_v54 = vadd.f32 %v11537_v3, %v11748_v29  ;;  %v4686_v4 = vadd.f32 %v13038_v35, %v11748_v29  ;;  %v4692_v51 = vadd.f32 %v11566_v12, %v11748_v29  ;;  %v4698_v15 = vadd.f32 %v11606_v55, %v11748_v29 }
 0x684   :  { %v4695_v59 = vadd.f32 %v11587_v28, %v11748_v29  ;;  %v4701_v1 = vadd.f32 %v11624_v43, %v11748_v29  ;;  %v4704_v28 = vadd.f32 %v11640_v0, %v11748_v29  ;;  %v4707_v0 = vadd.f32 %v11653_v22, %v11748_v29 }
 0x685   :  { %v4762_v40 = vpop.f32.mrf.mxu3  ;;  %v4754_v23 = vadd.f32 %v4753_v6, %v4689_v54  ;;  %v4751_v46 = vadd.f32 %v4750_v16, %v4686_v4  ;;  %v4757_v21 = vadd.f32 %v4756_v39, %v4692_v51  ;;  %v3866_v16 = vrot.slane %v13032_v52, 1 }
 0x686   :  { %v4763_v3 = vadd.f32 %v4762_v40, %v4698_v15  ;;  %v4760_v12 = vadd.f32 %v4759_v42, %v4695_v59  ;;  %v4423_v37 = vpop.permute.xlu2 %4422  ;;  %v3867_v54 = vrot.slane %v13033_v38, 1  ;;  %v13039_v22 = vrot.slane %v9765_v34, 1 }
 0x687   :  { %v4799_v33 = vmax.f32 %v4754_v23, 0.0  ;;  %v4798_v32 = vmax.f32 %v4751_v46, 0.0  ;;  %v4800_v50 = vmax.f32 %v4757_v21, 0.0  ;;  %v3869_v43 = vsel %vm1625_vm6, %v3865_v27, %v3866_v16 }
 0x688   :  { %v4802_v55 = vmax.f32 %v4763_v3, 0.0  ;;  %v4801_v14 = vmax.f32 %v4760_v12, 0.0  ;;  %v3961_v42 = vmul.f32 %v3938_v48, %v3869_v43  ;;  %v3868_v48 = vsel %vm1625_vm6, %v3866_v16, %v3867_v54  ;;  %v13040_v43 = vld [vmem:[#allocation56_spill] sm:$0xff] }
 0x689   :  { %4992 = vrot.lane.b32.xlu0 %v4799_v33, %s6446_s24  ;;  %4990 = vrot.lane.b32.xlu2 %v4798_v32, %s6446_s24  ;;  %v3962_v51 = vmul.f32 %v3942_v10, %v3868_v48  ;;  %v3883_v21 = vsel %vm1625_vm6, %v3867_v54, %v13039_v22  ;;  %v4710_v32 = vadd.f32 %v11659_v20, %v11748_v29 }
 0x68a   :  { %4994 = vrot.lane.b32.xlu1 %v4800_v50, %s6446_s24  ;;  %v4570_v53 = vsel %vm3388_vm9, %v3961_v42, %v4423_v37  ;;  %v3963_v33 = vmul.f32 %v11741_v41, %v3883_v21  ;;  %v4713_v62 = vadd.f32 %v11669_v7, %v11748_v29  ;;  %v4716_v20 = vadd.f32 %v11682_v58, %v11748_v29 }
 0x68b   :  { %v4722_v37 = vadd.f32 %v11713_v44, %v11748_v29 }
 0x68d   :  { %v4765_v9 = vpop.f32.mrf.mxu3 }
 0x68e   :  { %v4766_v18 = vadd.f32 %v4765_v9, %v4701_v1  ;;  %v4425_v4 = vpop.permute.xlu2 %4424 }
 0x68f   :  { %v4571_v40 = vsel %vm3388_vm9, %v3962_v51, %v4425_v4 }
 0x690   :  { %v4803_v31 = vmax.f32 %v4766_v18, 0.0 }
 0x691   :  { %4998 = vrot.lane.b32.xlu0 %v4802_v55, %s6446_s24  ;;  %4996 = vrot.lane.b32.xlu2 %v4801_v14, %s6446_s24 }
 0x692   :  { %5000 = vrot.lane.b32.xlu1 %v4803_v31, %s6446_s24 }
 0x696   :  { %v4427_v15 = vpop.permute.xlu2 %4426 }
 0x697   :  { %v4572_v10 = vsel %vm3388_vm9, %v3963_v33, %v4427_v15  ;;  %v5200_v33 = vld [vmem:[%s12165_s9 + $0x8] sm:$0xff] }
 0x69f   :  { %v4768_v6 = vpop.f32.mrf.mxu3 }
 0x6a0   :  { %v4769_v39 = vadd.f32 %v4768_v6, %v4704_v28  ;;  %v4719_v28 = vadd.f32 %v11696_v47, %v11748_v29 }
 0x6a2   :  { %v4804_v61 = vmax.f32 %v4769_v39, 0.0 }
 0x6a4   :  { %5002 = vrot.lane.b32.xlu1 %v4804_v61, %s6446_s24 }
 0x6a6   :  { %v4487_v24 = vpop.permute.xlu0 %4486 }
 0x6a7   :  { %v4586_v19 = vsel %vm2652_vm5, %v4570_v53, %v4487_v24 }
 0x6a8   :  { %5967 = vmatmul.msk.f32.gmra.mxu3 %vm4540_vm10, %v4586_v19 }
 0x6ae   :  { %v4771_v36 = vpop.f32.mrf.mxu3 }
 0x6af   :  { %v4772_v35 = vadd.f32 %v4771_v36, %v4707_v0  ;;  %v13041_v36 = vld [vmem:[#allocation141_spill] sm:$0xff] }
 0x6b1   :  { %v4805_v27 = vmax.f32 %v4772_v35, 0.0 }
 0x6b3   :  { %5004 = vrot.lane.b32.xlu1 %v4805_v27, %s6446_s24 }
 0x6b6   :  { %v4489_v23 = vpop.permute.xlu0 %4488 }
 0x6b7   :  { %v4587_v46 = vsel %vm2652_vm5, %v4571_v40, %v4489_v23 }
 0x6b8   :  { %5968 = vmatmul.msk.f32.gmra.mxu3 %vm4540_vm10, %v4587_v46 }
 0x6be   :  { %v4491_v50 = vpop.permute.xlu0 %4490  ;;  %v4774_v59 = vpop.f32.mrf.mxu3 }
 0x6bf   :  { %v4588_v3 = vsel %vm2652_vm5, %v4572_v10, %v4491_v50  ;;  %v4775_v12 = vadd.f32 %v4774_v59, %v4710_v32  ;;  %v4731_v50 = vadd.f32 %v11736_v57, %v11748_v29  ;;  %v5202_v57 = vld [vmem:[%s12165_s9 + $0x18] sm:$0xff] }
 0x6c0   :  { %5969 = vmatmul.msk.f32.gmra.mxu3 %vm4540_vm10, %v4588_v3 }
 0x6c1   :  { %v4806_v1 = vmax.f32 %v4775_v12, 0.0 }
 0x6c3   :  { %5006 = vrot.lane.b32.xlu1 %v4806_v1, %s6446_s24 }
 0x6c6   :  { %v4777_v9 = vpop.f32.mrf.mxu3 }
 0x6c7   :  { %v4778_v41 = vadd.f32 %v4777_v9, %v4713_v62 }
 0x6c9   :  { %v4807_v18 = vmax.f32 %v4778_v41, 0.0 }
 0x6cb   :  { %5008 = vrot.lane.b32.xlu1 %v4807_v18, %s6446_s24 }
 0x6d8   :  { %v4780_v55 = vpop.f32.mrf.mxu3 }
 0x6d9   :  { %v4781_v14 = vadd.f32 %v4780_v55, %v4716_v20 }
 0x6db   :  { %v4808_v31 = vmax.f32 %v4781_v14, 0.0 }
 0x6dd   :  { %5010 = vrot.lane.b32.xlu1 %v4808_v31, %s6446_s24  ;;  %v5204_v31 = vld [vmem:[%s12165_s9 + $0x28] sm:$0xff] }
 0x6e2   :  { %v4783_v16 = vpop.f32.mrf.mxu3 }
 0x6e3   :  { %v4784_v6 = vadd.f32 %v4783_v16, %v4719_v28  ;;  %v4991_v39 = vpop.permute.xlu2 %4990 }
 0x6e4   :  { %v11807_v7 = vsel %vm3388_vm9, %v9765_v34, %v4991_v39 }
 0x6e5   :  { %v4809_v61 = vmax.f32 %v4784_v6, 0.0  ;;  %5070 = vrot.lane.b32.xlu0 %v11807_v7, %s6447_s6  ;;  %5118 = vrot.lane.b32.xlu2 %v11807_v7, %s6445_s25 }
 0x6e7   :  { %5012 = vrot.lane.b32.xlu1 %v4809_v61, %s6446_s24 }
 0x6eb   :  { %v4997_v0 = vpop.permute.xlu2 %4996 }
 0x6ec   :  { %v11835_v54 = vsel %vm3388_vm9, %v13041_v36, %v4997_v0 }
 0x6fb   :  { %v4993_v58 = vpop.permute.xlu0 %4992 }
 0x6fc   :  { %v11816_v47 = vsel %vm3388_vm9, %v13040_v43, %v4993_v58  ;;  %v4995_v34 = vpop.permute.xlu1 %4994  ;;  %v5201_v43 = vld [vmem:[%s12165_s9 + $0x10] sm:$0xff] }
 0x6fd   :  { %5072 = vrot.lane.b32.xlu0 %v11816_v47, %s6447_s6  ;;  %5120 = vrot.lane.b32.xlu2 %v11816_v47, %s6445_s25  ;;  %v11826_v42 = vsel %vm3388_vm9, %v12961_v5, %v4995_v34 }
 0x703   :  { %v4999_v5 = vpop.permute.xlu0 %4998 }
 0x704   :  { %v4786_v53 = vpop.f32.mrf.mxu3  ;;  %v11843_v44 = vsel %vm3388_vm9, %v12982_v60, %v4999_v5  ;;  %v5001_v35 = vpop.permute.xlu1 %5000  ;;  %v5203_v5 = vld [vmem:[%s12165_s9 + $0x20] sm:$0xff] }
 0x705   :  { %v4787_v24 = vadd.f32 %v4786_v53, %v4722_v37  ;;  %5074 = vrot.lane.b32.xlu0 %v11826_v42, %s6447_s6  ;;  %5122 = vrot.lane.b32.xlu2 %v11826_v42, %s6445_s25  ;;  %v11851_v4 = vsel %vm3388_vm9, %v10147_v17, %v5001_v35  ;;  %v4725_v17 = vadd.f32 %v11723_v56, %v11748_v29 }
 0x707   :  { %v4810_v19 = vmax.f32 %v4787_v24, 0.0 }
 0x709   :  { %5014 = vrot.lane.b32.xlu1 %v4810_v19, %s6446_s24  ;;  %v5210_v19 = vld [vmem:[%s12165_s9 + $0x58] sm:$0xff] }
 0x70d   :  { %5076 = vrot.lane.b32.xlu0 %v11835_v54, %s6447_s6  ;;  %5124 = vrot.lane.b32.xlu2 %v11835_v54, %s6445_s25 }
 0x715   :  { %5078 = vrot.lane.b32.xlu0 %v11843_v44, %s6447_s6  ;;  %5126 = vrot.lane.b32.xlu2 %v11843_v44, %s6445_s25 }
 0x716   :  { %v5003_v27 = vpop.permute.xlu1 %5002 }
 0x717   :  { %v11859_v60 = vsel %vm3388_vm9, %v10234_v8, %v5003_v27 }
 0x71d   :  { %5080 = vrot.lane.b32.xlu0 %v11851_v4, %s6447_s6  ;;  %5128 = vrot.lane.b32.xlu2 %v11851_v4, %s6445_s25 }
 0x725   :  { %5082 = vrot.lane.b32.xlu0 %v11859_v60, %s6447_s6  ;;  %5130 = vrot.lane.b32.xlu2 %v11859_v60, %s6445_s25  ;;  %v5005_v48 = vpop.permute.xlu1 %5004 }
 0x726   :  { %v11869_v40 = vsel %vm3388_vm9, %v13030_v13, %v5005_v48  ;;  %v4728_v13 = vadd.f32 %v11729_v26, %v11748_v29  ;;  %v5199_v29 = vld [vmem:[%s12165_s9] sm:$0xff] }
 0x72b   :  { %v4789_v51 = vpop.f32.mrf.mxu3 }
 0x72c   :  { %v4790_v23 = vadd.f32 %v4789_v51, %v4725_v17 }
 0x72d   :  { %5084 = vrot.lane.b32.xlu0 %v11869_v40, %s6447_s6  ;;  %5132 = vrot.lane.b32.xlu2 %v11869_v40, %s6445_s25 }
 0x72e   :  { %v4811_v8 = vmax.f32 %v4790_v23, 0.0 }
 0x730   :  { %5016 = vrot.lane.b32.xlu1 %v4811_v8, %s6446_s24 }
 0x735   :  { %v5007_v46 = vpop.permute.xlu1 %5006 }
 0x736   :  { %v11878_v22 = vsel %vm3388_vm9, %v13031_v49, %v5007_v46  ;;  %v5205_v46 = vld [vmem:[%s12165_s9 + $0x30] sm:$0xff] }
 0x737   :  { %5086 = vrot.lane.b32.xlu0 %v11878_v22, %s6447_s6  ;;  %5134 = vrot.lane.b32.xlu2 %v11878_v22, %s6445_s25 }
 0x73b   :  { %v4792_v56 = vpop.f32.mrf.mxu3 }
 0x73c   :  { %v4793_v21 = vadd.f32 %v4792_v56, %v4728_v13 }
 0x73d   :  { %v5009_v15 = vpop.permute.xlu1 %5008 }
 0x73e   :  { %v4812_v32 = vmax.f32 %v4793_v21, 0.0  ;;  %v11891_v49 = vsel %vm3388_vm9, %v13035_v63, %v5009_v15  ;;  %v5214_v15 = vld [vmem:[%s12165_s9 + $0x78] sm:$0xff] }
 0x73f   :  { %v5119_v10 = vpop.permute.xlu2 %5118  ;;  %5088 = vrot.lane.b32.xlu0 %v11891_v49, %s6447_s6  ;;  %5136 = vrot.lane.b32.xlu2 %v11891_v49, %s6445_s25 }
 0x740   :  { %v5232_v26 = vmul.f32 %v5200_v33, %v5119_v10  ;;  %5018 = vrot.lane.b32.xlu1 %v4812_v32, %s6446_s24 }
 0x742   :  { %6002 = vmatmul.msk.f32.vlgmr.msra.gmra.mxu3 %vm593_vm1, %v5232_v26 }
 0x743   :  { %v4795_v59 = vpop.f32.mrf.mxu3 }
 0x744   :  { %v4796_v3 = vadd.f32 %v4795_v59, %v4731_v50 }
 0x746   :  { %v4813_v12 = vmax.f32 %v4796_v3, 0.0 }
 0x748   :  { %5020 = vrot.lane.b32.xlu1 %v4813_v12, %s6446_s24  ;;  %v5216_v12 = vld [vmem:[%s12165_s9 + $0x88] sm:$0xff] }
 0x74f   :  { %v5011_v63 = vpop.permute.xlu1 %5010 }
 0x750   :  { %v11904_v1 = vsel %vm3388_vm9, %v13005_v45, %v5011_v63  ;;  %v5209_v63 = vld [vmem:[%s12165_s9 + $0x50] sm:$0xff] }
 0x751   :  { %5090 = vrot.lane.b32.xlu0 %v11904_v1, %s6447_s6  ;;  %5138 = vrot.lane.b32.xlu2 %v11904_v1, %s6445_s25 }
 0x757   :  { %v5071_v62 = vpop.permute.xlu0 %5070  ;;  %v5121_v9 = vpop.permute.xlu2 %5120 }
 0x758   :  { %v5167_v45 = vsel %vm5166_vm11, %v11807_v7, %v5071_v62  ;;  %v5234_v41 = vmul.f32 %v5202_v57, %v5121_v9  ;;  %v5208_v7 = vld [vmem:[%s12165_s9 + $0x48] sm:$0xff] }
 0x759   :  { %v5183_v18 = vsel %vm4540_vm10, %v5167_v45, %v5119_v10  ;;  %v5013_v20 = vpop.permute.xlu1 %5012  ;;  %v5207_v10 = vld [vmem:[%s12165_s9 + $0x40] sm:$0xff] }
 0x75a   :  { %v5231_v55 = vmul.f32 %v5199_v29, %v5183_v18  ;;  %v11921_v14 = vsel %vm3388_vm9, %v10424_v2, %v5013_v20  ;;  %6003 = vmatmul.msk.f32.gmra.mxu3 %vm593_vm1, %v5234_v41  ;;  %v5206_v2 = vld [vmem:[%s12165_s9 + $0x38] sm:$0xff]  ;;  %v5211_v18 = vld [vmem:[%s12165_s9 + $0x60] sm:$0xff] }
 0x75b   :  { %5092 = vrot.lane.b32.xlu2 %v11921_v14, %s6447_s6  ;;  %5140 = vrot.lane.b32.xlu1 %v11921_v14, %s6445_s25  ;;  %v5218_v41 = vld [vmem:[%s12165_s9 + $0x98] sm:$0xff] }
 0x75c   :  { %5691 = vmatmul.f32.vlgmr.msrb.gmra.mxu1 %v5231_v55 }
 0x75f   :  { %v5123_v28 = vpop.permute.xlu2 %5122 }
 0x760   :  { %v5236_v16 = vmul.f32 %v5204_v31, %v5123_v28 }
 0x762   :  { %6004 = vmatmul.msk.f32.gmra.mxu3 %vm593_vm1, %v5236_v16 }
 0x767   :  { %v5125_v6 = vpop.permute.xlu2 %5124 }
 0x768   :  { %v5238_v39 = vmul.f32 %v5206_v2, %v5125_v6  ;;  %v5213_v2 = vld [vmem:[%s12165_s9 + $0x70] sm:$0xff] }
 0x76a   :  { %6005 = vmatmul.msk.f32.gmra.mxu3 %vm593_vm1, %v5238_v39 }
 0x76f   :  { %v5073_v61 = vpop.permute.xlu0 %5072  ;;  %v5127_v58 = vpop.permute.xlu2 %5126 }
 0x770   :  { %v5168_v34 = vsel %vm5166_vm11, %v11816_v47, %v5073_v61  ;;  %v5240_v37 = vmul.f32 %v5208_v7, %v5127_v58 }
 0x771   :  { %v5184_v53 = vsel %vm4540_vm10, %v5168_v34, %v5121_v9 }
 0x772   :  { %6006 = vmatmul.msk.f32.gmra.mxu3 %vm593_vm1, %v5240_v37  ;;  %v5233_v24 = vmul.f32 %v5201_v43, %v5184_v53  ;;  %v5215_v43 = vld [vmem:[%s12165_s9 + $0x80] sm:$0xff] }
 0x774   :  { %5694 = vmatmul.f32.gmra.mxu1 %v5233_v24 }
 0x777   :  { %v5075_v0 = vpop.permute.xlu0 %5074  ;;  %v5129_v36 = vpop.permute.xlu2 %5128 }
 0x778   :  { %v5169_v47 = vsel %vm5166_vm11, %v11826_v42, %v5075_v0  ;;  %v5242_v35 = vmul.f32 %v5210_v19, %v5129_v36  ;;  %v5212_v42 = vld [vmem:[%s12165_s9 + $0x68] sm:$0xff]  ;;  %v5217_v0 = vld [vmem:[%s12165_s9 + $0x90] sm:$0xff] }
 0x779   :  { %v5185_v27 = vsel %vm4540_vm10, %v5169_v47, %v5123_v28 }
 0x77a   :  { %6007 = vmatmul.msk.f32.gmra.mxu3 %vm593_vm1, %v5242_v35  ;;  %v5235_v48 = vmul.f32 %v5203_v5, %v5185_v27 }
 0x77b   :  { %v5015_v17 = vpop.permute.xlu1 %5014 }
 0x77c   :  { %v11958_v51 = vsel %vm3388_vm9, %v10648_v30, %v5015_v17  ;;  %5697 = vmatmul.f32.gmra.mxu1 %v5235_v48 }
 0x77d   :  { %5094 = vrot.lane.b32.xlu1 %v11958_v51, %s6447_s6  ;;  %5142 = vrot.lane.b32.xlu0 %v11958_v51, %s6445_s25 }
 0x77f   :  { %v5077_v23 = vpop.permute.xlu0 %5076  ;;  %v5131_v8 = vpop.permute.xlu2 %5130 }
 0x780   :  { %v5170_v30 = vsel %vm5166_vm11, %v11835_v54, %v5077_v23  ;;  %v5244_v13 = vmul.f32 %v5212_v42, %v5131_v8 }
 0x781   :  { %v5186_v56 = vsel %vm4540_vm10, %v5170_v30, %v5125_v6 }
 0x782   :  { %6008 = vmatmul.msk.f32.gmra.mxu3 %vm593_vm1, %v5244_v13  ;;  %v5237_v21 = vmul.f32 %v5205_v46, %v5186_v56  ;;  %v5221_v46 = vld [vmem:[%s12165_s9 + $0xb0] sm:$0xff] }
 0x784   :  { %5700 = vmatmul.f32.gmra.mxu1 %v5237_v21 }
 0x787   :  { %v5079_v33 = vpop.permute.xlu0 %5078  ;;  %v5133_v32 = vpop.permute.xlu2 %5132 }
 0x788   :  { %v5171_v54 = vsel %vm5166_vm11, %v11843_v44, %v5079_v33  ;;  %v5246_v26 = vmul.f32 %v5214_v15, %v5133_v32 }
 0x789   :  { %v5187_v50 = vsel %vm4540_vm10, %v5171_v54, %v5127_v58  ;;  %v5224_v54 = vld [vmem:[%s12165_s9 + $0xc8] sm:$0xff] }
 0x78a   :  { %6009 = vmatmul.msk.f32.gmra.mxu3 %vm593_vm1, %v5246_v26  ;;  %v5239_v59 = vmul.f32 %v5207_v10, %v5187_v50 }
 0x78c   :  { %5703 = vmatmul.f32.gmra.mxu1 %v5239_v59  ;;  %v5223_v59 = vld [vmem:[%s12165_s9 + $0xc0] sm:$0xff] }
 0x78f   :  { %v5081_v3 = vpop.permute.xlu0 %5080 }
 0x790   :  { %v5172_v57 = vsel %vm5166_vm11, %v11851_v4, %v5081_v3 }
 0x791   :  { %v5188_v44 = vsel %vm4540_vm10, %v5172_v57, %v5129_v36  ;;  %v5135_v29 = vpop.permute.xlu2 %5134 }
 0x792   :  { %v5248_v62 = vmul.f32 %v5216_v12, %v5135_v29  ;;  %v5241_v9 = vmul.f32 %v5209_v63, %v5188_v44 }
 0x794   :  { %5706 = vmatmul.f32.gmra.mxu1 %v5241_v9  ;;  %6010 = vmatmul.msk.f32.gmra.mxu3 %vm593_vm1, %v5248_v62 }
 0x797   :  { %v5083_v45 = vpop.permute.xlu0 %5082 }
 0x798   :  { %v5173_v4 = vsel %vm5166_vm11, %v11859_v60, %v5083_v45 }
 0x799   :  { %v5189_v20 = vsel %vm4540_vm10, %v5173_v4, %v5131_v8  ;;  %v5137_v55 = vpop.permute.xlu2 %5136  ;;  %v5222_v8 = vld [vmem:[%s12165_s9 + $0xb8] sm:$0xff] }
 0x79a   :  { %v5250_v31 = vmul.f32 %v5218_v41, %v5137_v55  ;;  %v5243_v28 = vmul.f32 %v5211_v18, %v5189_v20  ;;  %v5226_v41 = vld [vmem:[%s12165_s9 + $0xd8] sm:$0xff] }
 0x79c   :  { %5709 = vmatmul.f32.gmra.mxu1 %v5243_v28  ;;  %6011 = vmatmul.msk.f32.gmra.mxu3 %vm593_vm1, %v5250_v31 }
 0x79f   :  { %v5085_v16 = vpop.permute.xlu0 %5084 }
 0x7a0   :  { %v5174_v6 = vsel %vm5166_vm11, %v11869_v40, %v5085_v16  ;;  %v5220_v40 = vld [vmem:[%s12165_s9 + $0xa8] sm:$0xff] }
 0x7a1   :  { %v5190_v39 = vsel %vm4540_vm10, %v5174_v6, %v5133_v32 }
 0x7a2   :  { %v5017_v7 = vpop.permute.xlu1 %5016  ;;  %v5245_v60 = vmul.f32 %v5213_v2, %v5190_v39 }
 0x7a3   :  { %v12012_v61 = vsel %vm3388_vm9, %v10565_v11, %v5017_v7  ;;  %v5225_v7 = vld [vmem:[%s12165_s9 + $0xd0] sm:$0xff] }
 0x7a4   :  { %5712 = vmatmul.f32.gmra.mxu1 %v5245_v60  ;;  %5096 = vrot.lane.b32.xlu0 %v12012_v61, %s6447_s6 }
 0x7a5   :  { %5144 = vrot.lane.b32.xlu2 %v12012_v61, %s6445_s25 }
 0x7a9   :  { %v5087_v58 = vpop.permute.xlu0 %5086 }
 0x7aa   :  { %v5175_v11 = vsel %vm5166_vm11, %v11878_v22, %v5087_v58 }
 0x7ab   :  { %v5191_v34 = vsel %vm4540_vm10, %v5175_v11, %v5135_v29  ;;  %v5139_v37 = vpop.permute.xlu2 %5138 }
 0x7ac   :  { %v5252_v53 = vmul.f32 %v5220_v40, %v5139_v37  ;;  %v5247_v24 = vmul.f32 %v5215_v43, %v5191_v34 }
 0x7ae   :  { %5715 = vmatmul.f32.gmra.mxu1 %v5247_v24  ;;  %6012 = vmatmul.msk.f32.gmra.mxu3 %vm593_vm1, %v5252_v53 }
 0x7b1   :  { %v5089_v19 = vpop.permute.xlu0 %5088 }
 0x7b2   :  { %v5176_v36 = vsel %vm5166_vm11, %v11891_v49, %v5089_v19  ;;  %v5019_v5 = vpop.permute.xlu1 %5018  ;;  %v5219_v49 = vld [vmem:[%s12165_s9 + $0xa0] sm:$0xff] }
 0x7b3   :  { %v5192_v47 = vsel %vm4540_vm10, %v5176_v36, %v5137_v55  ;;  %v12036_v22 = vsel %vm3388_vm9, %v13032_v52, %v5019_v5 }
 0x7b4   :  { %5098 = vrot.lane.b32.xlu2 %v12036_v22, %s6447_s6  ;;  %5146 = vrot.lane.b32.xlu1 %v12036_v22, %s6445_s25  ;;  %v5249_v35 = vmul.f32 %v5217_v0, %v5192_v47  ;;  %v5228_v0 = vld [vmem:[%s12165_s9 + $0xe8] sm:$0xff] }
 0x7b6   :  { %5718 = vmatmul.f32.gmra.mxu1 %v5249_v35 }
 0x7ba   :  { %v5021_v27 = vpop.permute.xlu1 %5020 }
 0x7bb   :  { %v12044_v48 = vsel %vm3388_vm9, %v13033_v38, %v5021_v27  ;;  %v5093_v38 = vpop.permute.xlu2 %5092 }
 0x7bc   :  { %5100 = vrot.lane.b32.xlu1 %v12044_v48, %s6447_s6  ;;  %5148 = vrot.lane.b32.xlu0 %v12044_v48, %s6445_s25  ;;  %v5178_v30 = vsel %vm5166_vm11, %v11921_v14, %v5093_v38 }
 0x7bd   :  { %5811 = vrot.lane.b32.xlu2 %v11649_v25, %s6448_s4  ;;  %v5809_v25 = vld [vmem:[%s12166_s11 + $0x20] sm:$0xff] }
 0x7c3   :  { %v5091_v52 = vpop.permute.xlu0 %5090 }
 0x7c4   :  { %v5177_v17 = vsel %vm5166_vm11, %v11904_v1, %v5091_v52 }
 0x7c5   :  { %v5193_v42 = vsel %vm4540_vm10, %v5177_v17, %v5139_v37  ;;  %v5757_v15 = vpop.f32.mrf.mxu3 }
 0x7c6   :  { %v5251_v23 = vmul.f32 %v5219_v49, %v5193_v42  ;;  %v5230_v42 = vld [vmem:[%s12165_s9 + $0xf8] sm:$0xff] }
 0x7c8   :  { %5721 = vmatmul.f32.gmra.mxu1 %v5251_v23 }
 0x7cd   :  { %v5141_v13 = vpop.permute.xlu1 %5140 }
 0x7ce   :  { %v5194_v56 = vsel %vm4540_vm10, %v5178_v30, %v5141_v13  ;;  %v5254_v1 = vmul.f32 %v5222_v8, %v5141_v13 }
 0x7cf   :  { %v5253_v21 = vmul.f32 %v5221_v46, %v5194_v56 }
 0x7d0   :  { %6013 = vmatmul.msk.f32.gmra.mxu3 %vm593_vm1, %v5254_v1 }
 0x7d1   :  { %5724 = vmatmul.f32.gmra.mxu1 %v5253_v21 }
 0x7d9   :  { %v5692_v33 = vpop.f32.mrf.mxu1 }
 0x7da   :  { %v12066_v32 = vadd.f32 %v5757_v15, %v5692_v33 }
 0x7dd   :  { %v5760_v10 = vpop.f32.mrf.mxu3 }
 0x7e5   :  { %v5763_v26 = vpop.f32.mrf.mxu3 }
 0x7ed   :  { %v5766_v62 = vpop.f32.mrf.mxu3 }
 0x7ef   :  { %v5143_v50 = vpop.permute.xlu0 %5142  ;;  %v5095_v14 = vpop.permute.xlu1 %5094 }
 0x7f0   :  { %v5256_v3 = vmul.f32 %v5224_v54, %v5143_v50  ;;  %v5179_v12 = vsel %vm5166_vm11, %v11958_v51, %v5095_v14 }
 0x7f1   :  { %v5195_v63 = vsel %vm4540_vm10, %v5179_v12, %v5143_v50  ;;  %v5695_v57 = vpop.f32.mrf.mxu1 }
 0x7f2   :  { %v12077_v44 = vadd.f32 %v5760_v10, %v5695_v57  ;;  %6014 = vmatmul.msk.f32.gmra.mxu3 %vm593_vm1, %v5256_v3  ;;  %v5255_v29 = vmul.f32 %v5223_v59, %v5195_v63  ;;  %v5805_v59 = vld [vmem:[%s12166_s11] sm:$0xff]  ;;  %v5808_v63 = vld [vmem:[%s12166_s11 + $0x18] sm:$0xff] }
 0x7f4   :  { %5727 = vmatmul.f32.gmra.mxu1 %v5255_v29 }
 0x7f5   :  { %v5769_v55 = vpop.f32.mrf.mxu3 }
 0x7f9   :  { %v5698_v9 = vpop.f32.mrf.mxu1 }
 0x7fa   :  { %v12080_v45 = vadd.f32 %v5763_v26, %v5698_v9 }
 0x7fd   :  { %v5772_v16 = vpop.f32.mrf.mxu3 }
 0x7ff   :  { %v5145_v18 = vpop.permute.xlu2 %5144 }
 0x800   :  { %v5258_v4 = vmul.f32 %v5226_v41, %v5145_v18 }
 0x801   :  { %v5701_v51 = vpop.f32.mrf.mxu1 }
 0x802   :  { %v12085_v20 = vadd.f32 %v5766_v62, %v5701_v51  ;;  %6015 = vmatmul.msk.f32.gmra.mxu3 %vm593_vm1, %v5258_v4 }
 0x805   :  { %v5775_v60 = vpop.f32.mrf.mxu3 }
 0x809   :  { %v5704_v31 = vpop.f32.mrf.mxu1 }
 0x80a   :  { %v12088_v28 = vadd.f32 %v5769_v55, %v5704_v31  ;;  %v5807_v31 = vld [vmem:[%s12166_s11 + $0x10] sm:$0xff] }
 0x80d   :  { %v5778_v37 = vpop.f32.mrf.mxu3 }
 0x80e   :  { %v5099_v19 = vpop.permute.xlu2 %5098 }
 0x80f   :  { %v5181_v36 = vsel %vm5166_vm11, %v12036_v22, %v5099_v19  ;;  %v5229_v22 = vld [vmem:[%s12165_s9 + $0xf0] sm:$0xff] }
 0x811   :  { %v5707_v2 = vpop.f32.mrf.mxu1 }
 0x812   :  { %v12090_v6 = vadd.f32 %v5772_v16, %v5707_v2  ;;  %v5810_v16 = vld [vmem:[%s12166_s11 + $0x28] sm:$0xff] }
 0x816   :  { %v5097_v39 = vpop.permute.xlu0 %5096 }
 0x817   :  { %v5180_v58 = vsel %vm5166_vm11, %v12012_v61, %v5097_v39  ;;  %v5227_v61 = vld [vmem:[%s12165_s9 + $0xe0] sm:$0xff]  ;;  %v5781_v52 = vpop.f32.mrf.mxu3 }
 0x818   :  { %v5196_v40 = vsel %vm4540_vm10, %v5180_v58, %v5145_v18 }
 0x819   :  { %v5710_v43 = vpop.f32.mrf.mxu1  ;;  %v5257_v11 = vmul.f32 %v5225_v7, %v5196_v40 }
 0x81a   :  { %v12098_v34 = vadd.f32 %v5775_v60, %v5710_v43 }
 0x81b   :  { %5730 = vmatmul.f32.gmra.mxu1 %v5257_v11 }
 0x81f   :  { %v5784_v1 = vpop.f32.mrf.mxu3 }
 0x821   :  { %v5713_v53 = vpop.f32.mrf.mxu1 }
 0x822   :  { %v12100_v24 = vadd.f32 %v5778_v37, %v5713_v53 }
 0x826   :  { %v5147_v5 = vpop.permute.xlu1 %5146 }
 0x827   :  { %v5197_v47 = vsel %vm4540_vm10, %v5181_v36, %v5147_v5  ;;  %v5260_v35 = vmul.f32 %v5228_v0, %v5147_v5 }
 0x828   :  { %v5259_v27 = vmul.f32 %v5227_v61, %v5197_v47 }
 0x829   :  { %6016 = vmatmul.msk.f32.gmra.mxu3 %vm593_vm1, %v5260_v35 }
 0x82a   :  { %5733 = vmatmul.f32.gmra.mxu1 %v5259_v27 }
 0x82b   :  { %v5716_v49 = vpop.f32.mrf.mxu1 }
 0x82c   :  { %v5782_v17 = vadd.f32 %v5781_v52, %v5716_v49 }
 0x82e   :  { %v5149_v23 = vpop.permute.xlu0 %5148  ;;  %v5101_v38 = vpop.permute.xlu1 %5100 }
 0x82f   :  { %v5262_v8 = vmul.f32 %v5230_v42, %v5149_v23  ;;  %v5182_v46 = vsel %vm5166_vm11, %v12044_v48, %v5101_v38  ;;  %v5806_v48 = vld [vmem:[%s12166_s11 + $0x8] sm:$0xff] }
 0x830   :  { %v5198_v30 = vsel %vm4540_vm10, %v5182_v46, %v5149_v23 }
 0x831   :  { %6017 = vmatmul.msk.f32.gmra.mxu3 %vm593_vm1, %v5262_v8  ;;  %v5261_v13 = vmul.f32 %v5229_v22, %v5198_v30  ;;  %v5787_v15 = vpop.f32.mrf.mxu3 }
 0x833   :  { %5736 = vmatmul.f32.gmra.mxu1 %v5261_v13  ;;  %v5719_v56 = vpop.f32.mrf.mxu1 }
 0x834   :  { %v5785_v55 = vadd.f32 %v5784_v1, %v5719_v56 }
 0x839   :  { %5853 = vmatmul.f32.vlgmr.msrb.gmra.mxu3 %v5806_v48 }
 0x83b   :  { %5830 = vmatmul.f32.vlgmr.msra.gmra.mxu1 %v5805_v59 }
 0x841   :  { %5856 = vmatmul.f32.gmra.mxu3 %v5809_v25 }
 0x843   :  { %5833 = vmatmul.f32.gmra.mxu1 %v5808_v63 }
 0x845   :  { %v5722_v21 = vpop.f32.mrf.mxu1 }
 0x846   :  { %v5788_v51 = vadd.f32 %v5787_v15, %v5722_v21 }
 0x84e   :  { %v5725_v33 = vpop.f32.mrf.mxu1 }
 0x853   :  { %v5790_v10 = vpop.f32.mrf.mxu3 }
 0x854   :  { %v5791_v4 = vadd.f32 %v5790_v10, %v5725_v33 }
 0x871   :  { %v5728_v54 = vpop.f32.mrf.mxu1 }
 0x875   :  { %v5793_v26 = vpop.f32.mrf.mxu3 }
 0x876   :  { %v5794_v18 = vadd.f32 %v5793_v26, %v5728_v54 }
 0x885   :  { %v5796_v14 = vpop.f32.mrf.mxu3 }
 0x898   :  { %v5731_v50 = vpop.f32.mrf.mxu1 }
 0x899   :  { %v5797_v41 = vadd.f32 %v5796_v14, %v5731_v50 }
 0x8a7   :  { %v5734_v3 = vpop.f32.mrf.mxu1 }
 0x8ac   :  { %v5799_v12 = vpop.f32.mrf.mxu3 }
 0x8ad   :  { %v5800_v9 = vadd.f32 %v5799_v12, %v5734_v3 }
 0x8b0   :  { %v5737_v57 = vpop.f32.mrf.mxu1 }
 0x8b4   :  { %v5802_v29 = vpop.f32.mrf.mxu3 }
 0x8b5   :  { %v5803_v62 = vadd.f32 %v5802_v29, %v5737_v57 }
 0x8b7   :  { %5860 = vmatpush.msrb.mxu1 %v5803_v62 }
 0x8b8   :  { %v5831_v2 = vpop.f32.mrf.mxu1 }
 0x8b9   :  { %5861 = vmatpush.msrb.mxu1 %v5800_v9 }
 0x8bb   :  { %5862 = vmatpush.msrb.mxu1 %v5797_v41 }
 0x8bd   :  { %5863 = vmatpush.msrb.mxu1 %v5794_v18 }
 0x8bf   :  { %5864 = vmatpush.msrb.mxu1 %v5791_v4 }
 0x8c1   :  { %5865 = vmatpush.msrb.mxu1 %v5788_v51 }
 0x8c3   :  { %5866 = vmatpush.msrb.mxu1 %v5785_v55 }
 0x8c5   :  { %5867 = vmatpush.msrb.mxu1 %v5782_v17 }
 0x8c7   :  { %5868 = vmatpush.msrb.mxu1 %v12100_v24 }
 0x8c9   :  { %5869 = vmatpush.msrb.mxu1 %v12098_v34 }
 0x8cb   :  { %5870 = vmatpush.msrb.mxu1 %v12090_v6  ;;  %v5812_v6 = vpop.permute.xlu2 %5811 }
 0x8cc   :  { %v5832_v39 = vadd.f32 %v5831_v2, %v5812_v6 }
 0x8cd   :  { %5871 = vmatpush.msrb.mxu1 %v12088_v28  ;;  %v5834_v28 = vpop.f32.mrf.mxu1 }
 0x8ce   :  { %v5835_v60 = vadd.f32 %v5834_v28, %v5812_v6 }
 0x8cf   :  { %5872 = vmatpush.msrb.mxu1 %v12085_v20  ;;  %v5854_v20 = vpop.f32.mrf.mxu3 }
 0x8d1   :  { %5873 = vmatpush.msrb.mxu1 %v12080_v45  ;;  %v5855_v45 = vadd.f32 %v5854_v20, %v5832_v39 }
 0x8d3   :  { %5874 = vmatpush.msrb.mxu1 %v12077_v44 }
 0x8d5   :  { %5875 = vmatpush.msrb.mxu1 %v12066_v32 }
 0x8d6   :  { %5876 = vmatmul.f32.vlgmr.msrb.gmra.mxu1 %v5807_v31 }
 0x8d7   :  { %v5857_v32 = vpop.f32.mrf.mxu3 }
 0x8d8   :  { %v5858_v58 = vadd.f32 %v5857_v32, %v5835_v60 }
 0x8de   :  { %5879 = vmatmul.f32.gmra.mxu1 %v5810_v16 }
 0x953   :  { %v5877_v7 = vpop.f32.mrf.mxu1 }
 0x954   :  { %v5878_v44 = vadd.f32 %v5877_v7, %v5855_v45 }
 0x956   :  { %5884 = vst.msk [vmem:[%s12167_s12] sm:$0xff] %vm5883_vm12, %v5878_v44 }
 0x95b   :  { %v5880_v40 = vpop.f32.mrf.mxu1 }
 0x95c   :  { %v5881_v43 = vadd.f32 %v5880_v40, %v5858_v58 }
 0x95e   :  { %5885 = vst.msk [vmem:[%s12167_s12 + $0x8] sm:$0xff] %vm5883_vm12, %v5881_v43 }

</bundles_post_ra>
